<compile_context>
chip_gen: v7x
topology: tpu7x:2x2x1
jax: 0.10.0
libtpu: 0.0.40
codegen_flags: <defaults>
</compile_context>

<pallas_src>
import functools

import numpy as np

import jax
import jax.numpy as jnp
from jax.experimental import pallas as pl
from jax.experimental.pallas import tpu as pltpu

_EPS = 1e-5


# ----------------------------------------------------------------------------
# Static geometry helpers
# ----------------------------------------------------------------------------

def _rup(n, m):
    return ((n + m - 1) // m) * m


def _cin_pad(c):
    # pad channels to the bf16 sublane tile so every im2col store is tile aligned
    return _rup(c, 16)


def _conv_geom(hp, wp, k):
    """VALID stride-1 kxk conv over a (hp, wp) image in the row-flattened 'extended'
    layout: output row i occupies lanes [i*wp, i*wp+wp); the last k-1 columns of each
    row (and the 128-padded tail) are garbage masked out of the IN statistics."""
    ho, wo = hp - k + 1, wp - k + 1
    how = _rup(ho * wp, 128)
    offsets = tuple(ki * wp + kj for ki in range(k) for kj in range(k))
    length = _rup(offsets[-1] + how, 128)
    return ho, wo, how, offsets, length


def _mask_constant(ho, wo, wp, how):
    idx = np.arange(how)
    valid = (idx < ho * wp) & ((idx % wp) < wo)
    return jnp.asarray(valid.astype(np.float32)[None, :])            # (1, how)


# ----------------------------------------------------------------------------
# Pallas kernels
# ----------------------------------------------------------------------------

def _conv_kernel(x_ref, w_ref, mask_ref, o_ref, xs_ref, *,
                 offsets, how, cin_p, count, eps, act):
    """Fused VALID stride-1 conv (single MXU matmul) + InstanceNorm/ReLU or tanh.

    x_ref:  (1, cin_p, L)          bf16  flattened zero-padded image
    w_ref:  (Cout, k*k*cin_p)      bf16  tap-major single-matmul weight
    o_ref:  (1, Cout, how)         bf16 (f32 for the tanh layer)
    xs_ref: (k*k*cin_p, how) bf16  scratch: im2col operand (fully rewritten each step)
    """
    for t, off in enumerate(offsets):                       # aligned VMEM stores only
        xs_ref[t * cin_p:(t + 1) * cin_p, :] = x_ref[0, :, off:off + how]
    acc = jnp.dot(w_ref[...], xs_ref[...], preferred_element_type=jnp.float32)

    if act == "tanh":                                       # final layer: no norm
        o_ref[0] = jnp.tanh(acc).astype(o_ref.dtype)
        return

    mask = mask_ref[...]                                    # (1, how)
    inv_n = 1.0 / count
    mean = jnp.sum(acc * mask, axis=1, keepdims=True) * inv_n
    cen = (acc - mean) * mask                               # reused for var and output
    var = jnp.sum(cen * cen, axis=1, keepdims=True) * inv_n
    y = cen * jax.lax.rsqrt(var + eps)
    if act == "relu":
        y = jnp.maximum(y, 0.0)
    o_ref[0] = y.astype(o_ref.dtype)


def _res_chain_kernel(x_ref, w_ref, mask_ref, o_ref, xbuf, xs_ref, *,
                      offsets, how, cin, base, count, eps, n_blocks):
    """All residual blocks fused: h = h + IN(conv3x3(h)), repeated n_blocks times with
    the activation resident in VMEM.  Works in the padded-flat layout: the masked block
    output shifted by (wp+1) is exactly the next block's padded-flat input, so the
    interior region [base, base+how) is updated in place (aligned, base % 128 == 0)."""
    xbuf[...] = x_ref[0]
    mask = mask_ref[...]
    inv_n = 1.0 / count
    for blk in range(n_blocks):
        for t, off in enumerate(offsets):
            xs_ref[t * cin:(t + 1) * cin, :] = xbuf[:, off:off + how]
        acc = jnp.dot(w_ref[blk], xs_ref[...], preferred_element_type=jnp.float32)
        mean = jnp.sum(acc * mask, axis=1, keepdims=True) * inv_n
        cen = (acc - mean) * mask
        var = jnp.sum(cen * cen, axis=1, keepdims=True) * inv_n
        y = cen * jax.lax.rsqrt(var + eps)                  # masked -> zeros on padding
        resid = xbuf[:, base:base + how].astype(jnp.float32)
        xbuf[:, base:base + how] = (resid + y).astype(jnp.bfloat16)
    o_ref[0] = xbuf[...]


def _deconv_kernel(x_ref, w_ref, mask_ref, o_ref, xs_ref, *,
                   offsets, how, cin, cout, count, eps):
    """Fused stride-2 transposed conv: the 4 sub-pixel output phases share one stacked
    (4*Cout, 4*Cin) matmul; InstanceNorm statistics span all 4 phases; ReLU epilogue."""
    for t, off in enumerate(offsets):
        xs_ref[t * cin:(t + 1) * cin, :] = x_ref[0, :, off:off + how]
    acc = jnp.dot(w_ref[...], xs_ref[...], preferred_element_type=jnp.float32)

    mask = mask_ref[...]
    inv_n = 1.0 / count                                     # count = 4 * H * W
    phases = [acc[p * cout:(p + 1) * cout, :] for p in range(4)]
    mean = sum(jnp.sum(ph * mask, axis=1, keepdims=True) for ph in phases) * inv_n
    cens = [(ph - mean) * mask for ph in phases]
    var = sum(jnp.sum(c * c, axis=1, keepdims=True) for c in cens) * inv_n
    inv_std = jax.lax.rsqrt(var + eps)
    for p in range(4):
        o_ref[0, p] = jnp.maximum(cens[p] * inv_std, 0.0).astype(o_ref.dtype)


# ----------------------------------------------------------------------------
# Layer wrappers (thin glue: pad / reshape / phase interleave only, all bf16)
# ----------------------------------------------------------------------------

def _conv_in_act(xp, w_prep, *, k, act, eps=_EPS):
    """VALID stride-1 kxk conv over the pre-padded (B,Cin,Hp,Wp) image with a fused
    InstanceNorm+ReLU (or tanh) epilogue.  Returns (B, Cout, Ho, Wo)."""
    b, cin, hp, wp = xp.shape
    cin_p = _cin_pad(cin)
    cout, kdim = w_prep.shape
    assert kdim == k * k * cin_p, (w_prep.shape, k, cin_p)
    ho, wo, how, offsets, length = _conv_geom(hp, wp, k)

    flat = xp.reshape(b, cin, hp * wp).astype(jnp.bfloat16)
    x_flat = jnp.pad(flat, ((0, 0), (0, cin_p - cin), (0, length - hp * wp)))
    mask = _mask_constant(ho, wo, wp, how)
    out_dtype = jnp.float32 if act == "tanh" else jnp.bfloat16

    kernel = functools.partial(_conv_kernel, offsets=offsets, how=how, cin_p=cin_p,
                               count=ho * wo, eps=eps, act=act)
    out = pl.pallas_call(
        kernel,
        out_shape=jax.ShapeDtypeStruct((b, cout, how), out_dtype),
        grid=(b,),
        in_specs=[
            pl.BlockSpec((1, cin_p, length), lambda i: (i, 0, 0)),
            pl.BlockSpec((cout, kdim), lambda i: (0, 0)),
            pl.BlockSpec((1, how), lambda i: (0, 0)),
        ],
        out_specs=pl.BlockSpec((1, cout, how), lambda i: (i, 0, 0)),
        scratch_shapes=[pltpu.VMEM((k * k * cin_p, how), jnp.bfloat16)],
        compiler_params=pltpu.CompilerParams(dimension_semantics=("parallel",)),
    )(x_flat, w_prep, mask)
    return out[:, :, :ho * wp].reshape(b, cout, ho, wp)[:, :, :, :wo]


def _conv_s2(x, w_prep, eps=_EPS):
    """3x3 stride-2 pad-1 conv + IN + ReLU via the sub-pixel INPUT decomposition:
    4 input phases -> one VALID 2x2 conv over 4*Cin channels (one fused matmul)."""
    b, c, h, w = x.shape
    assert h % 2 == 0 and w % 2 == 0
    xp = jnp.pad(x, ((0, 0), (0, 0), (1, 1), (1, 1)))
    phases = [xp[:, :, a::2, bb::2] for a in (0, 1) for bb in (0, 1)]
    xph = jnp.concatenate(phases, axis=1)                   # (B, 4C, H/2+1, W/2+1)
    return _conv_in_act(xph, w_prep, k=2, act="relu", eps=eps)


def _res_chain(x, w_stack, eps=_EPS):
    """Fused residual chain.  Returns the result in the padded-flat layout
    (B, C, L) (interior starts at `base`, row stride wp) so deconv1 consumes it
    directly with no relayout glue."""
    b, c, h, w = x.shape
    assert c % 16 == 0, "res-block channel count must be a multiple of 16"
    n_blocks = w_stack.shape[0]
    assert w_stack.shape == (n_blocks, c, 9 * c)
    hp, wp = h + 2, w + 2
    how = _rup(h * wp, 128)
    lead = _rup(wp + 1, 128) - (wp + 1)            # make the interior write lane-aligned
    base = lead + wp + 1
    offsets = tuple(lead + ki * wp + kj for ki in range(3) for kj in range(3))
    length = _rup(offsets[-1] + how, 128)

    flat = jnp.pad(x, ((0, 0), (0, 0), (1, 1), (1, 1))).reshape(b, c, hp * wp)
    x_flat = jnp.pad(flat.astype(jnp.bfloat16),
                     ((0, 0), (0, 0), (lead, length - lead - hp * wp)))
    mask = _mask_constant(h, w, wp, how)

    kernel = functools.partial(_res_chain_kernel, offsets=offsets, how=how, cin=c,
                               base=base, count=h * w, eps=eps, n_blocks=n_blocks)
    out = pl.pallas_call(
        kernel,
        out_shape=jax.ShapeDtypeStruct((b, c, length), jnp.bfloat16),
        grid=(b,),
        in_specs=[
            pl.BlockSpec((1, c, length), lambda i: (i, 0, 0)),
            pl.BlockSpec((n_blocks, c, 9 * c), lambda i: (0, 0, 0)),
            pl.BlockSpec((1, how), lambda i: (0, 0)),
        ],
        out_specs=pl.BlockSpec((1, c, length), lambda i: (i, 0, 0)),
        scratch_shapes=[pltpu.VMEM((c, length), jnp.bfloat16),
                        pltpu.VMEM((9 * c, how), jnp.bfloat16)],
        compiler_params=pltpu.CompilerParams(dimension_semantics=("parallel",)),
    )(x_flat, w_stack, mask)
    return out, (h, w, wp, base)


def _deconv_s2_flat(x_flat, w_stack, *, h, w, wp, base, eps=_EPS):
    """3x3 stride-2 pad-1 output_pad-1 transposed conv + IN + ReLU from an already
    flattened, high-side zero-padded input (row stride wp, content starting at base)."""
    b, cin, length = x_flat.shape
    assert cin % 16 == 0
    cout4, kdim = w_stack.shape
    cout = cout4 // 4
    assert kdim == 4 * cin and cout % 8 == 0
    how = _rup(h * wp, 128)
    offsets = (base, base + 1, base + wp, base + wp + 1)
    assert offsets[-1] + how <= length
    mask = _mask_constant(h, w, wp, how)

    kernel = functools.partial(_deconv_kernel, offsets=offsets, how=how, cin=cin,
                               cout=cout, count=4 * h * w, eps=eps)
    out = pl.pallas_call(
        kernel,
        out_shape=jax.ShapeDtypeStruct((b, 4, cout, how), jnp.bfloat16),
        grid=(b,),
        in_specs=[
            pl.BlockSpec((1, cin, length), lambda i: (i, 0, 0)),
            pl.BlockSpec((cout4, kdim), lambda i: (0, 0)),
            pl.BlockSpec((1, how), lambda i: (0, 0)),
        ],
        out_specs=pl.BlockSpec((1, 4, cout, how), lambda i: (i, 0, 0, 0)),
        scratch_shapes=[pltpu.VMEM((4 * cin, how), jnp.bfloat16)],
        compiler_params=pltpu.CompilerParams(dimension_semantics=("parallel",)),
    )(x_flat, w_stack, mask)

    # TODO(synk): the phase interleave still runs as XLA glue; it could be folded into
    # the kernel with lane-strided stores to save one HBM pass per deconv stage.
    ph = out[:, :, :, :h * wp].reshape(b, 2, 2, cout, h, wp)[:, :, :, :, :, :w]
    return jnp.transpose(ph, (0, 3, 4, 1, 5, 2)).reshape(b, cout, 2 * h, 2 * w)


def _deconv_s2(x, w_stack, eps=_EPS):
    b, cin, h, w = x.shape
    xp = jnp.pad(x, ((0, 0), (0, 0), (0, 1), (0, 1)))       # high-side pad only
    wp = w + 1
    how = _rup(h * wp, 128)
    length = _rup(wp + 1 + how, 128)
    flat = xp.reshape(b, cin, (h + 1) * wp).astype(jnp.bfloat16)
    x_flat = jnp.pad(flat, ((0, 0), (0, 0), (0, length - (h + 1) * wp)))
    return _deconv_s2_flat(x_flat, w_stack, h=h, w=w, wp=wp, base=0, eps=eps)


# ----------------------------------------------------------------------------
# Parameters: PyTorch layouts + one-time prep (all layout transforms folded in)
# ----------------------------------------------------------------------------

def init_params(key, conv_dim=8, n_res_blocks=2):
    """PyTorch layouts: Conv2d (Cout,Cin,k,k); ConvTranspose2d (Cin,Cout,k,k)."""
    def w(k_, shape):
        fan_in = shape[1] * shape[2] * shape[3]
        return jax.random.normal(k_, shape, jnp.float32) / np.sqrt(fan_in)

    ks = jax.random.split(key, 6 + n_res_blocks)
    return {
        "conv1": w(ks[0], (conv_dim, 3, 7, 7)),
        "conv2": w(ks[1], (conv_dim * 2, conv_dim, 3, 3)),
        "conv3": w(ks[2], (conv_dim * 4, conv_dim * 2, 3, 3)),
        "res": [w(ks[3 + i], (conv_dim * 4, conv_dim * 4, 3, 3))
                for i in range(n_res_blocks)],
        "deconv1": w(ks[3 + n_res_blocks], (conv_dim * 4, conv_dim * 2, 3, 3)),
        "deconv2": w(ks[4 + n_res_blocks], (conv_dim * 2, conv_dim, 3, 3)),
        "deconv3": w(ks[5 + n_res_blocks], (conv_dim, 3, 7, 7)),
    }


def _prep_conv_w(w):
    """Conv2d weight (Cout,Cin,k,k) -> single-matmul layout (Cout, k*k*cin_p) bf16."""
    w = np.asarray(w)
    cout, cin, k, _ = w.shape
    cin_p = _cin_pad(cin)
    out = np.zeros((cout, k * k * cin_p), np.float32)
    for ki in range(k):
        for kj in range(k):
            t = ki * k + kj
            out[:, t * cin_p:t * cin_p + cin] = w[:, :, ki, kj]
    return jnp.asarray(out, jnp.bfloat16)


def _prep_conv_s2_w(w):
    """Stride-2 3x3 Conv2d weight -> (Cout, 4*cin_e_p) bf16 for the input-phase
    decomposition (tap t=2di+dj major; within a tap, channel p*Cin+c with p=2a+b)."""
    w = np.asarray(w)
    cout, cin = w.shape[:2]
    cin_e_p = _cin_pad(4 * cin)
    out = np.zeros((cout, 4 * cin_e_p), np.float32)
    for di in range(2):
        for dj in range(2):
            t = 2 * di + dj
            for a in range(2):
                for bb in range(2):
                    ki, kj = 2 * di + a, 2 * dj + bb
                    if ki < 3 and kj < 3:
                        col = t * cin_e_p + (2 * a + bb) * cin
                        out[:, col:col + cin] = w[:, :, ki, kj]
    return jnp.asarray(out, jnp.bfloat16)


def _prep_deconv_s2_w(w):
    """Stride-2 3x3 ConvTranspose2d weight (Cin,Cout,3,3), pad=1, output_pad=1 ->
    stacked (4*Cout, 4*Cin) bf16: rows p*Cout+co (output phase p=2a+b), cols t*Cin+c
    (tap t=2di+dj), feeding ONE fused matmul for all 4 output phases."""
    w_eq = np.asarray(w)[:, :, ::-1, ::-1].transpose(1, 0, 2, 3)     # (Cout,Cin,3,3)
    cout, cin = w_eq.shape[:2]
    sel = {(0, 0): 1, (1, 0): 0, (1, 1): 2}           # (phase, tap) -> flipped-kernel idx
    out = np.zeros((4 * cout, 4 * cin), np.float32)
    for a in range(2):
        for bb in range(2):
            p = 2 * a + bb
            for di in range(2):
                for dj in range(2):
                    t = 2 * di + dj
                    if (a, di) in sel and (bb, dj) in sel:
                        out[p * cout:(p + 1) * cout, t * cin:(t + 1) * cin] = \
                            w_eq[:, :, sel[(a, di)], sel[(bb, dj)]]
    return jnp.asarray(out, jnp.bfloat16)


def _prep_deconv_s1_w(w):
    """Stride-1 ConvTranspose2d (Cin,Cout,k,k), pad p -> direct-conv taps (flip + swap)."""
    w_eq = np.asarray(w)[:, :, ::-1, ::-1].transpose(1, 0, 2, 3)
    return _prep_conv_w(w_eq)


def prepare_params(params):
    """Fold every weight layout transform into the params once (outside the jit)."""
    return {
        "conv1": _prep_conv_w(params["conv1"]),
        "conv2": _prep_conv_s2_w(params["conv2"]),
        "conv3": _prep_conv_s2_w(params["conv3"]),
        "res": jnp.stack([_prep_conv_w(w) for w in params["res"]], axis=0),
        "deconv1": _prep_deconv_s2_w(params["deconv1"]),
        "deconv2": _prep_deconv_s2_w(params["deconv2"]),
        "deconv3": _prep_deconv_s1_w(params["deconv3"]),
    }


# ----------------------------------------------------------------------------
# CycleGenerator forward
# ----------------------------------------------------------------------------

@jax.jit
def cycle_generator_forward(params, x_nchw):
    """x: (B, 3, H, W) float32 -> (B, 3, H, W) float32 in [-1, 1]."""
    x = x_nchw.astype(jnp.bfloat16)

    # conv1: 7x7 s1 p3 + IN + ReLU
    h = _conv_in_act(jnp.pad(x, ((0, 0), (0, 0), (3, 3), (3, 3))),
                     params["conv1"], k=7, act="relu")
    # conv2 / conv3: 3x3 s2 p1 + IN + ReLU (sub-pixel input phases, one matmul each)
    h = _conv_s2(h, params["conv2"])
    h = _conv_s2(h, params["conv3"])

    # residual blocks fused into ONE kernel; output kept in the padded-flat layout
    h_flat, (rh, rw, rwp, rbase) = _res_chain(h, params["res"])

    # deconv1 consumes the res-chain output directly (no relayout glue); deconv2 from image
    h = _deconv_s2_flat(h_flat, params["deconv1"], h=rh, w=rw, wp=rwp, base=rbase)
    h = _deconv_s2(h, params["deconv2"])

    # deconv3: 7x7 s1 p3 transposed conv == direct conv with flipped kernel; tanh, f32 out
    out = _conv_in_act(jnp.pad(h, ((0, 0), (0, 0), (3, 3), (3, 3))),
                       params["deconv3"], k=7, act="tanh")
    return out


# ----------------------------------------------------------------------------
# Pure-JAX reference (f32, lax convolutions) for numerical validation
# ----------------------------------------------------------------------------

def _ref_instance_norm(x, eps=_EPS):
    mean = jnp.mean(x, axis=(2, 3), keepdims=True)
    var = jnp.mean(jnp.square(x - mean), axis=(2, 3), keepdims=True)
    return (x - mean) * jax.lax.rsqrt(var + eps)


def reference_forward(raw, x):
    dn = ("NCHW", "OIHW", "NCHW")
    P = jax.lax.Precision.HIGHEST

    def conv(h, w, stride, pad):
        return jax.lax.conv_general_dilated(h, w, (stride, stride),
                                            ((pad, pad), (pad, pad)),
                                            dimension_numbers=dn, precision=P)

    def deconv_s2(h, w_t):          # ConvTranspose2d k3 s2 p1 output_padding 1
        w_d = jnp.flip(w_t, (2, 3)).transpose(1, 0, 2, 3)
        return jax.lax.conv_general_dilated(h, w_d, (1, 1), ((1, 2), (1, 2)),
                                            lhs_dilation=(2, 2),
                                            dimension_numbers=dn, precision=P)

    def deconv_s1(h, w_t):          # ConvTranspose2d k7 s1 p3
        w_d = jnp.flip(w_t, (2, 3)).transpose(1, 0, 2, 3)
        return conv(h, w_d, 1, 3)

    h = jax.nn.relu(_ref_instance_norm(conv(x, raw["conv1"], 1, 3)))
    h = jax.nn.relu(_ref_instance_norm(conv(h, raw["conv2"], 2, 1)))
    h = jax.nn.relu(_ref_instance_norm(conv(h, raw["conv3"], 2, 1)))
    for w_res in raw["res"]:
        h = h + _ref_instance_norm(conv(h, w_res, 1, 1))
    h = jax.nn.relu(_ref_instance_norm(deconv_s2(h, raw["deconv1"])))
    h = jax.nn.relu(_ref_instance_norm(deconv_s2(h, raw["deconv2"])))
    return jnp.tanh(deconv_s1(h, raw["deconv3"]))


if __name__ == "__main__":
    key = jax.random.PRNGKey(0)
    k_param, k_x = jax.random.split(key)

    conv_dim = 8
    n_res_blocks = 2
    raw_params = init_params(k_param, conv_dim=conv_dim, n_res_blocks=n_res_blocks)
    params = prepare_params(raw_params)            # one-time layout folding

    x = jax.random.normal(k_x, (2, 3, 16, 16), jnp.float32)          # NCHW input

    out = jax.block_until_ready(cycle_generator_forward(params, x))

    assert out.shape == (2, 3, 16, 16), out.shape
    assert out.dtype == jnp.float32
    assert bool(jnp.all(jnp.isfinite(out)))
    assert bool(jnp.all(jnp.abs(out) <= 1.0))                        # tanh range

    # numerical check against a pure-JAX f32 reference (loose tol: bf16 activations)
    ref = reference_forward(raw_params, x)
    err = float(jnp.max(jnp.abs(out - ref.astype(jnp.float32))))
    assert err < 0.15, f"mismatch vs reference: max abs err = {err}"

    print("KERNEL_OK")
</pallas_src>

<mosaic_0001>
module attributes {stable_mosaic.version = 11 : i64} {
  func.func @_conv_kernel(%arg0: i32, %arg1: memref<1x16x640xbf16, #tpu.memory_space<vmem>>, %arg2: memref<8x784xbf16, #tpu.memory_space<vmem>>, %arg3: memref<1x384xf32, #tpu.memory_space<vmem>>, %arg4: memref<1x8x384xbf16, #tpu.memory_space<vmem>>, %arg5: memref<784x384xbf16, #tpu.memory_space<vmem>>) attributes {dimension_semantics = [#tpu.dimension_semantics<parallel>], iteration_bounds = array<i64: 2>, scalar_prefetch = 0 : i64, scratch_operands = 1 : i64, tpu.core_type = #tpu.core_type<tc>, window_params = [{transform_indices = @transform_0, window_bounds = array<i64: 1, 16, 640>}, {pipeline_mode = #tpu.pipeline_mode<synchronous>, transform_indices = @transform_1, window_bounds = array<i64: 8, 784>}, {pipeline_mode = #tpu.pipeline_mode<synchronous>, transform_indices = @transform_2, window_bounds = array<i64: 1, 384>}, {transform_indices = @transform_3, window_bounds = array<i64: 1, 8, 384>}]} {
    %c0 = arith.constant 0 : index
    %c0_0 = arith.constant 0 : index
    %c0_1 = arith.constant 0 : index
    %0 = vector.load %arg1[%c0, %c0_0, %c0_1] : memref<1x16x640xbf16, #tpu.memory_space<vmem>>, vector<1x16x384xbf16>
    %1 = vector.shape_cast %0 : vector<1x16x384xbf16> to vector<16x384xbf16>
    %c0_2 = arith.constant 0 : index
    %c0_3 = arith.constant 0 : index
    %2 = vector.load %arg5[%c0_2, %c0_3] : memref<784x384xbf16, #tpu.memory_space<vmem>>, vector<16x384xbf16>
    tpu.vector_store %arg5[%c0_2, %c0_3], %1 {strides = array<i32>} : memref<784x384xbf16, #tpu.memory_space<vmem>>, vector<16x384xbf16>,
    %c0_4 = arith.constant 0 : index
    %c0_5 = arith.constant 0 : index
    %c1 = arith.constant 1 : index
    %3 = vector.load %arg1[%c0_4, %c0_5, %c1] : memref<1x16x640xbf16, #tpu.memory_space<vmem>>, vector<1x16x384xbf16>
    %4 = vector.shape_cast %3 : vector<1x16x384xbf16> to vector<16x384xbf16>
    %c16 = arith.constant 16 : index
    %c0_6 = arith.constant 0 : index
    %5 = vector.load %arg5[%c16, %c0_6] : memref<784x384xbf16, #tpu.memory_space<vmem>>, vector<16x384xbf16>
    tpu.vector_store %arg5[%c16, %c0_6], %4 {strides = array<i32>} : memref<784x384xbf16, #tpu.memory_space<vmem>>, vector<16x384xbf16>,
    %c0_7 = arith.constant 0 : index
    %c0_8 = arith.constant 0 : index
    %c2 = arith.constant 2 : index
    %6 = vector.load %arg1[%c0_7, %c0_8, %c2] : memref<1x16x640xbf16, #tpu.memory_space<vmem>>, vector<1x16x384xbf16>
    %7 = vector.shape_cast %6 : vector<1x16x384xbf16> to vector<16x384xbf16>
    %c32 = arith.constant 32 : index
    %c0_9 = arith.constant 0 : index
    %8 = vector.load %arg5[%c32, %c0_9] : memref<784x384xbf16, #tpu.memory_space<vmem>>, vector<16x384xbf16>
    tpu.vector_store %arg5[%c32, %c0_9], %7 {strides = array<i32>} : memref<784x384xbf16, #tpu.memory_space<vmem>>, vector<16x384xbf16>,
    %c0_10 = arith.constant 0 : index
    %c0_11 = arith.constant 0 : index
    %c3 = arith.constant 3 : index
    %9 = vector.load %arg1[%c0_10, %c0_11, %c3] : memref<1x16x640xbf16, #tpu.memory_space<vmem>>, vector<1x16x384xbf16>
    %10 = vector.shape_cast %9 : vector<1x16x384xbf16> to vector<16x384xbf16>
    %c48 = arith.constant 48 : index
    %c0_12 = arith.constant 0 : index
    %11 = vector.load %arg5[%c48, %c0_12] : memref<784x384xbf16, #tpu.memory_space<vmem>>, vector<16x384xbf16>
    tpu.vector_store %arg5[%c48, %c0_12], %10 {strides = array<i32>} : memref<784x384xbf16, #tpu.memory_space<vmem>>, vector<16x384xbf16>,
    %c0_13 = arith.constant 0 : index
    %c0_14 = arith.constant 0 : index
    %c4 = arith.constant 4 : index
    %12 = vector.load %arg1[%c0_13, %c0_14, %c4] : memref<1x16x640xbf16, #tpu.memory_space<vmem>>, vector<1x16x384xbf16>
    %13 = vector.shape_cast %12 : vector<1x16x384xbf16> to vector<16x384xbf16>
    %c64 = arith.constant 64 : index
    %c0_15 = arith.constant 0 : index
    %14 = vector.load %arg5[%c64, %c0_15] : memref<784x384xbf16, #tpu.memory_space<vmem>>, vector<16x384xbf16>
    tpu.vector_store %arg5[%c64, %c0_15], %13 {strides = array<i32>} : memref<784x384xbf16, #tpu.memory_space<vmem>>, vector<16x384xbf16>,
    %c0_16 = arith.constant 0 : index
    %c0_17 = arith.constant 0 : index
    %c5 = arith.constant 5 : index
    %15 = vector.load %arg1[%c0_16, %c0_17, %c5] : memref<1x16x640xbf16, #tpu.memory_space<vmem>>, vector<1x16x384xbf16>
    %16 = vector.shape_cast %15 : vector<1x16x384xbf16> to vector<16x384xbf16>
    %c80 = arith.constant 80 : index
    %c0_18 = arith.constant 0 : index
    %17 = vector.load %arg5[%c80, %c0_18] : memref<784x384xbf16, #tpu.memory_space<vmem>>, vector<16x384xbf16>
    tpu.vector_store %arg5[%c80, %c0_18], %16 {strides = array<i32>} : memref<784x384xbf16, #tpu.memory_space<vmem>>, vector<16x384xbf16>,
    %c0_19 = arith.constant 0 : index
    %c0_20 = arith.constant 0 : index
    %c6 = arith.constant 6 : index
    %18 = vector.load %arg1[%c0_19, %c0_20, %c6] : memref<1x16x640xbf16, #tpu.memory_space<vmem>>, vector<1x16x384xbf16>
    %19 = vector.shape_cast %18 : vector<1x16x384xbf16> to vector<16x384xbf16>
    %c96 = arith.constant 96 : index
    %c0_21 = arith.constant 0 : index
    %20 = vector.load %arg5[%c96, %c0_21] : memref<784x384xbf16, #tpu.memory_space<vmem>>, vector<16x384xbf16>
    tpu.vector_store %arg5[%c96, %c0_21], %19 {strides = array<i32>} : memref<784x384xbf16, #tpu.memory_space<vmem>>, vector<16x384xbf16>,
    %c0_22 = arith.constant 0 : index
    %c0_23 = arith.constant 0 : index
    %c22 = arith.constant 22 : index
    %21 = vector.load %arg1[%c0_22, %c0_23, %c22] : memref<1x16x640xbf16, #tpu.memory_space<vmem>>, vector<1x16x384xbf16>
    %22 = vector.shape_cast %21 : vector<1x16x384xbf16> to vector<16x384xbf16>
    %c112 = arith.constant 112 : index
    %c0_24 = arith.constant 0 : index
    %23 = vector.load %arg5[%c112, %c0_24] : memref<784x384xbf16, #tpu.memory_space<vmem>>, vector<16x384xbf16>
    tpu.vector_store %arg5[%c112, %c0_24], %22 {strides = array<i32>} : memref<784x384xbf16, #tpu.memory_space<vmem>>, vector<16x384xbf16>,
    %c0_25 = arith.constant 0 : index
    %c0_26 = arith.constant 0 : index
    %c23 = arith.constant 23 : index
    %24 = vector.load %arg1[%c0_25, %c0_26, %c23] : memref<1x16x640xbf16, #tpu.memory_space<vmem>>, vector<1x16x384xbf16>
    %25 = vector.shape_cast %24 : vector<1x16x384xbf16> to vector<16x384xbf16>
    %c128 = arith.constant 128 : index
    %c0_27 = arith.constant 0 : index
    %26 = vector.load %arg5[%c128, %c0_27] : memref<784x384xbf16, #tpu.memory_space<vmem>>, vector<16x384xbf16>
    tpu.vector_store %arg5[%c128, %c0_27], %25 {strides = array<i32>} : memref<784x384xbf16, #tpu.memory_space<vmem>>, vector<16x384xbf16>,
    %c0_28 = arith.constant 0 : index
    %c0_29 = arith.constant 0 : index
    %c24 = arith.constant 24 : index
    %27 = vector.load %arg1[%c0_28, %c0_29, %c24] : memref<1x16x640xbf16, #tpu.memory_space<vmem>>, vector<1x16x384xbf16>
    %28 = vector.shape_cast %27 : vector<1x16x384xbf16> to vector<16x384xbf16>
    %c144 = arith.constant 144 : index
    %c0_30 = arith.constant 0 : index
    %29 = vector.load %arg5[%c144, %c0_30] : memref<784x384xbf16, #tpu.memory_space<vmem>>, vector<16x384xbf16>
    tpu.vector_store %arg5[%c144, %c0_30], %28 {strides = array<i32>} : memref<784x384xbf16, #tpu.memory_space<vmem>>, vector<16x384xbf16>,
    %c0_31 = arith.constant 0 : index
    %c0_32 = arith.constant 0 : index
    %c25 = arith.constant 25 : index
    %30 = vector.load %arg1[%c0_31, %c0_32, %c25] : memref<1x16x640xbf16, #tpu.memory_space<vmem>>, vector<1x16x384xbf16>
    %31 = vector.shape_cast %30 : vector<1x16x384xbf16> to vector<16x384xbf16>
    %c160 = arith.constant 160 : index
    %c0_33 = arith.constant 0 : index
    %32 = vector.load %arg5[%c160, %c0_33] : memref<784x384xbf16, #tpu.memory_space<vmem>>, vector<16x384xbf16>
    tpu.vector_store %arg5[%c160, %c0_33], %31 {strides = array<i32>} : memref<784x384xbf16, #tpu.memory_space<vmem>>, vector<16x384xbf16>,
    %c0_34 = arith.constant 0 : index
    %c0_35 = arith.constant 0 : index
    %c26 = arith.constant 26 : index
    %33 = vector.load %arg1[%c0_34, %c0_35, %c26] : memref<1x16x640xbf16, #tpu.memory_space<vmem>>, vector<1x16x384xbf16>
    %34 = vector.shape_cast %33 : vector<1x16x384xbf16> to vector<16x384xbf16>
    %c176 = arith.constant 176 : index
    %c0_36 = arith.constant 0 : index
    %35 = vector.load %arg5[%c176, %c0_36] : memref<784x384xbf16, #tpu.memory_space<vmem>>, vector<16x384xbf16>
    tpu.vector_store %arg5[%c176, %c0_36], %34 {strides = array<i32>} : memref<784x384xbf16, #tpu.memory_space<vmem>>, vector<16x384xbf16>,
    %c0_37 = arith.constant 0 : index
    %c0_38 = arith.constant 0 : index
    %c27 = arith.constant 27 : index
    %36 = vector.load %arg1[%c0_37, %c0_38, %c27] : memref<1x16x640xbf16, #tpu.memory_space<vmem>>, vector<1x16x384xbf16>
    %37 = vector.shape_cast %36 : vector<1x16x384xbf16> to vector<16x384xbf16>
    %c192 = arith.constant 192 : index
    %c0_39 = arith.constant 0 : index
    %38 = vector.load %arg5[%c192, %c0_39] : memref<784x384xbf16, #tpu.memory_space<vmem>>, vector<16x384xbf16>
    tpu.vector_store %arg5[%c192, %c0_39], %37 {strides = array<i32>} : memref<784x384xbf16, #tpu.memory_space<vmem>>, vector<16x384xbf16>,
    %c0_40 = arith.constant 0 : index
    %c0_41 = arith.constant 0 : index
    %c28 = arith.constant 28 : index
    %39 = vector.load %arg1[%c0_40, %c0_41, %c28] : memref<1x16x640xbf16, #tpu.memory_space<vmem>>, vector<1x16x384xbf16>
    %40 = vector.shape_cast %39 : vector<1x16x384xbf16> to vector<16x384xbf16>
    %c208 = arith.constant 208 : index
    %c0_42 = arith.constant 0 : index
    %41 = vector.load %arg5[%c208, %c0_42] : memref<784x384xbf16, #tpu.memory_space<vmem>>, vector<16x384xbf16>
    tpu.vector_store %arg5[%c208, %c0_42], %40 {strides = array<i32>} : memref<784x384xbf16, #tpu.memory_space<vmem>>, vector<16x384xbf16>,
    %c0_43 = arith.constant 0 : index
    %c0_44 = arith.constant 0 : index
    %c44 = arith.constant 44 : index
    %42 = vector.load %arg1[%c0_43, %c0_44, %c44] : memref<1x16x640xbf16, #tpu.memory_space<vmem>>, vector<1x16x384xbf16>
    %43 = vector.shape_cast %42 : vector<1x16x384xbf16> to vector<16x384xbf16>
    %c224 = arith.constant 224 : index
    %c0_45 = arith.constant 0 : index
    %44 = vector.load %arg5[%c224, %c0_45] : memref<784x384xbf16, #tpu.memory_space<vmem>>, vector<16x384xbf16>
    tpu.vector_store %arg5[%c224, %c0_45], %43 {strides = array<i32>} : memref<784x384xbf16, #tpu.memory_space<vmem>>, vector<16x384xbf16>,
    %c0_46 = arith.constant 0 : index
    %c0_47 = arith.constant 0 : index
    %c45 = arith.constant 45 : index
    %45 = vector.load %arg1[%c0_46, %c0_47, %c45] : memref<1x16x640xbf16, #tpu.memory_space<vmem>>, vector<1x16x384xbf16>
    %46 = vector.shape_cast %45 : vector<1x16x384xbf16> to vector<16x384xbf16>
    %c240 = arith.constant 240 : index
    %c0_48 = arith.constant 0 : index
    %47 = vector.load %arg5[%c240, %c0_48] : memref<784x384xbf16, #tpu.memory_space<vmem>>, vector<16x384xbf16>
    tpu.vector_store %arg5[%c240, %c0_48], %46 {strides = array<i32>} : memref<784x384xbf16, #tpu.memory_space<vmem>>, vector<16x384xbf16>,
    %c0_49 = arith.constant 0 : index
    %c0_50 = arith.constant 0 : index
    %c46 = arith.constant 46 : index
    %48 = vector.load %arg1[%c0_49, %c0_50, %c46] : memref<1x16x640xbf16, #tpu.memory_space<vmem>>, vector<1x16x384xbf16>
    %49 = vector.shape_cast %48 : vector<1x16x384xbf16> to vector<16x384xbf16>
    %c256 = arith.constant 256 : index
    %c0_51 = arith.constant 0 : index
    %50 = vector.load %arg5[%c256, %c0_51] : memref<784x384xbf16, #tpu.memory_space<vmem>>, vector<16x384xbf16>
    tpu.vector_store %arg5[%c256, %c0_51], %49 {strides = array<i32>} : memref<784x384xbf16, #tpu.memory_space<vmem>>, vector<16x384xbf16>,
    %c0_52 = arith.constant 0 : index
    %c0_53 = arith.constant 0 : index
    %c47 = arith.constant 47 : index
    %51 = vector.load %arg1[%c0_52, %c0_53, %c47] : memref<1x16x640xbf16, #tpu.memory_space<vmem>>, vector<1x16x384xbf16>
    %52 = vector.shape_cast %51 : vector<1x16x384xbf16> to vector<16x384xbf16>
    %c272 = arith.constant 272 : index
    %c0_54 = arith.constant 0 : index
    %53 = vector.load %arg5[%c272, %c0_54] : memref<784x384xbf16, #tpu.memory_space<vmem>>, vector<16x384xbf16>
    tpu.vector_store %arg5[%c272, %c0_54], %52 {strides = array<i32>} : memref<784x384xbf16, #tpu.memory_space<vmem>>, vector<16x384xbf16>,
    %c0_55 = arith.constant 0 : index
    %c0_56 = arith.constant 0 : index
    %c48_57 = arith.constant 48 : index
    %54 = vector.load %arg1[%c0_55, %c0_56, %c48_57] : memref<1x16x640xbf16, #tpu.memory_space<vmem>>, vector<1x16x384xbf16>
    %55 = vector.shape_cast %54 : vector<1x16x384xbf16> to vector<16x384xbf16>
    %c288 = arith.constant 288 : index
    %c0_58 = arith.constant 0 : index
    %56 = vector.load %arg5[%c288, %c0_58] : memref<784x384xbf16, #tpu.memory_space<vmem>>, vector<16x384xbf16>
    tpu.vector_store %arg5[%c288, %c0_58], %55 {strides = array<i32>} : memref<784x384xbf16, #tpu.memory_space<vmem>>, vector<16x384xbf16>,
    %c0_59 = arith.constant 0 : index
    %c0_60 = arith.constant 0 : index
    %c49 = arith.constant 49 : index
    %57 = vector.load %arg1[%c0_59, %c0_60, %c49] : memref<1x16x640xbf16, #tpu.memory_space<vmem>>, vector<1x16x384xbf16>
    %58 = vector.shape_cast %57 : vector<1x16x384xbf16> to vector<16x384xbf16>
    %c304 = arith.constant 304 : index
    %c0_61 = arith.constant 0 : index
    %59 = vector.load %arg5[%c304, %c0_61] : memref<784x384xbf16, #tpu.memory_space<vmem>>, vector<16x384xbf16>
    tpu.vector_store %arg5[%c304, %c0_61], %58 {strides = array<i32>} : memref<784x384xbf16, #tpu.memory_space<vmem>>, vector<16x384xbf16>,
    %c0_62 = arith.constant 0 : index
    %c0_63 = arith.constant 0 : index
    %c50 = arith.constant 50 : index
    %60 = vector.load %arg1[%c0_62, %c0_63, %c50] : memref<1x16x640xbf16, #tpu.memory_space<vmem>>, vector<1x16x384xbf16>
    %61 = vector.shape_cast %60 : vector<1x16x384xbf16> to vector<16x384xbf16>
    %c320 = arith.constant 320 : index
    %c0_64 = arith.constant 0 : index
    %62 = vector.load %arg5[%c320, %c0_64] : memref<784x384xbf16, #tpu.memory_space<vmem>>, vector<16x384xbf16>
    tpu.vector_store %arg5[%c320, %c0_64], %61 {strides = array<i32>} : memref<784x384xbf16, #tpu.memory_space<vmem>>, vector<16x384xbf16>,
    %c0_65 = arith.constant 0 : index
    %c0_66 = arith.constant 0 : index
    %c66 = arith.constant 66 : index
    %63 = vector.load %arg1[%c0_65, %c0_66, %c66] : memref<1x16x640xbf16, #tpu.memory_space<vmem>>, vector<1x16x384xbf16>
    %64 = vector.shape_cast %63 : vector<1x16x384xbf16> to vector<16x384xbf16>
    %c336 = arith.constant 336 : index
    %c0_67 = arith.constant 0 : index
    %65 = vector.load %arg5[%c336, %c0_67] : memref<784x384xbf16, #tpu.memory_space<vmem>>, vector<16x384xbf16>
    tpu.vector_store %arg5[%c336, %c0_67], %64 {strides = array<i32>} : memref<784x384xbf16, #tpu.memory_space<vmem>>, vector<16x384xbf16>,
    %c0_68 = arith.constant 0 : index
    %c0_69 = arith.constant 0 : index
    %c67 = arith.constant 67 : index
    %66 = vector.load %arg1[%c0_68, %c0_69, %c67] : memref<1x16x640xbf16, #tpu.memory_space<vmem>>, vector<1x16x384xbf16>
    %67 = vector.shape_cast %66 : vector<1x16x384xbf16> to vector<16x384xbf16>
    %c352 = arith.constant 352 : index
    %c0_70 = arith.constant 0 : index
    %68 = vector.load %arg5[%c352, %c0_70] : memref<784x384xbf16, #tpu.memory_space<vmem>>, vector<16x384xbf16>
    tpu.vector_store %arg5[%c352, %c0_70], %67 {strides = array<i32>} : memref<784x384xbf16, #tpu.memory_space<vmem>>, vector<16x384xbf16>,
    %c0_71 = arith.constant 0 : index
    %c0_72 = arith.constant 0 : index
    %c68 = arith.constant 68 : index
    %69 = vector.load %arg1[%c0_71, %c0_72, %c68] : memref<1x16x640xbf16, #tpu.memory_space<vmem>>, vector<1x16x384xbf16>
    %70 = vector.shape_cast %69 : vector<1x16x384xbf16> to vector<16x384xbf16>
    %c368 = arith.constant 368 : index
    %c0_73 = arith.constant 0 : index
    %71 = vector.load %arg5[%c368, %c0_73] : memref<784x384xbf16, #tpu.memory_space<vmem>>, vector<16x384xbf16>
    tpu.vector_store %arg5[%c368, %c0_73], %70 {strides = array<i32>} : memref<784x384xbf16, #tpu.memory_space<vmem>>, vector<16x384xbf16>,
    %c0_74 = arith.constant 0 : index
    %c0_75 = arith.constant 0 : index
    %c69 = arith.constant 69 : index
    %72 = vector.load %arg1[%c0_74, %c0_75, %c69] : memref<1x16x640xbf16, #tpu.memory_space<vmem>>, vector<1x16x384xbf16>
    %73 = vector.shape_cast %72 : vector<1x16x384xbf16> to vector<16x384xbf16>
    %c384 = arith.constant 384 : index
    %c0_76 = arith.constant 0 : index
    %74 = vector.load %arg5[%c384, %c0_76] : memref<784x384xbf16, #tpu.memory_space<vmem>>, vector<16x384xbf16>
    tpu.vector_store %arg5[%c384, %c0_76], %73 {strides = array<i32>} : memref<784x384xbf16, #tpu.memory_space<vmem>>, vector<16x384xbf16>,
    %c0_77 = arith.constant 0 : index
    %c0_78 = arith.constant 0 : index
    %c70 = arith.constant 70 : index
    %75 = vector.load %arg1[%c0_77, %c0_78, %c70] : memref<1x16x640xbf16, #tpu.memory_space<vmem>>, vector<1x16x384xbf16>
    %76 = vector.shape_cast %75 : vector<1x16x384xbf16> to vector<16x384xbf16>
    %c400 = arith.constant 400 : index
    %c0_79 = arith.constant 0 : index
    %77 = vector.load %arg5[%c400, %c0_79] : memref<784x384xbf16, #tpu.memory_space<vmem>>, vector<16x384xbf16>
    tpu.vector_store %arg5[%c400, %c0_79], %76 {strides = array<i32>} : memref<784x384xbf16, #tpu.memory_space<vmem>>, vector<16x384xbf16>,
    %c0_80 = arith.constant 0 : index
    %c0_81 = arith.constant 0 : index
    %c71 = arith.constant 71 : index
    %78 = vector.load %arg1[%c0_80, %c0_81, %c71] : memref<1x16x640xbf16, #tpu.memory_space<vmem>>, vector<1x16x384xbf16>
    %79 = vector.shape_cast %78 : vector<1x16x384xbf16> to vector<16x384xbf16>
    %c416 = arith.constant 416 : index
    %c0_82 = arith.constant 0 : index
    %80 = vector.load %arg5[%c416, %c0_82] : memref<784x384xbf16, #tpu.memory_space<vmem>>, vector<16x384xbf16>
    tpu.vector_store %arg5[%c416, %c0_82], %79 {strides = array<i32>} : memref<784x384xbf16, #tpu.memory_space<vmem>>, vector<16x384xbf16>,
    %c0_83 = arith.constant 0 : index
    %c0_84 = arith.constant 0 : index
    %c72 = arith.constant 72 : index
    %81 = vector.load %arg1[%c0_83, %c0_84, %c72] : memref<1x16x640xbf16, #tpu.memory_space<vmem>>, vector<1x16x384xbf16>
    %82 = vector.shape_cast %81 : vector<1x16x384xbf16> to vector<16x384xbf16>
    %c432 = arith.constant 432 : index
    %c0_85 = arith.constant 0 : index
    %83 = vector.load %arg5[%c432, %c0_85] : memref<784x384xbf16, #tpu.memory_space<vmem>>, vector<16x384xbf16>
    tpu.vector_store %arg5[%c432, %c0_85], %82 {strides = array<i32>} : memref<784x384xbf16, #tpu.memory_space<vmem>>, vector<16x384xbf16>,
    %c0_86 = arith.constant 0 : index
    %c0_87 = arith.constant 0 : index
    %c88 = arith.constant 88 : index
    %84 = vector.load %arg1[%c0_86, %c0_87, %c88] : memref<1x16x640xbf16, #tpu.memory_space<vmem>>, vector<1x16x384xbf16>
    %85 = vector.shape_cast %84 : vector<1x16x384xbf16> to vector<16x384xbf16>
    %c448 = arith.constant 448 : index
    %c0_88 = arith.constant 0 : index
    %86 = vector.load %arg5[%c448, %c0_88] : memref<784x384xbf16, #tpu.memory_space<vmem>>, vector<16x384xbf16>
    tpu.vector_store %arg5[%c448, %c0_88], %85 {strides = array<i32>} : memref<784x384xbf16, #tpu.memory_space<vmem>>, vector<16x384xbf16>,
    %c0_89 = arith.constant 0 : index
    %c0_90 = arith.constant 0 : index
    %c89 = arith.constant 89 : index
    %87 = vector.load %arg1[%c0_89, %c0_90, %c89] : memref<1x16x640xbf16, #tpu.memory_space<vmem>>, vector<1x16x384xbf16>
    %88 = vector.shape_cast %87 : vector<1x16x384xbf16> to vector<16x384xbf16>
    %c464 = arith.constant 464 : index
    %c0_91 = arith.constant 0 : index
    %89 = vector.load %arg5[%c464, %c0_91] : memref<784x384xbf16, #tpu.memory_space<vmem>>, vector<16x384xbf16>
    tpu.vector_store %arg5[%c464, %c0_91], %88 {strides = array<i32>} : memref<784x384xbf16, #tpu.memory_space<vmem>>, vector<16x384xbf16>,
    %c0_92 = arith.constant 0 : index
    %c0_93 = arith.constant 0 : index
    %c90 = arith.constant 90 : index
    %90 = vector.load %arg1[%c0_92, %c0_93, %c90] : memref<1x16x640xbf16, #tpu.memory_space<vmem>>, vector<1x16x384xbf16>
    %91 = vector.shape_cast %90 : vector<1x16x384xbf16> to vector<16x384xbf16>
    %c480 = arith.constant 480 : index
    %c0_94 = arith.constant 0 : index
    %92 = vector.load %arg5[%c480, %c0_94] : memref<784x384xbf16, #tpu.memory_space<vmem>>, vector<16x384xbf16>
    tpu.vector_store %arg5[%c480, %c0_94], %91 {strides = array<i32>} : memref<784x384xbf16, #tpu.memory_space<vmem>>, vector<16x384xbf16>,
    %c0_95 = arith.constant 0 : index
    %c0_96 = arith.constant 0 : index
    %c91 = arith.constant 91 : index
    %93 = vector.load %arg1[%c0_95, %c0_96, %c91] : memref<1x16x640xbf16, #tpu.memory_space<vmem>>, vector<1x16x384xbf16>
    %94 = vector.shape_cast %93 : vector<1x16x384xbf16> to vector<16x384xbf16>
    %c496 = arith.constant 496 : index
    %c0_97 = arith.constant 0 : index
    %95 = vector.load %arg5[%c496, %c0_97] : memref<784x384xbf16, #tpu.memory_space<vmem>>, vector<16x384xbf16>
    tpu.vector_store %arg5[%c496, %c0_97], %94 {strides = array<i32>} : memref<784x384xbf16, #tpu.memory_space<vmem>>, vector<16x384xbf16>,
    %c0_98 = arith.constant 0 : index
    %c0_99 = arith.constant 0 : index
    %c92 = arith.constant 92 : index
    %96 = vector.load %arg1[%c0_98, %c0_99, %c92] : memref<1x16x640xbf16, #tpu.memory_space<vmem>>, vector<1x16x384xbf16>
    %97 = vector.shape_cast %96 : vector<1x16x384xbf16> to vector<16x384xbf16>
    %c512 = arith.constant 512 : index
    %c0_100 = arith.constant 0 : index
    %98 = vector.load %arg5[%c512, %c0_100] : memref<784x384xbf16, #tpu.memory_space<vmem>>, vector<16x384xbf16>
    tpu.vector_store %arg5[%c512, %c0_100], %97 {strides = array<i32>} : memref<784x384xbf16, #tpu.memory_space<vmem>>, vector<16x384xbf16>,
    %c0_101 = arith.constant 0 : index
    %c0_102 = arith.constant 0 : index
    %c93 = arith.constant 93 : index
    %99 = vector.load %arg1[%c0_101, %c0_102, %c93] : memref<1x16x640xbf16, #tpu.memory_space<vmem>>, vector<1x16x384xbf16>
    %100 = vector.shape_cast %99 : vector<1x16x384xbf16> to vector<16x384xbf16>
    %c528 = arith.constant 528 : index
    %c0_103 = arith.constant 0 : index
    %101 = vector.load %arg5[%c528, %c0_103] : memref<784x384xbf16, #tpu.memory_space<vmem>>, vector<16x384xbf16>
    tpu.vector_store %arg5[%c528, %c0_103], %100 {strides = array<i32>} : memref<784x384xbf16, #tpu.memory_space<vmem>>, vector<16x384xbf16>,
    %c0_104 = arith.constant 0 : index
    %c0_105 = arith.constant 0 : index
    %c94 = arith.constant 94 : index
    %102 = vector.load %arg1[%c0_104, %c0_105, %c94] : memref<1x16x640xbf16, #tpu.memory_space<vmem>>, vector<1x16x384xbf16>
    %103 = vector.shape_cast %102 : vector<1x16x384xbf16> to vector<16x384xbf16>
    %c544 = arith.constant 544 : index
    %c0_106 = arith.constant 0 : index
    %104 = vector.load %arg5[%c544, %c0_106] : memref<784x384xbf16, #tpu.memory_space<vmem>>, vector<16x384xbf16>
    tpu.vector_store %arg5[%c544, %c0_106], %103 {strides = array<i32>} : memref<784x384xbf16, #tpu.memory_space<vmem>>, vector<16x384xbf16>,
    %c0_107 = arith.constant 0 : index
    %c0_108 = arith.constant 0 : index
    %c110 = arith.constant 110 : index
    %105 = vector.load %arg1[%c0_107, %c0_108, %c110] : memref<1x16x640xbf16, #tpu.memory_space<vmem>>, vector<1x16x384xbf16>
    %106 = vector.shape_cast %105 : vector<1x16x384xbf16> to vector<16x384xbf16>
    %c560 = arith.constant 560 : index
    %c0_109 = arith.constant 0 : index
    %107 = vector.load %arg5[%c560, %c0_109] : memref<784x384xbf16, #tpu.memory_space<vmem>>, vector<16x384xbf16>
    tpu.vector_store %arg5[%c560, %c0_109], %106 {strides = array<i32>} : memref<784x384xbf16, #tpu.memory_space<vmem>>, vector<16x384xbf16>,
    %c0_110 = arith.constant 0 : index
    %c0_111 = arith.constant 0 : index
    %c111 = arith.constant 111 : index
    %108 = vector.load %arg1[%c0_110, %c0_111, %c111] : memref<1x16x640xbf16, #tpu.memory_space<vmem>>, vector<1x16x384xbf16>
    %109 = vector.shape_cast %108 : vector<1x16x384xbf16> to vector<16x384xbf16>
    %c576 = arith.constant 576 : index
    %c0_112 = arith.constant 0 : index
    %110 = vector.load %arg5[%c576, %c0_112] : memref<784x384xbf16, #tpu.memory_space<vmem>>, vector<16x384xbf16>
    tpu.vector_store %arg5[%c576, %c0_112], %109 {strides = array<i32>} : memref<784x384xbf16, #tpu.memory_space<vmem>>, vector<16x384xbf16>,
    %c0_113 = arith.constant 0 : index
    %c0_114 = arith.constant 0 : index
    %c112_115 = arith.constant 112 : index
    %111 = vector.load %arg1[%c0_113, %c0_114, %c112_115] : memref<1x16x640xbf16, #tpu.memory_space<vmem>>, vector<1x16x384xbf16>
    %112 = vector.shape_cast %111 : vector<1x16x384xbf16> to vector<16x384xbf16>
    %c592 = arith.constant 592 : index
    %c0_116 = arith.constant 0 : index
    %113 = vector.load %arg5[%c592, %c0_116] : memref<784x384xbf16, #tpu.memory_space<vmem>>, vector<16x384xbf16>
    tpu.vector_store %arg5[%c592, %c0_116], %112 {strides = array<i32>} : memref<784x384xbf16, #tpu.memory_space<vmem>>, vector<16x384xbf16>,
    %c0_117 = arith.constant 0 : index
    %c0_118 = arith.constant 0 : index
    %c113 = arith.constant 113 : index
    %114 = vector.load %arg1[%c0_117, %c0_118, %c113] : memref<1x16x640xbf16, #tpu.memory_space<vmem>>, vector<1x16x384xbf16>
    %115 = vector.shape_cast %114 : vector<1x16x384xbf16> to vector<16x384xbf16>
    %c608 = arith.constant 608 : index
    %c0_119 = arith.constant 0 : index
    %116 = vector.load %arg5[%c608, %c0_119] : memref<784x384xbf16, #tpu.memory_space<vmem>>, vector<16x384xbf16>
    tpu.vector_store %arg5[%c608, %c0_119], %115 {strides = array<i32>} : memref<784x384xbf16, #tpu.memory_space<vmem>>, vector<16x384xbf16>,
    %c0_120 = arith.constant 0 : index
    %c0_121 = arith.constant 0 : index
    %c114 = arith.constant 114 : index
    %117 = vector.load %arg1[%c0_120, %c0_121, %c114] : memref<1x16x640xbf16, #tpu.memory_space<vmem>>, vector<1x16x384xbf16>
    %118 = vector.shape_cast %117 : vector<1x16x384xbf16> to vector<16x384xbf16>
    %c624 = arith.constant 624 : index
    %c0_122 = arith.constant 0 : index
    %119 = vector.load %arg5[%c624, %c0_122] : memref<784x384xbf16, #tpu.memory_space<vmem>>, vector<16x384xbf16>
    tpu.vector_store %arg5[%c624, %c0_122], %118 {strides = array<i32>} : memref<784x384xbf16, #tpu.memory_space<vmem>>, vector<16x384xbf16>,
    %c0_123 = arith.constant 0 : index
    %c0_124 = arith.constant 0 : index
    %c115 = arith.constant 115 : index
    %120 = vector.load %arg1[%c0_123, %c0_124, %c115] : memref<1x16x640xbf16, #tpu.memory_space<vmem>>, vector<1x16x384xbf16>
    %121 = vector.shape_cast %120 : vector<1x16x384xbf16> to vector<16x384xbf16>
    %c640 = arith.constant 640 : index
    %c0_125 = arith.constant 0 : index
    %122 = vector.load %arg5[%c640, %c0_125] : memref<784x384xbf16, #tpu.memory_space<vmem>>, vector<16x384xbf16>
    tpu.vector_store %arg5[%c640, %c0_125], %121 {strides = array<i32>} : memref<784x384xbf16, #tpu.memory_space<vmem>>, vector<16x384xbf16>,
    %c0_126 = arith.constant 0 : index
    %c0_127 = arith.constant 0 : index
    %c116 = arith.constant 116 : index
    %123 = vector.load %arg1[%c0_126, %c0_127, %c116] : memref<1x16x640xbf16, #tpu.memory_space<vmem>>, vector<1x16x384xbf16>
    %124 = vector.shape_cast %123 : vector<1x16x384xbf16> to vector<16x384xbf16>
    %c656 = arith.constant 656 : index
    %c0_128 = arith.constant 0 : index
    %125 = vector.load %arg5[%c656, %c0_128] : memref<784x384xbf16, #tpu.memory_space<vmem>>, vector<16x384xbf16>
    tpu.vector_store %arg5[%c656, %c0_128], %124 {strides = array<i32>} : memref<784x384xbf16, #tpu.memory_space<vmem>>, vector<16x384xbf16>,
    %c0_129 = arith.constant 0 : index
    %c0_130 = arith.constant 0 : index
    %c132 = arith.constant 132 : index
    %126 = vector.load %arg1[%c0_129, %c0_130, %c132] : memref<1x16x640xbf16, #tpu.memory_space<vmem>>, vector<1x16x384xbf16>
    %127 = vector.shape_cast %126 : vector<1x16x384xbf16> to vector<16x384xbf16>
    %c672 = arith.constant 672 : index
    %c0_131 = arith.constant 0 : index
    %128 = vector.load %arg5[%c672, %c0_131] : memref<784x384xbf16, #tpu.memory_space<vmem>>, vector<16x384xbf16>
    tpu.vector_store %arg5[%c672, %c0_131], %127 {strides = array<i32>} : memref<784x384xbf16, #tpu.memory_space<vmem>>, vector<16x384xbf16>,
    %c0_132 = arith.constant 0 : index
    %c0_133 = arith.constant 0 : index
    %c133 = arith.constant 133 : index
    %129 = vector.load %arg1[%c0_132, %c0_133, %c133] : memref<1x16x640xbf16, #tpu.memory_space<vmem>>, vector<1x16x384xbf16>
    %130 = vector.shape_cast %129 : vector<1x16x384xbf16> to vector<16x384xbf16>
    %c688 = arith.constant 688 : index
    %c0_134 = arith.constant 0 : index
    %131 = vector.load %arg5[%c688, %c0_134] : memref<784x384xbf16, #tpu.memory_space<vmem>>, vector<16x384xbf16>
    tpu.vector_store %arg5[%c688, %c0_134], %130 {strides = array<i32>} : memref<784x384xbf16, #tpu.memory_space<vmem>>, vector<16x384xbf16>,
    %c0_135 = arith.constant 0 : index
    %c0_136 = arith.constant 0 : index
    %c134 = arith.constant 134 : index
    %132 = vector.load %arg1[%c0_135, %c0_136, %c134] : memref<1x16x640xbf16, #tpu.memory_space<vmem>>, vector<1x16x384xbf16>
    %133 = vector.shape_cast %132 : vector<1x16x384xbf16> to vector<16x384xbf16>
    %c704 = arith.constant 704 : index
    %c0_137 = arith.constant 0 : index
    %134 = vector.load %arg5[%c704, %c0_137] : memref<784x384xbf16, #tpu.memory_space<vmem>>, vector<16x384xbf16>
    tpu.vector_store %arg5[%c704, %c0_137], %133 {strides = array<i32>} : memref<784x384xbf16, #tpu.memory_space<vmem>>, vector<16x384xbf16>,
    %c0_138 = arith.constant 0 : index
    %c0_139 = arith.constant 0 : index
    %c135 = arith.constant 135 : index
    %135 = vector.load %arg1[%c0_138, %c0_139, %c135] : memref<1x16x640xbf16, #tpu.memory_space<vmem>>, vector<1x16x384xbf16>
    %136 = vector.shape_cast %135 : vector<1x16x384xbf16> to vector<16x384xbf16>
    %c720 = arith.constant 720 : index
    %c0_140 = arith.constant 0 : index
    %137 = vector.load %arg5[%c720, %c0_140] : memref<784x384xbf16, #tpu.memory_space<vmem>>, vector<16x384xbf16>
    tpu.vector_store %arg5[%c720, %c0_140], %136 {strides = array<i32>} : memref<784x384xbf16, #tpu.memory_space<vmem>>, vector<16x384xbf16>,
    %c0_141 = arith.constant 0 : index
    %c0_142 = arith.constant 0 : index
    %c136 = arith.constant 136 : index
    %138 = vector.load %arg1[%c0_141, %c0_142, %c136] : memref<1x16x640xbf16, #tpu.memory_space<vmem>>, vector<1x16x384xbf16>
    %139 = vector.shape_cast %138 : vector<1x16x384xbf16> to vector<16x384xbf16>
    %c736 = arith.constant 736 : index
    %c0_143 = arith.constant 0 : index
    %140 = vector.load %arg5[%c736, %c0_143] : memref<784x384xbf16, #tpu.memory_space<vmem>>, vector<16x384xbf16>
    tpu.vector_store %arg5[%c736, %c0_143], %139 {strides = array<i32>} : memref<784x384xbf16, #tpu.memory_space<vmem>>, vector<16x384xbf16>,
    %c0_144 = arith.constant 0 : index
    %c0_145 = arith.constant 0 : index
    %c137 = arith.constant 137 : index
    %141 = vector.load %arg1[%c0_144, %c0_145, %c137] : memref<1x16x640xbf16, #tpu.memory_space<vmem>>, vector<1x16x384xbf16>
    %142 = vector.shape_cast %141 : vector<1x16x384xbf16> to vector<16x384xbf16>
    %c752 = arith.constant 752 : index
    %c0_146 = arith.constant 0 : index
    %143 = vector.load %arg5[%c752, %c0_146] : memref<784x384xbf16, #tpu.memory_space<vmem>>, vector<16x384xbf16>
    tpu.vector_store %arg5[%c752, %c0_146], %142 {strides = array<i32>} : memref<784x384xbf16, #tpu.memory_space<vmem>>, vector<16x384xbf16>,
    %c0_147 = arith.constant 0 : index
    %c0_148 = arith.constant 0 : index
    %c138 = arith.constant 138 : index
    %144 = vector.load %arg1[%c0_147, %c0_148, %c138] : memref<1x16x640xbf16, #tpu.memory_space<vmem>>, vector<1x16x384xbf16>
    %145 = vector.shape_cast %144 : vector<1x16x384xbf16> to vector<16x384xbf16>
    %c768 = arith.constant 768 : index
    %c0_149 = arith.constant 0 : index
    %146 = vector.load %arg5[%c768, %c0_149] : memref<784x384xbf16, #tpu.memory_space<vmem>>, vector<16x384xbf16>
    tpu.vector_store %arg5[%c768, %c0_149], %145 {strides = array<i32>} : memref<784x384xbf16, #tpu.memory_space<vmem>>, vector<16x384xbf16>,
    %c0_150 = arith.constant 0 : index
    %c0_151 = arith.constant 0 : index
    %147 = vector.load %arg2[%c0_150, %c0_151] : memref<8x784xbf16, #tpu.memory_space<vmem>>, vector<8x784xbf16>
    %c0_152 = arith.constant 0 : index
    %c0_153 = arith.constant 0 : index
    %148 = vector.load %arg5[%c0_152, %c0_153] : memref<784x384xbf16, #tpu.memory_space<vmem>>, vector<784x384xbf16>
    %cst = arith.constant dense<0.000000e+00> : vector<8x384xf32>
    %149 = tpu.matmul %147, %148, %cst {dimension_numbers = #tpu.dot_dimension_numbers<[1], [0], [0], [1], [0, 0, 1, 1], [], []>} : vector<8x784xbf16>, vector<784x384xbf16>, vector<8x384xf32> -> vector<8x384xf32>
    %c0_154 = arith.constant 0 : index
    %c0_155 = arith.constant 0 : index
    %150 = vector.load %arg3[%c0_154, %c0_155] : memref<1x384xf32, #tpu.memory_space<vmem>>, vector<1x384xf32>
    %151 = vector.broadcast %150 : vector<1x384xf32> to vector<8x384xf32>
    %152 = arith.mulf %149, %151 : vector<8x384xf32>
    %cst_156 = arith.constant dense<0.000000e+00> : vector<8xf32>
    %153 = vector.multi_reduction <add>, %152, %cst_156 [1] : vector<8x384xf32> to vector<8xf32>
    %154 = vector.shape_cast %153 : vector<8xf32> to vector<8x1xf32>
    %cst_157 = arith.constant 3.906250e-03 : f32
    %155 = vector.broadcast %cst_157 : f32 to vector<8x1xf32>
    %156 = arith.mulf %154, %155 : vector<8x1xf32>
    %157 = vector.broadcast %156 : vector<8x1xf32> to vector<8x384xf32>
    %158 = arith.subf %149, %157 : vector<8x384xf32>
    %159 = vector.broadcast %150 : vector<1x384xf32> to vector<8x384xf32>
    %160 = arith.mulf %158, %159 : vector<8x384xf32>
    %161 = arith.mulf %160, %160 : vector<8x384xf32>
    %cst_158 = arith.constant dense<0.000000e+00> : vector<8xf32>
    %162 = vector.multi_reduction <add>, %161, %cst_158 [1] : vector<8x384xf32> to vector<8xf32>
    %163 = vector.shape_cast %162 : vector<8xf32> to vector<8x1xf32>
    %cst_159 = arith.constant 3.906250e-03 : f32
    %164 = vector.broadcast %cst_159 : f32 to vector<8x1xf32>
    %165 = arith.mulf %163, %164 : vector<8x1xf32>
    %cst_160 = arith.constant 9.99999974E-6 : f32
    %166 = vector.broadcast %cst_160 : f32 to vector<8x1xf32>
    %167 = arith.addf %165, %166 : vector<8x1xf32>
    %168 = math.rsqrt %167 : vector<8x1xf32>
    %169 = vector.broadcast %168 : vector<8x1xf32> to vector<8x384xf32>
    %170 = arith.mulf %160, %169 : vector<8x384xf32>
    %cst_161 = arith.constant 0.000000e+00 : f32
    %171 = vector.broadcast %cst_161 : f32 to vector<8x384xf32>
    %172 = arith.maximumf %170, %171 : vector<8x384xf32>
    %173 = arith.truncf %172 : vector<8x384xf32> to vector<8x384xbf16>
    %c0_162 = arith.constant 0 : index
    %c0_163 = arith.constant 0 : index
    %c0_164 = arith.constant 0 : index
    %174 = vector.load %arg4[%c0_162, %c0_163, %c0_164] : memref<1x8x384xbf16, #tpu.memory_space<vmem>>, vector<1x8x384xbf16>
    %175 = vector.shape_cast %174 : vector<1x8x384xbf16> to vector<8x384xbf16>
    %176 = vector.shape_cast %173 : vector<8x384xbf16> to vector<1x8x384xbf16>
    tpu.vector_store %arg4[%c0_162, %c0_163, %c0_164], %176 {strides = array<i32>} : memref<1x8x384xbf16, #tpu.memory_space<vmem>>, vector<1x8x384xbf16>,
    return
  }
  func.func @transform_0(%arg0: i32) -> (i32, i32, i32) {
    %c0_i32 = arith.constant 0 : i32
    %c0_i32_0 = arith.constant 0 : i32
    %c0_i32_1 = arith.constant 0 : i32
    return %arg0, %c0_i32, %c0_i32_0 : i32, i32, i32
  }
  func.func @transform_1(%arg0: i32) -> (i32, i32) {
    %c0_i32 = arith.constant 0 : i32
    %c0_i32_0 = arith.constant 0 : i32
    %c0_i32_1 = arith.constant 0 : i32
    return %c0_i32, %c0_i32_0 : i32, i32
  }
  func.func @transform_2(%arg0: i32) -> (i32, i32) {
    %c0_i32 = arith.constant 0 : i32
    %c0_i32_0 = arith.constant 0 : i32
    %c0_i32_1 = arith.constant 0 : i32
    return %c0_i32, %c0_i32_0 : i32, i32
  }
  func.func @transform_3(%arg0: i32) -> (i32, i32, i32) {
    %c0_i32 = arith.constant 0 : i32
    %c0_i32_0 = arith.constant 0 : i32
    %c0_i32_1 = arith.constant 0 : i32
    return %arg0, %c0_i32, %c0_i32_0 : i32, i32, i32
  }
}

module attributes {stable_mosaic.version = 11 : i64} {
  func.func @_conv_kernel(%arg0: i32, %arg1: memref<1x32x256xbf16, #tpu.memory_space<vmem>>, %arg2: memref<16x128xbf16, #tpu.memory_space<vmem>>, %arg3: memref<1x128xf32, #tpu.memory_space<vmem>>, %arg4: memref<1x16x128xbf16, #tpu.memory_space<vmem>>, %arg5: memref<128x128xbf16, #tpu.memory_space<vmem>>) attributes {dimension_semantics = [#tpu.dimension_semantics<parallel>], iteration_bounds = array<i64: 2>, scalar_prefetch = 0 : i64, scratch_operands = 1 : i64, tpu.core_type = #tpu.core_type<tc>, window_params = [{transform_indices = @transform_0, window_bounds = array<i64: 1, 32, 256>}, {pipeline_mode = #tpu.pipeline_mode<synchronous>, transform_indices = @transform_1, window_bounds = array<i64: 16, 128>}, {pipeline_mode = #tpu.pipeline_mode<synchronous>, transform_indices = @transform_2, window_bounds = array<i64: 1, 128>}, {transform_indices = @transform_3, window_bounds = array<i64: 1, 16, 128>}]} {
    %c0 = arith.constant 0 : index
    %c0_0 = arith.constant 0 : index
    %c0_1 = arith.constant 0 : index
    %0 = vector.load %arg1[%c0, %c0_0, %c0_1] : memref<1x32x256xbf16, #tpu.memory_space<vmem>>, vector<1x32x128xbf16>
    %1 = vector.shape_cast %0 : vector<1x32x128xbf16> to vector<32x128xbf16>
    %c0_2 = arith.constant 0 : index
    %c0_3 = arith.constant 0 : index
    %2 = vector.load %arg5[%c0_2, %c0_3] : memref<128x128xbf16, #tpu.memory_space<vmem>>, vector<32x128xbf16>
    tpu.vector_store %arg5[%c0_2, %c0_3], %1 {strides = array<i32>} : memref<128x128xbf16, #tpu.memory_space<vmem>>, vector<32x128xbf16>,
    %c0_4 = arith.constant 0 : index
    %c0_5 = arith.constant 0 : index
    %c1 = arith.constant 1 : index
    %3 = vector.load %arg1[%c0_4, %c0_5, %c1] : memref<1x32x256xbf16, #tpu.memory_space<vmem>>, vector<1x32x128xbf16>
    %4 = vector.shape_cast %3 : vector<1x32x128xbf16> to vector<32x128xbf16>
    %c32 = arith.constant 32 : index
    %c0_6 = arith.constant 0 : index
    %5 = vector.load %arg5[%c32, %c0_6] : memref<128x128xbf16, #tpu.memory_space<vmem>>, vector<32x128xbf16>
    tpu.vector_store %arg5[%c32, %c0_6], %4 {strides = array<i32>} : memref<128x128xbf16, #tpu.memory_space<vmem>>, vector<32x128xbf16>,
    %c0_7 = arith.constant 0 : index
    %c0_8 = arith.constant 0 : index
    %c9 = arith.constant 9 : index
    %6 = vector.load %arg1[%c0_7, %c0_8, %c9] : memref<1x32x256xbf16, #tpu.memory_space<vmem>>, vector<1x32x128xbf16>
    %7 = vector.shape_cast %6 : vector<1x32x128xbf16> to vector<32x128xbf16>
    %c64 = arith.constant 64 : index
    %c0_9 = arith.constant 0 : index
    %8 = vector.load %arg5[%c64, %c0_9] : memref<128x128xbf16, #tpu.memory_space<vmem>>, vector<32x128xbf16>
    tpu.vector_store %arg5[%c64, %c0_9], %7 {strides = array<i32>} : memref<128x128xbf16, #tpu.memory_space<vmem>>, vector<32x128xbf16>,
    %c0_10 = arith.constant 0 : index
    %c0_11 = arith.constant 0 : index
    %c10 = arith.constant 10 : index
    %9 = vector.load %arg1[%c0_10, %c0_11, %c10] : memref<1x32x256xbf16, #tpu.memory_space<vmem>>, vector<1x32x128xbf16>
    %10 = vector.shape_cast %9 : vector<1x32x128xbf16> to vector<32x128xbf16>
    %c96 = arith.constant 96 : index
    %c0_12 = arith.constant 0 : index
    %11 = vector.load %arg5[%c96, %c0_12] : memref<128x128xbf16, #tpu.memory_space<vmem>>, vector<32x128xbf16>
    tpu.vector_store %arg5[%c96, %c0_12], %10 {strides = array<i32>} : memref<128x128xbf16, #tpu.memory_space<vmem>>, vector<32x128xbf16>,
    %c0_13 = arith.constant 0 : index
    %c0_14 = arith.constant 0 : index
    %12 = vector.load %arg2[%c0_13, %c0_14] : memref<16x128xbf16, #tpu.memory_space<vmem>>, vector<16x128xbf16>
    %c0_15 = arith.constant 0 : index
    %c0_16 = arith.constant 0 : index
    %13 = vector.load %arg5[%c0_15, %c0_16] : memref<128x128xbf16, #tpu.memory_space<vmem>>, vector<128x128xbf16>
    %cst = arith.constant dense<0.000000e+00> : vector<16x128xf32>
    %14 = tpu.matmul %12, %13, %cst {dimension_numbers = #tpu.dot_dimension_numbers<[1], [0], [0], [1], [0, 0, 1, 1], [], []>} : vector<16x128xbf16>, vector<128x128xbf16>, vector<16x128xf32> -> vector<16x128xf32>
    %c0_17 = arith.constant 0 : index
    %c0_18 = arith.constant 0 : index
    %15 = vector.load %arg3[%c0_17, %c0_18] : memref<1x128xf32, #tpu.memory_space<vmem>>, vector<1x128xf32>
    %16 = vector.broadcast %15 : vector<1x128xf32> to vector<16x128xf32>
    %17 = arith.mulf %14, %16 : vector<16x128xf32>
    %cst_19 = arith.constant dense<0.000000e+00> : vector<16xf32>
    %18 = vector.multi_reduction <add>, %17, %cst_19 [1] : vector<16x128xf32> to vector<16xf32>
    %19 = vector.shape_cast %18 : vector<16xf32> to vector<16x1xf32>
    %cst_20 = arith.constant 1.562500e-02 : f32
    %20 = vector.broadcast %cst_20 : f32 to vector<16x1xf32>
    %21 = arith.mulf %19, %20 : vector<16x1xf32>
    %22 = vector.broadcast %21 : vector<16x1xf32> to vector<16x128xf32>
    %23 = arith.subf %14, %22 : vector<16x128xf32>
    %24 = vector.broadcast %15 : vector<1x128xf32> to vector<16x128xf32>
    %25 = arith.mulf %23, %24 : vector<16x128xf32>
    %26 = arith.mulf %25, %25 : vector<16x128xf32>
    %cst_21 = arith.constant dense<0.000000e+00> : vector<16xf32>
    %27 = vector.multi_reduction <add>, %26, %cst_21 [1] : vector<16x128xf32> to vector<16xf32>
    %28 = vector.shape_cast %27 : vector<16xf32> to vector<16x1xf32>
    %cst_22 = arith.constant 1.562500e-02 : f32
    %29 = vector.broadcast %cst_22 : f32 to vector<16x1xf32>
    %30 = arith.mulf %28, %29 : vector<16x1xf32>
    %cst_23 = arith.constant 9.99999974E-6 : f32
    %31 = vector.broadcast %cst_23 : f32 to vector<16x1xf32>
    %32 = arith.addf %30, %31 : vector<16x1xf32>
    %33 = math.rsqrt %32 : vector<16x1xf32>
    %34 = vector.broadcast %33 : vector<16x1xf32> to vector<16x128xf32>
    %35 = arith.mulf %25, %34 : vector<16x128xf32>
    %cst_24 = arith.constant 0.000000e+00 : f32
    %36 = vector.broadcast %cst_24 : f32 to vector<16x128xf32>
    %37 = arith.maximumf %35, %36 : vector<16x128xf32>
    %38 = arith.truncf %37 : vector<16x128xf32> to vector<16x128xbf16>
    %c0_25 = arith.constant 0 : index
    %c0_26 = arith.constant 0 : index
    %c0_27 = arith.constant 0 : index
    %39 = vector.load %arg4[%c0_25, %c0_26, %c0_27] : memref<1x16x128xbf16, #tpu.memory_space<vmem>>, vector<1x16x128xbf16>
    %40 = vector.shape_cast %39 : vector<1x16x128xbf16> to vector<16x128xbf16>
    %41 = vector.shape_cast %38 : vector<16x128xbf16> to vector<1x16x128xbf16>
    tpu.vector_store %arg4[%c0_25, %c0_26, %c0_27], %41 {strides = array<i32>} : memref<1x16x128xbf16, #tpu.memory_space<vmem>>, vector<1x16x128xbf16>,
    return
  }
  func.func @transform_0(%arg0: i32) -> (i32, i32, i32) {
    %c0_i32 = arith.constant 0 : i32
    %c0_i32_0 = arith.constant 0 : i32
    %c0_i32_1 = arith.constant 0 : i32
    return %arg0, %c0_i32, %c0_i32_0 : i32, i32, i32
  }
  func.func @transform_1(%arg0: i32) -> (i32, i32) {
    %c0_i32 = arith.constant 0 : i32
    %c0_i32_0 = arith.constant 0 : i32
    %c0_i32_1 = arith.constant 0 : i32
    return %c0_i32, %c0_i32_0 : i32, i32
  }
  func.func @transform_2(%arg0: i32) -> (i32, i32) {
    %c0_i32 = arith.constant 0 : i32
    %c0_i32_0 = arith.constant 0 : i32
    %c0_i32_1 = arith.constant 0 : i32
    return %c0_i32, %c0_i32_0 : i32, i32
  }
  func.func @transform_3(%arg0: i32) -> (i32, i32, i32) {
    %c0_i32 = arith.constant 0 : i32
    %c0_i32_0 = arith.constant 0 : i32
    %c0_i32_1 = arith.constant 0 : i32
    return %arg0, %c0_i32, %c0_i32_0 : i32, i32, i32
  }
}

module attributes {stable_mosaic.version = 11 : i64} {
  func.func @_conv_kernel(%arg0: i32, %arg1: memref<1x64x256xbf16, #tpu.memory_space<vmem>>, %arg2: memref<32x256xbf16, #tpu.memory_space<vmem>>, %arg3: memref<1x128xf32, #tpu.memory_space<vmem>>, %arg4: memref<1x32x128xbf16, #tpu.memory_space<vmem>>, %arg5: memref<256x128xbf16, #tpu.memory_space<vmem>>) attributes {dimension_semantics = [#tpu.dimension_semantics<parallel>], iteration_bounds = array<i64: 2>, scalar_prefetch = 0 : i64, scratch_operands = 1 : i64, tpu.core_type = #tpu.core_type<tc>, window_params = [{transform_indices = @transform_0, window_bounds = array<i64: 1, 64, 256>}, {pipeline_mode = #tpu.pipeline_mode<synchronous>, transform_indices = @transform_1, window_bounds = array<i64: 32, 256>}, {pipeline_mode = #tpu.pipeline_mode<synchronous>, transform_indices = @transform_2, window_bounds = array<i64: 1, 128>}, {transform_indices = @transform_3, window_bounds = array<i64: 1, 32, 128>}]} {
    %c0 = arith.constant 0 : index
    %c0_0 = arith.constant 0 : index
    %c0_1 = arith.constant 0 : index
    %0 = vector.load %arg1[%c0, %c0_0, %c0_1] : memref<1x64x256xbf16, #tpu.memory_space<vmem>>, vector<1x64x128xbf16>
    %1 = vector.shape_cast %0 : vector<1x64x128xbf16> to vector<64x128xbf16>
    %c0_2 = arith.constant 0 : index
    %c0_3 = arith.constant 0 : index
    %2 = vector.load %arg5[%c0_2, %c0_3] : memref<256x128xbf16, #tpu.memory_space<vmem>>, vector<64x128xbf16>
    tpu.vector_store %arg5[%c0_2, %c0_3], %1 {strides = array<i32>} : memref<256x128xbf16, #tpu.memory_space<vmem>>, vector<64x128xbf16>,
    %c0_4 = arith.constant 0 : index
    %c0_5 = arith.constant 0 : index
    %c1 = arith.constant 1 : index
    %3 = vector.load %arg1[%c0_4, %c0_5, %c1] : memref<1x64x256xbf16, #tpu.memory_space<vmem>>, vector<1x64x128xbf16>
    %4 = vector.shape_cast %3 : vector<1x64x128xbf16> to vector<64x128xbf16>
    %c64 = arith.constant 64 : index
    %c0_6 = arith.constant 0 : index
    %5 = vector.load %arg5[%c64, %c0_6] : memref<256x128xbf16, #tpu.memory_space<vmem>>, vector<64x128xbf16>
    tpu.vector_store %arg5[%c64, %c0_6], %4 {strides = array<i32>} : memref<256x128xbf16, #tpu.memory_space<vmem>>, vector<64x128xbf16>,
    %c0_7 = arith.constant 0 : index
    %c0_8 = arith.constant 0 : index
    %c5 = arith.constant 5 : index
    %6 = vector.load %arg1[%c0_7, %c0_8, %c5] : memref<1x64x256xbf16, #tpu.memory_space<vmem>>, vector<1x64x128xbf16>
    %7 = vector.shape_cast %6 : vector<1x64x128xbf16> to vector<64x128xbf16>
    %c128 = arith.constant 128 : index
    %c0_9 = arith.constant 0 : index
    %8 = vector.load %arg5[%c128, %c0_9] : memref<256x128xbf16, #tpu.memory_space<vmem>>, vector<64x128xbf16>
    tpu.vector_store %arg5[%c128, %c0_9], %7 {strides = array<i32>} : memref<256x128xbf16, #tpu.memory_space<vmem>>, vector<64x128xbf16>,
    %c0_10 = arith.constant 0 : index
    %c0_11 = arith.constant 0 : index
    %c6 = arith.constant 6 : index
    %9 = vector.load %arg1[%c0_10, %c0_11, %c6] : memref<1x64x256xbf16, #tpu.memory_space<vmem>>, vector<1x64x128xbf16>
    %10 = vector.shape_cast %9 : vector<1x64x128xbf16> to vector<64x128xbf16>
    %c192 = arith.constant 192 : index
    %c0_12 = arith.constant 0 : index
    %11 = vector.load %arg5[%c192, %c0_12] : memref<256x128xbf16, #tpu.memory_space<vmem>>, vector<64x128xbf16>
    tpu.vector_store %arg5[%c192, %c0_12], %10 {strides = array<i32>} : memref<256x128xbf16, #tpu.memory_space<vmem>>, vector<64x128xbf16>,
    %c0_13 = arith.constant 0 : index
    %c0_14 = arith.constant 0 : index
    %12 = vector.load %arg2[%c0_13, %c0_14] : memref<32x256xbf16, #tpu.memory_space<vmem>>, vector<32x256xbf16>
    %c0_15 = arith.constant 0 : index
    %c0_16 = arith.constant 0 : index
    %13 = vector.load %arg5[%c0_15, %c0_16] : memref<256x128xbf16, #tpu.memory_space<vmem>>, vector<256x128xbf16>
    %cst = arith.constant dense<0.000000e+00> : vector<32x128xf32>
    %14 = tpu.matmul %12, %13, %cst {dimension_numbers = #tpu.dot_dimension_numbers<[1], [0], [0], [1], [0, 0, 1, 1], [], []>} : vector<32x256xbf16>, vector<256x128xbf16>, vector<32x128xf32> -> vector<32x128xf32>
    %c0_17 = arith.constant 0 : index
    %c0_18 = arith.constant 0 : index
    %15 = vector.load %arg3[%c0_17, %c0_18] : memref<1x128xf32, #tpu.memory_space<vmem>>, vector<1x128xf32>
    %16 = vector.broadcast %15 : vector<1x128xf32> to vector<32x128xf32>
    %17 = arith.mulf %14, %16 : vector<32x128xf32>
    %cst_19 = arith.constant dense<0.000000e+00> : vector<32xf32>
    %18 = vector.multi_reduction <add>, %17, %cst_19 [1] : vector<32x128xf32> to vector<32xf32>
    %19 = vector.shape_cast %18 : vector<32xf32> to vector<32x1xf32>
    %cst_20 = arith.constant 6.250000e-02 : f32
    %20 = vector.broadcast %cst_20 : f32 to vector<32x1xf32>
    %21 = arith.mulf %19, %20 : vector<32x1xf32>
    %22 = vector.broadcast %21 : vector<32x1xf32> to vector<32x128xf32>
    %23 = arith.subf %14, %22 : vector<32x128xf32>
    %24 = vector.broadcast %15 : vector<1x128xf32> to vector<32x128xf32>
    %25 = arith.mulf %23, %24 : vector<32x128xf32>
    %26 = arith.mulf %25, %25 : vector<32x128xf32>
    %cst_21 = arith.constant dense<0.000000e+00> : vector<32xf32>
    %27 = vector.multi_reduction <add>, %26, %cst_21 [1] : vector<32x128xf32> to vector<32xf32>
    %28 = vector.shape_cast %27 : vector<32xf32> to vector<32x1xf32>
    %cst_22 = arith.constant 6.250000e-02 : f32
    %29 = vector.broadcast %cst_22 : f32 to vector<32x1xf32>
    %30 = arith.mulf %28, %29 : vector<32x1xf32>
    %cst_23 = arith.constant 9.99999974E-6 : f32
    %31 = vector.broadcast %cst_23 : f32 to vector<32x1xf32>
    %32 = arith.addf %30, %31 : vector<32x1xf32>
    %33 = math.rsqrt %32 : vector<32x1xf32>
    %34 = vector.broadcast %33 : vector<32x1xf32> to vector<32x128xf32>
    %35 = arith.mulf %25, %34 : vector<32x128xf32>
    %cst_24 = arith.constant 0.000000e+00 : f32
    %36 = vector.broadcast %cst_24 : f32 to vector<32x128xf32>
    %37 = arith.maximumf %35, %36 : vector<32x128xf32>
    %38 = arith.truncf %37 : vector<32x128xf32> to vector<32x128xbf16>
    %c0_25 = arith.constant 0 : index
    %c0_26 = arith.constant 0 : index
    %c0_27 = arith.constant 0 : index
    %39 = vector.load %arg4[%c0_25, %c0_26, %c0_27] : memref<1x32x128xbf16, #tpu.memory_space<vmem>>, vector<1x32x128xbf16>
    %40 = vector.shape_cast %39 : vector<1x32x128xbf16> to vector<32x128xbf16>
    %41 = vector.shape_cast %38 : vector<32x128xbf16> to vector<1x32x128xbf16>
    tpu.vector_store %arg4[%c0_25, %c0_26, %c0_27], %41 {strides = array<i32>} : memref<1x32x128xbf16, #tpu.memory_space<vmem>>, vector<1x32x128xbf16>,
    return
  }
  func.func @transform_0(%arg0: i32) -> (i32, i32, i32) {
    %c0_i32 = arith.constant 0 : i32
    %c0_i32_0 = arith.constant 0 : i32
    %c0_i32_1 = arith.constant 0 : i32
    return %arg0, %c0_i32, %c0_i32_0 : i32, i32, i32
  }
  func.func @transform_1(%arg0: i32) -> (i32, i32) {
    %c0_i32 = arith.constant 0 : i32
    %c0_i32_0 = arith.constant 0 : i32
    %c0_i32_1 = arith.constant 0 : i32
    return %c0_i32, %c0_i32_0 : i32, i32
  }
  func.func @transform_2(%arg0: i32) -> (i32, i32) {
    %c0_i32 = arith.constant 0 : i32
    %c0_i32_0 = arith.constant 0 : i32
    %c0_i32_1 = arith.constant 0 : i32
    return %c0_i32, %c0_i32_0 : i32, i32
  }
  func.func @transform_3(%arg0: i32) -> (i32, i32, i32) {
    %c0_i32 = arith.constant 0 : i32
    %c0_i32_0 = arith.constant 0 : i32
    %c0_i32_1 = arith.constant 0 : i32
    return %arg0, %c0_i32, %c0_i32_0 : i32, i32, i32
  }
}

module attributes {stable_mosaic.version = 11 : i64} {
  func.func @_deconv_kernel(%arg0: i32, %arg1: memref<1x32x384xbf16, #tpu.memory_space<vmem>>, %arg2: memref<64x128xbf16, #tpu.memory_space<vmem>>, %arg3: memref<1x128xf32, #tpu.memory_space<vmem>>, %arg4: memref<1x4x16x128xbf16, #tpu.memory_space<vmem>>, %arg5: memref<128x128xbf16, #tpu.memory_space<vmem>>) attributes {dimension_semantics = [#tpu.dimension_semantics<parallel>], iteration_bounds = array<i64: 2>, scalar_prefetch = 0 : i64, scratch_operands = 1 : i64, tpu.core_type = #tpu.core_type<tc>, window_params = [{transform_indices = @transform_0, window_bounds = array<i64: 1, 32, 384>}, {pipeline_mode = #tpu.pipeline_mode<synchronous>, transform_indices = @transform_1, window_bounds = array<i64: 64, 128>}, {pipeline_mode = #tpu.pipeline_mode<synchronous>, transform_indices = @transform_2, window_bounds = array<i64: 1, 128>}, {transform_indices = @transform_3, window_bounds = array<i64: 1, 4, 16, 128>}]} {
    %c0 = arith.constant 0 : index
    %c0_0 = arith.constant 0 : index
    %c128 = arith.constant 128 : index
    %0 = vector.load %arg1[%c0, %c0_0, %c128] : memref<1x32x384xbf16, #tpu.memory_space<vmem>>, vector<1x32x128xbf16>
    %1 = vector.shape_cast %0 : vector<1x32x128xbf16> to vector<32x128xbf16>
    %c0_1 = arith.constant 0 : index
    %c0_2 = arith.constant 0 : index
    %2 = vector.load %arg5[%c0_1, %c0_2] : memref<128x128xbf16, #tpu.memory_space<vmem>>, vector<32x128xbf16>
    tpu.vector_store %arg5[%c0_1, %c0_2], %1 {strides = array<i32>} : memref<128x128xbf16, #tpu.memory_space<vmem>>, vector<32x128xbf16>,
    %c0_3 = arith.constant 0 : index
    %c0_4 = arith.constant 0 : index
    %c129 = arith.constant 129 : index
    %3 = vector.load %arg1[%c0_3, %c0_4, %c129] : memref<1x32x384xbf16, #tpu.memory_space<vmem>>, vector<1x32x128xbf16>
    %4 = vector.shape_cast %3 : vector<1x32x128xbf16> to vector<32x128xbf16>
    %c32 = arith.constant 32 : index
    %c0_5 = arith.constant 0 : index
    %5 = vector.load %arg5[%c32, %c0_5] : memref<128x128xbf16, #tpu.memory_space<vmem>>, vector<32x128xbf16>
    tpu.vector_store %arg5[%c32, %c0_5], %4 {strides = array<i32>} : memref<128x128xbf16, #tpu.memory_space<vmem>>, vector<32x128xbf16>,
    %c0_6 = arith.constant 0 : index
    %c0_7 = arith.constant 0 : index
    %c134 = arith.constant 134 : index
    %6 = vector.load %arg1[%c0_6, %c0_7, %c134] : memref<1x32x384xbf16, #tpu.memory_space<vmem>>, vector<1x32x128xbf16>
    %7 = vector.shape_cast %6 : vector<1x32x128xbf16> to vector<32x128xbf16>
    %c64 = arith.constant 64 : index
    %c0_8 = arith.constant 0 : index
    %8 = vector.load %arg5[%c64, %c0_8] : memref<128x128xbf16, #tpu.memory_space<vmem>>, vector<32x128xbf16>
    tpu.vector_store %arg5[%c64, %c0_8], %7 {strides = array<i32>} : memref<128x128xbf16, #tpu.memory_space<vmem>>, vector<32x128xbf16>,
    %c0_9 = arith.constant 0 : index
    %c0_10 = arith.constant 0 : index
    %c135 = arith.constant 135 : index
    %9 = vector.load %arg1[%c0_9, %c0_10, %c135] : memref<1x32x384xbf16, #tpu.memory_space<vmem>>, vector<1x32x128xbf16>
    %10 = vector.shape_cast %9 : vector<1x32x128xbf16> to vector<32x128xbf16>
    %c96 = arith.constant 96 : index
    %c0_11 = arith.constant 0 : index
    %11 = vector.load %arg5[%c96, %c0_11] : memref<128x128xbf16, #tpu.memory_space<vmem>>, vector<32x128xbf16>
    tpu.vector_store %arg5[%c96, %c0_11], %10 {strides = array<i32>} : memref<128x128xbf16, #tpu.memory_space<vmem>>, vector<32x128xbf16>,
    %c0_12 = arith.constant 0 : index
    %c0_13 = arith.constant 0 : index
    %12 = vector.load %arg2[%c0_12, %c0_13] : memref<64x128xbf16, #tpu.memory_space<vmem>>, vector<64x128xbf16>
    %c0_14 = arith.constant 0 : index
    %c0_15 = arith.constant 0 : index
    %13 = vector.load %arg5[%c0_14, %c0_15] : memref<128x128xbf16, #tpu.memory_space<vmem>>, vector<128x128xbf16>
    %cst = arith.constant dense<0.000000e+00> : vector<64x128xf32>
    %14 = tpu.matmul %12, %13, %cst {dimension_numbers = #tpu.dot_dimension_numbers<[1], [0], [0], [1], [0, 0, 1, 1], [], []>} : vector<64x128xbf16>, vector<128x128xbf16>, vector<64x128xf32> -> vector<64x128xf32>
    %c0_16 = arith.constant 0 : index
    %c0_17 = arith.constant 0 : index
    %15 = vector.load %arg3[%c0_16, %c0_17] : memref<1x128xf32, #tpu.memory_space<vmem>>, vector<1x128xf32>
    %16 = vector.extract_strided_slice %14 {offsets = [0, 0], sizes = [16, 128], strides = [1, 1]} : vector<64x128xf32> to vector<16x128xf32>
    %17 = vector.extract_strided_slice %14 {offsets = [16, 0], sizes = [16, 128], strides = [1, 1]} : vector<64x128xf32> to vector<16x128xf32>
    %18 = vector.extract_strided_slice %14 {offsets = [32, 0], sizes = [16, 128], strides = [1, 1]} : vector<64x128xf32> to vector<16x128xf32>
    %19 = vector.extract_strided_slice %14 {offsets = [48, 0], sizes = [16, 128], strides = [1, 1]} : vector<64x128xf32> to vector<16x128xf32>
    %20 = vector.broadcast %15 : vector<1x128xf32> to vector<16x128xf32>
    %21 = arith.mulf %16, %20 : vector<16x128xf32>
    %cst_18 = arith.constant dense<0.000000e+00> : vector<16xf32>
    %22 = vector.multi_reduction <add>, %21, %cst_18 [1] : vector<16x128xf32> to vector<16xf32>
    %23 = vector.shape_cast %22 : vector<16xf32> to vector<16x1xf32>
    %cst_19 = arith.constant 0.000000e+00 : f32
    %24 = vector.broadcast %cst_19 : f32 to vector<16x1xf32>
    %25 = arith.addf %24, %23 : vector<16x1xf32>
    %26 = vector.broadcast %15 : vector<1x128xf32> to vector<16x128xf32>
    %27 = arith.mulf %17, %26 : vector<16x128xf32>
    %cst_20 = arith.constant dense<0.000000e+00> : vector<16xf32>
    %28 = vector.multi_reduction <add>, %27, %cst_20 [1] : vector<16x128xf32> to vector<16xf32>
    %29 = vector.shape_cast %28 : vector<16xf32> to vector<16x1xf32>
    %30 = arith.addf %25, %29 : vector<16x1xf32>
    %31 = vector.broadcast %15 : vector<1x128xf32> to vector<16x128xf32>
    %32 = arith.mulf %18, %31 : vector<16x128xf32>
    %cst_21 = arith.constant dense<0.000000e+00> : vector<16xf32>
    %33 = vector.multi_reduction <add>, %32, %cst_21 [1] : vector<16x128xf32> to vector<16xf32>
    %34 = vector.shape_cast %33 : vector<16xf32> to vector<16x1xf32>
    %35 = arith.addf %30, %34 : vector<16x1xf32>
    %36 = vector.broadcast %15 : vector<1x128xf32> to vector<16x128xf32>
    %37 = arith.mulf %19, %36 : vector<16x128xf32>
    %cst_22 = arith.constant dense<0.000000e+00> : vector<16xf32>
    %38 = vector.multi_reduction <add>, %37, %cst_22 [1] : vector<16x128xf32> to vector<16xf32>
    %39 = vector.shape_cast %38 : vector<16xf32> to vector<16x1xf32>
    %40 = arith.addf %35, %39 : vector<16x1xf32>
    %cst_23 = arith.constant 1.562500e-02 : f32
    %41 = vector.broadcast %cst_23 : f32 to vector<16x1xf32>
    %42 = arith.mulf %40, %41 : vector<16x1xf32>
    %43 = vector.broadcast %42 : vector<16x1xf32> to vector<16x128xf32>
    %44 = arith.subf %16, %43 : vector<16x128xf32>
    %45 = vector.broadcast %15 : vector<1x128xf32> to vector<16x128xf32>
    %46 = arith.mulf %44, %45 : vector<16x128xf32>
    %47 = vector.broadcast %42 : vector<16x1xf32> to vector<16x128xf32>
    %48 = arith.subf %17, %47 : vector<16x128xf32>
    %49 = vector.broadcast %15 : vector<1x128xf32> to vector<16x128xf32>
    %50 = arith.mulf %48, %49 : vector<16x128xf32>
    %51 = vector.broadcast %42 : vector<16x1xf32> to vector<16x128xf32>
    %52 = arith.subf %18, %51 : vector<16x128xf32>
    %53 = vector.broadcast %15 : vector<1x128xf32> to vector<16x128xf32>
    %54 = arith.mulf %52, %53 : vector<16x128xf32>
    %55 = vector.broadcast %42 : vector<16x1xf32> to vector<16x128xf32>
    %56 = arith.subf %19, %55 : vector<16x128xf32>
    %57 = vector.broadcast %15 : vector<1x128xf32> to vector<16x128xf32>
    %58 = arith.mulf %56, %57 : vector<16x128xf32>
    %59 = arith.mulf %46, %46 : vector<16x128xf32>
    %cst_24 = arith.constant dense<0.000000e+00> : vector<16xf32>
    %60 = vector.multi_reduction <add>, %59, %cst_24 [1] : vector<16x128xf32> to vector<16xf32>
    %61 = vector.shape_cast %60 : vector<16xf32> to vector<16x1xf32>
    %cst_25 = arith.constant 0.000000e+00 : f32
    %62 = vector.broadcast %cst_25 : f32 to vector<16x1xf32>
    %63 = arith.addf %62, %61 : vector<16x1xf32>
    %64 = arith.mulf %50, %50 : vector<16x128xf32>
    %cst_26 = arith.constant dense<0.000000e+00> : vector<16xf32>
    %65 = vector.multi_reduction <add>, %64, %cst_26 [1] : vector<16x128xf32> to vector<16xf32>
    %66 = vector.shape_cast %65 : vector<16xf32> to vector<16x1xf32>
    %67 = arith.addf %63, %66 : vector<16x1xf32>
    %68 = arith.mulf %54, %54 : vector<16x128xf32>
    %cst_27 = arith.constant dense<0.000000e+00> : vector<16xf32>
    %69 = vector.multi_reduction <add>, %68, %cst_27 [1] : vector<16x128xf32> to vector<16xf32>
    %70 = vector.shape_cast %69 : vector<16xf32> to vector<16x1xf32>
    %71 = arith.addf %67, %70 : vector<16x1xf32>
    %72 = arith.mulf %58, %58 : vector<16x128xf32>
    %cst_28 = arith.constant dense<0.000000e+00> : vector<16xf32>
    %73 = vector.multi_reduction <add>, %72, %cst_28 [1] : vector<16x128xf32> to vector<16xf32>
    %74 = vector.shape_cast %73 : vector<16xf32> to vector<16x1xf32>
    %75 = arith.addf %71, %74 : vector<16x1xf32>
    %cst_29 = arith.constant 1.562500e-02 : f32
    %76 = vector.broadcast %cst_29 : f32 to vector<16x1xf32>
    %77 = arith.mulf %75, %76 : vector<16x1xf32>
    %cst_30 = arith.constant 9.99999974E-6 : f32
    %78 = vector.broadcast %cst_30 : f32 to vector<16x1xf32>
    %79 = arith.addf %77, %78 : vector<16x1xf32>
    %80 = math.rsqrt %79 : vector<16x1xf32>
    %81 = vector.broadcast %80 : vector<16x1xf32> to vector<16x128xf32>
    %82 = arith.mulf %46, %81 : vector<16x128xf32>
    %cst_31 = arith.constant 0.000000e+00 : f32
    %83 = vector.broadcast %cst_31 : f32 to vector<16x128xf32>
    %84 = arith.maximumf %82, %83 : vector<16x128xf32>
    %85 = arith.truncf %84 : vector<16x128xf32> to vector<16x128xbf16>
    %c0_32 = arith.constant 0 : index
    %c0_33 = arith.constant 0 : index
    %c0_34 = arith.constant 0 : index
    %c0_35 = arith.constant 0 : index
    %86 = vector.load %arg4[%c0_32, %c0_33, %c0_34, %c0_35] : memref<1x4x16x128xbf16, #tpu.memory_space<vmem>>, vector<1x1x16x128xbf16>
    %87 = vector.shape_cast %86 : vector<1x1x16x128xbf16> to vector<16x128xbf16>
    %88 = vector.shape_cast %85 : vector<16x128xbf16> to vector<1x1x16x128xbf16>
    tpu.vector_store %arg4[%c0_32, %c0_33, %c0_34, %c0_35], %88 {strides = array<i32>} : memref<1x4x16x128xbf16, #tpu.memory_space<vmem>>, vector<1x1x16x128xbf16>,
    %89 = vector.broadcast %80 : vector<16x1xf32> to vector<16x128xf32>
    %90 = arith.mulf %50, %89 : vector<16x128xf32>
    %cst_36 = arith.constant 0.000000e+00 : f32
    %91 = vector.broadcast %cst_36 : f32 to vector<16x128xf32>
    %92 = arith.maximumf %90, %91 : vector<16x128xf32>
    %93 = arith.truncf %92 : vector<16x128xf32> to vector<16x128xbf16>
    %c0_37 = arith.constant 0 : index
    %c1 = arith.constant 1 : index
    %c0_38 = arith.constant 0 : index
    %c0_39 = arith.constant 0 : index
    %94 = vector.load %arg4[%c0_37, %c1, %c0_38, %c0_39] : memref<1x4x16x128xbf16, #tpu.memory_space<vmem>>, vector<1x1x16x128xbf16>
    %95 = vector.shape_cast %94 : vector<1x1x16x128xbf16> to vector<16x128xbf16>
    %96 = vector.shape_cast %93 : vector<16x128xbf16> to vector<1x1x16x128xbf16>
    tpu.vector_store %arg4[%c0_37, %c1, %c0_38, %c0_39], %96 {strides = array<i32>} : memref<1x4x16x128xbf16, #tpu.memory_space<vmem>>, vector<1x1x16x128xbf16>,
    %97 = vector.broadcast %80 : vector<16x1xf32> to vector<16x128xf32>
    %98 = arith.mulf %54, %97 : vector<16x128xf32>
    %cst_40 = arith.constant 0.000000e+00 : f32
    %99 = vector.broadcast %cst_40 : f32 to vector<16x128xf32>
    %100 = arith.maximumf %98, %99 : vector<16x128xf32>
    %101 = arith.truncf %100 : vector<16x128xf32> to vector<16x128xbf16>
    %c0_41 = arith.constant 0 : index
    %c2 = arith.constant 2 : index
    %c0_42 = arith.constant 0 : index
    %c0_43 = arith.constant 0 : index
    %102 = vector.load %arg4[%c0_41, %c2, %c0_42, %c0_43] : memref<1x4x16x128xbf16, #tpu.memory_space<vmem>>, vector<1x1x16x128xbf16>
    %103 = vector.shape_cast %102 : vector<1x1x16x128xbf16> to vector<16x128xbf16>
    %104 = vector.shape_cast %101 : vector<16x128xbf16> to vector<1x1x16x128xbf16>
    tpu.vector_store %arg4[%c0_41, %c2, %c0_42, %c0_43], %104 {strides = array<i32>} : memref<1x4x16x128xbf16, #tpu.memory_space<vmem>>, vector<1x1x16x128xbf16>,
    %105 = vector.broadcast %80 : vector<16x1xf32> to vector<16x128xf32>
    %106 = arith.mulf %58, %105 : vector<16x128xf32>
    %cst_44 = arith.constant 0.000000e+00 : f32
    %107 = vector.broadcast %cst_44 : f32 to vector<16x128xf32>
    %108 = arith.maximumf %106, %107 : vector<16x128xf32>
    %109 = arith.truncf %108 : vector<16x128xf32> to vector<16x128xbf16>
    %c0_45 = arith.constant 0 : index
    %c3 = arith.constant 3 : index
    %c0_46 = arith.constant 0 : index
    %c0_47 = arith.constant 0 : index
    %110 = vector.load %arg4[%c0_45, %c3, %c0_46, %c0_47] : memref<1x4x16x128xbf16, #tpu.memory_space<vmem>>, vector<1x1x16x128xbf16>
    %111 = vector.shape_cast %110 : vector<1x1x16x128xbf16> to vector<16x128xbf16>
    %112 = vector.shape_cast %109 : vector<16x128xbf16> to vector<1x1x16x128xbf16>
    tpu.vector_store %arg4[%c0_45, %c3, %c0_46, %c0_47], %112 {strides = array<i32>} : memref<1x4x16x128xbf16, #tpu.memory_space<vmem>>, vector<1x1x16x128xbf16>,
    return
  }
  func.func @transform_0(%arg0: i32) -> (i32, i32, i32) {
    %c0_i32 = arith.constant 0 : i32
    %c0_i32_0 = arith.constant 0 : i32
    %c0_i32_1 = arith.constant 0 : i32
    return %arg0, %c0_i32, %c0_i32_0 : i32, i32, i32
  }
  func.func @transform_1(%arg0: i32) -> (i32, i32) {
    %c0_i32 = arith.constant 0 : i32
    %c0_i32_0 = arith.constant 0 : i32
    %c0_i32_1 = arith.constant 0 : i32
    return %c0_i32, %c0_i32_0 : i32, i32
  }
  func.func @transform_2(%arg0: i32) -> (i32, i32) {
    %c0_i32 = arith.constant 0 : i32
    %c0_i32_0 = arith.constant 0 : i32
    %c0_i32_1 = arith.constant 0 : i32
    return %c0_i32, %c0_i32_0 : i32, i32
  }
  func.func @transform_3(%arg0: i32) -> (i32, i32, i32, i32) {
    %c0_i32 = arith.constant 0 : i32
    %c0_i32_0 = arith.constant 0 : i32
    %c0_i32_1 = arith.constant 0 : i32
    %c0_i32_2 = arith.constant 0 : i32
    return %arg0, %c0_i32, %c0_i32_0, %c0_i32_1 : i32, i32, i32, i32
  }
}

module attributes {stable_mosaic.version = 11 : i64} {
  func.func @_res_chain_kernel(%arg0: i32, %arg1: memref<1x32x384xbf16, #tpu.memory_space<vmem>>, %arg2: memref<2x32x288xbf16, #tpu.memory_space<vmem>>, %arg3: memref<1x128xf32, #tpu.memory_space<vmem>>, %arg4: memref<1x32x384xbf16, #tpu.memory_space<vmem>>, %arg5: memref<32x384xbf16, #tpu.memory_space<vmem>>, %arg6: memref<288x128xbf16, #tpu.memory_space<vmem>>) attributes {dimension_semantics = [#tpu.dimension_semantics<parallel>], iteration_bounds = array<i64: 2>, scalar_prefetch = 0 : i64, scratch_operands = 2 : i64, tpu.core_type = #tpu.core_type<tc>, window_params = [{transform_indices = @transform_0, window_bounds = array<i64: 1, 32, 384>}, {pipeline_mode = #tpu.pipeline_mode<synchronous>, transform_indices = @transform_1, window_bounds = array<i64: 2, 32, 288>}, {pipeline_mode = #tpu.pipeline_mode<synchronous>, transform_indices = @transform_2, window_bounds = array<i64: 1, 128>}, {transform_indices = @transform_3, window_bounds = array<i64: 1, 32, 384>}]} {
    %c0 = arith.constant 0 : index
    %c0_0 = arith.constant 0 : index
    %c0_1 = arith.constant 0 : index
    %0 = vector.load %arg1[%c0, %c0_0, %c0_1] : memref<1x32x384xbf16, #tpu.memory_space<vmem>>, vector<1x32x384xbf16>
    %1 = vector.shape_cast %0 : vector<1x32x384xbf16> to vector<32x384xbf16>
    %c0_2 = arith.constant 0 : index
    %c0_3 = arith.constant 0 : index
    %2 = vector.load %arg5[%c0_2, %c0_3] : memref<32x384xbf16, #tpu.memory_space<vmem>>, vector<32x384xbf16>
    tpu.vector_store %arg5[%c0_2, %c0_3], %1 {strides = array<i32>} : memref<32x384xbf16, #tpu.memory_space<vmem>>, vector<32x384xbf16>,
    %c0_4 = arith.constant 0 : index
    %c0_5 = arith.constant 0 : index
    %3 = vector.load %arg3[%c0_4, %c0_5] : memref<1x128xf32, #tpu.memory_space<vmem>>, vector<1x128xf32>
    %c0_6 = arith.constant 0 : index
    %c121 = arith.constant 121 : index
    %4 = vector.load %arg5[%c0_6, %c121] : memref<32x384xbf16, #tpu.memory_space<vmem>>, vector<32x128xbf16>
    %c0_7 = arith.constant 0 : index
    %c0_8 = arith.constant 0 : index
    %5 = vector.load %arg6[%c0_7, %c0_8] : memref<288x128xbf16, #tpu.memory_space<vmem>>, vector<32x128xbf16>
    tpu.vector_store %arg6[%c0_7, %c0_8], %4 {strides = array<i32>} : memref<288x128xbf16, #tpu.memory_space<vmem>>, vector<32x128xbf16>,
    %c0_9 = arith.constant 0 : index
    %c122 = arith.constant 122 : index
    %6 = vector.load %arg5[%c0_9, %c122] : memref<32x384xbf16, #tpu.memory_space<vmem>>, vector<32x128xbf16>
    %c32 = arith.constant 32 : index
    %c0_10 = arith.constant 0 : index
    %7 = vector.load %arg6[%c32, %c0_10] : memref<288x128xbf16, #tpu.memory_space<vmem>>, vector<32x128xbf16>
    tpu.vector_store %arg6[%c32, %c0_10], %6 {strides = array<i32>} : memref<288x128xbf16, #tpu.memory_space<vmem>>, vector<32x128xbf16>,
    %c0_11 = arith.constant 0 : index
    %c123 = arith.constant 123 : index
    %8 = vector.load %arg5[%c0_11, %c123] : memref<32x384xbf16, #tpu.memory_space<vmem>>, vector<32x128xbf16>
    %c64 = arith.constant 64 : index
    %c0_12 = arith.constant 0 : index
    %9 = vector.load %arg6[%c64, %c0_12] : memref<288x128xbf16, #tpu.memory_space<vmem>>, vector<32x128xbf16>
    tpu.vector_store %arg6[%c64, %c0_12], %8 {strides = array<i32>} : memref<288x128xbf16, #tpu.memory_space<vmem>>, vector<32x128xbf16>,
    %c0_13 = arith.constant 0 : index
    %c127 = arith.constant 127 : index
    %10 = vector.load %arg5[%c0_13, %c127] : memref<32x384xbf16, #tpu.memory_space<vmem>>, vector<32x128xbf16>
    %c96 = arith.constant 96 : index
    %c0_14 = arith.constant 0 : index
    %11 = vector.load %arg6[%c96, %c0_14] : memref<288x128xbf16, #tpu.memory_space<vmem>>, vector<32x128xbf16>
    tpu.vector_store %arg6[%c96, %c0_14], %10 {strides = array<i32>} : memref<288x128xbf16, #tpu.memory_space<vmem>>, vector<32x128xbf16>,
    %c0_15 = arith.constant 0 : index
    %c128 = arith.constant 128 : index
    %12 = vector.load %arg5[%c0_15, %c128] : memref<32x384xbf16, #tpu.memory_space<vmem>>, vector<32x128xbf16>
    %c128_16 = arith.constant 128 : index
    %c0_17 = arith.constant 0 : index
    %13 = vector.load %arg6[%c128_16, %c0_17] : memref<288x128xbf16, #tpu.memory_space<vmem>>, vector<32x128xbf16>
    tpu.vector_store %arg6[%c128_16, %c0_17], %12 {strides = array<i32>} : memref<288x128xbf16, #tpu.memory_space<vmem>>, vector<32x128xbf16>,
    %c0_18 = arith.constant 0 : index
    %c129 = arith.constant 129 : index
    %14 = vector.load %arg5[%c0_18, %c129] : memref<32x384xbf16, #tpu.memory_space<vmem>>, vector<32x128xbf16>
    %c160 = arith.constant 160 : index
    %c0_19 = arith.constant 0 : index
    %15 = vector.load %arg6[%c160, %c0_19] : memref<288x128xbf16, #tpu.memory_space<vmem>>, vector<32x128xbf16>
    tpu.vector_store %arg6[%c160, %c0_19], %14 {strides = array<i32>} : memref<288x128xbf16, #tpu.memory_space<vmem>>, vector<32x128xbf16>,
    %c0_20 = arith.constant 0 : index
    %c133 = arith.constant 133 : index
    %16 = vector.load %arg5[%c0_20, %c133] : memref<32x384xbf16, #tpu.memory_space<vmem>>, vector<32x128xbf16>
    %c192 = arith.constant 192 : index
    %c0_21 = arith.constant 0 : index
    %17 = vector.load %arg6[%c192, %c0_21] : memref<288x128xbf16, #tpu.memory_space<vmem>>, vector<32x128xbf16>
    tpu.vector_store %arg6[%c192, %c0_21], %16 {strides = array<i32>} : memref<288x128xbf16, #tpu.memory_space<vmem>>, vector<32x128xbf16>,
    %c0_22 = arith.constant 0 : index
    %c134 = arith.constant 134 : index
    %18 = vector.load %arg5[%c0_22, %c134] : memref<32x384xbf16, #tpu.memory_space<vmem>>, vector<32x128xbf16>
    %c224 = arith.constant 224 : index
    %c0_23 = arith.constant 0 : index
    %19 = vector.load %arg6[%c224, %c0_23] : memref<288x128xbf16, #tpu.memory_space<vmem>>, vector<32x128xbf16>
    tpu.vector_store %arg6[%c224, %c0_23], %18 {strides = array<i32>} : memref<288x128xbf16, #tpu.memory_space<vmem>>, vector<32x128xbf16>,
    %c0_24 = arith.constant 0 : index
    %c135 = arith.constant 135 : index
    %20 = vector.load %arg5[%c0_24, %c135] : memref<32x384xbf16, #tpu.memory_space<vmem>>, vector<32x128xbf16>
    %c256 = arith.constant 256 : index
    %c0_25 = arith.constant 0 : index
    %21 = vector.load %arg6[%c256, %c0_25] : memref<288x128xbf16, #tpu.memory_space<vmem>>, vector<32x128xbf16>
    tpu.vector_store %arg6[%c256, %c0_25], %20 {strides = array<i32>} : memref<288x128xbf16, #tpu.memory_space<vmem>>, vector<32x128xbf16>,
    %c0_26 = arith.constant 0 : index
    %c0_27 = arith.constant 0 : index
    %c0_28 = arith.constant 0 : index
    %22 = vector.load %arg2[%c0_26, %c0_27, %c0_28] : memref<2x32x288xbf16, #tpu.memory_space<vmem>>, vector<1x32x288xbf16>
    %23 = vector.shape_cast %22 : vector<1x32x288xbf16> to vector<32x288xbf16>
    %c0_29 = arith.constant 0 : index
    %c0_30 = arith.constant 0 : index
    %24 = vector.load %arg6[%c0_29, %c0_30] : memref<288x128xbf16, #tpu.memory_space<vmem>>, vector<288x128xbf16>
    %cst = arith.constant dense<0.000000e+00> : vector<32x128xf32>
    %25 = tpu.matmul %23, %24, %cst {dimension_numbers = #tpu.dot_dimension_numbers<[1], [0], [0], [1], [0, 0, 1, 1], [], []>} : vector<32x288xbf16>, vector<288x128xbf16>, vector<32x128xf32> -> vector<32x128xf32>
    %26 = vector.broadcast %3 : vector<1x128xf32> to vector<32x128xf32>
    %27 = arith.mulf %25, %26 : vector<32x128xf32>
    %cst_31 = arith.constant dense<0.000000e+00> : vector<32xf32>
    %28 = vector.multi_reduction <add>, %27, %cst_31 [1] : vector<32x128xf32> to vector<32xf32>
    %29 = vector.shape_cast %28 : vector<32xf32> to vector<32x1xf32>
    %cst_32 = arith.constant 6.250000e-02 : f32
    %30 = vector.broadcast %cst_32 : f32 to vector<32x1xf32>
    %31 = arith.mulf %29, %30 : vector<32x1xf32>
    %32 = vector.broadcast %31 : vector<32x1xf32> to vector<32x128xf32>
    %33 = arith.subf %25, %32 : vector<32x128xf32>
    %34 = vector.broadcast %3 : vector<1x128xf32> to vector<32x128xf32>
    %35 = arith.mulf %33, %34 : vector<32x128xf32>
    %36 = arith.mulf %35, %35 : vector<32x128xf32>
    %cst_33 = arith.constant dense<0.000000e+00> : vector<32xf32>
    %37 = vector.multi_reduction <add>, %36, %cst_33 [1] : vector<32x128xf32> to vector<32xf32>
    %38 = vector.shape_cast %37 : vector<32xf32> to vector<32x1xf32>
    %cst_34 = arith.constant 6.250000e-02 : f32
    %39 = vector.broadcast %cst_34 : f32 to vector<32x1xf32>
    %40 = arith.mulf %38, %39 : vector<32x1xf32>
    %cst_35 = arith.constant 9.99999974E-6 : f32
    %41 = vector.broadcast %cst_35 : f32 to vector<32x1xf32>
    %42 = arith.addf %40, %41 : vector<32x1xf32>
    %43 = math.rsqrt %42 : vector<32x1xf32>
    %44 = vector.broadcast %43 : vector<32x1xf32> to vector<32x128xf32>
    %45 = arith.mulf %35, %44 : vector<32x128xf32>
    %c0_36 = arith.constant 0 : index
    %c128_37 = arith.constant 128 : index
    %46 = vector.load %arg5[%c0_36, %c128_37] : memref<32x384xbf16, #tpu.memory_space<vmem>>, vector<32x128xbf16>
    %47 = arith.extf %46 : vector<32x128xbf16> to vector<32x128xf32>
    %48 = arith.addf %47, %45 : vector<32x128xf32>
    %49 = arith.truncf %48 : vector<32x128xf32> to vector<32x128xbf16>
    %c0_38 = arith.constant 0 : index
    %c128_39 = arith.constant 128 : index
    %50 = vector.load %arg5[%c0_38, %c128_39] : memref<32x384xbf16, #tpu.memory_space<vmem>>, vector<32x128xbf16>
    tpu.vector_store %arg5[%c0_38, %c128_39], %49 {strides = array<i32>} : memref<32x384xbf16, #tpu.memory_space<vmem>>, vector<32x128xbf16>,
    %c0_40 = arith.constant 0 : index
    %c121_41 = arith.constant 121 : index
    %51 = vector.load %arg5[%c0_40, %c121_41] : memref<32x384xbf16, #tpu.memory_space<vmem>>, vector<32x128xbf16>
    %c0_42 = arith.constant 0 : index
    %c0_43 = arith.constant 0 : index
    %52 = vector.load %arg6[%c0_42, %c0_43] : memref<288x128xbf16, #tpu.memory_space<vmem>>, vector<32x128xbf16>
    tpu.vector_store %arg6[%c0_42, %c0_43], %51 {strides = array<i32>} : memref<288x128xbf16, #tpu.memory_space<vmem>>, vector<32x128xbf16>,
    %c0_44 = arith.constant 0 : index
    %c122_45 = arith.constant 122 : index
    %53 = vector.load %arg5[%c0_44, %c122_45] : memref<32x384xbf16, #tpu.memory_space<vmem>>, vector<32x128xbf16>
    %c32_46 = arith.constant 32 : index
    %c0_47 = arith.constant 0 : index
    %54 = vector.load %arg6[%c32_46, %c0_47] : memref<288x128xbf16, #tpu.memory_space<vmem>>, vector<32x128xbf16>
    tpu.vector_store %arg6[%c32_46, %c0_47], %53 {strides = array<i32>} : memref<288x128xbf16, #tpu.memory_space<vmem>>, vector<32x128xbf16>,
    %c0_48 = arith.constant 0 : index
    %c123_49 = arith.constant 123 : index
    %55 = vector.load %arg5[%c0_48, %c123_49] : memref<32x384xbf16, #tpu.memory_space<vmem>>, vector<32x128xbf16>
    %c64_50 = arith.constant 64 : index
    %c0_51 = arith.constant 0 : index
    %56 = vector.load %arg6[%c64_50, %c0_51] : memref<288x128xbf16, #tpu.memory_space<vmem>>, vector<32x128xbf16>
    tpu.vector_store %arg6[%c64_50, %c0_51], %55 {strides = array<i32>} : memref<288x128xbf16, #tpu.memory_space<vmem>>, vector<32x128xbf16>,
    %c0_52 = arith.constant 0 : index
    %c127_53 = arith.constant 127 : index
    %57 = vector.load %arg5[%c0_52, %c127_53] : memref<32x384xbf16, #tpu.memory_space<vmem>>, vector<32x128xbf16>
    %c96_54 = arith.constant 96 : index
    %c0_55 = arith.constant 0 : index
    %58 = vector.load %arg6[%c96_54, %c0_55] : memref<288x128xbf16, #tpu.memory_space<vmem>>, vector<32x128xbf16>
    tpu.vector_store %arg6[%c96_54, %c0_55], %57 {strides = array<i32>} : memref<288x128xbf16, #tpu.memory_space<vmem>>, vector<32x128xbf16>,
    %c0_56 = arith.constant 0 : index
    %c128_57 = arith.constant 128 : index
    %59 = vector.load %arg5[%c0_56, %c128_57] : memref<32x384xbf16, #tpu.memory_space<vmem>>, vector<32x128xbf16>
    %c128_58 = arith.constant 128 : index
    %c0_59 = arith.constant 0 : index
    %60 = vector.load %arg6[%c128_58, %c0_59] : memref<288x128xbf16, #tpu.memory_space<vmem>>, vector<32x128xbf16>
    tpu.vector_store %arg6[%c128_58, %c0_59], %59 {strides = array<i32>} : memref<288x128xbf16, #tpu.memory_space<vmem>>, vector<32x128xbf16>,
    %c0_60 = arith.constant 0 : index
    %c129_61 = arith.constant 129 : index
    %61 = vector.load %arg5[%c0_60, %c129_61] : memref<32x384xbf16, #tpu.memory_space<vmem>>, vector<32x128xbf16>
    %c160_62 = arith.constant 160 : index
    %c0_63 = arith.constant 0 : index
    %62 = vector.load %arg6[%c160_62, %c0_63] : memref<288x128xbf16, #tpu.memory_space<vmem>>, vector<32x128xbf16>
    tpu.vector_store %arg6[%c160_62, %c0_63], %61 {strides = array<i32>} : memref<288x128xbf16, #tpu.memory_space<vmem>>, vector<32x128xbf16>,
    %c0_64 = arith.constant 0 : index
    %c133_65 = arith.constant 133 : index
    %63 = vector.load %arg5[%c0_64, %c133_65] : memref<32x384xbf16, #tpu.memory_space<vmem>>, vector<32x128xbf16>
    %c192_66 = arith.constant 192 : index
    %c0_67 = arith.constant 0 : index
    %64 = vector.load %arg6[%c192_66, %c0_67] : memref<288x128xbf16, #tpu.memory_space<vmem>>, vector<32x128xbf16>
    tpu.vector_store %arg6[%c192_66, %c0_67], %63 {strides = array<i32>} : memref<288x128xbf16, #tpu.memory_space<vmem>>, vector<32x128xbf16>,
    %c0_68 = arith.constant 0 : index
    %c134_69 = arith.constant 134 : index
    %65 = vector.load %arg5[%c0_68, %c134_69] : memref<32x384xbf16, #tpu.memory_space<vmem>>, vector<32x128xbf16>
    %c224_70 = arith.constant 224 : index
    %c0_71 = arith.constant 0 : index
    %66 = vector.load %arg6[%c224_70, %c0_71] : memref<288x128xbf16, #tpu.memory_space<vmem>>, vector<32x128xbf16>
    tpu.vector_store %arg6[%c224_70, %c0_71], %65 {strides = array<i32>} : memref<288x128xbf16, #tpu.memory_space<vmem>>, vector<32x128xbf16>,
    %c0_72 = arith.constant 0 : index
    %c135_73 = arith.constant 135 : index
    %67 = vector.load %arg5[%c0_72, %c135_73] : memref<32x384xbf16, #tpu.memory_space<vmem>>, vector<32x128xbf16>
    %c256_74 = arith.constant 256 : index
    %c0_75 = arith.constant 0 : index
    %68 = vector.load %arg6[%c256_74, %c0_75] : memref<288x128xbf16, #tpu.memory_space<vmem>>, vector<32x128xbf16>
    tpu.vector_store %arg6[%c256_74, %c0_75], %67 {strides = array<i32>} : memref<288x128xbf16, #tpu.memory_space<vmem>>, vector<32x128xbf16>,
    %c1 = arith.constant 1 : index
    %c0_76 = arith.constant 0 : index
    %c0_77 = arith.constant 0 : index
    %69 = vector.load %arg2[%c1, %c0_76, %c0_77] : memref<2x32x288xbf16, #tpu.memory_space<vmem>>, vector<1x32x288xbf16>
    %70 = vector.shape_cast %69 : vector<1x32x288xbf16> to vector<32x288xbf16>
    %c0_78 = arith.constant 0 : index
    %c0_79 = arith.constant 0 : index
    %71 = vector.load %arg6[%c0_78, %c0_79] : memref<288x128xbf16, #tpu.memory_space<vmem>>, vector<288x128xbf16>
    %cst_80 = arith.constant dense<0.000000e+00> : vector<32x128xf32>
    %72 = tpu.matmul %70, %71, %cst_80 {dimension_numbers = #tpu.dot_dimension_numbers<[1], [0], [0], [1], [0, 0, 1, 1], [], []>} : vector<32x288xbf16>, vector<288x128xbf16>, vector<32x128xf32> -> vector<32x128xf32>
    %73 = vector.broadcast %3 : vector<1x128xf32> to vector<32x128xf32>
    %74 = arith.mulf %72, %73 : vector<32x128xf32>
    %cst_81 = arith.constant dense<0.000000e+00> : vector<32xf32>
    %75 = vector.multi_reduction <add>, %74, %cst_81 [1] : vector<32x128xf32> to vector<32xf32>
    %76 = vector.shape_cast %75 : vector<32xf32> to vector<32x1xf32>
    %cst_82 = arith.constant 6.250000e-02 : f32
    %77 = vector.broadcast %cst_82 : f32 to vector<32x1xf32>
    %78 = arith.mulf %76, %77 : vector<32x1xf32>
    %79 = vector.broadcast %78 : vector<32x1xf32> to vector<32x128xf32>
    %80 = arith.subf %72, %79 : vector<32x128xf32>
    %81 = vector.broadcast %3 : vector<1x128xf32> to vector<32x128xf32>
    %82 = arith.mulf %80, %81 : vector<32x128xf32>
    %83 = arith.mulf %82, %82 : vector<32x128xf32>
    %cst_83 = arith.constant dense<0.000000e+00> : vector<32xf32>
    %84 = vector.multi_reduction <add>, %83, %cst_83 [1] : vector<32x128xf32> to vector<32xf32>
    %85 = vector.shape_cast %84 : vector<32xf32> to vector<32x1xf32>
    %cst_84 = arith.constant 6.250000e-02 : f32
    %86 = vector.broadcast %cst_84 : f32 to vector<32x1xf32>
    %87 = arith.mulf %85, %86 : vector<32x1xf32>
    %cst_85 = arith.constant 9.99999974E-6 : f32
    %88 = vector.broadcast %cst_85 : f32 to vector<32x1xf32>
    %89 = arith.addf %87, %88 : vector<32x1xf32>
    %90 = math.rsqrt %89 : vector<32x1xf32>
    %91 = vector.broadcast %90 : vector<32x1xf32> to vector<32x128xf32>
    %92 = arith.mulf %82, %91 : vector<32x128xf32>
    %c0_86 = arith.constant 0 : index
    %c128_87 = arith.constant 128 : index
    %93 = vector.load %arg5[%c0_86, %c128_87] : memref<32x384xbf16, #tpu.memory_space<vmem>>, vector<32x128xbf16>
    %94 = arith.extf %93 : vector<32x128xbf16> to vector<32x128xf32>
    %95 = arith.addf %94, %92 : vector<32x128xf32>
    %96 = arith.truncf %95 : vector<32x128xf32> to vector<32x128xbf16>
    %c0_88 = arith.constant 0 : index
    %c128_89 = arith.constant 128 : index
    %97 = vector.load %arg5[%c0_88, %c128_89] : memref<32x384xbf16, #tpu.memory_space<vmem>>, vector<32x128xbf16>
    tpu.vector_store %arg5[%c0_88, %c128_89], %96 {strides = array<i32>} : memref<32x384xbf16, #tpu.memory_space<vmem>>, vector<32x128xbf16>,
    %c0_90 = arith.constant 0 : index
    %c0_91 = arith.constant 0 : index
    %98 = vector.load %arg5[%c0_90, %c0_91] : memref<32x384xbf16, #tpu.memory_space<vmem>>, vector<32x384xbf16>
    %c0_92 = arith.constant 0 : index
    %c0_93 = arith.constant 0 : index
    %c0_94 = arith.constant 0 : index
    %99 = vector.load %arg4[%c0_92, %c0_93, %c0_94] : memref<1x32x384xbf16, #tpu.memory_space<vmem>>, vector<1x32x384xbf16>
    %100 = vector.shape_cast %99 : vector<1x32x384xbf16> to vector<32x384xbf16>
    %101 = vector.shape_cast %98 : vector<32x384xbf16> to vector<1x32x384xbf16>
    tpu.vector_store %arg4[%c0_92, %c0_93, %c0_94], %101 {strides = array<i32>} : memref<1x32x384xbf16, #tpu.memory_space<vmem>>, vector<1x32x384xbf16>,
    return
  }
  func.func @transform_0(%arg0: i32) -> (i32, i32, i32) {
    %c0_i32 = arith.constant 0 : i32
    %c0_i32_0 = arith.constant 0 : i32
    %c0_i32_1 = arith.constant 0 : i32
    return %arg0, %c0_i32, %c0_i32_0 : i32, i32, i32
  }
  func.func @transform_1(%arg0: i32) -> (i32, i32, i32) {
    %c0_i32 = arith.constant 0 : i32
    %c0_i32_0 = arith.constant 0 : i32
    %c0_i32_1 = arith.constant 0 : i32
    %c0_i32_2 = arith.constant 0 : i32
    return %c0_i32, %c0_i32_0, %c0_i32_1 : i32, i32, i32
  }
  func.func @transform_2(%arg0: i32) -> (i32, i32) {
    %c0_i32 = arith.constant 0 : i32
    %c0_i32_0 = arith.constant 0 : i32
    %c0_i32_1 = arith.constant 0 : i32
    return %c0_i32, %c0_i32_0 : i32, i32
  }
  func.func @transform_3(%arg0: i32) -> (i32, i32, i32) {
    %c0_i32 = arith.constant 0 : i32
    %c0_i32_0 = arith.constant 0 : i32
    %c0_i32_1 = arith.constant 0 : i32
    return %arg0, %c0_i32, %c0_i32_0 : i32, i32, i32
  }
}

module attributes {stable_mosaic.version = 11 : i64} {
  func.func @_deconv_kernel(%arg0: i32, %arg1: memref<1x16x256xbf16, #tpu.memory_space<vmem>>, %arg2: memref<32x64xbf16, #tpu.memory_space<vmem>>, %arg3: memref<1x128xf32, #tpu.memory_space<vmem>>, %arg4: memref<1x4x8x128xbf16, #tpu.memory_space<vmem>>, %arg5: memref<64x128xbf16, #tpu.memory_space<vmem>>) attributes {dimension_semantics = [#tpu.dimension_semantics<parallel>], iteration_bounds = array<i64: 2>, scalar_prefetch = 0 : i64, scratch_operands = 1 : i64, tpu.core_type = #tpu.core_type<tc>, window_params = [{transform_indices = @transform_0, window_bounds = array<i64: 1, 16, 256>}, {pipeline_mode = #tpu.pipeline_mode<synchronous>, transform_indices = @transform_1, window_bounds = array<i64: 32, 64>}, {pipeline_mode = #tpu.pipeline_mode<synchronous>, transform_indices = @transform_2, window_bounds = array<i64: 1, 128>}, {transform_indices = @transform_3, window_bounds = array<i64: 1, 4, 8, 128>}]} {
    %c0 = arith.constant 0 : index
    %c0_0 = arith.constant 0 : index
    %c0_1 = arith.constant 0 : index
    %0 = vector.load %arg1[%c0, %c0_0, %c0_1] : memref<1x16x256xbf16, #tpu.memory_space<vmem>>, vector<1x16x128xbf16>
    %1 = vector.shape_cast %0 : vector<1x16x128xbf16> to vector<16x128xbf16>
    %c0_2 = arith.constant 0 : index
    %c0_3 = arith.constant 0 : index
    %2 = vector.load %arg5[%c0_2, %c0_3] : memref<64x128xbf16, #tpu.memory_space<vmem>>, vector<16x128xbf16>
    tpu.vector_store %arg5[%c0_2, %c0_3], %1 {strides = array<i32>} : memref<64x128xbf16, #tpu.memory_space<vmem>>, vector<16x128xbf16>,
    %c0_4 = arith.constant 0 : index
    %c0_5 = arith.constant 0 : index
    %c1 = arith.constant 1 : index
    %3 = vector.load %arg1[%c0_4, %c0_5, %c1] : memref<1x16x256xbf16, #tpu.memory_space<vmem>>, vector<1x16x128xbf16>
    %4 = vector.shape_cast %3 : vector<1x16x128xbf16> to vector<16x128xbf16>
    %c16 = arith.constant 16 : index
    %c0_6 = arith.constant 0 : index
    %5 = vector.load %arg5[%c16, %c0_6] : memref<64x128xbf16, #tpu.memory_space<vmem>>, vector<16x128xbf16>
    tpu.vector_store %arg5[%c16, %c0_6], %4 {strides = array<i32>} : memref<64x128xbf16, #tpu.memory_space<vmem>>, vector<16x128xbf16>,
    %c0_7 = arith.constant 0 : index
    %c0_8 = arith.constant 0 : index
    %c9 = arith.constant 9 : index
    %6 = vector.load %arg1[%c0_7, %c0_8, %c9] : memref<1x16x256xbf16, #tpu.memory_space<vmem>>, vector<1x16x128xbf16>
    %7 = vector.shape_cast %6 : vector<1x16x128xbf16> to vector<16x128xbf16>
    %c32 = arith.constant 32 : index
    %c0_9 = arith.constant 0 : index
    %8 = vector.load %arg5[%c32, %c0_9] : memref<64x128xbf16, #tpu.memory_space<vmem>>, vector<16x128xbf16>
    tpu.vector_store %arg5[%c32, %c0_9], %7 {strides = array<i32>} : memref<64x128xbf16, #tpu.memory_space<vmem>>, vector<16x128xbf16>,
    %c0_10 = arith.constant 0 : index
    %c0_11 = arith.constant 0 : index
    %c10 = arith.constant 10 : index
    %9 = vector.load %arg1[%c0_10, %c0_11, %c10] : memref<1x16x256xbf16, #tpu.memory_space<vmem>>, vector<1x16x128xbf16>
    %10 = vector.shape_cast %9 : vector<1x16x128xbf16> to vector<16x128xbf16>
    %c48 = arith.constant 48 : index
    %c0_12 = arith.constant 0 : index
    %11 = vector.load %arg5[%c48, %c0_12] : memref<64x128xbf16, #tpu.memory_space<vmem>>, vector<16x128xbf16>
    tpu.vector_store %arg5[%c48, %c0_12], %10 {strides = array<i32>} : memref<64x128xbf16, #tpu.memory_space<vmem>>, vector<16x128xbf16>,
    %c0_13 = arith.constant 0 : index
    %c0_14 = arith.constant 0 : index
    %12 = vector.load %arg2[%c0_13, %c0_14] : memref<32x64xbf16, #tpu.memory_space<vmem>>, vector<32x64xbf16>
    %c0_15 = arith.constant 0 : index
    %c0_16 = arith.constant 0 : index
    %13 = vector.load %arg5[%c0_15, %c0_16] : memref<64x128xbf16, #tpu.memory_space<vmem>>, vector<64x128xbf16>
    %cst = arith.constant dense<0.000000e+00> : vector<32x128xf32>
    %14 = tpu.matmul %12, %13, %cst {dimension_numbers = #tpu.dot_dimension_numbers<[1], [0], [0], [1], [0, 0, 1, 1], [], []>} : vector<32x64xbf16>, vector<64x128xbf16>, vector<32x128xf32> -> vector<32x128xf32>
    %c0_17 = arith.constant 0 : index
    %c0_18 = arith.constant 0 : index
    %15 = vector.load %arg3[%c0_17, %c0_18] : memref<1x128xf32, #tpu.memory_space<vmem>>, vector<1x128xf32>
    %16 = vector.extract_strided_slice %14 {offsets = [0, 0], sizes = [8, 128], strides = [1, 1]} : vector<32x128xf32> to vector<8x128xf32>
    %17 = vector.extract_strided_slice %14 {offsets = [8, 0], sizes = [8, 128], strides = [1, 1]} : vector<32x128xf32> to vector<8x128xf32>
    %18 = vector.extract_strided_slice %14 {offsets = [16, 0], sizes = [8, 128], strides = [1, 1]} : vector<32x128xf32> to vector<8x128xf32>
    %19 = vector.extract_strided_slice %14 {offsets = [24, 0], sizes = [8, 128], strides = [1, 1]} : vector<32x128xf32> to vector<8x128xf32>
    %20 = vector.broadcast %15 : vector<1x128xf32> to vector<8x128xf32>
    %21 = arith.mulf %16, %20 : vector<8x128xf32>
    %cst_19 = arith.constant dense<0.000000e+00> : vector<8xf32>
    %22 = vector.multi_reduction <add>, %21, %cst_19 [1] : vector<8x128xf32> to vector<8xf32>
    %23 = vector.shape_cast %22 : vector<8xf32> to vector<8x1xf32>
    %cst_20 = arith.constant 0.000000e+00 : f32
    %24 = vector.broadcast %cst_20 : f32 to vector<8x1xf32>
    %25 = arith.addf %24, %23 : vector<8x1xf32>
    %26 = vector.broadcast %15 : vector<1x128xf32> to vector<8x128xf32>
    %27 = arith.mulf %17, %26 : vector<8x128xf32>
    %cst_21 = arith.constant dense<0.000000e+00> : vector<8xf32>
    %28 = vector.multi_reduction <add>, %27, %cst_21 [1] : vector<8x128xf32> to vector<8xf32>
    %29 = vector.shape_cast %28 : vector<8xf32> to vector<8x1xf32>
    %30 = arith.addf %25, %29 : vector<8x1xf32>
    %31 = vector.broadcast %15 : vector<1x128xf32> to vector<8x128xf32>
    %32 = arith.mulf %18, %31 : vector<8x128xf32>
    %cst_22 = arith.constant dense<0.000000e+00> : vector<8xf32>
    %33 = vector.multi_reduction <add>, %32, %cst_22 [1] : vector<8x128xf32> to vector<8xf32>
    %34 = vector.shape_cast %33 : vector<8xf32> to vector<8x1xf32>
    %35 = arith.addf %30, %34 : vector<8x1xf32>
    %36 = vector.broadcast %15 : vector<1x128xf32> to vector<8x128xf32>
    %37 = arith.mulf %19, %36 : vector<8x128xf32>
    %cst_23 = arith.constant dense<0.000000e+00> : vector<8xf32>
    %38 = vector.multi_reduction <add>, %37, %cst_23 [1] : vector<8x128xf32> to vector<8xf32>
    %39 = vector.shape_cast %38 : vector<8xf32> to vector<8x1xf32>
    %40 = arith.addf %35, %39 : vector<8x1xf32>
    %cst_24 = arith.constant 3.906250e-03 : f32
    %41 = vector.broadcast %cst_24 : f32 to vector<8x1xf32>
    %42 = arith.mulf %40, %41 : vector<8x1xf32>
    %43 = vector.broadcast %42 : vector<8x1xf32> to vector<8x128xf32>
    %44 = arith.subf %16, %43 : vector<8x128xf32>
    %45 = vector.broadcast %15 : vector<1x128xf32> to vector<8x128xf32>
    %46 = arith.mulf %44, %45 : vector<8x128xf32>
    %47 = vector.broadcast %42 : vector<8x1xf32> to vector<8x128xf32>
    %48 = arith.subf %17, %47 : vector<8x128xf32>
    %49 = vector.broadcast %15 : vector<1x128xf32> to vector<8x128xf32>
    %50 = arith.mulf %48, %49 : vector<8x128xf32>
    %51 = vector.broadcast %42 : vector<8x1xf32> to vector<8x128xf32>
    %52 = arith.subf %18, %51 : vector<8x128xf32>
    %53 = vector.broadcast %15 : vector<1x128xf32> to vector<8x128xf32>
    %54 = arith.mulf %52, %53 : vector<8x128xf32>
    %55 = vector.broadcast %42 : vector<8x1xf32> to vector<8x128xf32>
    %56 = arith.subf %19, %55 : vector<8x128xf32>
    %57 = vector.broadcast %15 : vector<1x128xf32> to vector<8x128xf32>
    %58 = arith.mulf %56, %57 : vector<8x128xf32>
    %59 = arith.mulf %46, %46 : vector<8x128xf32>
    %cst_25 = arith.constant dense<0.000000e+00> : vector<8xf32>
    %60 = vector.multi_reduction <add>, %59, %cst_25 [1] : vector<8x128xf32> to vector<8xf32>
    %61 = vector.shape_cast %60 : vector<8xf32> to vector<8x1xf32>
    %cst_26 = arith.constant 0.000000e+00 : f32
    %62 = vector.broadcast %cst_26 : f32 to vector<8x1xf32>
    %63 = arith.addf %62, %61 : vector<8x1xf32>
    %64 = arith.mulf %50, %50 : vector<8x128xf32>
    %cst_27 = arith.constant dense<0.000000e+00> : vector<8xf32>
    %65 = vector.multi_reduction <add>, %64, %cst_27 [1] : vector<8x128xf32> to vector<8xf32>
    %66 = vector.shape_cast %65 : vector<8xf32> to vector<8x1xf32>
    %67 = arith.addf %63, %66 : vector<8x1xf32>
    %68 = arith.mulf %54, %54 : vector<8x128xf32>
    %cst_28 = arith.constant dense<0.000000e+00> : vector<8xf32>
    %69 = vector.multi_reduction <add>, %68, %cst_28 [1] : vector<8x128xf32> to vector<8xf32>
    %70 = vector.shape_cast %69 : vector<8xf32> to vector<8x1xf32>
    %71 = arith.addf %67, %70 : vector<8x1xf32>
    %72 = arith.mulf %58, %58 : vector<8x128xf32>
    %cst_29 = arith.constant dense<0.000000e+00> : vector<8xf32>
    %73 = vector.multi_reduction <add>, %72, %cst_29 [1] : vector<8x128xf32> to vector<8xf32>
    %74 = vector.shape_cast %73 : vector<8xf32> to vector<8x1xf32>
    %75 = arith.addf %71, %74 : vector<8x1xf32>
    %cst_30 = arith.constant 3.906250e-03 : f32
    %76 = vector.broadcast %cst_30 : f32 to vector<8x1xf32>
    %77 = arith.mulf %75, %76 : vector<8x1xf32>
    %cst_31 = arith.constant 9.99999974E-6 : f32
    %78 = vector.broadcast %cst_31 : f32 to vector<8x1xf32>
    %79 = arith.addf %77, %78 : vector<8x1xf32>
    %80 = math.rsqrt %79 : vector<8x1xf32>
    %81 = vector.broadcast %80 : vector<8x1xf32> to vector<8x128xf32>
    %82 = arith.mulf %46, %81 : vector<8x128xf32>
    %cst_32 = arith.constant 0.000000e+00 : f32
    %83 = vector.broadcast %cst_32 : f32 to vector<8x128xf32>
    %84 = arith.maximumf %82, %83 : vector<8x128xf32>
    %85 = arith.truncf %84 : vector<8x128xf32> to vector<8x128xbf16>
    %c0_33 = arith.constant 0 : index
    %c0_34 = arith.constant 0 : index
    %c0_35 = arith.constant 0 : index
    %c0_36 = arith.constant 0 : index
    %86 = vector.load %arg4[%c0_33, %c0_34, %c0_35, %c0_36] : memref<1x4x8x128xbf16, #tpu.memory_space<vmem>>, vector<1x1x8x128xbf16>
    %87 = vector.shape_cast %86 : vector<1x1x8x128xbf16> to vector<8x128xbf16>
    %88 = vector.shape_cast %85 : vector<8x128xbf16> to vector<1x1x8x128xbf16>
    tpu.vector_store %arg4[%c0_33, %c0_34, %c0_35, %c0_36], %88 {strides = array<i32>} : memref<1x4x8x128xbf16, #tpu.memory_space<vmem>>, vector<1x1x8x128xbf16>,
    %89 = vector.broadcast %80 : vector<8x1xf32> to vector<8x128xf32>
    %90 = arith.mulf %50, %89 : vector<8x128xf32>
    %cst_37 = arith.constant 0.000000e+00 : f32
    %91 = vector.broadcast %cst_37 : f32 to vector<8x128xf32>
    %92 = arith.maximumf %90, %91 : vector<8x128xf32>
    %93 = arith.truncf %92 : vector<8x128xf32> to vector<8x128xbf16>
    %c0_38 = arith.constant 0 : index
    %c1_39 = arith.constant 1 : index
    %c0_40 = arith.constant 0 : index
    %c0_41 = arith.constant 0 : index
    %94 = vector.load %arg4[%c0_38, %c1_39, %c0_40, %c0_41] : memref<1x4x8x128xbf16, #tpu.memory_space<vmem>>, vector<1x1x8x128xbf16>
    %95 = vector.shape_cast %94 : vector<1x1x8x128xbf16> to vector<8x128xbf16>
    %96 = vector.shape_cast %93 : vector<8x128xbf16> to vector<1x1x8x128xbf16>
    tpu.vector_store %arg4[%c0_38, %c1_39, %c0_40, %c0_41], %96 {strides = array<i32>} : memref<1x4x8x128xbf16, #tpu.memory_space<vmem>>, vector<1x1x8x128xbf16>,
    %97 = vector.broadcast %80 : vector<8x1xf32> to vector<8x128xf32>
    %98 = arith.mulf %54, %97 : vector<8x128xf32>
    %cst_42 = arith.constant 0.000000e+00 : f32
    %99 = vector.broadcast %cst_42 : f32 to vector<8x128xf32>
    %100 = arith.maximumf %98, %99 : vector<8x128xf32>
    %101 = arith.truncf %100 : vector<8x128xf32> to vector<8x128xbf16>
    %c0_43 = arith.constant 0 : index
    %c2 = arith.constant 2 : index
    %c0_44 = arith.constant 0 : index
    %c0_45 = arith.constant 0 : index
    %102 = vector.load %arg4[%c0_43, %c2, %c0_44, %c0_45] : memref<1x4x8x128xbf16, #tpu.memory_space<vmem>>, vector<1x1x8x128xbf16>
    %103 = vector.shape_cast %102 : vector<1x1x8x128xbf16> to vector<8x128xbf16>
    %104 = vector.shape_cast %101 : vector<8x128xbf16> to vector<1x1x8x128xbf16>
    tpu.vector_store %arg4[%c0_43, %c2, %c0_44, %c0_45], %104 {strides = array<i32>} : memref<1x4x8x128xbf16, #tpu.memory_space<vmem>>, vector<1x1x8x128xbf16>,
    %105 = vector.broadcast %80 : vector<8x1xf32> to vector<8x128xf32>
    %106 = arith.mulf %58, %105 : vector<8x128xf32>
    %cst_46 = arith.constant 0.000000e+00 : f32
    %107 = vector.broadcast %cst_46 : f32 to vector<8x128xf32>
    %108 = arith.maximumf %106, %107 : vector<8x128xf32>
    %109 = arith.truncf %108 : vector<8x128xf32> to vector<8x128xbf16>
    %c0_47 = arith.constant 0 : index
    %c3 = arith.constant 3 : index
    %c0_48 = arith.constant 0 : index
    %c0_49 = arith.constant 0 : index
    %110 = vector.load %arg4[%c0_47, %c3, %c0_48, %c0_49] : memref<1x4x8x128xbf16, #tpu.memory_space<vmem>>, vector<1x1x8x128xbf16>
    %111 = vector.shape_cast %110 : vector<1x1x8x128xbf16> to vector<8x128xbf16>
    %112 = vector.shape_cast %109 : vector<8x128xbf16> to vector<1x1x8x128xbf16>
    tpu.vector_store %arg4[%c0_47, %c3, %c0_48, %c0_49], %112 {strides = array<i32>} : memref<1x4x8x128xbf16, #tpu.memory_space<vmem>>, vector<1x1x8x128xbf16>,
    return
  }
  func.func @transform_0(%arg0: i32) -> (i32, i32, i32) {
    %c0_i32 = arith.constant 0 : i32
    %c0_i32_0 = arith.constant 0 : i32
    %c0_i32_1 = arith.constant 0 : i32
    return %arg0, %c0_i32, %c0_i32_0 : i32, i32, i32
  }
  func.func @transform_1(%arg0: i32) -> (i32, i32) {
    %c0_i32 = arith.constant 0 : i32
    %c0_i32_0 = arith.constant 0 : i32
    %c0_i32_1 = arith.constant 0 : i32
    return %c0_i32, %c0_i32_0 : i32, i32
  }
  func.func @transform_2(%arg0: i32) -> (i32, i32) {
    %c0_i32 = arith.constant 0 : i32
    %c0_i32_0 = arith.constant 0 : i32
    %c0_i32_1 = arith.constant 0 : i32
    return %c0_i32, %c0_i32_0 : i32, i32
  }
  func.func @transform_3(%arg0: i32) -> (i32, i32, i32, i32) {
    %c0_i32 = arith.constant 0 : i32
    %c0_i32_0 = arith.constant 0 : i32
    %c0_i32_1 = arith.constant 0 : i32
    %c0_i32_2 = arith.constant 0 : i32
    return %arg0, %c0_i32, %c0_i32_0, %c0_i32_1 : i32, i32, i32, i32
  }
}

module attributes {stable_mosaic.version = 11 : i64} {
  func.func @_conv_kernel(%arg0: i32, %arg1: memref<1x16x640xbf16, #tpu.memory_space<vmem>>, %arg2: memref<3x784xbf16, #tpu.memory_space<vmem>>, %arg3: memref<1x384xf32, #tpu.memory_space<vmem>>, %arg4: memref<1x3x384xf32, #tpu.memory_space<vmem>>, %arg5: memref<784x384xbf16, #tpu.memory_space<vmem>>) attributes {dimension_semantics = [#tpu.dimension_semantics<parallel>], iteration_bounds = array<i64: 2>, scalar_prefetch = 0 : i64, scratch_operands = 1 : i64, tpu.core_type = #tpu.core_type<tc>, window_params = [{transform_indices = @transform_0, window_bounds = array<i64: 1, 16, 640>}, {pipeline_mode = #tpu.pipeline_mode<synchronous>, transform_indices = @transform_1, window_bounds = array<i64: 3, 784>}, {pipeline_mode = #tpu.pipeline_mode<synchronous>, transform_indices = @transform_2, window_bounds = array<i64: 1, 384>}, {transform_indices = @transform_3, window_bounds = array<i64: 1, 3, 384>}]} {
    %c0 = arith.constant 0 : index
    %c0_0 = arith.constant 0 : index
    %c0_1 = arith.constant 0 : index
    %0 = vector.load %arg1[%c0, %c0_0, %c0_1] : memref<1x16x640xbf16, #tpu.memory_space<vmem>>, vector<1x16x384xbf16>
    %1 = vector.shape_cast %0 : vector<1x16x384xbf16> to vector<16x384xbf16>
    %c0_2 = arith.constant 0 : index
    %c0_3 = arith.constant 0 : index
    %2 = vector.load %arg5[%c0_2, %c0_3] : memref<784x384xbf16, #tpu.memory_space<vmem>>, vector<16x384xbf16>
    tpu.vector_store %arg5[%c0_2, %c0_3], %1 {strides = array<i32>} : memref<784x384xbf16, #tpu.memory_space<vmem>>, vector<16x384xbf16>,
    %c0_4 = arith.constant 0 : index
    %c0_5 = arith.constant 0 : index
    %c1 = arith.constant 1 : index
    %3 = vector.load %arg1[%c0_4, %c0_5, %c1] : memref<1x16x640xbf16, #tpu.memory_space<vmem>>, vector<1x16x384xbf16>
    %4 = vector.shape_cast %3 : vector<1x16x384xbf16> to vector<16x384xbf16>
    %c16 = arith.constant 16 : index
    %c0_6 = arith.constant 0 : index
    %5 = vector.load %arg5[%c16, %c0_6] : memref<784x384xbf16, #tpu.memory_space<vmem>>, vector<16x384xbf16>
    tpu.vector_store %arg5[%c16, %c0_6], %4 {strides = array<i32>} : memref<784x384xbf16, #tpu.memory_space<vmem>>, vector<16x384xbf16>,
    %c0_7 = arith.constant 0 : index
    %c0_8 = arith.constant 0 : index
    %c2 = arith.constant 2 : index
    %6 = vector.load %arg1[%c0_7, %c0_8, %c2] : memref<1x16x640xbf16, #tpu.memory_space<vmem>>, vector<1x16x384xbf16>
    %7 = vector.shape_cast %6 : vector<1x16x384xbf16> to vector<16x384xbf16>
    %c32 = arith.constant 32 : index
    %c0_9 = arith.constant 0 : index
    %8 = vector.load %arg5[%c32, %c0_9] : memref<784x384xbf16, #tpu.memory_space<vmem>>, vector<16x384xbf16>
    tpu.vector_store %arg5[%c32, %c0_9], %7 {strides = array<i32>} : memref<784x384xbf16, #tpu.memory_space<vmem>>, vector<16x384xbf16>,
    %c0_10 = arith.constant 0 : index
    %c0_11 = arith.constant 0 : index
    %c3 = arith.constant 3 : index
    %9 = vector.load %arg1[%c0_10, %c0_11, %c3] : memref<1x16x640xbf16, #tpu.memory_space<vmem>>, vector<1x16x384xbf16>
    %10 = vector.shape_cast %9 : vector<1x16x384xbf16> to vector<16x384xbf16>
    %c48 = arith.constant 48 : index
    %c0_12 = arith.constant 0 : index
    %11 = vector.load %arg5[%c48, %c0_12] : memref<784x384xbf16, #tpu.memory_space<vmem>>, vector<16x384xbf16>
    tpu.vector_store %arg5[%c48, %c0_12], %10 {strides = array<i32>} : memref<784x384xbf16, #tpu.memory_space<vmem>>, vector<16x384xbf16>,
    %c0_13 = arith.constant 0 : index
    %c0_14 = arith.constant 0 : index
    %c4 = arith.constant 4 : index
    %12 = vector.load %arg1[%c0_13, %c0_14, %c4] : memref<1x16x640xbf16, #tpu.memory_space<vmem>>, vector<1x16x384xbf16>
    %13 = vector.shape_cast %12 : vector<1x16x384xbf16> to vector<16x384xbf16>
    %c64 = arith.constant 64 : index
    %c0_15 = arith.constant 0 : index
    %14 = vector.load %arg5[%c64, %c0_15] : memref<784x384xbf16, #tpu.memory_space<vmem>>, vector<16x384xbf16>
    tpu.vector_store %arg5[%c64, %c0_15], %13 {strides = array<i32>} : memref<784x384xbf16, #tpu.memory_space<vmem>>, vector<16x384xbf16>,
    %c0_16 = arith.constant 0 : index
    %c0_17 = arith.constant 0 : index
    %c5 = arith.constant 5 : index
    %15 = vector.load %arg1[%c0_16, %c0_17, %c5] : memref<1x16x640xbf16, #tpu.memory_space<vmem>>, vector<1x16x384xbf16>
    %16 = vector.shape_cast %15 : vector<1x16x384xbf16> to vector<16x384xbf16>
    %c80 = arith.constant 80 : index
    %c0_18 = arith.constant 0 : index
    %17 = vector.load %arg5[%c80, %c0_18] : memref<784x384xbf16, #tpu.memory_space<vmem>>, vector<16x384xbf16>
    tpu.vector_store %arg5[%c80, %c0_18], %16 {strides = array<i32>} : memref<784x384xbf16, #tpu.memory_space<vmem>>, vector<16x384xbf16>,
    %c0_19 = arith.constant 0 : index
    %c0_20 = arith.constant 0 : index
    %c6 = arith.constant 6 : index
    %18 = vector.load %arg1[%c0_19, %c0_20, %c6] : memref<1x16x640xbf16, #tpu.memory_space<vmem>>, vector<1x16x384xbf16>
    %19 = vector.shape_cast %18 : vector<1x16x384xbf16> to vector<16x384xbf16>
    %c96 = arith.constant 96 : index
    %c0_21 = arith.constant 0 : index
    %20 = vector.load %arg5[%c96, %c0_21] : memref<784x384xbf16, #tpu.memory_space<vmem>>, vector<16x384xbf16>
    tpu.vector_store %arg5[%c96, %c0_21], %19 {strides = array<i32>} : memref<784x384xbf16, #tpu.memory_space<vmem>>, vector<16x384xbf16>,
    %c0_22 = arith.constant 0 : index
    %c0_23 = arith.constant 0 : index
    %c22 = arith.constant 22 : index
    %21 = vector.load %arg1[%c0_22, %c0_23, %c22] : memref<1x16x640xbf16, #tpu.memory_space<vmem>>, vector<1x16x384xbf16>
    %22 = vector.shape_cast %21 : vector<1x16x384xbf16> to vector<16x384xbf16>
    %c112 = arith.constant 112 : index
    %c0_24 = arith.constant 0 : index
    %23 = vector.load %arg5[%c112, %c0_24] : memref<784x384xbf16, #tpu.memory_space<vmem>>, vector<16x384xbf16>
    tpu.vector_store %arg5[%c112, %c0_24], %22 {strides = array<i32>} : memref<784x384xbf16, #tpu.memory_space<vmem>>, vector<16x384xbf16>,
    %c0_25 = arith.constant 0 : index
    %c0_26 = arith.constant 0 : index
    %c23 = arith.constant 23 : index
    %24 = vector.load %arg1[%c0_25, %c0_26, %c23] : memref<1x16x640xbf16, #tpu.memory_space<vmem>>, vector<1x16x384xbf16>
    %25 = vector.shape_cast %24 : vector<1x16x384xbf16> to vector<16x384xbf16>
    %c128 = arith.constant 128 : index
    %c0_27 = arith.constant 0 : index
    %26 = vector.load %arg5[%c128, %c0_27] : memref<784x384xbf16, #tpu.memory_space<vmem>>, vector<16x384xbf16>
    tpu.vector_store %arg5[%c128, %c0_27], %25 {strides = array<i32>} : memref<784x384xbf16, #tpu.memory_space<vmem>>, vector<16x384xbf16>,
    %c0_28 = arith.constant 0 : index
    %c0_29 = arith.constant 0 : index
    %c24 = arith.constant 24 : index
    %27 = vector.load %arg1[%c0_28, %c0_29, %c24] : memref<1x16x640xbf16, #tpu.memory_space<vmem>>, vector<1x16x384xbf16>
    %28 = vector.shape_cast %27 : vector<1x16x384xbf16> to vector<16x384xbf16>
    %c144 = arith.constant 144 : index
    %c0_30 = arith.constant 0 : index
    %29 = vector.load %arg5[%c144, %c0_30] : memref<784x384xbf16, #tpu.memory_space<vmem>>, vector<16x384xbf16>
    tpu.vector_store %arg5[%c144, %c0_30], %28 {strides = array<i32>} : memref<784x384xbf16, #tpu.memory_space<vmem>>, vector<16x384xbf16>,
    %c0_31 = arith.constant 0 : index
    %c0_32 = arith.constant 0 : index
    %c25 = arith.constant 25 : index
    %30 = vector.load %arg1[%c0_31, %c0_32, %c25] : memref<1x16x640xbf16, #tpu.memory_space<vmem>>, vector<1x16x384xbf16>
    %31 = vector.shape_cast %30 : vector<1x16x384xbf16> to vector<16x384xbf16>
    %c160 = arith.constant 160 : index
    %c0_33 = arith.constant 0 : index
    %32 = vector.load %arg5[%c160, %c0_33] : memref<784x384xbf16, #tpu.memory_space<vmem>>, vector<16x384xbf16>
    tpu.vector_store %arg5[%c160, %c0_33], %31 {strides = array<i32>} : memref<784x384xbf16, #tpu.memory_space<vmem>>, vector<16x384xbf16>,
    %c0_34 = arith.constant 0 : index
    %c0_35 = arith.constant 0 : index
    %c26 = arith.constant 26 : index
    %33 = vector.load %arg1[%c0_34, %c0_35, %c26] : memref<1x16x640xbf16, #tpu.memory_space<vmem>>, vector<1x16x384xbf16>
    %34 = vector.shape_cast %33 : vector<1x16x384xbf16> to vector<16x384xbf16>
    %c176 = arith.constant 176 : index
    %c0_36 = arith.constant 0 : index
    %35 = vector.load %arg5[%c176, %c0_36] : memref<784x384xbf16, #tpu.memory_space<vmem>>, vector<16x384xbf16>
    tpu.vector_store %arg5[%c176, %c0_36], %34 {strides = array<i32>} : memref<784x384xbf16, #tpu.memory_space<vmem>>, vector<16x384xbf16>,
    %c0_37 = arith.constant 0 : index
    %c0_38 = arith.constant 0 : index
    %c27 = arith.constant 27 : index
    %36 = vector.load %arg1[%c0_37, %c0_38, %c27] : memref<1x16x640xbf16, #tpu.memory_space<vmem>>, vector<1x16x384xbf16>
    %37 = vector.shape_cast %36 : vector<1x16x384xbf16> to vector<16x384xbf16>
    %c192 = arith.constant 192 : index
    %c0_39 = arith.constant 0 : index
    %38 = vector.load %arg5[%c192, %c0_39] : memref<784x384xbf16, #tpu.memory_space<vmem>>, vector<16x384xbf16>
    tpu.vector_store %arg5[%c192, %c0_39], %37 {strides = array<i32>} : memref<784x384xbf16, #tpu.memory_space<vmem>>, vector<16x384xbf16>,
    %c0_40 = arith.constant 0 : index
    %c0_41 = arith.constant 0 : index
    %c28 = arith.constant 28 : index
    %39 = vector.load %arg1[%c0_40, %c0_41, %c28] : memref<1x16x640xbf16, #tpu.memory_space<vmem>>, vector<1x16x384xbf16>
    %40 = vector.shape_cast %39 : vector<1x16x384xbf16> to vector<16x384xbf16>
    %c208 = arith.constant 208 : index
    %c0_42 = arith.constant 0 : index
    %41 = vector.load %arg5[%c208, %c0_42] : memref<784x384xbf16, #tpu.memory_space<vmem>>, vector<16x384xbf16>
    tpu.vector_store %arg5[%c208, %c0_42], %40 {strides = array<i32>} : memref<784x384xbf16, #tpu.memory_space<vmem>>, vector<16x384xbf16>,
    %c0_43 = arith.constant 0 : index
    %c0_44 = arith.constant 0 : index
    %c44 = arith.constant 44 : index
    %42 = vector.load %arg1[%c0_43, %c0_44, %c44] : memref<1x16x640xbf16, #tpu.memory_space<vmem>>, vector<1x16x384xbf16>
    %43 = vector.shape_cast %42 : vector<1x16x384xbf16> to vector<16x384xbf16>
    %c224 = arith.constant 224 : index
    %c0_45 = arith.constant 0 : index
    %44 = vector.load %arg5[%c224, %c0_45] : memref<784x384xbf16, #tpu.memory_space<vmem>>, vector<16x384xbf16>
    tpu.vector_store %arg5[%c224, %c0_45], %43 {strides = array<i32>} : memref<784x384xbf16, #tpu.memory_space<vmem>>, vector<16x384xbf16>,
    %c0_46 = arith.constant 0 : index
    %c0_47 = arith.constant 0 : index
    %c45 = arith.constant 45 : index
    %45 = vector.load %arg1[%c0_46, %c0_47, %c45] : memref<1x16x640xbf16, #tpu.memory_space<vmem>>, vector<1x16x384xbf16>
    %46 = vector.shape_cast %45 : vector<1x16x384xbf16> to vector<16x384xbf16>
    %c240 = arith.constant 240 : index
    %c0_48 = arith.constant 0 : index
    %47 = vector.load %arg5[%c240, %c0_48] : memref<784x384xbf16, #tpu.memory_space<vmem>>, vector<16x384xbf16>
    tpu.vector_store %arg5[%c240, %c0_48], %46 {strides = array<i32>} : memref<784x384xbf16, #tpu.memory_space<vmem>>, vector<16x384xbf16>,
    %c0_49 = arith.constant 0 : index
    %c0_50 = arith.constant 0 : index
    %c46 = arith.constant 46 : index
    %48 = vector.load %arg1[%c0_49, %c0_50, %c46] : memref<1x16x640xbf16, #tpu.memory_space<vmem>>, vector<1x16x384xbf16>
    %49 = vector.shape_cast %48 : vector<1x16x384xbf16> to vector<16x384xbf16>
    %c256 = arith.constant 256 : index
    %c0_51 = arith.constant 0 : index
    %50 = vector.load %arg5[%c256, %c0_51] : memref<784x384xbf16, #tpu.memory_space<vmem>>, vector<16x384xbf16>
    tpu.vector_store %arg5[%c256, %c0_51], %49 {strides = array<i32>} : memref<784x384xbf16, #tpu.memory_space<vmem>>, vector<16x384xbf16>,
    %c0_52 = arith.constant 0 : index
    %c0_53 = arith.constant 0 : index
    %c47 = arith.constant 47 : index
    %51 = vector.load %arg1[%c0_52, %c0_53, %c47] : memref<1x16x640xbf16, #tpu.memory_space<vmem>>, vector<1x16x384xbf16>
    %52 = vector.shape_cast %51 : vector<1x16x384xbf16> to vector<16x384xbf16>
    %c272 = arith.constant 272 : index
    %c0_54 = arith.constant 0 : index
    %53 = vector.load %arg5[%c272, %c0_54] : memref<784x384xbf16, #tpu.memory_space<vmem>>, vector<16x384xbf16>
    tpu.vector_store %arg5[%c272, %c0_54], %52 {strides = array<i32>} : memref<784x384xbf16, #tpu.memory_space<vmem>>, vector<16x384xbf16>,
    %c0_55 = arith.constant 0 : index
    %c0_56 = arith.constant 0 : index
    %c48_57 = arith.constant 48 : index
    %54 = vector.load %arg1[%c0_55, %c0_56, %c48_57] : memref<1x16x640xbf16, #tpu.memory_space<vmem>>, vector<1x16x384xbf16>
    %55 = vector.shape_cast %54 : vector<1x16x384xbf16> to vector<16x384xbf16>
    %c288 = arith.constant 288 : index
    %c0_58 = arith.constant 0 : index
    %56 = vector.load %arg5[%c288, %c0_58] : memref<784x384xbf16, #tpu.memory_space<vmem>>, vector<16x384xbf16>
    tpu.vector_store %arg5[%c288, %c0_58], %55 {strides = array<i32>} : memref<784x384xbf16, #tpu.memory_space<vmem>>, vector<16x384xbf16>,
    %c0_59 = arith.constant 0 : index
    %c0_60 = arith.constant 0 : index
    %c49 = arith.constant 49 : index
    %57 = vector.load %arg1[%c0_59, %c0_60, %c49] : memref<1x16x640xbf16, #tpu.memory_space<vmem>>, vector<1x16x384xbf16>
    %58 = vector.shape_cast %57 : vector<1x16x384xbf16> to vector<16x384xbf16>
    %c304 = arith.constant 304 : index
    %c0_61 = arith.constant 0 : index
    %59 = vector.load %arg5[%c304, %c0_61] : memref<784x384xbf16, #tpu.memory_space<vmem>>, vector<16x384xbf16>
    tpu.vector_store %arg5[%c304, %c0_61], %58 {strides = array<i32>} : memref<784x384xbf16, #tpu.memory_space<vmem>>, vector<16x384xbf16>,
    %c0_62 = arith.constant 0 : index
    %c0_63 = arith.constant 0 : index
    %c50 = arith.constant 50 : index
    %60 = vector.load %arg1[%c0_62, %c0_63, %c50] : memref<1x16x640xbf16, #tpu.memory_space<vmem>>, vector<1x16x384xbf16>
    %61 = vector.shape_cast %60 : vector<1x16x384xbf16> to vector<16x384xbf16>
    %c320 = arith.constant 320 : index
    %c0_64 = arith.constant 0 : index
    %62 = vector.load %arg5[%c320, %c0_64] : memref<784x384xbf16, #tpu.memory_space<vmem>>, vector<16x384xbf16>
    tpu.vector_store %arg5[%c320, %c0_64], %61 {strides = array<i32>} : memref<784x384xbf16, #tpu.memory_space<vmem>>, vector<16x384xbf16>,
    %c0_65 = arith.constant 0 : index
    %c0_66 = arith.constant 0 : index
    %c66 = arith.constant 66 : index
    %63 = vector.load %arg1[%c0_65, %c0_66, %c66] : memref<1x16x640xbf16, #tpu.memory_space<vmem>>, vector<1x16x384xbf16>
    %64 = vector.shape_cast %63 : vector<1x16x384xbf16> to vector<16x384xbf16>
    %c336 = arith.constant 336 : index
    %c0_67 = arith.constant 0 : index
    %65 = vector.load %arg5[%c336, %c0_67] : memref<784x384xbf16, #tpu.memory_space<vmem>>, vector<16x384xbf16>
    tpu.vector_store %arg5[%c336, %c0_67], %64 {strides = array<i32>} : memref<784x384xbf16, #tpu.memory_space<vmem>>, vector<16x384xbf16>,
    %c0_68 = arith.constant 0 : index
    %c0_69 = arith.constant 0 : index
    %c67 = arith.constant 67 : index
    %66 = vector.load %arg1[%c0_68, %c0_69, %c67] : memref<1x16x640xbf16, #tpu.memory_space<vmem>>, vector<1x16x384xbf16>
    %67 = vector.shape_cast %66 : vector<1x16x384xbf16> to vector<16x384xbf16>
    %c352 = arith.constant 352 : index
    %c0_70 = arith.constant 0 : index
    %68 = vector.load %arg5[%c352, %c0_70] : memref<784x384xbf16, #tpu.memory_space<vmem>>, vector<16x384xbf16>
    tpu.vector_store %arg5[%c352, %c0_70], %67 {strides = array<i32>} : memref<784x384xbf16, #tpu.memory_space<vmem>>, vector<16x384xbf16>,
    %c0_71 = arith.constant 0 : index
    %c0_72 = arith.constant 0 : index
    %c68 = arith.constant 68 : index
    %69 = vector.load %arg1[%c0_71, %c0_72, %c68] : memref<1x16x640xbf16, #tpu.memory_space<vmem>>, vector<1x16x384xbf16>
    %70 = vector.shape_cast %69 : vector<1x16x384xbf16> to vector<16x384xbf16>
    %c368 = arith.constant 368 : index
    %c0_73 = arith.constant 0 : index
    %71 = vector.load %arg5[%c368, %c0_73] : memref<784x384xbf16, #tpu.memory_space<vmem>>, vector<16x384xbf16>
    tpu.vector_store %arg5[%c368, %c0_73], %70 {strides = array<i32>} : memref<784x384xbf16, #tpu.memory_space<vmem>>, vector<16x384xbf16>,
    %c0_74 = arith.constant 0 : index
    %c0_75 = arith.constant 0 : index
    %c69 = arith.constant 69 : index
    %72 = vector.load %arg1[%c0_74, %c0_75, %c69] : memref<1x16x640xbf16, #tpu.memory_space<vmem>>, vector<1x16x384xbf16>
    %73 = vector.shape_cast %72 : vector<1x16x384xbf16> to vector<16x384xbf16>
    %c384 = arith.constant 384 : index
    %c0_76 = arith.constant 0 : index
    %74 = vector.load %arg5[%c384, %c0_76] : memref<784x384xbf16, #tpu.memory_space<vmem>>, vector<16x384xbf16>
    tpu.vector_store %arg5[%c384, %c0_76], %73 {strides = array<i32>} : memref<784x384xbf16, #tpu.memory_space<vmem>>, vector<16x384xbf16>,
    %c0_77 = arith.constant 0 : index
    %c0_78 = arith.constant 0 : index
    %c70 = arith.constant 70 : index
    %75 = vector.load %arg1[%c0_77, %c0_78, %c70] : memref<1x16x640xbf16, #tpu.memory_space<vmem>>, vector<1x16x384xbf16>
    %76 = vector.shape_cast %75 : vector<1x16x384xbf16> to vector<16x384xbf16>
    %c400 = arith.constant 400 : index
    %c0_79 = arith.constant 0 : index
    %77 = vector.load %arg5[%c400, %c0_79] : memref<784x384xbf16, #tpu.memory_space<vmem>>, vector<16x384xbf16>
    tpu.vector_store %arg5[%c400, %c0_79], %76 {strides = array<i32>} : memref<784x384xbf16, #tpu.memory_space<vmem>>, vector<16x384xbf16>,
    %c0_80 = arith.constant 0 : index
    %c0_81 = arith.constant 0 : index
    %c71 = arith.constant 71 : index
    %78 = vector.load %arg1[%c0_80, %c0_81, %c71] : memref<1x16x640xbf16, #tpu.memory_space<vmem>>, vector<1x16x384xbf16>
    %79 = vector.shape_cast %78 : vector<1x16x384xbf16> to vector<16x384xbf16>
    %c416 = arith.constant 416 : index
    %c0_82 = arith.constant 0 : index
    %80 = vector.load %arg5[%c416, %c0_82] : memref<784x384xbf16, #tpu.memory_space<vmem>>, vector<16x384xbf16>
    tpu.vector_store %arg5[%c416, %c0_82], %79 {strides = array<i32>} : memref<784x384xbf16, #tpu.memory_space<vmem>>, vector<16x384xbf16>,
    %c0_83 = arith.constant 0 : index
    %c0_84 = arith.constant 0 : index
    %c72 = arith.constant 72 : index
    %81 = vector.load %arg1[%c0_83, %c0_84, %c72] : memref<1x16x640xbf16, #tpu.memory_space<vmem>>, vector<1x16x384xbf16>
    %82 = vector.shape_cast %81 : vector<1x16x384xbf16> to vector<16x384xbf16>
    %c432 = arith.constant 432 : index
    %c0_85 = arith.constant 0 : index
    %83 = vector.load %arg5[%c432, %c0_85] : memref<784x384xbf16, #tpu.memory_space<vmem>>, vector<16x384xbf16>
    tpu.vector_store %arg5[%c432, %c0_85], %82 {strides = array<i32>} : memref<784x384xbf16, #tpu.memory_space<vmem>>, vector<16x384xbf16>,
    %c0_86 = arith.constant 0 : index
    %c0_87 = arith.constant 0 : index
    %c88 = arith.constant 88 : index
    %84 = vector.load %arg1[%c0_86, %c0_87, %c88] : memref<1x16x640xbf16, #tpu.memory_space<vmem>>, vector<1x16x384xbf16>
    %85 = vector.shape_cast %84 : vector<1x16x384xbf16> to vector<16x384xbf16>
    %c448 = arith.constant 448 : index
    %c0_88 = arith.constant 0 : index
    %86 = vector.load %arg5[%c448, %c0_88] : memref<784x384xbf16, #tpu.memory_space<vmem>>, vector<16x384xbf16>
    tpu.vector_store %arg5[%c448, %c0_88], %85 {strides = array<i32>} : memref<784x384xbf16, #tpu.memory_space<vmem>>, vector<16x384xbf16>,
    %c0_89 = arith.constant 0 : index
    %c0_90 = arith.constant 0 : index
    %c89 = arith.constant 89 : index
    %87 = vector.load %arg1[%c0_89, %c0_90, %c89] : memref<1x16x640xbf16, #tpu.memory_space<vmem>>, vector<1x16x384xbf16>
    %88 = vector.shape_cast %87 : vector<1x16x384xbf16> to vector<16x384xbf16>
    %c464 = arith.constant 464 : index
    %c0_91 = arith.constant 0 : index
    %89 = vector.load %arg5[%c464, %c0_91] : memref<784x384xbf16, #tpu.memory_space<vmem>>, vector<16x384xbf16>
    tpu.vector_store %arg5[%c464, %c0_91], %88 {strides = array<i32>} : memref<784x384xbf16, #tpu.memory_space<vmem>>, vector<16x384xbf16>,
    %c0_92 = arith.constant 0 : index
    %c0_93 = arith.constant 0 : index
    %c90 = arith.constant 90 : index
    %90 = vector.load %arg1[%c0_92, %c0_93, %c90] : memref<1x16x640xbf16, #tpu.memory_space<vmem>>, vector<1x16x384xbf16>
    %91 = vector.shape_cast %90 : vector<1x16x384xbf16> to vector<16x384xbf16>
    %c480 = arith.constant 480 : index
    %c0_94 = arith.constant 0 : index
    %92 = vector.load %arg5[%c480, %c0_94] : memref<784x384xbf16, #tpu.memory_space<vmem>>, vector<16x384xbf16>
    tpu.vector_store %arg5[%c480, %c0_94], %91 {strides = array<i32>} : memref<784x384xbf16, #tpu.memory_space<vmem>>, vector<16x384xbf16>,
    %c0_95 = arith.constant 0 : index
    %c0_96 = arith.constant 0 : index
    %c91 = arith.constant 91 : index
    %93 = vector.load %arg1[%c0_95, %c0_96, %c91] : memref<1x16x640xbf16, #tpu.memory_space<vmem>>, vector<1x16x384xbf16>
    %94 = vector.shape_cast %93 : vector<1x16x384xbf16> to vector<16x384xbf16>
    %c496 = arith.constant 496 : index
    %c0_97 = arith.constant 0 : index
    %95 = vector.load %arg5[%c496, %c0_97] : memref<784x384xbf16, #tpu.memory_space<vmem>>, vector<16x384xbf16>
    tpu.vector_store %arg5[%c496, %c0_97], %94 {strides = array<i32>} : memref<784x384xbf16, #tpu.memory_space<vmem>>, vector<16x384xbf16>,
    %c0_98 = arith.constant 0 : index
    %c0_99 = arith.constant 0 : index
    %c92 = arith.constant 92 : index
    %96 = vector.load %arg1[%c0_98, %c0_99, %c92] : memref<1x16x640xbf16, #tpu.memory_space<vmem>>, vector<1x16x384xbf16>
    %97 = vector.shape_cast %96 : vector<1x16x384xbf16> to vector<16x384xbf16>
    %c512 = arith.constant 512 : index
    %c0_100 = arith.constant 0 : index
    %98 = vector.load %arg5[%c512, %c0_100] : memref<784x384xbf16, #tpu.memory_space<vmem>>, vector<16x384xbf16>
    tpu.vector_store %arg5[%c512, %c0_100], %97 {strides = array<i32>} : memref<784x384xbf16, #tpu.memory_space<vmem>>, vector<16x384xbf16>,
    %c0_101 = arith.constant 0 : index
    %c0_102 = arith.constant 0 : index
    %c93 = arith.constant 93 : index
    %99 = vector.load %arg1[%c0_101, %c0_102, %c93] : memref<1x16x640xbf16, #tpu.memory_space<vmem>>, vector<1x16x384xbf16>
    %100 = vector.shape_cast %99 : vector<1x16x384xbf16> to vector<16x384xbf16>
    %c528 = arith.constant 528 : index
    %c0_103 = arith.constant 0 : index
    %101 = vector.load %arg5[%c528, %c0_103] : memref<784x384xbf16, #tpu.memory_space<vmem>>, vector<16x384xbf16>
    tpu.vector_store %arg5[%c528, %c0_103], %100 {strides = array<i32>} : memref<784x384xbf16, #tpu.memory_space<vmem>>, vector<16x384xbf16>,
    %c0_104 = arith.constant 0 : index
    %c0_105 = arith.constant 0 : index
    %c94 = arith.constant 94 : index
    %102 = vector.load %arg1[%c0_104, %c0_105, %c94] : memref<1x16x640xbf16, #tpu.memory_space<vmem>>, vector<1x16x384xbf16>
    %103 = vector.shape_cast %102 : vector<1x16x384xbf16> to vector<16x384xbf16>
    %c544 = arith.constant 544 : index
    %c0_106 = arith.constant 0 : index
    %104 = vector.load %arg5[%c544, %c0_106] : memref<784x384xbf16, #tpu.memory_space<vmem>>, vector<16x384xbf16>
    tpu.vector_store %arg5[%c544, %c0_106], %103 {strides = array<i32>} : memref<784x384xbf16, #tpu.memory_space<vmem>>, vector<16x384xbf16>,
    %c0_107 = arith.constant 0 : index
    %c0_108 = arith.constant 0 : index
    %c110 = arith.constant 110 : index
    %105 = vector.load %arg1[%c0_107, %c0_108, %c110] : memref<1x16x640xbf16, #tpu.memory_space<vmem>>, vector<1x16x384xbf16>
    %106 = vector.shape_cast %105 : vector<1x16x384xbf16> to vector<16x384xbf16>
    %c560 = arith.constant 560 : index
    %c0_109 = arith.constant 0 : index
    %107 = vector.load %arg5[%c560, %c0_109] : memref<784x384xbf16, #tpu.memory_space<vmem>>, vector<16x384xbf16>
    tpu.vector_store %arg5[%c560, %c0_109], %106 {strides = array<i32>} : memref<784x384xbf16, #tpu.memory_space<vmem>>, vector<16x384xbf16>,
    %c0_110 = arith.constant 0 : index
    %c0_111 = arith.constant 0 : index
    %c111 = arith.constant 111 : index
    %108 = vector.load %arg1[%c0_110, %c0_111, %c111] : memref<1x16x640xbf16, #tpu.memory_space<vmem>>, vector<1x16x384xbf16>
    %109 = vector.shape_cast %108 : vector<1x16x384xbf16> to vector<16x384xbf16>
    %c576 = arith.constant 576 : index
    %c0_112 = arith.constant 0 : index
    %110 = vector.load %arg5[%c576, %c0_112] : memref<784x384xbf16, #tpu.memory_space<vmem>>, vector<16x384xbf16>
    tpu.vector_store %arg5[%c576, %c0_112], %109 {strides = array<i32>} : memref<784x384xbf16, #tpu.memory_space<vmem>>, vector<16x384xbf16>,
    %c0_113 = arith.constant 0 : index
    %c0_114 = arith.constant 0 : index
    %c112_115 = arith.constant 112 : index
    %111 = vector.load %arg1[%c0_113, %c0_114, %c112_115] : memref<1x16x640xbf16, #tpu.memory_space<vmem>>, vector<1x16x384xbf16>
    %112 = vector.shape_cast %111 : vector<1x16x384xbf16> to vector<16x384xbf16>
    %c592 = arith.constant 592 : index
    %c0_116 = arith.constant 0 : index
    %113 = vector.load %arg5[%c592, %c0_116] : memref<784x384xbf16, #tpu.memory_space<vmem>>, vector<16x384xbf16>
    tpu.vector_store %arg5[%c592, %c0_116], %112 {strides = array<i32>} : memref<784x384xbf16, #tpu.memory_space<vmem>>, vector<16x384xbf16>,
    %c0_117 = arith.constant 0 : index
    %c0_118 = arith.constant 0 : index
    %c113 = arith.constant 113 : index
    %114 = vector.load %arg1[%c0_117, %c0_118, %c113] : memref<1x16x640xbf16, #tpu.memory_space<vmem>>, vector<1x16x384xbf16>
    %115 = vector.shape_cast %114 : vector<1x16x384xbf16> to vector<16x384xbf16>
    %c608 = arith.constant 608 : index
    %c0_119 = arith.constant 0 : index
    %116 = vector.load %arg5[%c608, %c0_119] : memref<784x384xbf16, #tpu.memory_space<vmem>>, vector<16x384xbf16>
    tpu.vector_store %arg5[%c608, %c0_119], %115 {strides = array<i32>} : memref<784x384xbf16, #tpu.memory_space<vmem>>, vector<16x384xbf16>,
    %c0_120 = arith.constant 0 : index
    %c0_121 = arith.constant 0 : index
    %c114 = arith.constant 114 : index
    %117 = vector.load %arg1[%c0_120, %c0_121, %c114] : memref<1x16x640xbf16, #tpu.memory_space<vmem>>, vector<1x16x384xbf16>
    %118 = vector.shape_cast %117 : vector<1x16x384xbf16> to vector<16x384xbf16>
    %c624 = arith.constant 624 : index
    %c0_122 = arith.constant 0 : index
    %119 = vector.load %arg5[%c624, %c0_122] : memref<784x384xbf16, #tpu.memory_space<vmem>>, vector<16x384xbf16>
    tpu.vector_store %arg5[%c624, %c0_122], %118 {strides = array<i32>} : memref<784x384xbf16, #tpu.memory_space<vmem>>, vector<16x384xbf16>,
    %c0_123 = arith.constant 0 : index
    %c0_124 = arith.constant 0 : index
    %c115 = arith.constant 115 : index
    %120 = vector.load %arg1[%c0_123, %c0_124, %c115] : memref<1x16x640xbf16, #tpu.memory_space<vmem>>, vector<1x16x384xbf16>
    %121 = vector.shape_cast %120 : vector<1x16x384xbf16> to vector<16x384xbf16>
    %c640 = arith.constant 640 : index
    %c0_125 = arith.constant 0 : index
    %122 = vector.load %arg5[%c640, %c0_125] : memref<784x384xbf16, #tpu.memory_space<vmem>>, vector<16x384xbf16>
    tpu.vector_store %arg5[%c640, %c0_125], %121 {strides = array<i32>} : memref<784x384xbf16, #tpu.memory_space<vmem>>, vector<16x384xbf16>,
    %c0_126 = arith.constant 0 : index
    %c0_127 = arith.constant 0 : index
    %c116 = arith.constant 116 : index
    %123 = vector.load %arg1[%c0_126, %c0_127, %c116] : memref<1x16x640xbf16, #tpu.memory_space<vmem>>, vector<1x16x384xbf16>
    %124 = vector.shape_cast %123 : vector<1x16x384xbf16> to vector<16x384xbf16>
    %c656 = arith.constant 656 : index
    %c0_128 = arith.constant 0 : index
    %125 = vector.load %arg5[%c656, %c0_128] : memref<784x384xbf16, #tpu.memory_space<vmem>>, vector<16x384xbf16>
    tpu.vector_store %arg5[%c656, %c0_128], %124 {strides = array<i32>} : memref<784x384xbf16, #tpu.memory_space<vmem>>, vector<16x384xbf16>,
    %c0_129 = arith.constant 0 : index
    %c0_130 = arith.constant 0 : index
    %c132 = arith.constant 132 : index
    %126 = vector.load %arg1[%c0_129, %c0_130, %c132] : memref<1x16x640xbf16, #tpu.memory_space<vmem>>, vector<1x16x384xbf16>
    %127 = vector.shape_cast %126 : vector<1x16x384xbf16> to vector<16x384xbf16>
    %c672 = arith.constant 672 : index
    %c0_131 = arith.constant 0 : index
    %128 = vector.load %arg5[%c672, %c0_131] : memref<784x384xbf16, #tpu.memory_space<vmem>>, vector<16x384xbf16>
    tpu.vector_store %arg5[%c672, %c0_131], %127 {strides = array<i32>} : memref<784x384xbf16, #tpu.memory_space<vmem>>, vector<16x384xbf16>,
    %c0_132 = arith.constant 0 : index
    %c0_133 = arith.constant 0 : index
    %c133 = arith.constant 133 : index
    %129 = vector.load %arg1[%c0_132, %c0_133, %c133] : memref<1x16x640xbf16, #tpu.memory_space<vmem>>, vector<1x16x384xbf16>
    %130 = vector.shape_cast %129 : vector<1x16x384xbf16> to vector<16x384xbf16>
    %c688 = arith.constant 688 : index
    %c0_134 = arith.constant 0 : index
    %131 = vector.load %arg5[%c688, %c0_134] : memref<784x384xbf16, #tpu.memory_space<vmem>>, vector<16x384xbf16>
    tpu.vector_store %arg5[%c688, %c0_134], %130 {strides = array<i32>} : memref<784x384xbf16, #tpu.memory_space<vmem>>, vector<16x384xbf16>,
    %c0_135 = arith.constant 0 : index
    %c0_136 = arith.constant 0 : index
    %c134 = arith.constant 134 : index
    %132 = vector.load %arg1[%c0_135, %c0_136, %c134] : memref<1x16x640xbf16, #tpu.memory_space<vmem>>, vector<1x16x384xbf16>
    %133 = vector.shape_cast %132 : vector<1x16x384xbf16> to vector<16x384xbf16>
    %c704 = arith.constant 704 : index
    %c0_137 = arith.constant 0 : index
    %134 = vector.load %arg5[%c704, %c0_137] : memref<784x384xbf16, #tpu.memory_space<vmem>>, vector<16x384xbf16>
    tpu.vector_store %arg5[%c704, %c0_137], %133 {strides = array<i32>} : memref<784x384xbf16, #tpu.memory_space<vmem>>, vector<16x384xbf16>,
    %c0_138 = arith.constant 0 : index
    %c0_139 = arith.constant 0 : index
    %c135 = arith.constant 135 : index
    %135 = vector.load %arg1[%c0_138, %c0_139, %c135] : memref<1x16x640xbf16, #tpu.memory_space<vmem>>, vector<1x16x384xbf16>
    %136 = vector.shape_cast %135 : vector<1x16x384xbf16> to vector<16x384xbf16>
    %c720 = arith.constant 720 : index
    %c0_140 = arith.constant 0 : index
    %137 = vector.load %arg5[%c720, %c0_140] : memref<784x384xbf16, #tpu.memory_space<vmem>>, vector<16x384xbf16>
    tpu.vector_store %arg5[%c720, %c0_140], %136 {strides = array<i32>} : memref<784x384xbf16, #tpu.memory_space<vmem>>, vector<16x384xbf16>,
    %c0_141 = arith.constant 0 : index
    %c0_142 = arith.constant 0 : index
    %c136 = arith.constant 136 : index
    %138 = vector.load %arg1[%c0_141, %c0_142, %c136] : memref<1x16x640xbf16, #tpu.memory_space<vmem>>, vector<1x16x384xbf16>
    %139 = vector.shape_cast %138 : vector<1x16x384xbf16> to vector<16x384xbf16>
    %c736 = arith.constant 736 : index
    %c0_143 = arith.constant 0 : index
    %140 = vector.load %arg5[%c736, %c0_143] : memref<784x384xbf16, #tpu.memory_space<vmem>>, vector<16x384xbf16>
    tpu.vector_store %arg5[%c736, %c0_143], %139 {strides = array<i32>} : memref<784x384xbf16, #tpu.memory_space<vmem>>, vector<16x384xbf16>,
    %c0_144 = arith.constant 0 : index
    %c0_145 = arith.constant 0 : index
    %c137 = arith.constant 137 : index
    %141 = vector.load %arg1[%c0_144, %c0_145, %c137] : memref<1x16x640xbf16, #tpu.memory_space<vmem>>, vector<1x16x384xbf16>
    %142 = vector.shape_cast %141 : vector<1x16x384xbf16> to vector<16x384xbf16>
    %c752 = arith.constant 752 : index
    %c0_146 = arith.constant 0 : index
    %143 = vector.load %arg5[%c752, %c0_146] : memref<784x384xbf16, #tpu.memory_space<vmem>>, vector<16x384xbf16>
    tpu.vector_store %arg5[%c752, %c0_146], %142 {strides = array<i32>} : memref<784x384xbf16, #tpu.memory_space<vmem>>, vector<16x384xbf16>,
    %c0_147 = arith.constant 0 : index
    %c0_148 = arith.constant 0 : index
    %c138 = arith.constant 138 : index
    %144 = vector.load %arg1[%c0_147, %c0_148, %c138] : memref<1x16x640xbf16, #tpu.memory_space<vmem>>, vector<1x16x384xbf16>
    %145 = vector.shape_cast %144 : vector<1x16x384xbf16> to vector<16x384xbf16>
    %c768 = arith.constant 768 : index
    %c0_149 = arith.constant 0 : index
    %146 = vector.load %arg5[%c768, %c0_149] : memref<784x384xbf16, #tpu.memory_space<vmem>>, vector<16x384xbf16>
    tpu.vector_store %arg5[%c768, %c0_149], %145 {strides = array<i32>} : memref<784x384xbf16, #tpu.memory_space<vmem>>, vector<16x384xbf16>,
    %c0_150 = arith.constant 0 : index
    %c0_151 = arith.constant 0 : index
    %147 = vector.load %arg2[%c0_150, %c0_151] : memref<3x784xbf16, #tpu.memory_space<vmem>>, vector<3x784xbf16>
    %c0_152 = arith.constant 0 : index
    %c0_153 = arith.constant 0 : index
    %148 = vector.load %arg5[%c0_152, %c0_153] : memref<784x384xbf16, #tpu.memory_space<vmem>>, vector<784x384xbf16>
    %cst = arith.constant dense<0.000000e+00> : vector<3x384xf32>
    %149 = tpu.matmul %147, %148, %cst {dimension_numbers = #tpu.dot_dimension_numbers<[1], [0], [0], [1], [0, 0, 1, 1], [], []>} : vector<3x784xbf16>, vector<784x384xbf16>, vector<3x384xf32> -> vector<3x384xf32>
    %150 = math.tanh %149 : vector<3x384xf32>
    %c0_154 = arith.constant 0 : index
    %c0_155 = arith.constant 0 : index
    %c0_156 = arith.constant 0 : index
    %151 = vector.load %arg4[%c0_154, %c0_155, %c0_156] : memref<1x3x384xf32, #tpu.memory_space<vmem>>, vector<1x3x384xf32>
    %152 = vector.shape_cast %151 : vector<1x3x384xf32> to vector<3x384xf32>
    %153 = vector.shape_cast %150 : vector<3x384xf32> to vector<1x3x384xf32>
    tpu.vector_store %arg4[%c0_154, %c0_155, %c0_156], %153 {strides = array<i32>} : memref<1x3x384xf32, #tpu.memory_space<vmem>>, vector<1x3x384xf32>,
    return
  }
  func.func @transform_0(%arg0: i32) -> (i32, i32, i32) {
    %c0_i32 = arith.constant 0 : i32
    %c0_i32_0 = arith.constant 0 : i32
    %c0_i32_1 = arith.constant 0 : i32
    return %arg0, %c0_i32, %c0_i32_0 : i32, i32, i32
  }
  func.func @transform_1(%arg0: i32) -> (i32, i32) {
    %c0_i32 = arith.constant 0 : i32
    %c0_i32_0 = arith.constant 0 : i32
    %c0_i32_1 = arith.constant 0 : i32
    return %c0_i32, %c0_i32_0 : i32, i32
  }
  func.func @transform_2(%arg0: i32) -> (i32, i32) {
    %c0_i32 = arith.constant 0 : i32
    %c0_i32_0 = arith.constant 0 : i32
    %c0_i32_1 = arith.constant 0 : i32
    return %c0_i32, %c0_i32_0 : i32, i32
  }
  func.func @transform_3(%arg0: i32) -> (i32, i32, i32) {
    %c0_i32 = arith.constant 0 : i32
    %c0_i32_0 = arith.constant 0 : i32
    %c0_i32_1 = arith.constant 0 : i32
    return %arg0, %c0_i32, %c0_i32_0 : i32, i32, i32
  }
}

</mosaic_0001>

<bundles_post_ra>
// kernel: cycle_generator_forward.8
= control target key start
LH: loop header
LB: loop body
LE: loop exit
PB: predicated region body
PF: predicated region fallthrough
CT: control target
= control target key end

     0   :  { %s578_s12 = smov 0   ;;  %s605_s0 = inlined_call_operand.vmem [shape: bf16[2,32,256], index: 0, kind: input, shape index: {}]   ;;  %s606_s1 = inlined_call_operand.vmem [shape: bf16[16,128], index: 1, kind: input, shape index: {}]   ;;  %s607_s2 = inlined_call_operand.vmem [shape: f32[1,128], index: 2, kind: input, shape index: {}]   ;;  %s608_s3 = inlined_call_operand.vmem [shape: bf16[2,16,128], index: 3, kind: output, shape index: {}]  }
   0x1 LB: > { %s452_s13 = sadd.s32 4294967295, %s551_s12   ;;  %p456_p0 = scmp.ge.s32.totalorder %s551_s12, 1  ;;  %s551_s12 = sphi %s578_s12, %s13_s12  }
   0x2   : > { %p137_p1 = scmp.lt.s32.totalorder %s551_s12, 3 }
   0x4   : > { %p138_p2 = pnand %p456_p0, %p137_p1 }
   0x5   : > { %p161_p3 = scmp.lt.s32.totalorder (!%p138_p2), %s452_s13, 1  ;;  %v553_v0 = vmov (!%p138_p2), 0.0   ;;  %s554_s18 = smov (!%p138_p2), 127   ;;  %vm556_vm0 = vmmov (!%p138_p2), 0   ;;  %vm218_vm1 = vcmask (!%p138_p2), 1039360   ;;  %vm253_vm2 = vcmask (!%p138_p2), 973824  }
   0x6   : > { %141 = sbr.rel (%p138_p2) target bundleno = 692 (0x2b4), region = 32  ;;  %499 = vmatprep.subr.bf16.mxu0 (!%p138_p2), %v553_v0  ;;  %s555_s19 = smov (!%p138_p2), 119   ;;  %515 = vmatprep.mubr.msk.bf16.mxu0 (!%p138_p2), %vm556_vm0, %v553_v0  ;;  %vm288_vm3 = vcmask (!%p138_p2), 965632   ;;  %v540_v25 = vld [vmem:[%s606_s1] sm:$0xff] (!%p138_p2)  }
   0x7   : > { %s557_s20 = smov (!%p138_p2), 118   ;;  %v476_v26 = vld [vmem:[%s607_s2] ss:$0 sm:$0xff] (!%p138_p2) }
   0xd   : > { %s610_s13 = smov (!%p161_p3, %s452_s13), 1 }
   0xe   : > { %s481_s14 = sshll.u32 %s610_s13, 5  ;;  %s482_s25 = sshll.u32 %s610_s13, 3 }
   0xf   : > { %s165_s17 = scalar_lea.vmem %s605_s0, %s481_s14  ;;  %s170_s28 = scalar_lea.vmem %s608_s3, %s482_s25 }
  0x10   : > { %v532_v1 = vld [vmem:[%s165_s17 + $0x10] ss:$8 sps:$4 sm:$0xff]   ;;  %v534_v2 = vld [vmem:[%s165_s17 + $0x14] ss:$8 sps:$4 sm:$0xff]   ;;  %v535_v3 = vld [vmem:[%s165_s17] ss:$8 sps:$4 sm:$0xff]  }
  0x11   : > { %214 = vrot.lane.b32.xlu1 %v532_v1, %s554_s18  ;;  %v538_v4 = vld [vmem:[%s165_s17] ss:$8 sps:$4 sm:$0xff]   ;;  %v537_v5 = vld [vmem:[%s165_s17 + $0x4] ss:$8 sps:$4 sm:$0xff]   ;;  %210 = vrot.lane.b32.xlu0 %v535_v3, %s554_s18 }
  0x12   : > { %500 = vmatpush3.bf16.msra.mxu0 %v538_v4  ;;  %v539_v6 = vld [vmem:[%s165_s17 + $0x10] ss:$8 sps:$4 sm:$0xff]  }
  0x13   : > { %501 = vmatprep.subr.bf16.mxu0 %v553_v0 }
  0x15   : > { %216 = vrot.lane.b32.xlu1 %v534_v2, %s554_s18  ;;  %212 = vrot.lane.b32.xlu0 %v537_v5, %s554_s18 }
  0x16   : > { %502 = vmatpush3.bf16.msra.mxu0 %v539_v6 }
  0x17   : > { %503 = vmatprep.subr.bf16.mxu0 %v553_v0 }
  0x19   : > { %247 = vrot.lane.b32.xlu1 %v537_v5, %s555_s19  ;;  %245 = vrot.lane.b32.xlu0 %v535_v3, %s555_s19 }
  0x1d   : > { %251 = vrot.lane.b32.xlu1 %v534_v2, %s555_s19  ;;  %249 = vrot.lane.b32.xlu0 %v532_v1, %s555_s19 }
  0x21   : > { %282 = vrot.lane.b32.xlu1 %v537_v5, %s557_s20  ;;  %280 = vrot.lane.b32.xlu0 %v535_v3, %s557_s20 }
  0x25   : > { %286 = vrot.lane.b32.xlu1 %v534_v2, %s557_s20  ;;  %284 = vrot.lane.b32.xlu0 %v532_v1, %s557_s20 }
  0x83   : > { %v215_v7 = vpop.permute.xlu1 %214  ;;  %v211_v8 = vpop.permute.xlu0 %210 }
  0x87   : > { %v217_v9 = vpop.permute.xlu1 %216  ;;  %v213_v10 = vpop.permute.xlu0 %212 }
  0x88   : > { %v219_v11 = vsel %vm218_vm1, %v211_v8, %v213_v10  ;;  %v220_v14 = vsel %vm218_vm1, %v215_v7, %v217_v9 }
  0x89   : > { %504 = vmatpush3.bf16.msra.mxu0 %v219_v11 }
  0x8a   : > { %505 = vmatprep.subr.bf16.mxu0 %v553_v0 }
  0x8b   : > { %v248_v12 = vpop.permute.xlu1 %247  ;;  %v246_v13 = vpop.permute.xlu0 %245 }
  0x8c   : > { %v254_v16 = vsel %vm253_vm2, %v246_v13, %v248_v12 }
  0x8d   : > { %506 = vmatpush3.bf16.msra.mxu0 %v220_v14 }
  0x8e   : > { %507 = vmatprep.subr.bf16.mxu0 %v553_v0 }
  0x8f   : > { %v252_v15 = vpop.permute.xlu1 %251  ;;  %v250_v17 = vpop.permute.xlu0 %249 }
  0x90   : > { %v255_v19 = vsel %vm253_vm2, %v250_v17, %v252_v15 }
  0x91   : > { %508 = vmatpush3.bf16.msra.mxu0 %v254_v16 }
  0x92   : > { %509 = vmatprep.subr.bf16.mxu0 %v553_v0 }
  0x93   : > { %v283_v18 = vpop.permute.xlu1 %282  ;;  %v281_v20 = vpop.permute.xlu0 %280 }
  0x94   : > { %v289_v21 = vsel %vm288_vm3, %v281_v20, %v283_v18 }
  0x95   : > { %510 = vmatpush3.bf16.msra.mxu0 %v255_v19 }
  0x96   : > { %511 = vmatprep.subr.bf16.mxu0 %v553_v0 }
  0x97   : > { %v287_v22 = vpop.permute.xlu1 %286  ;;  %v285_v23 = vpop.permute.xlu0 %284 }
  0x98   : > { %v290_v24 = vsel %vm288_vm3, %v285_v23, %v287_v22 }
  0x99   : > { %512 = vmatpush3.bf16.msra.mxu0 %v289_v21 }
  0x9a   : > { %513 = vmatprep.subr.bf16.mxu0 %v553_v0 }
  0x9d   : > { %514 = vmatpush3.bf16.msra.mxu0 %v290_v24 }
  0xa0   : > { %516 = vmatmul.mubr.bf16.vlgmr.msra.gmra.mrb[0].mxu0 %v540_v25 }
 0x173   : > { %v345_v27 = vpop.f32.mrb[0].mxu0 }
 0x174   : > { %v517_v28 = vpop.f32.mrb[1].mxu0  ;;  %v359_v29 = vmul.f32 %v476_v26, %v345_v27 }
 0x175   : > { %v348_v30 = vpop.f32.mrb[2].mxu0 }
 0x176   : > { %361 = vadd.xlane.f32.xlu0 %v359_v29  ;;  %v518_v31 = vpop.f32.mrb[3].mxu0  ;;  %v360_v32 = vmul.f32 %v476_v26, %v348_v30 }
 0x178   : > { %363 = vadd.xlane.f32.xlu1 %v360_v32 }
 0x203   : > { %v362_v33 = vpop.xlane.xlu0 %361 }
 0x204   : > { %v365_v34 = vmul.f32 0.015625, %v362_v33 }
 0x205   : > { %v364_v35 = vpop.xlane.xlu1 %363 }
 0x206   : > { %v367_v36 = vsub.f32 %v345_v27, %v365_v34  ;;  %v366_v37 = vmul.f32 0.015625, %v364_v35 }
 0x208   : > { %v368_v38 = vsub.f32 %v348_v30, %v366_v37  ;;  %v369_v39 = vmul.f32 %v476_v26, %v367_v36 }
 0x20a   : > { %v371_v40 = vmul.f32 %v369_v39, %v369_v39  ;;  %v370_v41 = vmul.f32 %v476_v26, %v368_v38 }
 0x20c   : > { %373 = vadd.xlane.f32.xlu0 %v371_v40  ;;  %v372_v42 = vmul.f32 %v370_v41, %v370_v41 }
 0x210   : > { %375 = vadd.xlane.f32.xlu0 %v372_v42 }
 0x299   : > { %v374_v43 = vpop.xlane.xlu0 %373 }
 0x29a   : > { %v377_v44 = vmul.f32 0.015625, %v374_v43 }
 0x29c   : > { %v379_v45 = vadd.f32 1e-05, %v377_v44 }
 0x29d   : > { %v376_v46 = vpop.xlane.xlu0 %375 }
 0x29e   : > { %541 = vrsqrt.f32 %v379_v45  ;;  %v378_v47 = vmul.f32 0.015625, %v376_v46 }
 0x2a0   : > { %v380_v48 = vadd.f32 1e-05, %v378_v47 }
 0x2a2   : > { %543 = vrsqrt.f32 %v380_v48 }
 0x2a8   : > { %v542_v49 = vpop.eup %541 }
 0x2a9   : > { %v383_v50 = vmul.f32 %v542_v49, %v369_v39 }
 0x2ab   : > { %v385_v53 = vmax.f32 %v383_v50, 0.0 }
 0x2ac   : > { %v544_v51 = vpop.eup %543 }
 0x2ad   : > { %v384_v52 = vmul.f32 %v544_v51, %v370_v41 }
 0x2af   : > { %v386_v54 = vmax.f32 %v384_v52, 0.0 }
 0x2b1   : > { %v488_v55 = vpack.c.bf16 %v386_v54, %v385_v53 }
 0x2b3   : > { %489 = vst [vmem:[%s170_s28] sm:$0xff] %v488_v55  }
 0x2b4 PF: > { %s13_s12 = sadd.s32 1, %s551_s12  }
 0x2b5   : > { %p10_p4 = scmp.ge.s32.totalorder %s13_s12, 4  }
 0x2b7   :  { %12 = sbr.rel (!%p10_p4) target bundleno = 1 (0x1), region = 62 }

// kernel: cycle_generator_forward.7
= control target key start
LH: loop header
LB: loop body
LE: loop exit
PB: predicated region body
PF: predicated region fallthrough
CT: control target
= control target key end

     0   :  { %s3099_s12 = smov 0   ;;  %s3904_s0 = inlined_call_operand.vmem [shape: bf16[2,16,640], index: 0, kind: input, shape index: {}]   ;;  %s3905_s1 = inlined_call_operand.vmem [shape: bf16[8,784], index: 1, kind: input, shape index: {}]   ;;  %s3906_s2 = inlined_call_operand.vmem [shape: f32[1,384], index: 2, kind: input, shape index: {}]   ;;  %s3907_s3 = inlined_call_operand.vmem [shape: bf16[2,8,384], index: 3, kind: output, shape index: {}]  }
   0x1 LB: > { %s2636_s13 = sadd.s32 4294967295, %s3029_s12   ;;  %p2640_p0 = scmp.ge.s32.totalorder %s3029_s12, 1  ;;  %s3029_s12 = sphi %s3099_s12, %s13_s12  }
   0x2   : > { %p137_p1 = scmp.lt.s32.totalorder %s3029_s12, 3 }
   0x4   : > { %p138_p2 = pnand %p2640_p0, %p137_p1 }
   0x5   : > { %p161_p3 = scmp.lt.s32.totalorder (!%p138_p2), %s2636_s13, 1  ;;  %s3031_s18 = smov (!%p138_p2), 127   ;;  %vm223_vm0 = vcmask (!%p138_p2), 1039360   ;;  %vm261_vm1 = vcmask (!%p138_p2), 1031168   ;;  %vm299_vm2 = vcmask (!%p138_p2), 1022976   ;;  %vm337_vm3 = vcmask (!%p138_p2), 1014784  }
   0x6   : > { %141 = sbr.rel (%p138_p2) target bundleno = 1060 (0x424), region = 32  ;;  %s3032_s19 = smov (!%p138_p2), 126   ;;  %vm3922_vm4 = vcmask (!%p138_p2), 670720   ;;  %vm375_vm5 = vcmask (!%p138_p2), 1006592   ;;  %vm3919_vm6 = vcmask (!%p138_p2), 662528   ;;  %v3326_v40 = vld [vmem:[%s3905_s1] sm:$0xff] (!%p138_p2) }
   0x7   : > { %s3033_s20 = smov (!%p138_p2), 125   ;;  %s3034_s21 = smov (!%p138_p2), 124   ;;  %v3330_v41 = vcombine.high (!%p138_p2), %v3326_v40, %v3326_v40  ;;  %vm413_vm7 = vcmask (!%p138_p2), 998400   ;;  %vm3918_vm8 = vcmask (!%p138_p2), 654336   ;;  %vm3924_vm9 = vcmask (!%p138_p2), 867328  }
   0x8   : > { %s3035_s22 = smov (!%p138_p2), 82   ;;  %s3036_s23 = smov (!%p138_p2), 123   ;;  %vm3916_vm10 = vcmask (!%p138_p2), 646144   ;;  %vm489_vm11 = vcmask (!%p138_p2), 859136   ;;  %vm3914_vm12 = vcmask (!%p138_p2), 637952   ;;  %vm527_vm13 = vcmask (!%p138_p2), 850944  }
   0x9   : > { %s3037_s24 = smov (!%p138_p2), 81   ;;  %s3038_s25 = smov (!%p138_p2), 122   ;;  %2227 = vmatprep.mubr.bf16.mxu1 (!%p138_p2), %v3330_v41  ;;  %vm3913_vm14 = vcmask (!%p138_p2), 506880   ;;  %vm565_vm15 = vcmask (!%p138_p2), 842752  }
   0xa   : > { %s3039_s26 = smov (!%p138_p2), 80   ;;  %s3040_s27 = smov (!%p138_p2), 106  }
   0xb   : > { %s3912_s28 = smov (!%p138_p2), 79   ;;  %s3042_s29 = smov (!%p138_p2), 105  }
   0xc   : > { %s3911_s30 = smov (!%p138_p2), 78   ;;  %s3044_s4 = smov (!%p138_p2), 104  }
   0xd   : > { %s3947_s13 = smov (!%p161_p3, %s2636_s13), 1  ;;  %s3910_s5 = smov 62  }
   0xe   : > { %s2937_s14 = smul.u32 40, %s3947_s13  ;;  %s3046_s6 = smov 103  }
   0xf   : > { %s3909_s7 = smov 61   ;;  %s3048_s8 = smov 102  }
  0x10   : > { %s3113_s17 = scalar_lea.vmem %s3904_s0, %s2937_s14  ;;  %s3908_s9 = smov 60  }
  0x11   : > { %v195_v0 = vld [vmem:[%s3113_s17] sm:$0xff]  ;;  %v197_v1 = vld [vmem:[%s3113_s17 + $0x14] sm:$0xff]  ;;  %v3118_v2 = vld [vmem:[%s3113_s17 + $0x8] sm:$0xff]  ;;  %s3050_s10 = smov 101   ;;  %s3051_s11 = smov 59  }
  0x12   : > { %v3120_v3 = vcombine.high %v195_v0, %v197_v1  ;;  %v3122_v4 = vcombine.low %v195_v0, %v197_v1  ;;  %v3125_v5 = vld [vmem:[%s3113_s17 + $0x1c] sm:$0xff]  ;;  %s3052_s14 = smov 100   ;;  %s3053_s15 = smov 58  }
  0x13   : > { %v3133_v6 = vcombine.low %v3118_v2, %v3125_v5  ;;  %s3054_s16 = smov 84   ;;  %v3336_v45 = vcombine.high %v3118_v2, %v3125_v5 }
  0x14   : > { %217 = vrot.lane.b32.xlu0 %v3120_v3, %s3031_s18  ;;  %215 = vrot.lane.b32.xlu1 %v3122_v4, %s3031_s18 }
  0x15   : > { %2195 = vmatprep.subr.bf16.mxu1 %v3120_v3 }
  0x16   : > { %2196 = vmatpush1.bf16.msra.mxu1 %v3122_v4 }
  0x18   : > { %219 = vrot.lane.b32.xlu0 %v3133_v6, %s3031_s18  ;;  %255 = vrot.lane.b32.xlu1 %v3120_v3, %s3032_s19 }
  0x1c   : > { %257 = vrot.lane.b32.xlu0 %v3133_v6, %s3032_s19  ;;  %253 = vrot.lane.b32.xlu1 %v3122_v4, %s3032_s19 }
  0x20   : > { %293 = vrot.lane.b32.xlu0 %v3120_v3, %s3033_s20  ;;  %295 = vrot.lane.b32.xlu1 %v3133_v6, %s3033_s20 }
  0x24   : > { %291 = vrot.lane.b32.xlu0 %v3122_v4, %s3033_s20  ;;  %331 = vrot.lane.b32.xlu1 %v3120_v3, %s3034_s21 }
  0x28   : > { %333 = vrot.lane.b32.xlu0 %v3133_v6, %s3034_s21  ;;  %329 = vrot.lane.b32.xlu1 %v3122_v4, %s3034_s21 }
  0x2c   : > { %787 = vrot.lane.b32.xlu0 %v3120_v3, %s3035_s22  ;;  %789 = vrot.lane.b32.xlu1 %v3133_v6, %s3035_s22 }
  0x30   : > { %785 = vrot.lane.b32.xlu0 %v3122_v4, %s3035_s22  ;;  %369 = vrot.lane.b32.xlu1 %v3120_v3, %s3036_s23 }
  0x34   : > { %371 = vrot.lane.b32.xlu0 %v3133_v6, %s3036_s23  ;;  %367 = vrot.lane.b32.xlu1 %v3122_v4, %s3036_s23 }
  0x38   : > { %825 = vrot.lane.b32.xlu0 %v3120_v3, %s3037_s24  ;;  %827 = vrot.lane.b32.xlu1 %v3133_v6, %s3037_s24 }
  0x3c   : > { %823 = vrot.lane.b32.xlu0 %v3122_v4, %s3037_s24  ;;  %407 = vrot.lane.b32.xlu1 %v3120_v3, %s3038_s25 }
  0x40   : > { %409 = vrot.lane.b32.xlu0 %v3133_v6, %s3038_s25  ;;  %405 = vrot.lane.b32.xlu1 %v3122_v4, %s3038_s25 }
  0x44   : > { %863 = vrot.lane.b32.xlu0 %v3120_v3, %s3039_s26  ;;  %865 = vrot.lane.b32.xlu1 %v3133_v6, %s3039_s26 }
  0x48   : > { %861 = vrot.lane.b32.xlu0 %v3122_v4, %s3039_s26  ;;  %445 = vrot.lane.b32.xlu1 %v3120_v3, %s3040_s27 }
  0x4c   : > { %447 = vrot.lane.b32.xlu0 %v3133_v6, %s3040_s27  ;;  %443 = vrot.lane.b32.xlu1 %v3122_v4, %s3040_s27 }
  0x50   : > { %901 = vrot.lane.b32.xlu0 %v3120_v3, %s3912_s28  ;;  %903 = vrot.lane.b32.xlu1 %v3133_v6, %s3912_s28 }
  0x54   : > { %899 = vrot.lane.b32.xlu0 %v3122_v4, %s3912_s28  ;;  %483 = vrot.lane.b32.xlu1 %v3120_v3, %s3042_s29  ;;  %s3057_s28 = smov 56  }
  0x58   : > { %485 = vrot.lane.b32.xlu0 %v3133_v6, %s3042_s29  ;;  %481 = vrot.lane.b32.xlu1 %v3122_v4, %s3042_s29 }
  0x5c   : > { %939 = vrot.lane.b32.xlu0 %v3120_v3, %s3911_s30  ;;  %941 = vrot.lane.b32.xlu1 %v3133_v6, %s3911_s30 }
  0x60   : > { %937 = vrot.lane.b32.xlu0 %v3122_v4, %s3911_s30  ;;  %521 = vrot.lane.b32.xlu1 %v3120_v3, %s3044_s4  ;;  %s3058_s30 = smov 40  }
  0x64   : > { %523 = vrot.lane.b32.xlu0 %v3133_v6, %s3044_s4  ;;  %519 = vrot.lane.b32.xlu1 %v3122_v4, %s3044_s4 }
  0x68   : > { %977 = vrot.lane.b32.xlu0 %v3120_v3, %s3910_s5  ;;  %979 = vrot.lane.b32.xlu1 %v3133_v6, %s3910_s5 }
  0x6c   : > { %975 = vrot.lane.b32.xlu0 %v3122_v4, %s3910_s5  ;;  %559 = vrot.lane.b32.xlu1 %v3120_v3, %s3046_s6 }
  0x70   : > { %561 = vrot.lane.b32.xlu0 %v3133_v6, %s3046_s6  ;;  %557 = vrot.lane.b32.xlu1 %v3122_v4, %s3046_s6 }
  0x74   : > { %1015 = vrot.lane.b32.xlu0 %v3120_v3, %s3909_s7  ;;  %1017 = vrot.lane.b32.xlu1 %v3133_v6, %s3909_s7 }
  0x78   : > { %1013 = vrot.lane.b32.xlu0 %v3122_v4, %s3909_s7  ;;  %597 = vrot.lane.b32.xlu1 %v3120_v3, %s3048_s8  ;;  %s3056_s7 = smov 83  }
  0x7c   : > { %599 = vrot.lane.b32.xlu0 %v3133_v6, %s3048_s8  ;;  %595 = vrot.lane.b32.xlu1 %v3122_v4, %s3048_s8 }
  0x80   : > { %1053 = vrot.lane.b32.xlu0 %v3120_v3, %s3908_s9  ;;  %1055 = vrot.lane.b32.xlu1 %v3133_v6, %s3908_s9 }
  0x84   : > { %1051 = vrot.lane.b32.xlu0 %v3122_v4, %s3908_s9  ;;  %635 = vrot.lane.b32.xlu1 %v3120_v3, %s3050_s10  ;;  %s3055_s9 = smov 57  }
  0x86   : > { %v218_v7 = vpop.permute.xlu0 %217  ;;  %v216_v8 = vpop.permute.xlu1 %215 }
  0x87   : > { %v224_v12 = vsel %vm223_vm0, %v216_v8, %v218_v7 }
  0x88   : > { %637 = vrot.lane.b32.xlu0 %v3133_v6, %s3050_s10  ;;  %633 = vrot.lane.b32.xlu1 %v3122_v4, %s3050_s10 }
  0x8a   : > { %v3253_v9 = vpop.permute.xlu0 %219  ;;  %v256_v10 = vpop.permute.xlu1 %255 }
  0x8b   : > { %v225_v11 = vsel %vm223_vm0, %v218_v7, %v3253_v9 }
  0x8c   : > { %1091 = vrot.lane.b32.xlu0 %v3120_v3, %s3051_s11  ;;  %1093 = vrot.lane.b32.xlu1 %v3133_v6, %s3051_s11 }
  0x8d   : > { %2197 = vmatprep.subr.bf16.mxu1 %v225_v11 }
  0x8e   : > { %2198 = vmatpush1.bf16.msra.mxu1 %v224_v12  ;;  %v3262_v13 = vpop.permute.xlu0 %257  ;;  %v254_v14 = vpop.permute.xlu1 %253 }
  0x8f   : > { %v263_v15 = vsel %vm261_vm1, %v256_v10, %v3262_v13  ;;  %v262_v16 = vsel %vm261_vm1, %v254_v14, %v256_v10 }
  0x90   : > { %1089 = vrot.lane.b32.xlu0 %v3122_v4, %s3051_s11  ;;  %673 = vrot.lane.b32.xlu1 %v3120_v3, %s3052_s14 }
  0x91   : > { %2199 = vmatprep.subr.bf16.mxu1 %v263_v15 }
  0x92   : > { %2200 = vmatpush1.bf16.msra.mxu1 %v262_v16  ;;  %v294_v17 = vpop.permute.xlu0 %293  ;;  %v3271_v18 = vpop.permute.xlu1 %295 }
  0x93   : > { %v301_v19 = vsel %vm299_vm2, %v294_v17, %v3271_v18 }
  0x94   : > { %675 = vrot.lane.b32.xlu0 %v3133_v6, %s3052_s14  ;;  %671 = vrot.lane.b32.xlu1 %v3122_v4, %s3052_s14 }
  0x95   : > { %2201 = vmatprep.subr.bf16.mxu1 %v301_v19 }
  0x96   : > { %v292_v20 = vpop.permute.xlu0 %291  ;;  %v332_v21 = vpop.permute.xlu1 %331 }
  0x97   : > { %v300_v22 = vsel %vm299_vm2, %v292_v20, %v294_v17  ;;  %v3411_v17 = vld [vmem:[%s3905_s1 + $0x8] sm:$0xff] }
  0x98   : > { %1129 = vrot.lane.b32.xlu0 %v3120_v3, %s3053_s15  ;;  %1131 = vrot.lane.b32.xlu1 %v3133_v6, %s3053_s15 }
  0x99   : > { %2202 = vmatpush1.bf16.msra.mxu1 %v300_v22 }
  0x9a   : > { %v3284_v23 = vpop.permute.xlu0 %333  ;;  %v330_v24 = vpop.permute.xlu1 %329 }
  0x9b   : > { %v339_v25 = vsel %vm337_vm3, %v332_v21, %v3284_v23  ;;  %v338_v26 = vsel %vm337_vm3, %v330_v24, %v332_v21  ;;  %v3417_v21 = vcombine.high %v3411_v17, %v3411_v17 }
  0x9c   : > { %1127 = vrot.lane.b32.xlu0 %v3122_v4, %s3053_s15  ;;  %711 = vrot.lane.b32.xlu1 %v3120_v3, %s3054_s16 }
  0x9d   : > { %2203 = vmatprep.subr.bf16.mxu1 %v339_v25  ;;  %2268 = vmatprep.mubr.bf16.mxu0 %v3417_v21 }
  0x9e   : > { %2204 = vmatpush1.bf16.msra.mxu1 %v338_v26  ;;  %v788_v27 = vpop.permute.xlu0 %787  ;;  %v3293_v28 = vpop.permute.xlu1 %789 }
  0x9f   : > { %v795_v29 = vsel %vm3922_vm4, %v788_v27, %v3293_v28 }
  0xa0   : > { %713 = vrot.lane.b32.xlu0 %v3133_v6, %s3054_s16  ;;  %709 = vrot.lane.b32.xlu1 %v3122_v4, %s3054_s16 }
  0xa1   : > { %2236 = vmatprep.subr.bf16.mxu0 %v795_v29 }
  0xa2   : > { %v786_v30 = vpop.permute.xlu0 %785  ;;  %v370_v31 = vpop.permute.xlu1 %369 }
  0xa3   : > { %v794_v32 = vsel %vm3922_vm4, %v786_v30, %v788_v27  ;;  %vm755_vm4 = vcmask 678912  }
  0xa4   : > { %1167 = vrot.lane.b32.xlu0 %v3120_v3, %s3055_s9  ;;  %1169 = vrot.lane.b32.xlu1 %v3133_v6, %s3055_s9 }
  0xa5   : > { %2237 = vmatpush1.bf16.msra.mxu0 %v794_v32 }
  0xa6   : > { %v3306_v33 = vpop.permute.xlu0 %371  ;;  %v368_v34 = vpop.permute.xlu1 %367 }
  0xa7   : > { %v377_v35 = vsel %vm375_vm5, %v370_v31, %v3306_v33  ;;  %v376_v36 = vsel %vm375_vm5, %v368_v34, %v370_v31 }
  0xa8   : > { %1165 = vrot.lane.b32.xlu0 %v3122_v4, %s3055_s9  ;;  %749 = vrot.lane.b32.xlu1 %v3120_v3, %s3056_s7 }
  0xa9   : > { %2205 = vmatprep.subr.bf16.mxu1 %v377_v35 }
  0xaa   : > { %2206 = vmatpush1.bf16.msra.mxu1 %v376_v36  ;;  %v826_v37 = vpop.permute.xlu0 %825  ;;  %v3315_v38 = vpop.permute.xlu1 %827 }
  0xab   : > { %v833_v39 = vsel %vm3919_vm6, %v826_v37, %v3315_v38 }
  0xac   : > { %751 = vrot.lane.b32.xlu0 %v3133_v6, %s3056_s7  ;;  %747 = vrot.lane.b32.xlu1 %v3122_v4, %s3056_s7 }
  0xad   : > { %2238 = vmatprep.subr.bf16.mxu0 %v833_v39 }
  0xae   : > { %v824_v42 = vpop.permute.xlu0 %823  ;;  %v408_v43 = vpop.permute.xlu1 %407 }
  0xaf   : > { %v832_v44 = vsel %vm3919_vm6, %v824_v42, %v826_v37  ;;  %v3464_v42 = vld [vmem:[%s3113_s17] ss:$20 sps:$4 sm:$0xff]   ;;  %vm3921_vm6 = vcmask 474112  }
  0xb0   : > { %1205 = vrot.lane.b32.xlu0 %v3120_v3, %s3057_s28  ;;  %1207 = vrot.lane.b32.xlu1 %v3133_v6, %s3057_s28 }
  0xb1   : > { %2239 = vmatpush1.bf16.msra.mxu0 %v832_v44 }
  0xb2   : > { %v3342_v46 = vpop.permute.xlu0 %409  ;;  %v406_v47 = vpop.permute.xlu1 %405 }
  0xb3   : > { %v415_v48 = vsel %vm413_vm7, %v408_v43, %v3342_v46  ;;  %v414_v49 = vsel %vm413_vm7, %v406_v47, %v408_v43 }
  0xb4   : > { %1203 = vrot.lane.b32.xlu0 %v3122_v4, %s3057_s28  ;;  %487 = vrot.lane.b32.xlu1 %v3336_v45, %s3042_s29  ;;  %s3059_s29 = smov 39  }
  0xb5   : > { %2207 = vmatprep.subr.bf16.mxu1 %v415_v48 }
  0xb6   : > { %2208 = vmatpush1.bf16.msra.mxu1 %v414_v49  ;;  %v864_v50 = vpop.permute.xlu0 %863  ;;  %v3351_v51 = vpop.permute.xlu1 %865 }
  0xb7   : > { %v871_v52 = vsel %vm3918_vm8, %v864_v50, %v3351_v51 }
  0xb8   : > { %1243 = vrot.lane.b32.xlu0 %v3120_v3, %s3058_s30  ;;  %1245 = vrot.lane.b32.xlu1 %v3133_v6, %s3058_s30 }
  0xb9   : > { %2240 = vmatprep.subr.bf16.mxu0 %v871_v52 }
  0xba   : > { %v862_v53 = vpop.permute.xlu0 %861  ;;  %v446_v54 = vpop.permute.xlu1 %445 }
  0xbb   : > { %v870_v55 = vsel %vm3918_vm8, %v862_v53, %v864_v50  ;;  %vm679_vm8 = vcmask 818176  }
  0xbc   : > { %1241 = vrot.lane.b32.xlu0 %v3122_v4, %s3058_s30  ;;  %525 = vrot.lane.b32.xlu1 %v3336_v45, %s3044_s4 }
  0xbd   : > { %2241 = vmatpush1.bf16.msra.mxu0 %v870_v55 }
  0xbe   : > { %v3364_v56 = vpop.permute.xlu0 %447  ;;  %v444_v57 = vpop.permute.xlu1 %443 }
  0xbf   : > { %v453_v58 = vsel %vm3924_vm9, %v446_v54, %v3364_v56  ;;  %v452_v59 = vsel %vm3924_vm9, %v444_v57, %v446_v54  ;;  %vm1249_vm9 = vcmask 326656  }
  0xc0   : > { %221 = vrot.lane.b32.xlu0 %v3336_v45, %s3031_s18  ;;  %1281 = vrot.lane.b32.xlu1 %v3120_v3, %s3059_s29  ;;  %s3060_s18 = smov 38  }
  0xc1   : > { %2209 = vmatprep.subr.bf16.mxu1 %v453_v58 }
  0xc2   : > { %2210 = vmatpush1.bf16.msra.mxu1 %v452_v59  ;;  %v902_v60 = vpop.permute.xlu0 %901  ;;  %v3373_v61 = vpop.permute.xlu1 %903 }
  0xc3   : > { %v909_v62 = vsel %vm3916_vm10, %v902_v60, %v3373_v61 }
  0xc4   : > { %1283 = vrot.lane.b32.xlu0 %v3133_v6, %s3059_s29  ;;  %1279 = vrot.lane.b32.xlu1 %v3122_v4, %s3059_s29 }
  0xc5   : > { %2242 = vmatprep.subr.bf16.mxu0 %v909_v62 }
  0xc6   : > { %v900_v63 = vpop.permute.xlu0 %899  ;;  %v484_v0 = vpop.permute.xlu1 %483 }
  0xc7   : > { %v908_v1 = vsel %vm3916_vm10, %v900_v63, %v902_v60  ;;  %vm641_vm10 = vcmask 826368  }
  0xc8   : > { %563 = vrot.lane.b32.xlu0 %v3336_v45, %s3046_s6  ;;  %259 = vrot.lane.b32.xlu1 %v3336_v45, %s3032_s19  ;;  %s3061_s19 = smov 37   ;;  %s3063_s6 = smov 35  }
  0xc9   : > { %2243 = vmatpush1.bf16.msra.mxu0 %v908_v1 }
  0xca   : > { %v3386_v2 = vpop.permute.xlu0 %485  ;;  %v482_v5 = vpop.permute.xlu1 %481 }
  0xcb   : > { %v491_v7 = vsel %vm489_vm11, %v484_v0, %v3386_v2  ;;  %v490_v8 = vsel %vm489_vm11, %v482_v5, %v484_v0 }
  0xcc   : > { %1319 = vrot.lane.b32.xlu0 %v3120_v3, %s3060_s18  ;;  %1321 = vrot.lane.b32.xlu1 %v3133_v6, %s3060_s18 }
  0xcd   : > { %2211 = vmatprep.subr.bf16.mxu1 %v491_v7 }
  0xce   : > { %2212 = vmatpush1.bf16.msra.mxu1 %v490_v8  ;;  %v940_v10 = vpop.permute.xlu0 %939  ;;  %v3395_v11 = vpop.permute.xlu1 %941 }
  0xcf   : > { %v947_v12 = vsel %vm3914_vm12, %v940_v10, %v3395_v11 }
  0xd0   : > { %1317 = vrot.lane.b32.xlu0 %v3122_v4, %s3060_s18  ;;  %601 = vrot.lane.b32.xlu1 %v3336_v45, %s3048_s8  ;;  %s3064_s8 = smov 34  }
  0xd1   : > { %2244 = vmatprep.subr.bf16.mxu0 %v947_v12 }
  0xd2   : > { %v938_v14 = vpop.permute.xlu0 %937  ;;  %v522_v15 = vpop.permute.xlu1 %521 }
  0xd3   : > { %v946_v16 = vsel %vm3914_vm12, %v938_v14, %v940_v10  ;;  %vm603_vm12 = vcmask 834560  }
  0xd4   : > { %297 = vrot.lane.b32.xlu0 %v3336_v45, %s3033_s20  ;;  %1357 = vrot.lane.b32.xlu1 %v3120_v3, %s3061_s19  ;;  %s3062_s20 = smov 36  }
  0xd5   : > { %2245 = vmatpush1.bf16.msra.mxu0 %v946_v16 }
  0xd6   : > { %v3413_v19 = vpop.permute.xlu0 %523  ;;  %v520_v20 = vpop.permute.xlu1 %519 }
  0xd7   : > { %v529_v22 = vsel %vm527_vm13, %v522_v15, %v3413_v19  ;;  %v528_v24 = vsel %vm527_vm13, %v520_v20, %v522_v15 }
  0xd8   : > { %1359 = vrot.lane.b32.xlu0 %v3133_v6, %s3061_s19  ;;  %1355 = vrot.lane.b32.xlu1 %v3122_v4, %s3061_s19 }
  0xd9   : > { %2213 = vmatprep.subr.bf16.mxu1 %v529_v22 }
  0xda   : > { %2214 = vmatpush1.bf16.msra.mxu1 %v528_v24  ;;  %v978_v25 = vpop.permute.xlu0 %977  ;;  %v3427_v26 = vpop.permute.xlu1 %979 }
  0xdb   : > { %v985_v27 = vsel %vm3913_vm14, %v978_v25, %v3427_v26 }
  0xdc   : > { %639 = vrot.lane.b32.xlu0 %v3336_v45, %s3050_s10  ;;  %335 = vrot.lane.b32.xlu1 %v3336_v45, %s3034_s21  ;;  %s3065_s10 = smov 18  }
  0xdd   : > { %2246 = vmatprep.subr.bf16.mxu0 %v985_v27 }
  0xde   : > { %v976_v29 = vpop.permute.xlu0 %975  ;;  %v560_v30 = vpop.permute.xlu1 %559 }
  0xdf   : > { %v984_v31 = vsel %vm3913_vm14, %v976_v29, %v978_v25  ;;  %vm3915_vm14 = vcmask 498688  }
  0xe0   : > { %1395 = vrot.lane.b32.xlu0 %v3120_v3, %s3062_s20  ;;  %1397 = vrot.lane.b32.xlu1 %v3133_v6, %s3062_s20  ;;  %v3450_v3 = vld [vmem:[%s3113_s17 + $0x4] ss:$20 sps:$4 sm:$0xff]  }
  0xe1   : > { %2247 = vmatpush1.bf16.msra.mxu0 %v984_v31 }
  0xe2   : > { %v3440_v32 = vpop.permute.xlu0 %561  ;;  %v558_v34 = vpop.permute.xlu1 %557 }
  0xe3   : > { %v567_v35 = vsel %vm565_vm15, %v560_v30, %v3440_v32  ;;  %v566_v36 = vsel %vm565_vm15, %v558_v34, %v560_v30 }
  0xe4   : > { %1393 = vrot.lane.b32.xlu0 %v3122_v4, %s3062_s20  ;;  %677 = vrot.lane.b32.xlu1 %v3336_v45, %s3052_s14  ;;  %v3461_v4 = vld [vmem:[%s3113_s17 + $0x8] ss:$20 sps:$4 sm:$0xff]   ;;  %s3071_s14 = smov 12  }
  0xe5   : > { %2215 = vmatprep.subr.bf16.mxu1 %v567_v35 }
  0xe6   : > { %2216 = vmatpush1.bf16.msra.mxu1 %v566_v36  ;;  %v1016_v6 = vpop.permute.xlu0 %1015  ;;  %v3452_v37 = vpop.permute.xlu1 %1017 }
  0xe7   : > { %v1023_v39 = vsel %vm3915_vm14, %v1016_v6, %v3452_v37 }
  0xe8   : > { %373 = vrot.lane.b32.xlu0 %v3336_v45, %s3036_s23  ;;  %1433 = vrot.lane.b32.xlu1 %v3450_v3, %s3063_s6 }
  0xe9   : > { %2248 = vmatprep.subr.bf16.mxu0 %v1023_v39 }
  0xea   : > { %v1014_v43 = vpop.permute.xlu0 %1013  ;;  %v598_v44 = vpop.permute.xlu1 %597 }
  0xeb   : > { %v1022_v47 = vsel %vm3915_vm14, %v1014_v43, %v1016_v6  ;;  %vm3917_vm14 = vcmask 490496  }
  0xec   : > { %1435 = vrot.lane.b32.xlu0 %v3461_v4, %s3063_s6  ;;  %1431 = vrot.lane.b32.xlu1 %v3464_v42, %s3063_s6 }
  0xed   : > { %2249 = vmatpush1.bf16.msra.mxu0 %v1022_v47 }
  0xee   : > { %v3471_v48 = vpop.permute.xlu0 %599  ;;  %v596_v49 = vpop.permute.xlu1 %595 }
  0xef   : > { %v605_v50 = vsel %vm603_vm12, %v598_v44, %v3471_v48  ;;  %v604_v52 = vsel %vm603_vm12, %v596_v49, %v598_v44 }
  0xf0   : > { %715 = vrot.lane.b32.xlu0 %v3336_v45, %s3054_s16  ;;  %411 = vrot.lane.b32.xlu1 %v3336_v45, %s3038_s25  ;;  %s3930_s16 = smov 60  }
  0xf1   : > { %2217 = vmatprep.subr.bf16.mxu1 %v605_v50 }
  0xf2   : > { %2218 = vmatpush1.bf16.msra.mxu1 %v604_v52  ;;  %v1054_v53 = vpop.permute.xlu0 %1053  ;;  %v3480_v54 = vpop.permute.xlu1 %1055 }
  0xf3   : > { %v1061_v55 = vsel %vm3917_vm14, %v1054_v53, %v3480_v54 }
  0xf4   : > { %1471 = vrot.lane.b32.xlu0 %v3450_v3, %s3064_s8  ;;  %1473 = vrot.lane.b32.xlu1 %v3461_v4, %s3064_s8 }
  0xf5   : > { %2250 = vmatprep.subr.bf16.mxu0 %v1061_v55 }
  0xf6   : > { %v1052_v57 = vpop.permute.xlu0 %1051  ;;  %v636_v58 = vpop.permute.xlu1 %635 }
  0xf7   : > { %v1060_v59 = vsel %vm3917_vm14, %v1052_v57, %v1054_v53  ;;  %vm3920_vm14 = vcmask 482304   ;;  %v3570_v57 = vcombine.low %v3326_v40, %v3326_v40 }
  0xf8   : > { %1469 = vrot.lane.b32.xlu0 %v3464_v42, %s3064_s8  ;;  %753 = vrot.lane.b32.xlu1 %v3336_v45, %s3056_s7  ;;  %s3069_s7 = smov 14  }
  0xf9   : > { %2251 = vmatpush1.bf16.msra.mxu0 %v1060_v59 }
  0xfa   : > { %v3493_v60 = vpop.permute.xlu0 %637  ;;  %v634_v62 = vpop.permute.xlu1 %633 }
  0xfb   : > { %v643_v63 = vsel %vm641_vm10, %v636_v58, %v3493_v60  ;;  %v642_v0 = vsel %vm641_vm10, %v634_v62, %v636_v58 }
  0xfc   : > { %449 = vrot.lane.b32.xlu0 %v3336_v45, %s3040_s27  ;;  %1509 = vrot.lane.b32.xlu1 %v3450_v3, %s3065_s10  ;;  %s3066_s27 = smov 17  }
  0xfd   : > { %2219 = vmatprep.subr.bf16.mxu1 %v643_v63 }
  0xfe   : > { %2220 = vmatpush1.bf16.msra.mxu1 %v642_v0  ;;  %v1092_v1 = vpop.permute.xlu0 %1091  ;;  %v3502_v5 = vpop.permute.xlu1 %1093  ;;  %v3007_v0 = vld [vmem:[%s3113_s17 + $0x8] ss:$20 sps:$4 sm:$0xff]  }
  0xff   : > { %v1099_v7 = vsel %vm3920_vm14, %v1092_v1, %v3502_v5 }
 0x100   : > { %1511 = vrot.lane.b32.xlu0 %v3461_v4, %s3065_s10  ;;  %1507 = vrot.lane.b32.xlu1 %v3464_v42, %s3065_s10 }
 0x101   : > { %2252 = vmatprep.subr.bf16.mxu0 %v1099_v7 }
 0x102   : > { %v1090_v8 = vpop.permute.xlu0 %1089  ;;  %v674_v10 = vpop.permute.xlu1 %673 }
 0x103   : > { %v1098_v12 = vsel %vm3920_vm14, %v1090_v8, %v1092_v1  ;;  %vm717_vm14 = vcmask 687104  }
 0x104   : > { %1095 = vrot.lane.b32.xlu0 %v3336_v45, %s3051_s11  ;;  %791 = vrot.lane.b32.xlu1 %v3336_v45, %s3035_s22  ;;  %s3067_s22 = smov 16   ;;  %s3928_s11 = smov 62  }
 0x105   : > { %2253 = vmatpush1.bf16.msra.mxu0 %v1098_v12 }
 0x106   : > { %v3515_v14 = vpop.permute.xlu0 %675  ;;  %v672_v15 = vpop.permute.xlu1 %671 }
 0x107   : > { %v681_v16 = vsel %vm679_vm8, %v674_v10, %v3515_v14  ;;  %v680_v20 = vsel %vm679_vm8, %v672_v15, %v674_v10 }
 0x108   : > { %1547 = vrot.lane.b32.xlu0 %v3450_v3, %s3066_s27  ;;  %1549 = vrot.lane.b32.xlu1 %v3461_v4, %s3066_s27 }
 0x109   : > { %2221 = vmatprep.subr.bf16.mxu1 %v681_v16 }
 0x10a   : > { %2222 = vmatpush1.bf16.msra.mxu1 %v680_v20  ;;  %v1130_v22 = vpop.permute.xlu0 %1129  ;;  %v3524_v24 = vpop.permute.xlu1 %1131 }
 0x10b   : > { %v1137_v25 = vsel %vm3921_vm6, %v1130_v22, %v3524_v24 }
 0x10c   : > { %1545 = vrot.lane.b32.xlu0 %v3464_v42, %s3066_s27  ;;  %1133 = vrot.lane.b32.xlu1 %v3336_v45, %s3053_s15  ;;  %s3929_s15 = smov 61  }
 0x10d   : > { %2254 = vmatprep.subr.bf16.mxu0 %v1137_v25 }
 0x10e   : > { %v1128_v27 = vpop.permute.xlu0 %1127  ;;  %v712_v29 = vpop.permute.xlu1 %711 }
 0x10f   : > { %v1136_v30 = vsel %vm3921_vm6, %v1128_v27, %v1130_v22  ;;  %vm3923_vm6 = vcmask 465920  }
 0x110   : > { %829 = vrot.lane.b32.xlu0 %v3336_v45, %s3037_s24  ;;  %1585 = vrot.lane.b32.xlu1 %v3450_v3, %s3067_s22  ;;  %s3068_s24 = smov 15  }
 0x111   : > { %2255 = vmatpush1.bf16.msra.mxu0 %v1136_v30 }
 0x112   : > { %v3537_v31 = vpop.permute.xlu0 %713  ;;  %v710_v34 = vpop.permute.xlu1 %709 }
 0x113   : > { %v719_v35 = vsel %vm717_vm14, %v712_v29, %v3537_v31  ;;  %v718_v36 = vsel %vm717_vm14, %v710_v34, %v712_v29 }
 0x114   : > { %1587 = vrot.lane.b32.xlu0 %v3461_v4, %s3067_s22  ;;  %1583 = vrot.lane.b32.xlu1 %v3464_v42, %s3067_s22 }
 0x115   : > { %2223 = vmatprep.subr.bf16.mxu1 %v719_v35 }
 0x116   : > { %2224 = vmatpush1.bf16.msra.mxu1 %v718_v36  ;;  %v1168_v6 = vpop.permute.xlu0 %1167  ;;  %v3546_v39 = vpop.permute.xlu1 %1169 }
 0x117   : > { %v1175_v43 = vsel %vm3923_vm6, %v1168_v6, %v3546_v39 }
 0x118   : > { %1171 = vrot.lane.b32.xlu0 %v3336_v45, %s3055_s9  ;;  %867 = vrot.lane.b32.xlu1 %v3336_v45, %s3039_s26  ;;  %s3926_s26 = smov 79   ;;  %s3070_s9 = smov 13  }
 0x119   : > { %2256 = vmatprep.subr.bf16.mxu0 %v1175_v43 }
 0x11a   : > { %v1166_v44 = vpop.permute.xlu0 %1165  ;;  %v750_v47 = vpop.permute.xlu1 %749 }
 0x11b   : > { %v1174_v49 = vsel %vm3923_vm6, %v1166_v44, %v1168_v6  ;;  %vm1211_vm6 = vcmask 457728  }
 0x11c   : > { %1623 = vrot.lane.b32.xlu0 %v3450_v3, %s3068_s24  ;;  %1625 = vrot.lane.b32.xlu1 %v3461_v4, %s3068_s24 }
 0x11d   : > { %2257 = vmatpush1.bf16.msra.mxu0 %v1174_v49  ;;  %v3650_v49 = vld [vmem:[%s3113_s17 + $0x4] ss:$20 sps:$4 sm:$0xff]  }
 0x11e   : > { %v3559_v50 = vpop.permute.xlu0 %751  ;;  %v748_v52 = vpop.permute.xlu1 %747 }
 0x11f   : > { %v757_v53 = vsel %vm755_vm4, %v750_v47, %v3559_v50  ;;  %v756_v55 = vsel %vm755_vm4, %v748_v52, %v750_v47 }
 0x120   : > { %1621 = vrot.lane.b32.xlu0 %v3464_v42, %s3068_s24  ;;  %1209 = vrot.lane.b32.xlu1 %v3336_v45, %s3057_s28  ;;  %s3927_s28 = smov 78  }
 0x121   : > { %2225 = vmatprep.subr.bf16.mxu1 %v757_v53 }
 0x122   : > { %2226 = vmatpush1.bf16.msra.mxu1 %v756_v55  ;;  %v1206_v58 = vpop.permute.xlu0 %1205  ;;  %v3572_v59 = vpop.permute.xlu1 %1207 }
 0x123   : > { %v1213_v62 = vsel %vm1211_vm6, %v1206_v58, %v3572_v59 }
 0x124   : > { %905 = vrot.lane.b32.xlu0 %v3336_v45, %s3926_s26  ;;  %1661 = vrot.lane.b32.xlu1 %v3450_v3, %s3069_s7 }
 0x125   : > { %2258 = vmatprep.subr.bf16.mxu0 %v1213_v62  ;;  %2228 = vmatmul.mubr.bf16.vlgmr.msra.gmra.mrb[0].mxu1 %v3570_v57 }
 0x126   : > { %v1204_v63 = vpop.permute.xlu0 %1203  ;;  %v488_v40 = vpop.permute.xlu1 %487  ;;  %2391 = vmatprep.mubr.bf16.mxu1 %v3330_v41 }
 0x127   : > { %v1212_v1 = vsel %vm1211_vm6, %v1204_v63, %v1206_v58  ;;  %v492_v7 = vsel %vm489_vm11, %v3386_v2, %v488_v40  ;;  %vm1287_vm11 = vcmask 318464  }
 0x128   : > { %1663 = vrot.lane.b32.xlu0 %v3461_v4, %s3069_s7  ;;  %1659 = vrot.lane.b32.xlu1 %v3464_v42, %s3069_s7 }
 0x129   : > { %2259 = vmatpush1.bf16.msra.mxu0 %v1212_v1  ;;  %2853 = vmatprep.subr.bf16.mxu1 %v492_v7 }
 0x12a   : > { %v1244_v8 = vpop.permute.xlu0 %1243  ;;  %v3590_v10 = vpop.permute.xlu1 %1245  ;;  %2854 = vmatpush3.bf16.msra.mxu1 %v3007_v0 }
 0x12b   : > { %v1251_v41 = vsel %vm1249_vm9, %v1244_v8, %v3590_v10 }
 0x12c   : > { %1247 = vrot.lane.b32.xlu0 %v3336_v45, %s3058_s30  ;;  %943 = vrot.lane.b32.xlu1 %v3336_v45, %s3927_s28  ;;  %s3072_s30 = smov 121  }
 0x12d   : > { %2260 = vmatprep.subr.bf16.mxu0 %v1251_v41 }
 0x12e   : > { %v1242_v2 = vpop.permute.xlu0 %1241  ;;  %v526_v12 = vpop.permute.xlu1 %525 }
 0x12f   : > { %v1250_v15 = vsel %vm1249_vm9, %v1242_v2, %v1244_v8  ;;  %v530_v16 = vsel %vm527_vm13, %v3413_v19, %v526_v12  ;;  %v3680_v8 = vld [vmem:[%s3113_s17 + $0xc] ss:$20 sps:$4 sm:$0xff]   ;;  %vm3932_vm13 = vcmask 670720  }
 0x130   : > { %1699 = vrot.lane.b32.xlu0 %v3450_v3, %s3070_s9  ;;  %1701 = vrot.lane.b32.xlu1 %v3461_v4, %s3070_s9 }
 0x131   : > { %2261 = vmatpush1.bf16.msra.mxu0 %v1250_v15  ;;  %2855 = vmatprep.subr.bf16.mxu1 %v530_v16 }
 0x132   : > { %v222_v20 = vpop.permute.xlu0 %221  ;;  %v1282_v22 = vpop.permute.xlu1 %1281 }
 0x133   : > { %v226_v25 = vsel %vm223_vm0, %v3253_v9, %v222_v20  ;;  %vm1325_vm0 = vcmask 310272  }
 0x134   : > { %1697 = vrot.lane.b32.xlu0 %v3464_v42, %s3070_s9  ;;  %1285 = vrot.lane.b32.xlu1 %v3336_v45, %s3059_s29 }
 0x135   : > { %2856 = vmatpush3.bf16.msra.mxu1 %v226_v25 }
 0x136   : > { %v3611_v19 = vpop.permute.xlu0 %1283  ;;  %v1280_v27 = vpop.permute.xlu1 %1279 }
 0x137   : > { %v1289_v29 = vsel %vm1287_vm11, %v1282_v22, %v3611_v19  ;;  %v1288_v30 = vsel %vm1287_vm11, %v1280_v27, %v1282_v22 }
 0x138   : > { %981 = vrot.lane.b32.xlu0 %v3336_v45, %s3928_s11  ;;  %1737 = vrot.lane.b32.xlu1 %v3450_v3, %s3071_s14 }
 0x139   : > { %2262 = vmatprep.subr.bf16.mxu0 %v1289_v29 }
 0x13a   : > { %2263 = vmatpush1.bf16.msra.mxu0 %v1288_v30  ;;  %v564_v9 = vpop.permute.xlu0 %563  ;;  %v260_v34 = vpop.permute.xlu1 %259 }
 0x13b   : > { %v264_v35 = vsel %vm261_vm1, %v3262_v13, %v260_v34  ;;  %v568_v36 = vsel %vm565_vm15, %v3440_v32, %v564_v9  ;;  %v3637_v13 = vld [vmem:[%s3113_s17 + $0x8] ss:$20 sps:$4 sm:$0xff]   ;;  %v3640_v32 = vld [vmem:[%s3113_s17 + $0xc] ss:$20 sps:$4 sm:$0xff]   ;;  %vm1363_vm1 = vcmask 302080   ;;  %vm1553_vm15 = vcmask 138240  }
 0x13c   : > { %1739 = vrot.lane.b32.xlu0 %v3461_v4, %s3071_s14  ;;  %1735 = vrot.lane.b32.xlu1 %v3464_v42, %s3071_s14  ;;  %v3722_v34 = vld [vmem:[%s3113_s17 + $0x10] ss:$20 sps:$4 sm:$0xff]   ;;  %s3073_s17 = smov 120  }
 0x13d   : > { %2857 = vmatprep.subr.bf16.mxu1 %v568_v36 }
 0x13e   : > { %2858 = vmatpush3.bf16.msra.mxu1 %v264_v35  ;;  %v1320_v3 = vpop.permute.xlu0 %1319  ;;  %v3628_v6 = vpop.permute.xlu1 %1321 }
 0x13f   : > { %v1327_v43 = vsel %vm1325_vm0, %v1320_v3, %v3628_v6 }
 0x140   : > { %1323 = vrot.lane.b32.xlu0 %v3336_v45, %s3060_s18  ;;  %1019 = vrot.lane.b32.xlu1 %v3336_v45, %s3929_s15 }
 0x141   : > { %2264 = vmatprep.subr.bf16.mxu0 %v1327_v43 }
 0x142   : > { %v1318_v4 = vpop.permute.xlu0 %1317  ;;  %v602_v42 = vpop.permute.xlu1 %601 }
 0x143   : > { %v1326_v44 = vsel %vm1325_vm0, %v1318_v4, %v1320_v3  ;;  %v606_v47 = vsel %vm603_vm12, %v3471_v48, %v602_v42  ;;  %vm3931_vm12 = vcmask 867328  }
 0x144   : > { %1775 = vrot.lane.b32.xlu0 %v3637_v13, %s3034_s21  ;;  %1777 = vrot.lane.b32.xlu1 %v3640_v32, %s3034_s21 }
 0x145   : > { %2265 = vmatpush1.bf16.msra.mxu0 %v1326_v44  ;;  %2859 = vmatprep.subr.bf16.mxu1 %v606_v47 }
 0x146   : > { %v298_v52 = vpop.permute.xlu0 %297  ;;  %v1358_v53 = vpop.permute.xlu1 %1357 }
 0x147   : > { %v302_v55 = vsel %vm299_vm2, %v3271_v18, %v298_v52  ;;  %v3669_v18 = vcombine.low %v3411_v17, %v3411_v17  ;;  %vm1401_vm2 = vcmask 293888  }
 0x148   : > { %1773 = vrot.lane.b32.xlu0 %v3650_v49, %s3034_s21  ;;  %1361 = vrot.lane.b32.xlu1 %v3336_v45, %s3061_s19 }
 0x149   : > { %2860 = vmatpush3.bf16.msra.mxu1 %v302_v55 }
 0x14a   : > { %v3658_v48 = vpop.permute.xlu0 %1359  ;;  %v1356_v58 = vpop.permute.xlu1 %1355 }
 0x14b   : > { %v1365_v62 = vsel %vm1363_vm1, %v1358_v53, %v3658_v48  ;;  %v1364_v63 = vsel %vm1363_vm1, %v1356_v58, %v1358_v53 }
 0x14c   : > { %1057 = vrot.lane.b32.xlu0 %v3336_v45, %s3930_s16  ;;  %1812 = vrot.lane.b32.xlu1 %v3637_v13, %s3036_s23 }
 0x14d   : > { %2266 = vmatprep.subr.bf16.mxu0 %v1365_v62 }
 0x14e   : > { %2267 = vmatpush1.bf16.msra.mxu0 %v1364_v63  ;;  %v640_v40 = vpop.permute.xlu0 %639  ;;  %v336_v0 = vpop.permute.xlu1 %335 }
 0x14f   : > { %v340_v1 = vsel %vm337_vm3, %v3284_v23, %v336_v0  ;;  %v644_v7 = vsel %vm641_vm10, %v3493_v60, %v640_v40  ;;  %vm1477_vm10 = vcmask 277504  }
 0x150   : > { %1814 = vrot.lane.b32.xlu0 %v3640_v32, %s3036_s23  ;;  %1810 = vrot.lane.b32.xlu1 %v3650_v49, %s3036_s23 }
 0x151   : > { %2861 = vmatprep.subr.bf16.mxu1 %v644_v7  ;;  %2269 = vmatmul.mubr.bf16.vlgmr.msra.gmra.mrb[0].mxu0 %v3669_v18 }
 0x152   : > { %2862 = vmatpush3.bf16.msra.mxu1 %v340_v1  ;;  %v1396_v17 = vpop.permute.xlu0 %1395  ;;  %v3683_v41 = vpop.permute.xlu1 %1397 }
 0x153   : > { %v1403_v23 = vsel %vm1401_vm2, %v1396_v17, %v3683_v41 }
 0x154   : > { %1703 = vrot.lane.b32.xlu0 %v3680_v8, %s3070_s9  ;;  %1399 = vrot.lane.b32.xlu1 %v3336_v45, %s3062_s20  ;;  %s2938_s20 = smul.u32 12, %s3947_s13 }
 0x155   : > { %2277 = vmatprep.subr.bf16.mxu0 %v1403_v23 }
 0x156   : > { %v1394_v60 = vpop.permute.xlu0 %1393  ;;  %v678_v2 = vpop.permute.xlu1 %677 }
 0x157   : > { %v1402_v12 = vsel %vm1401_vm2, %v1394_v60, %v1396_v17  ;;  %v682_v15 = vsel %vm679_vm8, %v3515_v14, %v678_v2  ;;  %vm1439_vm8 = vcmask 285696  }
 0x158   : > { %1849 = vrot.lane.b32.xlu0 %v3637_v13, %s3038_s25  ;;  %1851 = vrot.lane.b32.xlu1 %v3640_v32, %s3038_s25 }
 0x159   : > { %2278 = vmatpush1.bf16.msra.mxu0 %v1402_v12  ;;  %2863 = vmatprep.subr.bf16.mxu1 %v682_v15 }
 0x15a   : > { %v374_v16 = vpop.permute.xlu0 %373  ;;  %v1434_v20 = vpop.permute.xlu1 %1433 }
 0x15b   : > { %v378_v45 = vsel %vm375_vm5, %v3306_v33, %v374_v16 }
 0x15c   : > { %1847 = vrot.lane.b32.xlu0 %v3650_v49, %s3038_s25  ;;  %1741 = vrot.lane.b32.xlu1 %v3680_v8, %s3071_s14 }
 0x15d   : > { %2864 = vmatpush3.bf16.msra.mxu1 %v378_v45 }
 0x15e   : > { %v3704_v14 = vpop.permute.xlu0 %1435  ;;  %v1432_v22 = vpop.permute.xlu1 %1431 }
 0x15f   : > { %v1440_v25 = vsel %vm1439_vm8, %v1432_v22, %v1434_v20  ;;  %v1441_v27 = vsel %vm1439_vm8, %v1434_v20, %v3704_v14 }
 0x160   : > { %1437 = vrot.lane.b32.xlu0 %v3680_v8, %s3063_s6  ;;  %1886 = vrot.lane.b32.xlu1 %v3637_v13, %s3072_s30 }
 0x161   : > { %2279 = vmatprep.subr.bf16.mxu0 %v1441_v27 }
 0x162   : > { %2280 = vmatpush1.bf16.msra.mxu0 %v1440_v25  ;;  %v716_v33 = vpop.permute.xlu0 %715  ;;  %v412_v29 = vpop.permute.xlu1 %411 }
 0x163   : > { %v416_v30 = vsel %vm413_vm7, %v3342_v46, %v412_v29  ;;  %v720_v9 = vsel %vm717_vm14, %v3537_v31, %v716_v33  ;;  %vm3933_vm14 = vcmask 482304  }
 0x164   : > { %1888 = vrot.lane.b32.xlu0 %v3640_v32, %s3072_s30  ;;  %1884 = vrot.lane.b32.xlu1 %v3650_v49, %s3072_s30 }
 0x165   : > { %2865 = vmatprep.subr.bf16.mxu1 %v720_v9 }
 0x166   : > { %2866 = vmatpush3.bf16.msra.mxu1 %v416_v30  ;;  %v1472_v35 = vpop.permute.xlu0 %1471  ;;  %v3724_v36 = vpop.permute.xlu1 %1473 }
 0x167   : > { %v1479_v46 = vsel %vm1477_vm10, %v1472_v35, %v3724_v36 }
 0x168   : > { %1779 = vrot.lane.b32.xlu0 %v3722_v34, %s3034_s21  ;;  %1475 = vrot.lane.b32.xlu1 %v3680_v8, %s3064_s8  ;;  %s3074_s21 = smov 119  }
 0x169   : > { %2281 = vmatprep.subr.bf16.mxu0 %v1479_v46 }
 0x16a   : > { %v1470_v31 = vpop.permute.xlu0 %1469  ;;  %v754_v3 = vpop.permute.xlu1 %753 }
 0x16b   : > { %v1478_v43 = vsel %vm1477_vm10, %v1470_v31, %v1472_v35  ;;  %v758_v4 = vsel %vm755_vm4, %v3559_v50, %v754_v3  ;;  %vm1515_vm4 = vcmask 146432  }
 0x16c   : > { %1924 = vrot.lane.b32.xlu0 %v3637_v13, %s3073_s17  ;;  %1926 = vrot.lane.b32.xlu1 %v3640_v32, %s3073_s17 }
 0x16d   : > { %2282 = vmatpush1.bf16.msra.mxu0 %v1478_v43  ;;  %2867 = vmatprep.subr.bf16.mxu1 %v758_v4 }
 0x16e   : > { %v450_v42 = vpop.permute.xlu0 %449  ;;  %v1510_v44 = vpop.permute.xlu1 %1509 }
 0x16f   : > { %v454_v47 = vsel %vm3931_vm12, %v3364_v56, %v450_v42  ;;  %v3757_v56 = vld [vmem:[%s3905_s1 + $0x10] sm:$0xff]  ;;  %vm3934_vm12 = vcmask 474112  }
 0x170   : > { %1922 = vrot.lane.b32.xlu0 %v3650_v49, %s3073_s17  ;;  %1816 = vrot.lane.b32.xlu1 %v3722_v34, %s3036_s23  ;;  %v3762_v58 = vcombine.high %v3757_v56, %v3757_v56  ;;  %s3075_s23 = smov 118  }
 0x171   : > { %2868 = vmatpush3.bf16.msra.mxu1 %v454_v47 }
 0x172   : > { %v3745_v50 = vpop.permute.xlu0 %1511  ;;  %v1508_v52 = vpop.permute.xlu1 %1507  ;;  %2309 = vmatprep.mubr.bf16.mxu0 %v3762_v58 }
 0x173   : > { %v1516_v53 = vsel %vm1515_vm4, %v1508_v52, %v1510_v44  ;;  %v1517_v55 = vsel %vm1515_vm4, %v1510_v44, %v3745_v50 }
 0x174   : > { %1513 = vrot.lane.b32.xlu0 %v3680_v8, %s3065_s10  ;;  %1962 = vrot.lane.b32.xlu1 %v3637_v13, %s3074_s21  ;;  %s170_s10 = scalar_lea.vmem %s3907_s3, %s2938_s20 }
 0x175   : > { %2283 = vmatprep.subr.bf16.mxu0 %v1517_v55  ;;  %2392 = vmatmul.mubr.bf16.vlgmr.msra.gmra.mrb[4].mxu1 %v3570_v57 }
 0x176   : > { %2284 = vmatpush1.bf16.msra.mxu0 %v1516_v53  ;;  %v1096_v62 = vpop.permute.xlu0 %1095  ;;  %v792_v63 = vpop.permute.xlu1 %791  ;;  %2431 = vmatprep.mubr.bf16.mxu1 %v3417_v21 }
 0x177   : > { %v796_v40 = vsel %vm3932_vm13, %v3293_v28, %v792_v63  ;;  %v1100_v0 = vsel %vm3933_vm14, %v3502_v5, %v1096_v62  ;;  %vm3935_vm13 = vcmask 662528   ;;  %vm3925_vm14 = vcmask 130048  }
 0x178   : > { %1964 = vrot.lane.b32.xlu0 %v3640_v32, %s3074_s21  ;;  %1960 = vrot.lane.b32.xlu1 %v3650_v49, %s3074_s21 }
 0x179   : > { %2875 = vmatprep.subr.bf16.mxu1 %v1100_v0 }
 0x17a   : > { %2876 = vmatpush3.bf16.msra.mxu1 %v796_v40  ;;  %v1548_v57 = vpop.permute.xlu0 %1547  ;;  %v3774_v1 = vpop.permute.xlu1 %1549 }
 0x17b   : > { %v1555_v28 = vsel %vm1553_vm15, %v1548_v57, %v3774_v1 }
 0x17c   : > { %1853 = vrot.lane.b32.xlu0 %v3722_v34, %s3038_s25  ;;  %1551 = vrot.lane.b32.xlu1 %v3680_v8, %s3066_s27 }
 0x17d   : > { %2285 = vmatprep.subr.bf16.mxu0 %v1555_v28 }
 0x17e   : > { %v1546_v21 = vpop.permute.xlu0 %1545  ;;  %v1134_v5 = vpop.permute.xlu1 %1133 }
 0x17f   : > { %v1554_v7 = vsel %vm1553_vm15, %v1546_v21, %v1548_v57  ;;  %v1138_v17 = vsel %vm3934_vm12, %v3524_v24, %v1134_v5  ;;  %vm3936_vm12 = vcmask 654336  }
 0x180   : > { %1890 = vrot.lane.b32.xlu0 %v3722_v34, %s3072_s30  ;;  %1589 = vrot.lane.b32.xlu1 %v3680_v8, %s3067_s22 }
 0x181   : > { %2286 = vmatpush1.bf16.msra.mxu0 %v1554_v7  ;;  %2877 = vmatprep.subr.bf16.mxu1 %v1138_v17 }
 0x182   : > { %v830_v23 = vpop.permute.xlu0 %829  ;;  %v1586_v60 = vpop.permute.xlu1 %1585 }
 0x183   : > { %v834_v2 = vsel %vm3935_vm13, %v3315_v38, %v830_v23  ;;  %vm3937_vm13 = vcmask 465920  }
 0x184   : > { %1928 = vrot.lane.b32.xlu0 %v3722_v34, %s3073_s17  ;;  %1627 = vrot.lane.b32.xlu1 %v3680_v8, %s3068_s24 }
 0x185   : > { %2878 = vmatpush3.bf16.msra.mxu1 %v834_v2 }
 0x186   : > { %v3795_v24 = vpop.permute.xlu0 %1587  ;;  %v1584_v12 = vpop.permute.xlu1 %1583 }
 0x187   : > { %v1592_v15 = vsel %vm3925_vm14, %v1584_v12, %v1586_v60  ;;  %v1593_v16 = vsel %vm3925_vm14, %v1586_v60, %v3795_v24  ;;  %vm1629_vm14 = vcmask 121856  }
 0x188   : > { %2000 = vrot.lane.b32.xlu0 %v3637_v13, %s3075_s23  ;;  %2002 = vrot.lane.b32.xlu1 %v3640_v32, %s3075_s23 }
 0x189   : > { %2287 = vmatprep.subr.bf16.mxu0 %v1593_v16 }
 0x18a   : > { %2288 = vmatpush1.bf16.msra.mxu0 %v1592_v15  ;;  %v1172_v38 = vpop.permute.xlu0 %1171  ;;  %v868_v20 = vpop.permute.xlu1 %867 }
 0x18b   : > { %v872_v45 = vsel %vm3936_vm12, %v3351_v51, %v868_v20  ;;  %v1176_v22 = vsel %vm3937_vm13, %v3546_v39, %v1172_v38  ;;  %vm3938_vm12 = vcmask 646144   ;;  %vm1667_vm13 = vcmask 113664  }
 0x18c   : > { %1998 = vrot.lane.b32.xlu0 %v3650_v49, %s3075_s23  ;;  %1966 = vrot.lane.b32.xlu1 %v3722_v34, %s3074_s21 }
 0x18d   : > { %2879 = vmatprep.subr.bf16.mxu1 %v1176_v22 }
 0x18e   : > { %2880 = vmatpush3.bf16.msra.mxu1 %v872_v45  ;;  %v1624_v13 = vpop.permute.xlu0 %1623  ;;  %v3809_v32 = vpop.permute.xlu1 %1625 }
 0x18f   : > { %v1631_v25 = vsel %vm1629_vm14, %v1624_v13, %v3809_v32 }
 0x190   : > { %1665 = vrot.lane.b32.xlu0 %v3680_v8, %s3069_s7  ;;  %2004 = vrot.lane.b32.xlu1 %v3722_v34, %s3075_s23 }
 0x191   : > { %2289 = vmatprep.subr.bf16.mxu0 %v1631_v25 }
 0x192   : > { %v1622_v51 = vpop.permute.xlu0 %1621  ;;  %v1210_v39 = vpop.permute.xlu1 %1209 }
 0x193   : > { %v1630_v49 = vsel %vm1629_vm14, %v1622_v51, %v1624_v13  ;;  %v1214_v27 = vsel %vm1211_vm6, %v3572_v59, %v1210_v39  ;;  %vm3939_vm6 = vcmask 637952  }
 0x194   : > { %2290 = vmatpush1.bf16.msra.mxu0 %v1630_v49  ;;  %2881 = vmatprep.subr.bf16.mxu1 %v1214_v27 }
 0x196   : > { %v906_v33 = vpop.permute.xlu0 %905  ;;  %v1662_v29 = vpop.permute.xlu1 %1661 }
 0x197   : > { %v910_v30 = vsel %vm3938_vm12, %v3373_v61, %v906_v33  ;;  %vm1705_vm12 = vcmask 105472  }
 0x198   : > { %2882 = vmatpush3.bf16.msra.mxu1 %v910_v30 }
 0x19a   : > { %v3821_v8 = vpop.permute.xlu0 %1663  ;;  %v1660_v9 = vpop.permute.xlu1 %1659 }
 0x19b   : > { %v1668_v34 = vsel %vm1667_vm13, %v1660_v9, %v1662_v29  ;;  %v1669_v35 = vsel %vm1667_vm13, %v1662_v29, %v3821_v8 }
 0x19c   : > { %2291 = vmatprep.subr.bf16.mxu0 %v1669_v35 }
 0x19d   : > { %2292 = vmatpush1.bf16.msra.mxu0 %v1668_v34 }
 0x19e   : > { %v1248_v59 = vpop.permute.xlu0 %1247  ;;  %v944_v46 = vpop.permute.xlu1 %943 }
 0x19f   : > { %v948_v31 = vsel %vm3939_vm6, %v3395_v11, %v944_v46  ;;  %v1252_v61 = vsel %vm1249_vm9, %v3590_v10, %v1248_v59  ;;  %vm3940_vm9 = vcmask 506880   ;;  %vm1743_vm6 = vcmask 97280  }
 0x1a0   : > { %2883 = vmatprep.subr.bf16.mxu1 %v1252_v61 }
 0x1a1   : > { %2884 = vmatpush3.bf16.msra.mxu1 %v948_v31 }
 0x1a2   : > { %v1700_v3 = vpop.permute.xlu0 %1699  ;;  %v1702_v43 = vpop.permute.xlu1 %1701 }
 0x1a3   : > { %v1707_v4 = vsel %vm1705_vm12, %v1700_v3, %v1702_v43 }
 0x1a4   : > { %2293 = vmatprep.subr.bf16.mxu0 %v1707_v4 }
 0x1a6   : > { %v1698_v42 = vpop.permute.xlu0 %1697  ;;  %v1286_v44 = vpop.permute.xlu1 %1285 }
 0x1a7   : > { %v1706_v47 = vsel %vm1705_vm12, %v1698_v42, %v1700_v3  ;;  %v1290_v52 = vsel %vm1287_vm11, %v3611_v19, %v1286_v44  ;;  %vm3941_vm11 = vcmask 498688  }
 0x1a8   : > { %2294 = vmatpush1.bf16.msra.mxu0 %v1706_v47  ;;  %2885 = vmatprep.subr.bf16.mxu1 %v1290_v52 }
 0x1aa   : > { %v982_v11 = vpop.permute.xlu0 %981  ;;  %v1738_v53 = vpop.permute.xlu1 %1737 }
 0x1ab   : > { %v986_v10 = vsel %vm3940_vm9, %v3427_v26, %v982_v11 }
 0x1ac   : > { %2886 = vmatpush3.bf16.msra.mxu1 %v986_v10 }
 0x1ae   : > { %v1740_v55 = vpop.permute.xlu0 %1739  ;;  %v1736_v62 = vpop.permute.xlu1 %1735 }
 0x1af   : > { %v1744_v63 = vsel %vm1743_vm6, %v1736_v62, %v1738_v53  ;;  %v1745_v40 = vsel %vm1743_vm6, %v1738_v53, %v1740_v55 }
 0x1b0   : > { %2295 = vmatprep.subr.bf16.mxu0 %v1745_v40 }
 0x1b1   : > { %2296 = vmatpush1.bf16.msra.mxu0 %v1744_v63 }
 0x1b2   : > { %v1324_v0 = vpop.permute.xlu0 %1323  ;;  %v1020_v57 = vpop.permute.xlu1 %1019 }
 0x1b3   : > { %v1024_v19 = vsel %vm3941_vm11, %v3452_v37, %v1020_v57  ;;  %v1328_v28 = vsel %vm1325_vm0, %v3628_v6, %v1324_v0  ;;  %vm3942_vm0 = vcmask 490496   ;;  %v3076_v0 = vmov 0  }
 0x1b4   : > { %2887 = vmatprep.subr.bf16.mxu1 %v1328_v28 }
 0x1b5   : > { %2888 = vmatpush3.bf16.msra.mxu1 %v1024_v19 }
 0x1b6   : > { %v1776_v26 = vpop.permute.xlu0 %1775  ;;  %v1778_v21 = vpop.permute.xlu1 %1777 }
 0x1b7   : > { %v1782_v5 = vsel %vm337_vm3, %v1776_v26, %v1778_v21 }
 0x1b8   : > { %2297 = vmatprep.subr.bf16.mxu0 %v1782_v5 }
 0x1ba   : > { %v1774_v7 = vpop.permute.xlu0 %1773  ;;  %v1362_v17 = vpop.permute.xlu1 %1361 }
 0x1bb   : > { %v1781_v23 = vsel %vm337_vm3, %v1774_v7, %v1776_v26  ;;  %v1366_v60 = vsel %vm1363_vm1, %v3658_v48, %v1362_v17  ;;  %vm1892_vm1 = vcmask 990208  }
 0x1bc   : > { %2298 = vmatpush1.bf16.msra.mxu0 %v1781_v23  ;;  %2889 = vmatprep.subr.bf16.mxu1 %v1366_v60 }
 0x1be   : > { %v1058_v37 = vpop.permute.xlu0 %1057  ;;  %v1813_v2 = vpop.permute.xlu1 %1812 }
 0x1bf   : > { %v1062_v6 = vsel %vm3942_vm0, %v3480_v54, %v1058_v37 }
 0x1c0   : > { %2890 = vmatpush3.bf16.msra.mxu1 %v1062_v6 }
 0x1c2   : > { %v1815_v12 = vpop.permute.xlu0 %1814  ;;  %v1811_v15 = vpop.permute.xlu1 %1810 }
 0x1c3   : > { %v1818_v16 = vsel %vm375_vm5, %v1811_v15, %v1813_v2  ;;  %v1819_v38 = vsel %vm375_vm5, %v1813_v2, %v1815_v12  ;;  %2432 = vmatmul.mubr.bf16.vlgmr.msra.gmra.mrb[8].mxu1 %v3669_v18 }
 0x1c4   : > { %2299 = vmatprep.subr.bf16.mxu0 %v1819_v38  ;;  %2471 = vmatprep.mubr.bf16.mxu1 %v3762_v58  ;;  %v3077_v38 = vmov 0.0  }
 0x1c5   : > { %2300 = vmatpush1.bf16.msra.mxu0 %v1818_v16  ;;  %v3020_v16 = vld [vmem:[%s3905_s1 + $0x18] ss:$0 sps:$4 sm:$0xff]  }
 0x1c6   : > { %v1704_v48 = vpop.permute.xlu0 %1703  ;;  %v1400_v20 = vpop.permute.xlu1 %1399 }
 0x1c7   : > { %v1404_v45 = vsel %vm1401_vm2, %v3683_v41, %v1400_v20  ;;  %v1708_v54 = vsel %vm1705_vm12, %v1702_v43, %v1704_v48  ;;  %vm1930_vm2 = vcmask 982016  }
 0x1c8   : > { %2897 = vmatprep.subr.bf16.mxu1 %v1708_v54 }
 0x1c9   : > { %2898 = vmatpush3.bf16.msra.mxu1 %v1404_v45 }
 0x1ca   : > { %v1850_v22 = vpop.permute.xlu0 %1849  ;;  %v1852_v13 = vpop.permute.xlu1 %1851 }
 0x1cb   : > { %v1856_v25 = vsel %vm413_vm7, %v1850_v22, %v1852_v13 }
 0x1cc   : > { %2301 = vmatprep.subr.bf16.mxu0 %v1856_v25 }
 0x1ce   : > { %v1848_v51 = vpop.permute.xlu0 %1847  ;;  %v1742_v18 = vpop.permute.xlu1 %1741 }
 0x1cf   : > { %v1855_v39 = vsel %vm413_vm7, %v1848_v51, %v1850_v22  ;;  %v1746_v58 = vsel %vm1743_vm6, %v1740_v55, %v1742_v18  ;;  %v2842_v55 = vcombine.low %v3757_v56, %v3757_v56 }
 0x1d0   : > { %2302 = vmatpush1.bf16.msra.mxu0 %v1855_v39  ;;  %2899 = vmatprep.subr.bf16.mxu1 %v1746_v58 }
 0x1d2   : > { %v1438_v49 = vpop.permute.xlu0 %1437  ;;  %v1887_v27 = vpop.permute.xlu1 %1886 }
 0x1d3   : > { %v1442_v41 = vsel %vm1439_vm8, %v3704_v14, %v1438_v49 }
 0x1d4   : > { %2900 = vmatpush3.bf16.msra.mxu1 %v1442_v41 }
 0x1d6   : > { %v1889_v33 = vpop.permute.xlu0 %1888  ;;  %v1885_v29 = vpop.permute.xlu1 %1884 }
 0x1d7   : > { %v1893_v30 = vsel %vm1892_vm1, %v1885_v29, %v1887_v27  ;;  %v1894_v9 = vsel %vm1892_vm1, %v1887_v27, %v1889_v33 }
 0x1d8   : > { %2303 = vmatprep.subr.bf16.mxu0 %v1894_v9 }
 0x1d9   : > { %2304 = vmatpush1.bf16.msra.mxu0 %v1893_v30 }
 0x1da   : > { %v1780_v34 = vpop.permute.xlu0 %1779  ;;  %v1476_v35 = vpop.permute.xlu1 %1475 }
 0x1db   : > { %v1480_v59 = vsel %vm1477_vm10, %v3724_v36, %v1476_v35  ;;  %v1783_v46 = vsel %vm337_vm3, %v1778_v21, %v1780_v34  ;;  %vm1968_vm3 = vcmask 973824   ;;  %vm3078_vm10 = vmmov 0  }
 0x1dc   : > { %2901 = vmatprep.subr.bf16.mxu1 %v1783_v46 }
 0x1dd   : > { %2902 = vmatpush3.bf16.msra.mxu1 %v1480_v59  ;;  %v2519_v59 = vld [vmem:[%s3906_s2] sm:$0x7] }
 0x1de   : > { %v1925_v14 = vpop.permute.xlu0 %1924  ;;  %v1927_v31 = vpop.permute.xlu1 %1926 }
 0x1df   : > { %v1932_v61 = vsel %vm1930_vm2, %v1925_v14, %v1927_v31 }
 0x1e0   : > { %2305 = vmatprep.subr.bf16.mxu0 %v1932_v61 }
 0x1e2   : > { %v1923_v3 = vpop.permute.xlu0 %1922  ;;  %v1817_v43 = vpop.permute.xlu1 %1816 }
 0x1e3   : > { %v1931_v4 = vsel %vm1930_vm2, %v1923_v3, %v1925_v14  ;;  %v1820_v42 = vsel %vm375_vm5, %v1815_v12, %v1817_v43  ;;  %vm3943_vm5 = vcmask 130048  }
 0x1e4   : > { %2306 = vmatpush1.bf16.msra.mxu0 %v1931_v4  ;;  %2903 = vmatprep.subr.bf16.mxu1 %v1820_v42  ;;  %vm3944_vm8 = vmmov %vm3943_vm5 }
 0x1e6   : > { %v1514_v44 = vpop.permute.xlu0 %1513  ;;  %v1963_v36 = vpop.permute.xlu1 %1962 }
 0x1e7   : > { %v1518_v47 = vsel %vm1515_vm4, %v3745_v50, %v1514_v44  ;;  %vm3945_vm4 = vmmov %vm3943_vm5 }
 0x1e8   : > { %2904 = vmatpush3.bf16.msra.mxu1 %v1518_v47 }
 0x1ea   : > { %v1965_v52 = vpop.permute.xlu0 %1964  ;;  %v1961_v11 = vpop.permute.xlu1 %1960 }
 0x1eb   : > { %v1969_v53 = vsel %vm1968_vm3, %v1961_v11, %v1963_v36  ;;  %v1970_v10 = vsel %vm1968_vm3, %v1963_v36, %v1965_v52 }
 0x1ec   : > { %2307 = vmatprep.subr.bf16.mxu0 %v1970_v10 }
 0x1ed   : > { %2308 = vmatpush1.bf16.msra.mxu0 %v1969_v53 }
 0x1ee   : > { %v1854_v62 = vpop.permute.xlu0 %1853  ;;  %v1552_v63 = vpop.permute.xlu1 %1551 }
 0x1ef   : > { %v1556_v40 = vsel %vm1553_vm15, %v3774_v1, %v1552_v63  ;;  %v1857_v50 = vsel %vm413_vm7, %v1852_v13, %v1854_v62  ;;  %vm2006_vm7 = vcmask 965632  }
 0x1f0   : > { %2905 = vmatprep.subr.bf16.mxu1 %v1857_v50  ;;  %2310 = vmatmul.mubr.bf16.vlgmr.msra.gmra.mrb[0].mxu0 %v2842_v55 }
 0x1f1   : > { %2906 = vmatpush3.bf16.msra.mxu1 %v1556_v40  ;;  %2350 = vmatprep.mubr.bf16.mxu0 %v3076_v0 }
 0x1f2   : > { %v1891_v57 = vpop.permute.xlu0 %1890  ;;  %v1590_v19 = vpop.permute.xlu1 %1589 }
 0x1f3   : > { %v1594_v28 = vsel %vm3943_vm5, %v3795_v24, %v1590_v19  ;;  %v1895_v56 = vsel %vm1892_vm1, %v1889_v33, %v1891_v57  ;;  %v2521_v33 = vlaneseq }
 0x1f4   : > { %2907 = vmatprep.subr.bf16.mxu1 %v1895_v56 }
 0x1f5   : > { %2908 = vmatpush3.bf16.msra.mxu1 %v1594_v28  ;;  %v2522_v29 = vshrl.u32 %v2521_v33, 7 }
 0x1f6   : > { %v1929_v26 = vpop.permute.xlu0 %1928  ;;  %v1628_v21 = vpop.permute.xlu1 %1627 }
 0x1f7   : > { %v1632_v1 = vsel %vm1629_vm14, %v3809_v32, %v1628_v21  ;;  %v1933_v5 = vsel %vm1930_vm2, %v1927_v31, %v1929_v26  ;;  %v2523_v9 = vsub.s32 0, %v2522_v29  ;;  %v2527_v34 = vsub.s32 1, %v2522_v29 }
 0x1f8   : > { %2909 = vmatprep.subr.bf16.mxu1 %v1933_v5  ;;  %v2229_v7 = vpop.f32.mrb[0].mxu1  ;;  %v2531_v42 = vsub.s32 2, %v2522_v29 }
 0x1f9   : > { %2910 = vmatpush3.bf16.msra.mxu1 %v1632_v1  ;;  %v2231_v17 = vpop.f32.mrb[1].mxu1  ;;  %v2524_v3 = vrot.slane %v2519_v59, %v2523_v9  ;;  %v2528_v43 = vrot.slane %v2519_v59, %v2527_v34 }
 0x1fa   : > { %v2001_v23 = vpop.permute.xlu0 %2000  ;;  %v2003_v60 = vpop.permute.xlu1 %2002  ;;  %v2532_v62 = vrot.slane %v2519_v59, %v2531_v42 }
 0x1fb   : > { %v2008_v24 = vsel %vm2006_vm7, %v2001_v23, %v2003_v60  ;;  %v2233_v37 = vpop.f32.mrb[2].mxu1 }
 0x1fc   : > { %2318 = vmatprep.subr.bf16.mxu0 %v2008_v24  ;;  %v2234_v2 = vpop.f32.mrb[3].mxu1 }
 0x1fe   : > { %v1999_v6 = vpop.permute.xlu0 %1998  ;;  %v1967_v12 = vpop.permute.xlu1 %1966 }
 0x1ff   : > { %v2007_v15 = vsel %vm2006_vm7, %v1999_v6, %v2001_v23  ;;  %v1971_v32 = vsel %vm1968_vm3, %v1965_v52, %v1967_v12 }
 0x200   : > { %2319 = vmatpush1.bf16.msra.mxu0 %v2007_v15  ;;  %2911 = vmatprep.subr.bf16.mxu1 %v1971_v32 }
 0x201   : > { %2921 = vmatprep.subr.bf16.mxu0 %v3077_v38 }
 0x202   : > { %v1666_v48 = vpop.permute.xlu0 %1665  ;;  %v2005_v20 = vpop.permute.xlu1 %2004 }
 0x203   : > { %v1670_v45 = vsel %vm1667_vm13, %v3821_v8, %v1666_v48  ;;  %v2009_v54 = vsel %vm2006_vm7, %v2003_v60, %v2005_v20  ;;  %2845 = vmatmul.mubr.msk.bf16.vlgmr.msra.gmra.mrb[0].mxu0 %vm3944_vm8, %v3020_v16 }
 0x204   : > { %2912 = vmatpush3.bf16.msra.mxu1 %v1670_v45  ;;  %2922 = vmatpush3.bf16.msra.mxu0 %v2009_v54 }
 0x205   : > { %2923 = vmatprep.mubr.msk.bf16.mxu0 %vm3078_vm10, %v3077_v38 }
 0x207   : > { %2472 = vmatmul.mubr.bf16.vlgmr.msra.gmra.mrb[12].mxu1 %v2842_v55 }
 0x20b   : > { %2924 = vmatmul.mubr.msk.bf16.vlgmr.msra.gmra.mrb[4].mxu0 %vm3945_vm4, %v3020_v16 }
 0x248   : > { %v2869_v22 = vpop.f32.mrb[4].mxu1 }
 0x249   : > { %v2870_v13 = vpop.f32.mrb[5].mxu1 }
 0x24a   : > { %v2871_v25 = vadd.f32 %v2870_v13, %v2869_v22  ;;  %v2872_v51 = vpop.f32.mrb[6].mxu1 }
 0x24b   : > { %v2873_v18 = vpop.f32.mrb[7].mxu1 }
 0x296   : > { %v2891_v39 = vpop.f32.mrb[8].mxu1 }
 0x297   : > { %v2892_v58 = vpop.f32.mrb[9].mxu1 }
 0x298   : > { %v2893_v49 = vadd.f32 %v2892_v58, %v2891_v39  ;;  %v2894_v8 = vpop.f32.mrb[10].mxu1 }
 0x299   : > { %v2895_v27 = vpop.f32.mrb[11].mxu1 }
 0x29a   : > { %v2434_v41 = vadd.f32 %v2893_v49, %v2871_v25 }
 0x2d6   : > { %v2352_v30 = vpop.f32.mrb[0].mxu0 }
 0x2d7   : > { %v2927_v35 = vadd.f32 %v2352_v30, %v2229_v7  ;;  %v2354_v46 = vpop.f32.mrb[1].mxu0 }
 0x2d8   : > { %v2928_v14 = vadd.f32 %v2354_v46, %v2231_v17  ;;  %v2356_v31 = vpop.f32.mrb[2].mxu0 }
 0x2d9   : > { %v2357_v61 = vpop.f32.mrb[3].mxu0  ;;  %v2536_v11 = vmul.f32 %v2927_v35, %v2524_v3 }
 0x2da   : > { %v2913_v4 = vpop.f32.mrb[12].mxu1  ;;  %v2537_v53 = vmul.f32 %v2928_v14, %v2528_v43 }
 0x2db   : > { %v2914_v44 = vpop.f32.mrb[13].mxu1 }
 0x2dc   : > { %v2915_v36 = vadd.f32 %v2914_v44, %v2913_v4  ;;  %v2916_v47 = vpop.f32.mrb[14].mxu1  ;;  %v2539_v57 = vadd.f32 %v2537_v53, %v2536_v11 }
 0x2dd   : > { %v2917_v52 = vpop.f32.mrb[15].mxu1 }
 0x2de   : > { %v2474_v10 = vadd.f32 %v2915_v36, %v2434_v41  ;;  %v2513_v55 = vpop.f32.mrb[4].mxu0 }
 0x2df   : > { %v2925_v63 = vpop.f32.mrb[5].mxu0 }
 0x2e0   : > { %v2514_v40 = vadd.f32 %v2513_v55, %v2474_v10  ;;  %v2516_v50 = vpop.f32.mrb[6].mxu0 }
 0x2e1   : > { %v2926_v0 = vpop.f32.mrb[7].mxu0 }
 0x2e2   : > { %v2538_v19 = vmul.f32 %v2532_v62, %v2514_v40 }
 0x2e4   : > { %v2540_v28 = vadd.f32 %v2539_v57, %v2538_v19 }
 0x2e6   : > { %2541 = vadd.xlane.f32.xlu0 %v2540_v28 }
 0x373   : > { %v2542_v56 = vpop.xlane.xlu0 %2541 }
 0x374   : > { %v2543_v26 = vmul.f32 0.00390625, %v2542_v56 }
 0x376   : > { %v2544_v21 = vsub.f32 %v2927_v35, %v2543_v26  ;;  %v2545_v1 = vsub.f32 %v2928_v14, %v2543_v26  ;;  %v2546_v5 = vsub.f32 %v2514_v40, %v2543_v26 }
 0x378   : > { %v2547_v7 = vmul.f32 %v2544_v21, %v2524_v3  ;;  %v2548_v17 = vmul.f32 %v2545_v1, %v2528_v43  ;;  %v2549_v23 = vmul.f32 %v2546_v5, %v2532_v62 }
 0x37a   : > { %v2550_v60 = vmul.f32 %v2547_v7, %v2547_v7  ;;  %v2551_v24 = vmul.f32 %v2548_v17, %v2548_v17  ;;  %v2552_v37 = vmul.f32 %v2549_v23, %v2549_v23 }
 0x37c   : > { %v2553_v2 = vadd.f32 %v2551_v24, %v2550_v60 }
 0x37e   : > { %v2554_v6 = vadd.f32 %v2553_v2, %v2552_v37 }
 0x380   : > { %2555 = vadd.xlane.f32.xlu1 %v2554_v6 }
 0x40d   : > { %v2556_v12 = vpop.xlane.xlu1 %2555 }
 0x40e   : > { %v2557_v15 = vmul.f32 0.00390625, %v2556_v12 }
 0x410   : > { %v2558_v32 = vadd.f32 1e-05, %v2557_v15 }
 0x412   : > { %3021 = vrsqrt.f32 %v2558_v32 }
 0x41c   : > { %v3022_v16 = vpop.eup %3021 }
 0x41d   : > { %v2560_v38 = vmul.f32 %v3022_v16, %v2547_v7  ;;  %v2561_v48 = vmul.f32 %v3022_v16, %v2548_v17  ;;  %v2562_v20 = vmul.f32 %v3022_v16, %v2549_v23 }
 0x41f   : > { %v2563_v45 = vmax.f32 %v2560_v38, 0.0  ;;  %v2564_v54 = vmax.f32 %v2561_v48, 0.0  ;;  %v2565_v22 = vmax.f32 %v2562_v20, 0.0 }
 0x421   : > { %v2851_v13 = vpack.c.bf16 %v2564_v54, %v2563_v45  ;;  %v2852_v25 = vpack.c.bf16 %v2565_v22, %v2565_v22 }
 0x423   : > { %2579 = vst [vmem:[%s170_s10] sm:$0xff] %v2851_v13  ;;  %2580 = vst [vmem:[%s170_s10 + $0x8] sm:$0xf] %v2852_v25 }
 0x424 PF: > { %s13_s12 = sadd.s32 1, %s3029_s12  }
 0x425   : > { %p10_p4 = scmp.ge.s32.totalorder %s13_s12, 4  }
 0x427   :  { %12 = sbr.rel (!%p10_p4) target bundleno = 1 (0x1), region = 62 }

// kernel: cycle_generator_forward.9
= control target key start
LH: loop header
LB: loop body
LE: loop exit
PB: predicated region body
PF: predicated region fallthrough
CT: control target
= control target key end

     0   :  { %s823_s12 = smov 0   ;;  %s885_s0 = inlined_call_operand.vmem [shape: bf16[2,64,256], index: 0, kind: input, shape index: {}]   ;;  %s886_s1 = inlined_call_operand.vmem [shape: bf16[32,256], index: 1, kind: input, shape index: {}]   ;;  %s887_s2 = inlined_call_operand.vmem [shape: f32[1,128], index: 2, kind: input, shape index: {}]   ;;  %s888_s3 = inlined_call_operand.vmem [shape: bf16[2,32,128], index: 3, kind: output, shape index: {}]  }
   0x1 LB: > { %s642_s13 = sadd.s32 4294967295, %s798_s12   ;;  %p646_p0 = scmp.ge.s32.totalorder %s798_s12, 1  ;;  %s798_s12 = sphi %s823_s12, %s13_s12  }
   0x2   : > { %p137_p1 = scmp.lt.s32.totalorder %s798_s12, 3 }
   0x4   : > { %p138_p2 = pnand %p646_p0, %p137_p1 }
   0x5   : > { %p161_p3 = scmp.lt.s32.totalorder (!%p138_p2), %s642_s13, 1  ;;  %s800_s18 = smov (!%p138_p2), 123   ;;  %v780_v8 = vld [vmem:[%s886_s1 + $0x4] ss:$8 sps:$4 sm:$0xff] (!%p138_p2)   ;;  %v783_v9 = vld [vmem:[%s886_s1 + $0x14] ss:$8 sps:$4 sm:$0xff] (!%p138_p2)  }
   0x6   : > { %141 = sbr.rel (%p138_p2) target bundleno = 719 (0x2cf), region = 32  ;;  %s801_s19 = smov (!%p138_p2), 122   ;;  %487 = vmatprep.mubr.bf16.mxu0 (!%p138_p2), %v780_v8  ;;  %495 = vmatprep.mubr.bf16.mxu1 (!%p138_p2), %v783_v9  ;;  %vm333_vm0 = vcmask (!%p138_p2), 1006592   ;;  %vm402_vm1 = vcmask (!%p138_p2), 998400   ;;  %vm264_vm2 = vcmask (!%p138_p2), 1039360  }
   0x7   : > { %s802_s20 = smov (!%p138_p2), 127   ;;  %v778_v50 = vld [vmem:[%s886_s1] ss:$8 sps:$4 sm:$0xff] (!%p138_p2)   ;;  %v781_v51 = vld [vmem:[%s886_s1 + $0x10] ss:$8 sps:$4 sm:$0xff] (!%p138_p2)  }
   0x8   : > { %v683_v56 = vld [vmem:[%s887_s2] ss:$0 sm:$0xff] (!%p138_p2) }
   0xd   : > { %s890_s13 = smov (!%p161_p3, %s642_s13), 1 }
   0xe   : > { %s690_s14 = sshll.u32 %s890_s13, 6  ;;  %s691_s4 = sshll.u32 %s890_s13, 4 }
   0xf   : > { %s837_s17 = scalar_lea.vmem %s885_s0, %s690_s14  ;;  %s170_s7 = scalar_lea.vmem %s888_s3, %s691_s4 }
  0x10   : > { %v762_v0 = vld [vmem:[%s837_s17 + $0x10] ss:$8 sps:$4 sm:$0xff]   ;;  %v764_v1 = vld [vmem:[%s837_s17 + $0x14] ss:$8 sps:$4 sm:$0xff]   ;;  %v765_v2 = vld [vmem:[%s837_s17] ss:$8 sps:$4 sm:$0xff]  }
  0x11   : > { %321 = vrot.lane.b32.xlu1 %v762_v0, %s800_s18  ;;  %v767_v3 = vld [vmem:[%s837_s17 + $0x4] ss:$8 sps:$4 sm:$0xff]   ;;  %317 = vrot.lane.b32.xlu0 %v765_v2, %s800_s18  ;;  %v770_v5 = vld [vmem:[%s837_s17 + $0x20] ss:$8 sps:$4 sm:$0xff]  }
  0x12   : > { %v768_v4 = vld [vmem:[%s837_s17 + $0x24] ss:$8 sps:$4 sm:$0xff]   ;;  %v771_v6 = vld [vmem:[%s837_s17 + $0x34] ss:$8 sps:$4 sm:$0xff]   ;;  %v773_v7 = vld [vmem:[%s837_s17 + $0x30] ss:$8 sps:$4 sm:$0xff]  }
  0x13   : > { %v774_v13 = vld [vmem:[%s837_s17] ss:$8 sps:$4 sm:$0xff]   ;;  %v775_v18 = vld [vmem:[%s837_s17 + $0x10] ss:$8 sps:$4 sm:$0xff]  }
  0x14   : > { %v776_v22 = vld [vmem:[%s837_s17 + $0x20] ss:$8 sps:$4 sm:$0xff]   ;;  %v777_v26 = vld [vmem:[%s837_s17 + $0x30] ss:$8 sps:$4 sm:$0xff]  }
  0x15   : > { %323 = vrot.lane.b32.xlu1 %v764_v1, %s800_s18  ;;  %319 = vrot.lane.b32.xlu0 %v767_v3, %s800_s18 }
  0x19   : > { %327 = vrot.lane.b32.xlu1 %v768_v4, %s800_s18  ;;  %325 = vrot.lane.b32.xlu0 %v770_v5, %s800_s18 }
  0x1d   : > { %331 = vrot.lane.b32.xlu1 %v771_v6, %s800_s18  ;;  %329 = vrot.lane.b32.xlu0 %v773_v7, %s800_s18 }
  0x21   : > { %388 = vrot.lane.b32.xlu1 %v767_v3, %s801_s19  ;;  %386 = vrot.lane.b32.xlu0 %v765_v2, %s801_s19 }
  0x25   : > { %250 = vrot.lane.b32.xlu1 %v767_v3, %s802_s20  ;;  %248 = vrot.lane.b32.xlu0 %v765_v2, %s802_s20 }
  0x29   : > { %392 = vrot.lane.b32.xlu1 %v764_v1, %s801_s19  ;;  %390 = vrot.lane.b32.xlu0 %v762_v0, %s801_s19 }
  0x2d   : > { %254 = vrot.lane.b32.xlu1 %v764_v1, %s802_s20  ;;  %252 = vrot.lane.b32.xlu0 %v762_v0, %s802_s20 }
  0x31   : > { %396 = vrot.lane.b32.xlu1 %v768_v4, %s801_s19  ;;  %394 = vrot.lane.b32.xlu0 %v770_v5, %s801_s19 }
  0x35   : > { %258 = vrot.lane.b32.xlu1 %v768_v4, %s802_s20  ;;  %256 = vrot.lane.b32.xlu0 %v770_v5, %s802_s20 }
  0x39   : > { %400 = vrot.lane.b32.xlu1 %v771_v6, %s801_s19  ;;  %398 = vrot.lane.b32.xlu0 %v773_v7, %s801_s19 }
  0x3d   : > { %262 = vrot.lane.b32.xlu1 %v771_v6, %s802_s20  ;;  %260 = vrot.lane.b32.xlu0 %v773_v7, %s802_s20 }
  0x83   : > { %v322_v10 = vpop.permute.xlu1 %321  ;;  %v318_v11 = vpop.permute.xlu0 %317 }
  0x87   : > { %v324_v12 = vpop.permute.xlu1 %323  ;;  %v320_v14 = vpop.permute.xlu0 %319 }
  0x88   : > { %v334_v15 = vsel %vm333_vm0, %v318_v11, %v320_v14  ;;  %v335_v17 = vsel %vm333_vm0, %v322_v10, %v324_v12 }
  0x89   : > { %707 = vmatprep.subr.bf16.mxu0 %v334_v15  ;;  %735 = vmatprep.subr.bf16.mxu1 %v334_v15 }
  0x8a   : > { %708 = vmatpush3.bf16.msra.mxu0 %v774_v13  ;;  %743 = vmatpush3.bf16.msra.mxu1 %v774_v13 }
  0x8b   : > { %v328_v16 = vpop.permute.xlu1 %327  ;;  %v326_v19 = vpop.permute.xlu0 %325  ;;  %709 = vmatprep.subr.bf16.mxu0 %v335_v17  ;;  %736 = vmatprep.subr.bf16.mxu1 %v335_v17 }
  0x8c   : > { %v336_v21 = vsel %vm333_vm0, %v326_v19, %v328_v16 }
  0x8e   : > { %710 = vmatpush3.bf16.msra.mxu0 %v775_v18  ;;  %744 = vmatpush3.bf16.msra.mxu1 %v775_v18 }
  0x8f   : > { %v332_v20 = vpop.permute.xlu1 %331  ;;  %v330_v23 = vpop.permute.xlu0 %329  ;;  %711 = vmatprep.subr.bf16.mxu0 %v336_v21  ;;  %737 = vmatprep.subr.bf16.mxu1 %v336_v21 }
  0x90   : > { %v337_v25 = vsel %vm333_vm0, %v330_v23, %v332_v20 }
  0x92   : > { %712 = vmatpush3.bf16.msra.mxu0 %v776_v22  ;;  %745 = vmatpush3.bf16.msra.mxu1 %v776_v22 }
  0x93   : > { %v389_v24 = vpop.permute.xlu1 %388  ;;  %v387_v27 = vpop.permute.xlu0 %386  ;;  %713 = vmatprep.subr.bf16.mxu0 %v337_v25  ;;  %738 = vmatprep.subr.bf16.mxu1 %v337_v25 }
  0x94   : > { %v403_v29 = vsel %vm402_vm1, %v387_v27, %v389_v24 }
  0x96   : > { %714 = vmatpush3.bf16.msra.mxu0 %v777_v26  ;;  %746 = vmatpush3.bf16.msra.mxu1 %v777_v26 }
  0x97   : > { %v251_v28 = vpop.permute.xlu1 %250  ;;  %v249_v30 = vpop.permute.xlu0 %248  ;;  %715 = vmatprep.subr.bf16.mxu0 %v403_v29  ;;  %739 = vmatprep.subr.bf16.mxu1 %v403_v29 }
  0x98   : > { %v265_v31 = vsel %vm264_vm2, %v249_v30, %v251_v28 }
  0x9a   : > { %716 = vmatpush3.bf16.msra.mxu0 %v265_v31  ;;  %747 = vmatpush3.bf16.msra.mxu1 %v265_v31 }
  0x9b   : > { %v393_v32 = vpop.permute.xlu1 %392  ;;  %v391_v33 = vpop.permute.xlu0 %390 }
  0x9c   : > { %v404_v34 = vsel %vm402_vm1, %v391_v33, %v393_v32 }
  0x9d   : > { %717 = vmatprep.subr.bf16.mxu0 %v404_v34  ;;  %740 = vmatprep.subr.bf16.mxu1 %v404_v34 }
  0x9f   : > { %v255_v35 = vpop.permute.xlu1 %254  ;;  %v253_v36 = vpop.permute.xlu0 %252 }
  0xa0   : > { %v266_v37 = vsel %vm264_vm2, %v253_v36, %v255_v35 }
  0xa1   : > { %718 = vmatpush3.bf16.msra.mxu0 %v266_v37  ;;  %748 = vmatpush3.bf16.msra.mxu1 %v266_v37 }
  0xa3   : > { %v397_v38 = vpop.permute.xlu1 %396  ;;  %v395_v39 = vpop.permute.xlu0 %394 }
  0xa4   : > { %v405_v40 = vsel %vm402_vm1, %v395_v39, %v397_v38 }
  0xa5   : > { %719 = vmatprep.subr.bf16.mxu0 %v405_v40  ;;  %741 = vmatprep.subr.bf16.mxu1 %v405_v40 }
  0xa7   : > { %v259_v41 = vpop.permute.xlu1 %258  ;;  %v257_v42 = vpop.permute.xlu0 %256 }
  0xa8   : > { %v267_v43 = vsel %vm264_vm2, %v257_v42, %v259_v41 }
  0xa9   : > { %720 = vmatpush3.bf16.msra.mxu0 %v267_v43  ;;  %749 = vmatpush3.bf16.msra.mxu1 %v267_v43 }
  0xab   : > { %v401_v44 = vpop.permute.xlu1 %400  ;;  %v399_v45 = vpop.permute.xlu0 %398 }
  0xac   : > { %v406_v46 = vsel %vm402_vm1, %v399_v45, %v401_v44 }
  0xad   : > { %721 = vmatprep.subr.bf16.mxu0 %v406_v46  ;;  %742 = vmatprep.subr.bf16.mxu1 %v406_v46 }
  0xaf   : > { %v263_v47 = vpop.permute.xlu1 %262  ;;  %v261_v48 = vpop.permute.xlu0 %260 }
  0xb0   : > { %v268_v49 = vsel %vm264_vm2, %v261_v48, %v263_v47 }
  0xb1   : > { %722 = vmatpush3.bf16.msra.mxu0 %v268_v49  ;;  %750 = vmatpush3.bf16.msra.mxu1 %v268_v49 }
  0xb4   : > { %488 = vmatmul.mubr.bf16.vlgmr.msra.gmra.mrb[0].mxu0 %v778_v50  ;;  %496 = vmatmul.mubr.bf16.vlgmr.msra.gmra.mrb[0].mxu1 %v781_v51 }
 0x187   : > { %v723_v52 = vpop.f32.mrb[0].mxu0  ;;  %v729_v53 = vpop.f32.mrb[0].mxu1 }
 0x188   : > { %v724_v54 = vpop.f32.mrb[1].mxu0  ;;  %v730_v55 = vpop.f32.mrb[1].mxu1 }
 0x189   : > { %v725_v57 = vadd.f32 %v724_v54, %v723_v52  ;;  %v726_v58 = vpop.f32.mrb[2].mxu0  ;;  %v731_v59 = vadd.f32 %v730_v55, %v729_v53  ;;  %v732_v60 = vpop.f32.mrb[2].mxu1 }
 0x18a   : > { %v727_v61 = vpop.f32.mrb[3].mxu0  ;;  %v733_v62 = vpop.f32.mrb[3].mxu1 }
 0x18b   : > { %v728_v63 = vadd.f32 %v727_v61, %v726_v58  ;;  %v734_v0 = vadd.f32 %v733_v62, %v732_v60  ;;  %v511_v1 = vmul.f32 %v725_v57, %v683_v56  ;;  %v513_v3 = vmul.f32 %v731_v59, %v683_v56 }
 0x18d   : > { %515 = vadd.xlane.f32.xlu0 %v511_v1  ;;  %v512_v2 = vmul.f32 %v728_v63, %v683_v56  ;;  %v514_v4 = vmul.f32 %v734_v0, %v683_v56 }
 0x18f   : > { %517 = vadd.xlane.f32.xlu1 %v512_v2 }
 0x191   : > { %519 = vadd.xlane.f32.xlu0 %v513_v3 }
 0x195   : > { %521 = vadd.xlane.f32.xlu0 %v514_v4 }
 0x21a   : > { %v516_v5 = vpop.xlane.xlu0 %515 }
 0x21b   : > { %v523_v6 = vmul.f32 0.0625, %v516_v5 }
 0x21c   : > { %v518_v7 = vpop.xlane.xlu1 %517 }
 0x21d   : > { %v527_v8 = vsub.f32 %v725_v57, %v523_v6  ;;  %v524_v9 = vmul.f32 0.0625, %v518_v7 }
 0x21e   : > { %v520_v10 = vpop.xlane.xlu0 %519 }
 0x21f   : > { %v528_v11 = vsub.f32 %v728_v63, %v524_v9  ;;  %v525_v12 = vmul.f32 0.0625, %v520_v10  ;;  %v531_v13 = vmul.f32 %v683_v56, %v527_v8 }
 0x221   : > { %v529_v14 = vsub.f32 %v731_v59, %v525_v12  ;;  %v535_v15 = vmul.f32 %v531_v13, %v531_v13  ;;  %v532_v16 = vmul.f32 %v683_v56, %v528_v11 }
 0x222   : > { %v522_v17 = vpop.xlane.xlu0 %521 }
 0x223   : > { %v526_v18 = vmul.f32 0.0625, %v522_v17  ;;  %539 = vadd.xlane.f32.xlu1 %v535_v15  ;;  %v536_v19 = vmul.f32 %v532_v16, %v532_v16  ;;  %v533_v20 = vmul.f32 %v683_v56, %v529_v14 }
 0x225   : > { %v530_v21 = vsub.f32 %v734_v0, %v526_v18  ;;  %541 = vadd.xlane.f32.xlu0 %v536_v19  ;;  %v537_v22 = vmul.f32 %v533_v20, %v533_v20 }
 0x227   : > { %543 = vadd.xlane.f32.xlu1 %v537_v22  ;;  %v534_v23 = vmul.f32 %v683_v56, %v530_v21 }
 0x229   : > { %v538_v24 = vmul.f32 %v534_v23, %v534_v23 }
 0x22b   : > { %545 = vadd.xlane.f32.xlu0 %v538_v24 }
 0x2b0   : > { %v540_v25 = vpop.xlane.xlu1 %539 }
 0x2b1   : > { %v547_v26 = vmul.f32 0.0625, %v540_v25 }
 0x2b2   : > { %v542_v27 = vpop.xlane.xlu0 %541 }
 0x2b3   : > { %v551_v28 = vadd.f32 1e-05, %v547_v26  ;;  %v548_v29 = vmul.f32 0.0625, %v542_v27 }
 0x2b4   : > { %v544_v30 = vpop.xlane.xlu1 %543 }
 0x2b5   : > { %784 = vrsqrt.f32 %v551_v28  ;;  %v552_v31 = vadd.f32 1e-05, %v548_v29  ;;  %v549_v32 = vmul.f32 0.0625, %v544_v30 }
 0x2b7   : > { %786 = vrsqrt.f32 %v552_v31  ;;  %v553_v33 = vadd.f32 1e-05, %v549_v32 }
 0x2b8   : > { %v546_v34 = vpop.xlane.xlu0 %545 }
 0x2b9   : > { %788 = vrsqrt.f32 %v553_v33  ;;  %v550_v35 = vmul.f32 0.0625, %v546_v34 }
 0x2bb   : > { %v554_v36 = vadd.f32 1e-05, %v550_v35 }
 0x2bd   : > { %790 = vrsqrt.f32 %v554_v36 }
 0x2bf   : > { %v785_v37 = vpop.eup %784 }
 0x2c0   : > { %v559_v38 = vmul.f32 %v785_v37, %v531_v13 }
 0x2c1   : > { %v787_v39 = vpop.eup %786 }
 0x2c2   : > { %v560_v40 = vmul.f32 %v787_v39, %v532_v16  ;;  %v563_v42 = vmax.f32 %v559_v38, 0.0 }
 0x2c3   : > { %v789_v41 = vpop.eup %788 }
 0x2c4   : > { %v564_v43 = vmax.f32 %v560_v40, 0.0  ;;  %v561_v45 = vmul.f32 %v789_v41, %v533_v20 }
 0x2c6   : > { %v699_v44 = vpack.c.bf16 %v564_v43, %v563_v42  ;;  %v565_v48 = vmax.f32 %v561_v45, 0.0 }
 0x2c7   : > { %v791_v46 = vpop.eup %790 }
 0x2c8   : > { %700 = vst [vmem:[%s170_s7] sm:$0xff] %v699_v44   ;;  %v562_v47 = vmul.f32 %v791_v46, %v534_v23 }
 0x2ca   : > { %v566_v49 = vmax.f32 %v562_v47, 0.0 }
 0x2cc   : > { %v704_v50 = vpack.c.bf16 %v566_v49, %v565_v48 }
 0x2ce   : > { %706 = vst [vmem:[%s170_s7 + $0x8] sm:$0xff] %v704_v50  }
 0x2cf PF: > { %s13_s12 = sadd.s32 1, %s798_s12  }
 0x2d0   : > { %p10_p4 = scmp.ge.s32.totalorder %s13_s12, 4  }
 0x2d2   :  { %12 = sbr.rel (!%p10_p4) target bundleno = 1 (0x1), region = 62 }

// kernel: cycle_generator_forward.11
= control target key start
LH: loop header
LB: loop body
LE: loop exit
PB: predicated region body
PF: predicated region fallthrough
CT: control target
= control target key end

     0   :  { %s795_s12 = smov 0   ;;  %s849_s0 = inlined_call_operand.vmem [shape: bf16[2,32,384], index: 0, kind: input, shape index: {}]   ;;  %s850_s1 = inlined_call_operand.vmem [shape: bf16[64,128], index: 1, kind: input, shape index: {}]   ;;  %s851_s2 = inlined_call_operand.vmem [shape: f32[1,128], index: 2, kind: input, shape index: {}]   ;;  %s852_s3 = inlined_call_operand.vmem [shape: bf16[2,4,16,128], index: 3, kind: output, shape index: {}]  }
   0x1 LB: > { %s609_s13 = sadd.s32 4294967295, %s770_s12   ;;  %p613_p0 = scmp.ge.s32.totalorder %s770_s12, 1  ;;  %s770_s12 = sphi %s795_s12, %s13_s12  }
   0x2   : > { %p137_p1 = scmp.lt.s32.totalorder %s770_s12, 3 }
   0x4   : > { %p138_p2 = pnand %p613_p0, %p137_p1 }
   0x5   : > { %p161_p3 = scmp.lt.s32.totalorder (!%p138_p2), %s609_s13, 1  ;;  %s772_s18 = smov (!%p138_p2), 127   ;;  %v756_v6 = vld [vmem:[%s850_s1] sm:$0xff] (!%p138_p2)   ;;  %v757_v7 = vld [vmem:[%s850_s1 + $0x10] sm:$0xff] (!%p138_p2)   ;;  %vm218_vm0 = vcmask (!%p138_p2), 1039360   ;;  %vm253_vm1 = vcmask (!%p138_p2), 998400  }
   0x6   : > { %141 = sbr.rel (%p138_p2) target bundleno = 723 (0x2d3), region = 32  ;;  %s773_s19 = smov (!%p138_p2), 122   ;;  %712 = vmatprep.mubr.bf16.mxu0 (!%p138_p2), %v756_v6  ;;  %716 = vmatprep.mubr.bf16.mxu1 (!%p138_p2), %v757_v7  ;;  %vm288_vm2 = vcmask (!%p138_p2), 990208   ;;  %v758_v26 = vld [vmem:[%s850_s1 + $0x8] sm:$0xff] (!%p138_p2)   ;;  %v759_v27 = vld [vmem:[%s850_s1 + $0x18] sm:$0xff] (!%p138_p2)  }
   0x7   : > { %s774_s24 = smov (!%p138_p2), 121   ;;  %v824_v28 = vld [vmem:[%s851_s2] ss:$0 sm:$0xff] (!%p138_p2) }
   0xd   : > { %s854_s13 = smov (!%p161_p3, %s609_s13), 1 }
   0xe   : > { %s736_s14 = smul.u32 48, %s854_s13  ;;  %s652_s4 = sshll.u32 %s854_s13, 5 }
   0xf   : > { %s170_s7 = scalar_lea.vmem %s852_s3, %s652_s4 }
  0x10   : > { %s165_s17 = scalar_lea.vmem %s849_s0, %s736_s14 }
  0x11   : > { %v748_v0 = vld [vmem:[%s165_s17 + $0x1c] ss:$12 sps:$4 sm:$0xff]   ;;  %v750_v1 = vld [vmem:[%s165_s17 + $0x20] ss:$12 sps:$4 sm:$0xff]   ;;  %v751_v2 = vld [vmem:[%s165_s17 + $0x4] ss:$12 sps:$4 sm:$0xff]  }
  0x12   : > { %214 = vrot.lane.b32.xlu1 %v748_v0, %s772_s18  ;;  %v754_v3 = vld [vmem:[%s165_s17 + $0x4] ss:$12 sps:$4 sm:$0xff]   ;;  %v753_v4 = vld [vmem:[%s165_s17 + $0x8] ss:$12 sps:$4 sm:$0xff]   ;;  %210 = vrot.lane.b32.xlu0 %v751_v2, %s772_s18 }
  0x13   : > { %v755_v5 = vld [vmem:[%s165_s17 + $0x1c] ss:$12 sps:$4 sm:$0xff]   ;;  %696 = vmatprep.subr.bf16.mxu0 %v754_v3  ;;  %720 = vmatprep.subr.bf16.mxu1 %v754_v3 }
  0x14   : > { %697 = vmatpush3.bf16.msra.mxu0 %v754_v3  ;;  %728 = vmatpush3.bf16.msra.mxu1 %v754_v3 }
  0x15   : > { %698 = vmatprep.subr.bf16.mxu0 %v755_v5  ;;  %721 = vmatprep.subr.bf16.mxu1 %v755_v5 }
  0x16   : > { %216 = vrot.lane.b32.xlu1 %v750_v1, %s772_s18  ;;  %212 = vrot.lane.b32.xlu0 %v753_v4, %s772_s18 }
  0x18   : > { %699 = vmatpush3.bf16.msra.mxu0 %v755_v5  ;;  %729 = vmatpush3.bf16.msra.mxu1 %v755_v5 }
  0x1a   : > { %247 = vrot.lane.b32.xlu1 %v753_v4, %s773_s19  ;;  %245 = vrot.lane.b32.xlu0 %v751_v2, %s773_s19 }
  0x1e   : > { %251 = vrot.lane.b32.xlu1 %v750_v1, %s773_s19  ;;  %249 = vrot.lane.b32.xlu0 %v748_v0, %s773_s19 }
  0x22   : > { %282 = vrot.lane.b32.xlu1 %v753_v4, %s774_s24  ;;  %280 = vrot.lane.b32.xlu0 %v751_v2, %s774_s24 }
  0x26   : > { %286 = vrot.lane.b32.xlu1 %v750_v1, %s774_s24  ;;  %284 = vrot.lane.b32.xlu0 %v748_v0, %s774_s24 }
  0x84   : > { %v215_v8 = vpop.permute.xlu1 %214  ;;  %v211_v9 = vpop.permute.xlu0 %210 }
  0x88   : > { %v217_v10 = vpop.permute.xlu1 %216  ;;  %v213_v11 = vpop.permute.xlu0 %212 }
  0x89   : > { %v219_v12 = vsel %vm218_vm0, %v211_v9, %v213_v11  ;;  %v220_v14 = vsel %vm218_vm0, %v215_v8, %v217_v10 }
  0x8a   : > { %700 = vmatprep.subr.bf16.mxu0 %v219_v12  ;;  %722 = vmatprep.subr.bf16.mxu1 %v219_v12 }
  0x8b   : > { %701 = vmatpush3.bf16.msra.mxu0 %v219_v12  ;;  %730 = vmatpush3.bf16.msra.mxu1 %v219_v12 }
  0x8c   : > { %v248_v13 = vpop.permute.xlu1 %247  ;;  %702 = vmatprep.subr.bf16.mxu0 %v220_v14  ;;  %723 = vmatprep.subr.bf16.mxu1 %v220_v14  ;;  %v246_v15 = vpop.permute.xlu0 %245 }
  0x8d   : > { %v254_v16 = vsel %vm253_vm1, %v246_v15, %v248_v13 }
  0x8f   : > { %703 = vmatpush3.bf16.msra.mxu0 %v220_v14  ;;  %731 = vmatpush3.bf16.msra.mxu1 %v220_v14 }
  0x90   : > { %v252_v17 = vpop.permute.xlu1 %251  ;;  %704 = vmatprep.subr.bf16.mxu0 %v254_v16  ;;  %724 = vmatprep.subr.bf16.mxu1 %v254_v16  ;;  %v250_v18 = vpop.permute.xlu0 %249 }
  0x91   : > { %v255_v19 = vsel %vm253_vm1, %v250_v18, %v252_v17 }
  0x93   : > { %705 = vmatpush3.bf16.msra.mxu0 %v254_v16  ;;  %732 = vmatpush3.bf16.msra.mxu1 %v254_v16 }
  0x94   : > { %v283_v20 = vpop.permute.xlu1 %282  ;;  %706 = vmatprep.subr.bf16.mxu0 %v255_v19  ;;  %725 = vmatprep.subr.bf16.mxu1 %v255_v19  ;;  %v281_v21 = vpop.permute.xlu0 %280 }
  0x95   : > { %v289_v22 = vsel %vm288_vm2, %v281_v21, %v283_v20 }
  0x97   : > { %707 = vmatpush3.bf16.msra.mxu0 %v255_v19  ;;  %733 = vmatpush3.bf16.msra.mxu1 %v255_v19 }
  0x98   : > { %v287_v23 = vpop.permute.xlu1 %286  ;;  %708 = vmatprep.subr.bf16.mxu0 %v289_v22  ;;  %726 = vmatprep.subr.bf16.mxu1 %v289_v22  ;;  %v285_v24 = vpop.permute.xlu0 %284 }
  0x99   : > { %v290_v25 = vsel %vm288_vm2, %v285_v24, %v287_v23 }
  0x9b   : > { %709 = vmatpush3.bf16.msra.mxu0 %v289_v22  ;;  %734 = vmatpush3.bf16.msra.mxu1 %v289_v22 }
  0x9c   : > { %710 = vmatprep.subr.bf16.mxu0 %v290_v25  ;;  %727 = vmatprep.subr.bf16.mxu1 %v290_v25 }
  0x9f   : > { %711 = vmatpush3.bf16.msra.mxu0 %v290_v25  ;;  %735 = vmatpush3.bf16.msra.mxu1 %v290_v25 }
  0xa2   : > { %713 = vmatmul.mubr.bf16.vlgmr.msra.gmra.mrb[0].mxu0 %v758_v26  ;;  %717 = vmatmul.mubr.bf16.vlgmr.msra.gmra.mrb[0].mxu1 %v759_v27 }
 0x175   : > { %v714_v29 = vpop.f32.mrb[0].mxu0  ;;  %v718_v30 = vpop.f32.mrb[0].mxu1 }
 0x176   : > { %v369_v31 = vpop.f32.mrb[1].mxu0  ;;  %v385_v32 = vpop.f32.mrb[1].mxu1  ;;  %v415_v33 = vmul.f32 %v714_v29, %v824_v28  ;;  %v431_v42 = vmul.f32 %v718_v30, %v824_v28 }
 0x177   : > { %v715_v34 = vpop.f32.mrb[2].mxu0  ;;  %v423_v35 = vmul.f32 %v824_v28, %v385_v32  ;;  %v719_v36 = vpop.f32.mrb[2].mxu1  ;;  %v407_v39 = vmul.f32 %v824_v28, %v369_v31 }
 0x178   : > { %417 = vadd.xlane.f32.xlu0 %v415_v33  ;;  %v372_v37 = vpop.f32.mrb[3].mxu0  ;;  %v388_v38 = vpop.f32.mrb[3].mxu1  ;;  %v416_v41 = vmul.f32 %v715_v34, %v824_v28  ;;  %v432_v44 = vmul.f32 %v719_v36, %v824_v28 }
 0x179   : > { %425 = vadd.xlane.f32.xlu1 %v423_v35  ;;  %v408_v40 = vmul.f32 %v824_v28, %v372_v37  ;;  %v424_v43 = vmul.f32 %v824_v28, %v388_v38 }
 0x17c   : > { %409 = vadd.xlane.f32.xlu0 %v407_v39 }
 0x17d   : > { %411 = vadd.xlane.f32.xlu1 %v408_v40 }
 0x180   : > { %419 = vadd.xlane.f32.xlu0 %v416_v41 }
 0x181   : > { %433 = vadd.xlane.f32.xlu1 %v431_v42 }
 0x184   : > { %427 = vadd.xlane.f32.xlu0 %v424_v43 }
 0x188   : > { %435 = vadd.xlane.f32.xlu0 %v432_v44 }
 0x205   : > { %v418_v45 = vpop.xlane.xlu0 %417 }
 0x206   : > { %v426_v46 = vpop.xlane.xlu1 %425 }
 0x209   : > { %v410_v47 = vpop.xlane.xlu0 %409 }
 0x20a   : > { %v421_v48 = vadd.f32 %v418_v45, %v410_v47  ;;  %v412_v49 = vpop.xlane.xlu1 %411 }
 0x20c   : > { %v429_v50 = vadd.f32 %v426_v46, %v421_v48 }
 0x20d   : > { %v420_v51 = vpop.xlane.xlu0 %419 }
 0x20e   : > { %v434_v52 = vpop.xlane.xlu1 %433  ;;  %v422_v56 = vadd.f32 %v420_v51, %v412_v49 }
 0x20f   : > { %v437_v53 = vadd.f32 %v434_v52, %v429_v50 }
 0x211   : > { %v439_v54 = vmul.f32 0.015625, %v437_v53  ;;  %v428_v55 = vpop.xlane.xlu0 %427 }
 0x212   : > { %v430_v59 = vadd.f32 %v428_v55, %v422_v56 }
 0x213   : > { %v441_v57 = vsub.f32 %v369_v31, %v439_v54  ;;  %v445_v58 = vsub.f32 %v714_v29, %v439_v54  ;;  %v449_v1 = vsub.f32 %v385_v32, %v439_v54  ;;  %v453_v7 = vsub.f32 %v718_v30, %v439_v54 }
 0x215   : > { %v436_v60 = vpop.xlane.xlu0 %435  ;;  %v443_v61 = vmul.f32 %v824_v28, %v441_v57  ;;  %v447_v0 = vmul.f32 %v824_v28, %v445_v58  ;;  %v451_v6 = vmul.f32 %v824_v28, %v449_v1  ;;  %v455_v13 = vmul.f32 %v824_v28, %v453_v7 }
 0x216   : > { %v438_v62 = vadd.f32 %v436_v60, %v430_v59 }
 0x217   : > { %v457_v63 = vmul.f32 %v443_v61, %v443_v61  ;;  %v465_v5 = vmul.f32 %v447_v0, %v447_v0  ;;  %v473_v12 = vmul.f32 %v451_v6, %v451_v6  ;;  %v481_v17 = vmul.f32 %v455_v13, %v455_v13 }
 0x218   : > { %v440_v2 = vmul.f32 0.015625, %v438_v62 }
 0x219   : > { %459 = vadd.xlane.f32.xlu1 %v457_v63 }
 0x21a   : > { %v442_v3 = vsub.f32 %v372_v37, %v440_v2  ;;  %v446_v4 = vsub.f32 %v715_v34, %v440_v2  ;;  %v450_v11 = vsub.f32 %v388_v38, %v440_v2  ;;  %v454_v16 = vsub.f32 %v719_v36, %v440_v2 }
 0x21c   : > { %v444_v8 = vmul.f32 %v824_v28, %v442_v3  ;;  %v448_v10 = vmul.f32 %v824_v28, %v446_v4  ;;  %v452_v15 = vmul.f32 %v824_v28, %v450_v11  ;;  %v456_v19 = vmul.f32 %v824_v28, %v454_v16 }
 0x21d   : > { %467 = vadd.xlane.f32.xlu1 %v465_v5 }
 0x21e   : > { %v458_v9 = vmul.f32 %v444_v8, %v444_v8  ;;  %v466_v14 = vmul.f32 %v448_v10, %v448_v10  ;;  %v474_v18 = vmul.f32 %v452_v15, %v452_v15  ;;  %v482_v20 = vmul.f32 %v456_v19, %v456_v19 }
 0x220   : > { %461 = vadd.xlane.f32.xlu0 %v458_v9 }
 0x221   : > { %475 = vadd.xlane.f32.xlu1 %v473_v12 }
 0x224   : > { %469 = vadd.xlane.f32.xlu0 %v466_v14 }
 0x225   : > { %483 = vadd.xlane.f32.xlu1 %v481_v17 }
 0x228   : > { %477 = vadd.xlane.f32.xlu0 %v474_v18 }
 0x22c   : > { %485 = vadd.xlane.f32.xlu0 %v482_v20 }
 0x2a6   : > { %v460_v21 = vpop.xlane.xlu1 %459 }
 0x2aa   : > { %v468_v22 = vpop.xlane.xlu1 %467 }
 0x2ab   : > { %v471_v25 = vadd.f32 %v468_v22, %v460_v21 }
 0x2ad   : > { %v462_v23 = vpop.xlane.xlu0 %461 }
 0x2ae   : > { %v476_v24 = vpop.xlane.xlu1 %475 }
 0x2af   : > { %v479_v26 = vadd.f32 %v476_v24, %v471_v25 }
 0x2b1   : > { %v470_v27 = vpop.xlane.xlu0 %469 }
 0x2b2   : > { %v484_v29 = vpop.xlane.xlu1 %483  ;;  %v472_v33 = vadd.f32 %v470_v27, %v462_v23 }
 0x2b3   : > { %v487_v30 = vadd.f32 %v484_v29, %v479_v26 }
 0x2b5   : > { %v489_v31 = vmul.f32 0.015625, %v487_v30  ;;  %v478_v32 = vpop.xlane.xlu0 %477 }
 0x2b6   : > { %v480_v35 = vadd.f32 %v478_v32, %v472_v33 }
 0x2b7   : > { %v491_v34 = vadd.f32 1e-05, %v489_v31 }
 0x2b9   : > { %v486_v36 = vpop.xlane.xlu0 %485  ;;  %760 = vrsqrt.f32 %v491_v34 }
 0x2ba   : > { %v488_v28 = vadd.f32 %v486_v36, %v480_v35 }
 0x2bc   : > { %v490_v37 = vmul.f32 0.015625, %v488_v28 }
 0x2be   : > { %v492_v38 = vadd.f32 1e-05, %v490_v37 }
 0x2c0   : > { %762 = vrsqrt.f32 %v492_v38 }
 0x2c3   : > { %v761_v39 = vpop.eup %760 }
 0x2c4   : > { %v495_v40 = vmul.f32 %v761_v39, %v443_v61  ;;  %v509_v41 = vmul.f32 %v761_v39, %v447_v0  ;;  %v524_v42 = vmul.f32 %v761_v39, %v451_v6  ;;  %v539_v43 = vmul.f32 %v761_v39, %v455_v13 }
 0x2c6   : > { %v497_v49 = vmax.f32 %v495_v40, 0.0  ;;  %v511_v50 = vmax.f32 %v509_v41, 0.0  ;;  %v526_v51 = vmax.f32 %v524_v42, 0.0  ;;  %v541_v52 = vmax.f32 %v539_v43, 0.0 }
 0x2ca   : > { %v763_v44 = vpop.eup %762 }
 0x2cb   : > { %v496_v45 = vmul.f32 %v763_v44, %v444_v8  ;;  %v510_v46 = vmul.f32 %v763_v44, %v448_v10  ;;  %v525_v47 = vmul.f32 %v763_v44, %v452_v15  ;;  %v540_v48 = vmul.f32 %v763_v44, %v456_v19 }
 0x2cd   : > { %v498_v53 = vmax.f32 %v496_v45, 0.0  ;;  %v512_v54 = vmax.f32 %v510_v46, 0.0  ;;  %v527_v55 = vmax.f32 %v525_v47, 0.0  ;;  %v542_v56 = vmax.f32 %v540_v48, 0.0 }
 0x2cf   : > { %v664_v57 = vpack.c.bf16 %v498_v53, %v497_v49  ;;  %v669_v58 = vpack.c.bf16 %v512_v54, %v511_v50  ;;  %v674_v59 = vpack.c.bf16 %v527_v55, %v526_v51  ;;  %v679_v60 = vpack.c.bf16 %v542_v56, %v541_v52 }
 0x2d1   : > { %665 = vst [vmem:[%s170_s7] sm:$0xff] %v664_v57   ;;  %681 = vst [vmem:[%s170_s7 + $0x8] sm:$0xff] %v669_v58  }
 0x2d2   : > { %682 = vst [vmem:[%s170_s7 + $0x10] sm:$0xff] %v674_v59   ;;  %683 = vst [vmem:[%s170_s7 + $0x18] sm:$0xff] %v679_v60  }
 0x2d3 PF: > { %s13_s12 = sadd.s32 1, %s770_s12  }
 0x2d4   : > { %p10_p4 = scmp.ge.s32.totalorder %s13_s12, 4  }
 0x2d6   :  { %12 = sbr.rel (!%p10_p4) target bundleno = 1 (0x1), region = 65 }

// kernel: cycle_generator_forward.10
= control target key start
LH: loop header
LB: loop body
LE: loop exit
PB: predicated region body
PF: predicated region fallthrough
CT: control target
= control target key end

     0   :  { %s1379_s12 = smov 0   ;;  %s1667_s0 = inlined_call_operand.vmem [shape: bf16[2,32,384], index: 0, kind: input, shape index: {}]   ;;  %s1668_s1 = inlined_call_operand.vmem [shape: bf16[2,32,288], index: 1, kind: input, shape index: {}]   ;;  %s1669_s2 = inlined_call_operand.vmem [shape: f32[1,128], index: 2, kind: input, shape index: {}]   ;;  %s1670_s3 = inlined_call_operand.vmem [shape: bf16[2,32,384], index: 3, kind: output, shape index: {}]  }
   0x1 LB: > { %s1150_s13 = sadd.s32 4294967295, %s1349_s12   ;;  %p1154_p0 = scmp.ge.s32.totalorder %s1349_s12, 1  ;;  %s1349_s12 = sphi %s1379_s12, %s13_s12  }
   0x2   : > { %p137_p1 = scmp.lt.s32.totalorder %s1349_s12, 3 }
   0x4   : > { %p138_p2 = pnand %p1154_p0, %p137_p1 }
   0x5   : > { %p161_p3 = scmp.lt.s32.totalorder (!%p138_p2), %s1150_s13, 1  ;;  %s1351_s18 = smov (!%p138_p2), 7   ;;  %v1313_v18 = vld [vmem:[%s1668_s1 + $0x4] ss:$12 sps:$4 sm:$0xff] (!%p138_p2)   ;;  %v1317_v19 = vld [vmem:[%s1668_s1 + $0x8] ss:$12 sps:$4 sm:$0xff] (!%p138_p2)  }
   0x6   : > { %141 = sbr.rel (%p138_p2) target bundleno = 1434 (0x59a), region = 32  ;;  %s1352_s22 = smov (!%p138_p2), 127   ;;  %502 = vmatprep.mubr.bf16.mxu0 (!%p138_p2), %v1313_v18  ;;  %vm463_vm0 = vcmask (!%p138_p2), 261120   ;;  %vm235_vm1 = vcmask (!%p138_p2), 56320   ;;  %vm331_vm2 = vcmask (!%p138_p2), 1039360   ;;  %vm258_vm3 = vcmask (!%p138_p2), 48128  }
   0x7   : > { %s1353_s23 = smov (!%p138_p2), 6   ;;  %s1354_s24 = smov (!%p138_p2), 123   ;;  %1272 = vmatprep.mubr.msk.bf16.mxu1 (!%p138_p2), %vm463_vm0, %v1317_v19  ;;  %vm354_vm4 = vcmask (!%p138_p2), 1006592   ;;  %vm281_vm5 = vcmask (!%p138_p2), 39936   ;;  %vm377_vm6 = vcmask (!%p138_p2), 998400   ;;  %vm304_vm7 = vcmask (!%p138_p2), 7168  }
   0x8   : > { %s1355_s25 = smov (!%p138_p2), 5   ;;  %s1356_s26 = smov (!%p138_p2), 122   ;;  %v1311_v62 = vld [vmem:[%s1668_s1] ss:$12 sps:$4 sm:$0xff] (!%p138_p2)   ;;  %vm400_vm8 = vcmask (!%p138_p2), 990208  }
   0x9   : > { %s1357_s29 = smov (!%p138_p2), 1   ;;  %s1358_s5 = smov (!%p138_p2), 121   ;;  %v1314_v63 = vld [vmem:[%s1668_s1 + $0x1c] ss:$12 sps:$4 sm:$0xff] (!%p138_p2)  }
   0xd   : > { %s1672_s13 = smov (!%p161_p3, %s1150_s13), 1 }
   0xe   : > { %s1284_s14 = smul.u32 48, %s1672_s13 }
  0x10   : > { %s165_s17 = scalar_lea.vmem %s1667_s0, %s1284_s14  ;;  %s1411_s21 = scalar_lea.vmem %s1670_s3, %s1284_s14 }
  0x11   : > { %v1390_v0 = vld [vmem:[%s165_s17 + $0x18] sm:$0xff]  ;;  %v178_v1 = vld [vmem:[%s165_s17 + $0x24] sm:$0xff]  ;;  %v174_v4 = vld [vmem:[%s165_s17 + $0xc] sm:$0xff] }
  0x12   : > { %v1392_v2 = vld [vmem:[%s165_s17] sm:$0xff]  ;;  %v1395_v3 = vcombine.low %v1390_v0, %v178_v1  ;;  %v173_v5 = vld [vmem:[%s165_s17 + $0x8] sm:$0xf]  ;;  %v175_v8 = vld [vmem:[%s165_s17 + $0x14] sm:$0xf]  ;;  %v1404_v12 = vcombine.high %v1390_v0, %v178_v1 }
  0x13   : > { %v1398_v6 = vcombine.low %v1392_v2, %v174_v4  ;;  %v1401_v7 = vcombine.high %v1392_v2, %v174_v4  ;;  %v1199_v9 = vcombine.low %v173_v5, %v173_v5  ;;  %v177_v10 = vld [vmem:[%s165_s17 + $0x20] sm:$0xf]  ;;  %v179_v11 = vld [vmem:[%s165_s17 + $0x2c] sm:$0xf]  ;;  %v1200_v13 = vcombine.low %v175_v8, %v175_v8 }
  0x14   : > { %231 = vrot.lane.b32.xlu1 %v1395_v3, %s1351_s18  ;;  %v1202_v14 = vcombine.low %v177_v10, %v177_v10  ;;  %v1203_v15 = vcombine.low %v179_v11, %v179_v11  ;;  %v1422_v16 = vcombine.low %v173_v5, %v175_v8  ;;  %v1432_v17 = vcombine.low %v177_v10, %v179_v11  ;;  %v1316_v11 = vld [vmem:[%s1668_s1 + $0x18] ss:$12 sps:$4 sm:$0xff]  }
  0x15   : > { %227 = vrot.lane.b32.xlu0 %v1398_v6, %s1351_s18  ;;  %1088 = vst [vmem:[%s1411_s21 + $0x8] sm:$0xf] %v1199_v9  ;;  %1204 = vmatprep.subr.bf16.mxu0 %v1401_v7  ;;  %1090 = vst [vmem:[%s1411_s21 + $0x14] sm:$0xf] %v1200_v13  ;;  %v1318_v13 = vld [vmem:[%s1668_s1 + $0x20] ss:$12 sps:$4 sm:$0xff]  }
  0x16   : > { %1092 = vst [vmem:[%s1411_s21 + $0x20] sm:$0xf] %v1202_v14  ;;  %1094 = vst [vmem:[%s1411_s21 + $0x2c] sm:$0xf] %v1203_v15 }
  0x18   : > { %233 = vrot.lane.b32.xlu1 %v1404_v12, %s1351_s18 }
  0x19   : > { %229 = vrot.lane.b32.xlu0 %v1401_v7, %s1351_s18 }
  0x1c   : > { %325 = vrot.lane.b32.xlu1 %v1422_v16, %s1352_s22 }
  0x1d   : > { %323 = vrot.lane.b32.xlu0 %v1401_v7, %s1352_s22 }
  0x20   : > { %252 = vrot.lane.b32.xlu1 %v1401_v7, %s1353_s23 }
  0x21   : > { %250 = vrot.lane.b32.xlu0 %v1398_v6, %s1353_s23 }
  0x24   : > { %329 = vrot.lane.b32.xlu1 %v1432_v17, %s1352_s22 }
  0x25   : > { %327 = vrot.lane.b32.xlu0 %v1404_v12, %s1352_s22 }
  0x28   : > { %256 = vrot.lane.b32.xlu1 %v1404_v12, %s1353_s23 }
  0x29   : > { %254 = vrot.lane.b32.xlu0 %v1395_v3, %s1353_s23 }
  0x2c   : > { %348 = vrot.lane.b32.xlu1 %v1422_v16, %s1354_s24 }
  0x2d   : > { %346 = vrot.lane.b32.xlu0 %v1401_v7, %s1354_s24 }
  0x30   : > { %275 = vrot.lane.b32.xlu1 %v1401_v7, %s1355_s25 }
  0x31   : > { %273 = vrot.lane.b32.xlu0 %v1398_v6, %s1355_s25 }
  0x34   : > { %352 = vrot.lane.b32.xlu1 %v1432_v17, %s1354_s24 }
  0x35   : > { %350 = vrot.lane.b32.xlu0 %v1404_v12, %s1354_s24 }
  0x38   : > { %279 = vrot.lane.b32.xlu1 %v1404_v12, %s1355_s25 }
  0x39   : > { %277 = vrot.lane.b32.xlu0 %v1395_v3, %s1355_s25 }
  0x3c   : > { %371 = vrot.lane.b32.xlu1 %v1422_v16, %s1356_s26 }
  0x3d   : > { %369 = vrot.lane.b32.xlu0 %v1401_v7, %s1356_s26 }
  0x40   : > { %298 = vrot.lane.b32.xlu1 %v1401_v7, %s1357_s29 }
  0x41   : > { %296 = vrot.lane.b32.xlu0 %v1398_v6, %s1357_s29 }
  0x44   : > { %375 = vrot.lane.b32.xlu1 %v1432_v17, %s1356_s26 }
  0x45   : > { %373 = vrot.lane.b32.xlu0 %v1404_v12, %s1356_s26 }
  0x48   : > { %302 = vrot.lane.b32.xlu1 %v1404_v12, %s1357_s29 }
  0x49   : > { %300 = vrot.lane.b32.xlu0 %v1395_v3, %s1357_s29 }
  0x4c   : > { %394 = vrot.lane.b32.xlu1 %v1422_v16, %s1358_s5 }
  0x4d   : > { %392 = vrot.lane.b32.xlu0 %v1401_v7, %s1358_s5 }
  0x50   : > { %398 = vrot.lane.b32.xlu1 %v1432_v17, %s1358_s5 }
  0x51   : > { %396 = vrot.lane.b32.xlu0 %v1404_v12, %s1358_s5 }
  0x86   : > { %v232_v20 = vpop.permute.xlu1 %231 }
  0x87   : > { %v228_v21 = vpop.permute.xlu0 %227 }
  0x8a   : > { %v234_v22 = vpop.permute.xlu1 %233 }
  0x8b   : > { %v230_v23 = vpop.permute.xlu0 %229  ;;  %v237_v27 = vsel %vm235_vm1, %v232_v20, %v234_v22 }
  0x8c   : > { %v236_v24 = vsel %vm235_vm1, %v228_v21, %v230_v23 }
  0x8d   : > { %1205 = vmatpush3.bf16.msra.mxu0 %v236_v24 }
  0x8e   : > { %v326_v25 = vpop.permute.xlu1 %325  ;;  %1206 = vmatprep.subr.bf16.mxu0 %v1404_v12 }
  0x8f   : > { %v324_v26 = vpop.permute.xlu0 %323 }
  0x90   : > { %v332_v28 = vsel %vm331_vm2, %v324_v26, %v326_v25 }
  0x91   : > { %1207 = vmatpush3.bf16.msra.mxu0 %v237_v27 }
  0x92   : > { %1208 = vmatprep.subr.bf16.mxu0 %v332_v28  ;;  %v253_v29 = vpop.permute.xlu1 %252  ;;  %v1524_v28 = vld [vmem:[%s1669_s2] ss:$0 sm:$0xff] }
  0x93   : > { %v251_v30 = vpop.permute.xlu0 %250 }
  0x94   : > { %v259_v31 = vsel %vm258_vm3, %v251_v30, %v253_v29 }
  0x95   : > { %1209 = vmatpush3.bf16.msra.mxu0 %v259_v31 }
  0x96   : > { %v330_v32 = vpop.permute.xlu1 %329 }
  0x97   : > { %v328_v33 = vpop.permute.xlu0 %327 }
  0x98   : > { %v333_v34 = vsel %vm331_vm2, %v328_v33, %v330_v32 }
  0x99   : > { %1210 = vmatprep.subr.bf16.mxu0 %v333_v34 }
  0x9a   : > { %v257_v35 = vpop.permute.xlu1 %256 }
  0x9b   : > { %v255_v36 = vpop.permute.xlu0 %254 }
  0x9c   : > { %v260_v37 = vsel %vm258_vm3, %v255_v36, %v257_v35 }
  0x9d   : > { %1211 = vmatpush3.bf16.msra.mxu0 %v260_v37 }
  0x9e   : > { %v349_v38 = vpop.permute.xlu1 %348 }
  0x9f   : > { %v347_v39 = vpop.permute.xlu0 %346 }
  0xa0   : > { %v355_v40 = vsel %vm354_vm4, %v347_v39, %v349_v38 }
  0xa1   : > { %1212 = vmatprep.subr.bf16.mxu0 %v355_v40 }
  0xa2   : > { %v276_v41 = vpop.permute.xlu1 %275 }
  0xa3   : > { %v274_v42 = vpop.permute.xlu0 %273 }
  0xa4   : > { %v282_v43 = vsel %vm281_vm5, %v274_v42, %v276_v41 }
  0xa5   : > { %1213 = vmatpush3.bf16.msra.mxu0 %v282_v43 }
  0xa6   : > { %v353_v44 = vpop.permute.xlu1 %352 }
  0xa7   : > { %v351_v45 = vpop.permute.xlu0 %350 }
  0xa8   : > { %v356_v46 = vsel %vm354_vm4, %v351_v45, %v353_v44 }
  0xa9   : > { %1214 = vmatprep.subr.bf16.mxu0 %v356_v46 }
  0xaa   : > { %v280_v47 = vpop.permute.xlu1 %279 }
  0xab   : > { %v278_v48 = vpop.permute.xlu0 %277 }
  0xac   : > { %v283_v49 = vsel %vm281_vm5, %v278_v48, %v280_v47 }
  0xad   : > { %1215 = vmatpush3.bf16.msra.mxu0 %v283_v49 }
  0xae   : > { %v372_v50 = vpop.permute.xlu1 %371 }
  0xaf   : > { %v370_v51 = vpop.permute.xlu0 %369 }
  0xb0   : > { %v378_v52 = vsel %vm377_vm6, %v370_v51, %v372_v50 }
  0xb1   : > { %1216 = vmatprep.subr.bf16.mxu0 %v378_v52 }
  0xb2   : > { %v299_v53 = vpop.permute.xlu1 %298 }
  0xb3   : > { %v297_v54 = vpop.permute.xlu0 %296 }
  0xb4   : > { %v305_v55 = vsel %vm304_vm7, %v297_v54, %v299_v53 }
  0xb5   : > { %1217 = vmatpush3.bf16.msra.mxu0 %v305_v55 }
  0xb6   : > { %v376_v56 = vpop.permute.xlu1 %375 }
  0xb7   : > { %v374_v57 = vpop.permute.xlu0 %373 }
  0xb8   : > { %v379_v58 = vsel %vm377_vm6, %v374_v57, %v376_v56 }
  0xb9   : > { %1218 = vmatprep.subr.bf16.mxu0 %v379_v58 }
  0xba   : > { %v303_v59 = vpop.permute.xlu1 %302 }
  0xbb   : > { %v301_v60 = vpop.permute.xlu0 %300 }
  0xbc   : > { %v306_v61 = vsel %vm304_vm7, %v301_v60, %v303_v59 }
  0xbd   : > { %1219 = vmatpush3.bf16.msra.mxu0 %v306_v61 }
  0xbe   : > { %v395_v1 = vpop.permute.xlu1 %394 }
  0xbf   : > { %v393_v4 = vpop.permute.xlu0 %392 }
  0xc0   : > { %503 = vmatmul.mubr.bf16.vlgmr.msra.gmra.mrb[0].mxu0 %v1311_v62  ;;  %v401_v5 = vsel %vm400_vm8, %v393_v4, %v395_v1 }
  0xc1   : > { %1268 = vmatprep.subr.bf16.mxu1 %v401_v5  ;;  %510 = vmatprep.mubr.bf16.mxu0 %v1314_v63 }
  0xc2   : > { %1269 = vmatpush3.bf16.msra.mxu1 %v401_v5  ;;  %v399_v8 = vpop.permute.xlu1 %398 }
  0xc3   : > { %v397_v9 = vpop.permute.xlu0 %396 }
  0xc4   : > { %v402_v10 = vsel %vm400_vm8, %v397_v9, %v399_v8 }
  0xc5   : > { %1270 = vmatprep.subr.bf16.mxu1 %v402_v10 }
  0xc6   : > { %1271 = vmatpush3.bf16.msra.mxu1 %v402_v10 }
  0xc8   : > { %511 = vmatmul.mubr.bf16.gmra.mrb[4].mxu0 %v1316_v11 }
  0xc9   : > { %1273 = vmatmul.mubr.msk.bf16.vlgmr.msra.gmra.mrb[0].mxu1 %vm463_vm0, %v1318_v13 }
 0x193   : > { %v1220_v14 = vpop.f32.mrb[0].mxu0 }
 0x194   : > { %v1221_v15 = vpop.f32.mrb[1].mxu0 }
 0x195   : > { %v1222_v18 = vadd.f32 %v1221_v15, %v1220_v14  ;;  %v1223_v19 = vpop.f32.mrb[2].mxu0 }
 0x196   : > { %v1224_v20 = vpop.f32.mrb[3].mxu0 }
 0x197   : > { %v1225_v21 = vadd.f32 %v1224_v20, %v1223_v19  ;;  %v629_v20 = vunpack.c.h.bf16 %v1401_v7 }
 0x19b   : > { %v1226_v22 = vpop.f32.mrb[4].mxu0 }
 0x19c   : > { %v1227_v23 = vpop.f32.mrb[5].mxu0  ;;  %v1274_v24 = vpop.f32.mrb[0].mxu1 }
 0x19d   : > { %v1228_v25 = vadd.f32 %v1227_v23, %v1226_v22  ;;  %v1229_v26 = vpop.f32.mrb[6].mxu0  ;;  %v553_v27 = vpop.f32.mrb[1].mxu1 }
 0x19e   : > { %v554_v29 = vadd.f32 %v1222_v18, %v553_v27  ;;  %v1230_v30 = vpop.f32.mrb[7].mxu0  ;;  %v1275_v31 = vpop.f32.mrb[2].mxu1  ;;  %v628_v18 = vunpack.c.l.bf16 %v1401_v7  ;;  %v631_v27 = vunpack.c.h.bf16 %v1404_v12 }
 0x19f   : > { %v562_v32 = vadd.f32 %v1274_v24, %v1228_v25  ;;  %v1231_v33 = vadd.f32 %v1230_v30, %v1229_v26  ;;  %v556_v34 = vpop.f32.mrb[3].mxu1  ;;  %v630_v30 = vunpack.c.l.bf16 %v1404_v12  ;;  %v1321_v12 = vld [vmem:[%s1668_s1 + $0x34] ss:$12 sps:$4 sm:$0xff]  }
 0x1a0   : > { %v557_v35 = vadd.f32 %v1225_v21, %v556_v34  ;;  %v574_v36 = vmul.f32 %v1524_v28, %v554_v29  ;;  %915 = vmatprep.mubr.bf16.mxu1 %v1321_v12 }
 0x1a1   : > { %v565_v37 = vadd.f32 %v1275_v31, %v1231_v33  ;;  %v576_v39 = vmul.f32 %v1524_v28, %v562_v32 }
 0x1a2   : > { %578 = vadd.xlane.f32.xlu0 %v574_v36  ;;  %v575_v38 = vmul.f32 %v1524_v28, %v557_v35 }
 0x1a3   : > { %v577_v40 = vmul.f32 %v1524_v28, %v565_v37 }
 0x1a4   : > { %580 = vadd.xlane.f32.xlu1 %v575_v38 }
 0x1a6   : > { %582 = vadd.xlane.f32.xlu0 %v576_v39 }
 0x1aa   : > { %584 = vadd.xlane.f32.xlu0 %v577_v40 }
 0x22f   : > { %v579_v41 = vpop.xlane.xlu0 %578 }
 0x230   : > { %v586_v42 = vmul.f32 0.0625, %v579_v41 }
 0x231   : > { %v581_v43 = vpop.xlane.xlu1 %580 }
 0x232   : > { %v590_v44 = vsub.f32 %v554_v29, %v586_v42  ;;  %v587_v45 = vmul.f32 0.0625, %v581_v43 }
 0x233   : > { %v583_v46 = vpop.xlane.xlu0 %582 }
 0x234   : > { %v591_v47 = vsub.f32 %v557_v35, %v587_v45  ;;  %v588_v48 = vmul.f32 0.0625, %v583_v46  ;;  %v594_v49 = vmul.f32 %v1524_v28, %v590_v44  ;;  %v1322_v35 = vld [vmem:[%s1668_s1 + $0x38] ss:$12 sps:$4 sm:$0xff]  }
 0x235   : > { %1280 = vmatprep.mubr.msk.bf16.mxu0 %vm463_vm0, %v1322_v35 }
 0x236   : > { %v592_v50 = vsub.f32 %v562_v32, %v588_v48  ;;  %v598_v51 = vmul.f32 %v594_v49, %v594_v49  ;;  %v595_v52 = vmul.f32 %v1524_v28, %v591_v47 }
 0x237   : > { %v585_v53 = vpop.xlane.xlu0 %584 }
 0x238   : > { %v589_v54 = vmul.f32 0.0625, %v585_v53  ;;  %602 = vadd.xlane.f32.xlu1 %v598_v51  ;;  %v599_v55 = vmul.f32 %v595_v52, %v595_v52  ;;  %v596_v56 = vmul.f32 %v1524_v28, %v592_v50 }
 0x23a   : > { %v593_v57 = vsub.f32 %v565_v37, %v589_v54  ;;  %604 = vadd.xlane.f32.xlu0 %v599_v55  ;;  %v600_v58 = vmul.f32 %v596_v56, %v596_v56 }
 0x23c   : > { %606 = vadd.xlane.f32.xlu1 %v600_v58  ;;  %v597_v59 = vmul.f32 %v1524_v28, %v593_v57 }
 0x23e   : > { %v601_v60 = vmul.f32 %v597_v59, %v597_v59 }
 0x240   : > { %608 = vadd.xlane.f32.xlu0 %v601_v60 }
 0x24d   : > { %648 = vrot.lane.b32.xlu1 %v1398_v6, %s1351_s18 }
 0x251   : > { %652 = vrot.lane.b32.xlu1 %v1395_v3, %s1351_s18 }
 0x255   : > { %742 = vrot.lane.b32.xlu1 %v1422_v16, %s1352_s22 }
 0x256   : > { %670 = vrot.lane.b32.xlu0 %v1398_v6, %s1353_s23 }
 0x259   : > { %746 = vrot.lane.b32.xlu1 %v1432_v17, %s1352_s22 }
 0x25a   : > { %674 = vrot.lane.b32.xlu0 %v1395_v3, %s1353_s23 }
 0x25d   : > { %764 = vrot.lane.b32.xlu1 %v1422_v16, %s1354_s24 }
 0x25e   : > { %692 = vrot.lane.b32.xlu0 %v1398_v6, %s1355_s25 }
 0x261   : > { %768 = vrot.lane.b32.xlu1 %v1432_v17, %s1354_s24 }
 0x262   : > { %696 = vrot.lane.b32.xlu0 %v1395_v3, %s1355_s25 }
 0x2c5   : > { %v603_v61 = vpop.xlane.xlu1 %602 }
 0x2c6   : > { %v610_v62 = vmul.f32 0.0625, %v603_v61 }
 0x2c7   : > { %v605_v63 = vpop.xlane.xlu0 %604 }
 0x2c8   : > { %v614_v1 = vadd.f32 1e-05, %v610_v62  ;;  %v611_v4 = vmul.f32 0.0625, %v605_v63 }
 0x2c9   : > { %v607_v5 = vpop.xlane.xlu1 %606 }
 0x2ca   : > { %1327 = vrsqrt.f32 %v614_v1  ;;  %v615_v8 = vadd.f32 1e-05, %v611_v4  ;;  %v612_v9 = vmul.f32 0.0625, %v607_v5 }
 0x2cc   : > { %1329 = vrsqrt.f32 %v615_v8  ;;  %v616_v10 = vadd.f32 1e-05, %v612_v9 }
 0x2cd   : > { %v609_v11 = vpop.xlane.xlu0 %608  ;;  %v649_v36 = vpop.permute.xlu1 %648 }
 0x2ce   : > { %v613_v13 = vmul.f32 0.0625, %v609_v11  ;;  %1331 = vrsqrt.f32 %v616_v10 }
 0x2d0   : > { %v617_v14 = vadd.f32 1e-05, %v613_v13 }
 0x2d1   : > { %v653_v37 = vpop.permute.xlu1 %652  ;;  %v671_v39 = vpop.permute.xlu0 %670 }
 0x2d2   : > { %1333 = vrsqrt.f32 %v617_v14 }
 0x2d4   : > { %v1328_v15 = vpop.eup %1327 }
 0x2d5   : > { %v622_v19 = vmul.f32 %v1328_v15, %v594_v49  ;;  %v743_v38 = vpop.permute.xlu1 %742  ;;  %v675_v41 = vpop.permute.xlu0 %674 }
 0x2d6   : > { %v1330_v21 = vpop.eup %1329 }
 0x2d7   : > { %v623_v22 = vmul.f32 %v1330_v21, %v595_v52  ;;  %v632_v23 = vadd.f32 %v628_v18, %v622_v19  ;;  %v1324_v21 = vld [vmem:[%s1668_s1 + $0x4c] ss:$12 sps:$4 sm:$0xff]  }
 0x2d8   : > { %v1332_v25 = vpop.eup %1331 }
 0x2d9   : > { %v633_v24 = vadd.f32 %v629_v20, %v623_v22  ;;  %v624_v31 = vmul.f32 %v1332_v25, %v596_v56  ;;  %v747_v40 = vpop.permute.xlu1 %746  ;;  %v693_v43 = vpop.permute.xlu0 %692  ;;  %v1319_v20 = vld [vmem:[%s1668_s1 + $0x30] ss:$12 sps:$4 sm:$0xff]  }
 0x2db   : > { %v1556_v26 = vpack.c.bf16 %v633_v24, %v632_v23  ;;  %v634_v33 = vadd.f32 %v630_v30, %v624_v31  ;;  %v1326_v30 = vld [vmem:[%s1668_s1 + $0x48] ss:$12 sps:$4 sm:$0xff]   ;;  %v1323_v31 = vld [vmem:[%s1668_s1 + $0x50] ss:$12 sps:$4 sm:$0xff]  }
 0x2dc   : > { %v1334_v29 = vpop.eup %1333 }
 0x2dd   : > { %v625_v32 = vmul.f32 %v1334_v29, %v597_v59  ;;  %672 = vrot.lane.b32.xlu1 %v1556_v26, %s1353_s23  ;;  %650 = vrot.lane.b32.xlu0 %v1556_v26, %s1351_s18  ;;  %v765_v42 = vpop.permute.xlu1 %764  ;;  %v697_v45 = vpop.permute.xlu0 %696 }
 0x2de   : > { %1236 = vmatprep.subr.bf16.mxu1 %v1556_v26 }
 0x2df   : > { %v635_v7 = vadd.f32 %v631_v27, %v625_v32 }
 0x2e1   : > { %694 = vrot.lane.b32.xlu1 %v1556_v26, %s1355_s25  ;;  %740 = vrot.lane.b32.xlu0 %v1556_v26, %s1352_s22  ;;  %v1569_v34 = vpack.c.bf16 %v635_v7, %v634_v33  ;;  %v769_v44 = vpop.permute.xlu1 %768 }
 0x2e5   : > { %762 = vrot.lane.b32.xlu0 %v1556_v26, %s1354_s24  ;;  %654 = vrot.lane.b32.xlu1 %v1569_v34, %s1351_s18 }
 0x2e9   : > { %744 = vrot.lane.b32.xlu0 %v1569_v34, %s1352_s22  ;;  %786 = vrot.lane.b32.xlu1 %v1422_v16, %s1356_s26 }
 0x2ed   : > { %784 = vrot.lane.b32.xlu0 %v1556_v26, %s1356_s26  ;;  %676 = vrot.lane.b32.xlu1 %v1569_v34, %s1353_s23 }
 0x2f1   : > { %766 = vrot.lane.b32.xlu0 %v1569_v34, %s1354_s24  ;;  %716 = vrot.lane.b32.xlu1 %v1556_v26, %s1357_s29 }
 0x2f5   : > { %714 = vrot.lane.b32.xlu0 %v1398_v6, %s1357_s29  ;;  %698 = vrot.lane.b32.xlu1 %v1569_v34, %s1355_s25 }
 0x2f9   : > { %788 = vrot.lane.b32.xlu0 %v1569_v34, %s1356_s26  ;;  %790 = vrot.lane.b32.xlu1 %v1432_v17, %s1356_s26 }
 0x2fd   : > { %718 = vrot.lane.b32.xlu0 %v1395_v3, %s1357_s29  ;;  %720 = vrot.lane.b32.xlu1 %v1569_v34, %s1357_s29 }
 0x301   : > { %806 = vrot.lane.b32.xlu0 %v1556_v26, %s1358_s5  ;;  %808 = vrot.lane.b32.xlu1 %v1422_v16, %s1358_s5 }
 0x305   : > { %810 = vrot.lane.b32.xlu0 %v1569_v34, %s1358_s5  ;;  %812 = vrot.lane.b32.xlu1 %v1432_v17, %s1358_s5 }
 0x34f   : > { %v673_v46 = vpop.permute.xlu1 %672  ;;  %v651_v47 = vpop.permute.xlu0 %650 }
 0x350   : > { %v656_v16 = vsel %vm235_vm1, %v649_v36, %v651_v47  ;;  %v678_v55 = vsel %vm258_vm3, %v671_v39, %v673_v46 }
 0x351   : > { %1237 = vmatpush3.bf16.msra.mxu1 %v656_v16 }
 0x352   : > { %1238 = vmatprep.subr.bf16.mxu1 %v1569_v34 }
 0x353   : > { %v695_v48 = vpop.permute.xlu1 %694  ;;  %v741_v49 = vpop.permute.xlu0 %740 }
 0x354   : > { %v748_v52 = vsel %vm331_vm2, %v741_v49, %v743_v38  ;;  %v700_v63 = vsel %vm281_vm5, %v693_v43, %v695_v48 }
 0x357   : > { %v655_v17 = vpop.permute.xlu1 %654  ;;  %v763_v50 = vpop.permute.xlu0 %762 }
 0x358   : > { %v657_v51 = vsel %vm235_vm1, %v653_v37, %v655_v17  ;;  %v770_v60 = vsel %vm354_vm4, %v763_v50, %v765_v42 }
 0x359   : > { %1239 = vmatpush3.bf16.msra.mxu1 %v657_v51 }
 0x35a   : > { %1240 = vmatprep.subr.bf16.mxu1 %v748_v52 }
 0x35b   : > { %v787_v53 = vpop.permute.xlu1 %786  ;;  %v745_v54 = vpop.permute.xlu0 %744 }
 0x35c   : > { %v749_v56 = vsel %vm331_vm2, %v745_v54, %v747_v40 }
 0x35d   : > { %1241 = vmatpush3.bf16.msra.mxu1 %v678_v55 }
 0x35e   : > { %1242 = vmatprep.subr.bf16.mxu1 %v749_v56 }
 0x35f   : > { %v677_v57 = vpop.permute.xlu1 %676  ;;  %v785_v58 = vpop.permute.xlu0 %784 }
 0x360   : > { %v679_v59 = vsel %vm258_vm3, %v675_v41, %v677_v57  ;;  %v792_v9 = vsel %vm377_vm6, %v785_v58, %v787_v53 }
 0x361   : > { %1243 = vmatpush3.bf16.msra.mxu1 %v679_v59 }
 0x362   : > { %1244 = vmatprep.subr.bf16.mxu1 %v770_v60 }
 0x363   : > { %v717_v61 = vpop.permute.xlu1 %716  ;;  %v767_v62 = vpop.permute.xlu0 %766 }
 0x364   : > { %v771_v1 = vsel %vm354_vm4, %v767_v62, %v769_v44 }
 0x365   : > { %1245 = vmatpush3.bf16.msra.mxu1 %v700_v63 }
 0x366   : > { %1246 = vmatprep.subr.bf16.mxu1 %v771_v1 }
 0x367   : > { %v699_v4 = vpop.permute.xlu1 %698  ;;  %v715_v5 = vpop.permute.xlu0 %714 }
 0x368   : > { %v701_v8 = vsel %vm281_vm5, %v697_v45, %v699_v4  ;;  %v722_v13 = vsel %vm304_vm7, %v715_v5, %v717_v61 }
 0x369   : > { %1247 = vmatpush3.bf16.msra.mxu1 %v701_v8 }
 0x36a   : > { %1248 = vmatprep.subr.bf16.mxu1 %v792_v9 }
 0x36b   : > { %v791_v10 = vpop.permute.xlu1 %790  ;;  %v789_v11 = vpop.permute.xlu0 %788 }
 0x36c   : > { %v793_v14 = vsel %vm377_vm6, %v789_v11, %v791_v10 }
 0x36d   : > { %1249 = vmatpush3.bf16.msra.mxu1 %v722_v13 }
 0x36e   : > { %1250 = vmatprep.subr.bf16.mxu1 %v793_v14 }
 0x36f   : > { %v721_v15 = vpop.permute.xlu1 %720  ;;  %v719_v18 = vpop.permute.xlu0 %718 }
 0x370   : > { %v723_v19 = vsel %vm304_vm7, %v719_v18, %v721_v15 }
 0x371   : > { %1251 = vmatpush3.bf16.msra.mxu1 %v723_v19 }
 0x373   : > { %v809_v22 = vpop.permute.xlu1 %808  ;;  %v807_v23 = vpop.permute.xlu0 %806 }
 0x374   : > { %v814_v24 = vsel %vm400_vm8, %v807_v23, %v809_v22  ;;  %916 = vmatmul.mubr.bf16.vlgmr.msra.gmra.mrb[4].mxu1 %v1319_v20 }
 0x375   : > { %1276 = vmatprep.subr.bf16.mxu0 %v814_v24  ;;  %923 = vmatprep.mubr.bf16.mxu1 %v1324_v21 }
 0x376   : > { %1277 = vmatpush3.bf16.msra.mxu0 %v814_v24 }
 0x377   : > { %v813_v25 = vpop.permute.xlu1 %812  ;;  %v811_v27 = vpop.permute.xlu0 %810 }
 0x378   : > { %v815_v29 = vsel %vm400_vm8, %v811_v27, %v813_v25 }
 0x379   : > { %1278 = vmatprep.subr.bf16.mxu0 %v815_v29 }
 0x37a   : > { %1279 = vmatpush3.bf16.msra.mxu0 %v815_v29 }
 0x37c   : > { %924 = vmatmul.mubr.bf16.gmra.mrb[8].mxu1 %v1326_v30 }
 0x37d   : > { %1281 = vmatmul.mubr.msk.bf16.vlgmr.msra.gmra.mrb[8].mxu0 %vm463_vm0, %v1323_v31 }
 0x447   : > { %v1252_v32 = vpop.f32.mrb[4].mxu1 }
 0x448   : > { %v1253_v7 = vpop.f32.mrb[5].mxu1 }
 0x449   : > { %v1254_v33 = vadd.f32 %v1253_v7, %v1252_v32  ;;  %v1255_v12 = vpop.f32.mrb[6].mxu1  ;;  %v1035_v7 = vunpack.c.l.bf16 %v1556_v26 }
 0x44a   : > { %v1256_v35 = vpop.f32.mrb[7].mxu1 }
 0x44b   : > { %v1257_v36 = vadd.f32 %v1256_v35, %v1255_v12 }
 0x44f   : > { %v1258_v37 = vpop.f32.mrb[8].mxu1 }
 0x450   : > { %v1282_v38 = vpop.f32.mrb[8].mxu0  ;;  %v1259_v39 = vpop.f32.mrb[9].mxu1 }
 0x451   : > { %v966_v40 = vpop.f32.mrb[9].mxu0  ;;  %v1260_v41 = vadd.f32 %v1259_v39, %v1258_v37  ;;  %v1261_v42 = vpop.f32.mrb[10].mxu1 }
 0x452   : > { %v967_v43 = vadd.f32 %v1254_v33, %v966_v40  ;;  %v1283_v44 = vpop.f32.mrb[10].mxu0  ;;  %v1262_v45 = vpop.f32.mrb[11].mxu1  ;;  %v1036_v33 = vunpack.c.h.bf16 %v1556_v26 }
 0x453   : > { %v975_v46 = vadd.f32 %v1282_v38, %v1260_v41  ;;  %v969_v47 = vpop.f32.mrb[11].mxu0  ;;  %v1263_v16 = vadd.f32 %v1262_v45, %v1261_v42  ;;  %v1037_v41 = vunpack.c.l.bf16 %v1569_v34 }
 0x454   : > { %v970_v48 = vadd.f32 %v1257_v36, %v969_v47  ;;  %v981_v49 = vmul.f32 %v1524_v28, %v967_v43 }
 0x455   : > { %v978_v17 = vadd.f32 %v1283_v44, %v1263_v16  ;;  %v983_v51 = vmul.f32 %v1524_v28, %v975_v46  ;;  %v1038_v44 = vunpack.c.h.bf16 %v1569_v34 }
 0x456   : > { %985 = vadd.xlane.f32.xlu0 %v981_v49  ;;  %v982_v50 = vmul.f32 %v1524_v28, %v970_v48 }
 0x457   : > { %v984_v52 = vmul.f32 %v1524_v28, %v978_v17 }
 0x458   : > { %987 = vadd.xlane.f32.xlu1 %v982_v50 }
 0x45a   : > { %989 = vadd.xlane.f32.xlu0 %v983_v51 }
 0x45e   : > { %991 = vadd.xlane.f32.xlu0 %v984_v52 }
 0x4e3   : > { %v986_v53 = vpop.xlane.xlu0 %985 }
 0x4e4   : > { %v993_v54 = vmul.f32 0.0625, %v986_v53 }
 0x4e5   : > { %v988_v55 = vpop.xlane.xlu1 %987 }
 0x4e6   : > { %v997_v56 = vsub.f32 %v967_v43, %v993_v54  ;;  %v994_v57 = vmul.f32 0.0625, %v988_v55 }
 0x4e7   : > { %v990_v58 = vpop.xlane.xlu0 %989 }
 0x4e8   : > { %v998_v59 = vsub.f32 %v970_v48, %v994_v57  ;;  %v995_v60 = vmul.f32 0.0625, %v990_v58  ;;  %v1001_v61 = vmul.f32 %v1524_v28, %v997_v56 }
 0x4ea   : > { %v999_v62 = vsub.f32 %v975_v46, %v995_v60  ;;  %v1005_v63 = vmul.f32 %v1001_v61, %v1001_v61  ;;  %v1002_v1 = vmul.f32 %v1524_v28, %v998_v59 }
 0x4eb   : > { %v992_v4 = vpop.xlane.xlu0 %991 }
 0x4ec   : > { %v996_v5 = vmul.f32 0.0625, %v992_v4  ;;  %1009 = vadd.xlane.f32.xlu1 %v1005_v63  ;;  %v1006_v8 = vmul.f32 %v1002_v1, %v1002_v1  ;;  %v1003_v9 = vmul.f32 %v1524_v28, %v999_v62 }
 0x4ee   : > { %v1000_v10 = vsub.f32 %v978_v17, %v996_v5  ;;  %1011 = vadd.xlane.f32.xlu0 %v1006_v8  ;;  %v1007_v11 = vmul.f32 %v1003_v9, %v1003_v9 }
 0x4f0   : > { %1013 = vadd.xlane.f32.xlu1 %v1007_v11  ;;  %v1004_v13 = vmul.f32 %v1524_v28, %v1000_v10 }
 0x4f2   : > { %v1008_v14 = vmul.f32 %v1004_v13, %v1004_v13 }
 0x4f4   : > { %1015 = vadd.xlane.f32.xlu0 %v1008_v14 }
 0x579   : > { %v1010_v15 = vpop.xlane.xlu1 %1009 }
 0x57a   : > { %v1017_v18 = vmul.f32 0.0625, %v1010_v15 }
 0x57b   : > { %v1012_v19 = vpop.xlane.xlu0 %1011 }
 0x57c   : > { %v1021_v20 = vadd.f32 1e-05, %v1017_v18  ;;  %v1018_v21 = vmul.f32 0.0625, %v1012_v19 }
 0x57d   : > { %v1014_v22 = vpop.xlane.xlu1 %1013 }
 0x57e   : > { %1335 = vrsqrt.f32 %v1021_v20  ;;  %v1022_v23 = vadd.f32 1e-05, %v1018_v21  ;;  %v1019_v24 = vmul.f32 0.0625, %v1014_v22 }
 0x580   : > { %1337 = vrsqrt.f32 %v1022_v23  ;;  %v1023_v25 = vadd.f32 1e-05, %v1019_v24 }
 0x581   : > { %v1016_v27 = vpop.xlane.xlu0 %1015 }
 0x582   : > { %1339 = vrsqrt.f32 %v1023_v25  ;;  %v1020_v29 = vmul.f32 0.0625, %v1016_v27 }
 0x584   : > { %v1024_v30 = vadd.f32 1e-05, %v1020_v29 }
 0x586   : > { %1341 = vrsqrt.f32 %v1024_v30 }
 0x588   : > { %v1336_v31 = vpop.eup %1335 }
 0x589   : > { %v1029_v28 = vmul.f32 %v1336_v31, %v1001_v61 }
 0x58a   : > { %v1338_v32 = vpop.eup %1337 }
 0x58b   : > { %v1030_v12 = vmul.f32 %v1338_v32, %v1002_v1  ;;  %v1039_v36 = vadd.f32 %v1035_v7, %v1029_v28 }
 0x58c   : > { %v1340_v35 = vpop.eup %1339 }
 0x58d   : > { %v1040_v37 = vadd.f32 %v1036_v33, %v1030_v12  ;;  %v1031_v39 = vmul.f32 %v1340_v35, %v1003_v9 }
 0x58f   : > { %v1043_v38 = vpack.c.bf16 %v1040_v37, %v1039_v36  ;;  %v1041_v26 = vadd.f32 %v1037_v41, %v1031_v39 }
 0x590   : > { %v1342_v40 = vpop.eup %1341 }
 0x591   : > { %v1198_v42 = vcombine.low %v1392_v2, %v1043_v38  ;;  %v1190_v43 = vcombine.high %v1398_v6, %v1043_v38  ;;  %v1032_v45 = vmul.f32 %v1342_v40, %v1004_v13 }
 0x593   : > { %1087 = vst [vmem:[%s1411_s21] sm:$0xff] %v1198_v42  ;;  %1089 = vst [vmem:[%s1411_s21 + $0xc] sm:$0xff] %v1190_v43  ;;  %v1042_v46 = vadd.f32 %v1038_v44, %v1032_v45 }
 0x595   : > { %v1044_v47 = vpack.c.bf16 %v1042_v46, %v1041_v26 }
 0x597   : > { %v1201_v16 = vcombine.low %v1390_v0, %v1044_v47  ;;  %v1194_v48 = vcombine.high %v1395_v3, %v1044_v47 }
 0x599   : > { %1091 = vst [vmem:[%s1411_s21 + $0x18] sm:$0xff] %v1201_v16  ;;  %1093 = vst [vmem:[%s1411_s21 + $0x24] sm:$0xff] %v1194_v48 }
 0x59a PF: > { %s13_s12 = sadd.s32 1, %s1349_s12  }
 0x59b   : > { %p10_p4 = scmp.ge.s32.totalorder %s13_s12, 4  }
 0x59d   :  { %12 = sbr.rel (!%p10_p4) target bundleno = 1 (0x1), region = 63 }

// kernel: cycle_generator_forward.12
= control target key start
LH: loop header
LB: loop body
LE: loop exit
PB: predicated region body
PF: predicated region fallthrough
CT: control target
= control target key end

     0   :  { %s541_s12 = smov 0   ;;  %s576_s0 = inlined_call_operand.vmem [shape: bf16[2,16,256], index: 0, kind: input, shape index: {}]   ;;  %s577_s1 = inlined_call_operand.vmem [shape: bf16[32,64], index: 1, kind: input, shape index: {}]   ;;  %s578_s2 = inlined_call_operand.vmem [shape: f32[1,128], index: 2, kind: input, shape index: {}]   ;;  %s579_s3 = inlined_call_operand.vmem [shape: bf16[2,4,8,128], index: 3, kind: output, shape index: {}]  }
   0x1 LB: > { %s434_s13 = sadd.s32 4294967295, %s516_s12   ;;  %p438_p0 = scmp.ge.s32.totalorder %s516_s12, 1  ;;  %s516_s12 = sphi %s541_s12, %s13_s12  }
   0x2   : > { %p137_p1 = scmp.lt.s32.totalorder %s516_s12, 3 }
   0x4   : > { %p138_p2 = pnand %p438_p0, %p137_p1 }
   0x5   : > { %p161_p3 = scmp.lt.s32.totalorder (!%p138_p2), %s434_s13, 1  ;;  %s518_s18 = smov (!%p138_p2), 119   ;;  %v506_v3 = vld [vmem:[%s577_s1] sm:$0xff] (!%p138_p2)   ;;  %vm253_vm0 = vcmask (!%p138_p2), 523264   ;;  %vm195_vm1 = vcmask (!%p138_p2), 1039360   ;;  %vm213_vm2 = vcmask (!%p138_p2), 973824  }
   0x6   : > { %141 = sbr.rel (%p138_p2) target bundleno = 696 (0x2b8), region = 32  ;;  %s519_s19 = smov (!%p138_p2), 127   ;;  %487 = vmatprep.mubr.msk.bf16.mxu0 (!%p138_p2), %vm253_vm0, %v506_v3  ;;  %vm231_vm3 = vcmask (!%p138_p2), 965632   ;;  %v507_v13 = vld [vmem:[%s577_s1 + $0x8] sm:$0xff] (!%p138_p2)   ;;  %v454_v14 = vld [vmem:[%s578_s2] ss:$0 sm:$0xff] (!%p138_p2) }
   0x7   : > { %s520_s22 = smov (!%p138_p2), 118  }
   0xd   : > { %s581_s13 = smov (!%p161_p3, %s434_s13), 1 }
   0xe   : > { %s460_s14 = sshll.u32 %s581_s13, 4 }
   0xf   : > { %s165_s17 = scalar_lea.vmem %s576_s0, %s460_s14  ;;  %s170_s29 = scalar_lea.vmem %s579_s3, %s460_s14 }
  0x10   : > { %v502_v0 = vld [vmem:[%s165_s17] ss:$8 sps:$4 sm:$0xff]   ;;  %v504_v1 = vld [vmem:[%s165_s17 + $0x4] ss:$8 sps:$4 sm:$0xff]  }
  0x11   : > { %209 = vrot.lane.b32.xlu1 %v502_v0, %s518_s18  ;;  %191 = vrot.lane.b32.xlu0 %v502_v0, %s519_s19  ;;  %v505_v2 = vld [vmem:[%s165_s17] ss:$8 sps:$4 sm:$0xff]  }
  0x12   : > { %479 = vmatprep.subr.bf16.mxu0 %v505_v2 }
  0x13   : > { %480 = vmatpush3.bf16.msra.mxu0 %v505_v2 }
  0x15   : > { %211 = vrot.lane.b32.xlu1 %v504_v1, %s518_s18  ;;  %193 = vrot.lane.b32.xlu0 %v504_v1, %s519_s19 }
  0x19   : > { %229 = vrot.lane.b32.xlu1 %v504_v1, %s520_s22  ;;  %227 = vrot.lane.b32.xlu0 %v502_v0, %s520_s22 }
  0x83   : > { %v210_v4 = vpop.permute.xlu1 %209  ;;  %v192_v5 = vpop.permute.xlu0 %191 }
  0x87   : > { %v212_v6 = vpop.permute.xlu1 %211  ;;  %v194_v7 = vpop.permute.xlu0 %193 }
  0x88   : > { %v196_v8 = vsel %vm195_vm1, %v192_v5, %v194_v7  ;;  %v214_v9 = vsel %vm213_vm2, %v210_v4, %v212_v6 }
  0x89   : > { %481 = vmatprep.subr.bf16.mxu0 %v196_v8 }
  0x8a   : > { %482 = vmatpush3.bf16.msra.mxu0 %v196_v8 }
  0x8b   : > { %483 = vmatprep.subr.bf16.mxu0 %v214_v9  ;;  %v230_v10 = vpop.permute.xlu1 %229  ;;  %v228_v11 = vpop.permute.xlu0 %227 }
  0x8c   : > { %v232_v12 = vsel %vm231_vm3, %v228_v11, %v230_v10 }
  0x8e   : > { %484 = vmatpush3.bf16.msra.mxu0 %v214_v9 }
  0x8f   : > { %485 = vmatprep.subr.bf16.mxu0 %v232_v12 }
  0x92   : > { %486 = vmatpush3.bf16.msra.mxu0 %v232_v12 }
  0x95   : > { %488 = vmatmul.mubr.msk.bf16.vlgmr.msra.gmra.mrb[0].mxu0 %vm253_vm0, %v507_v13 }
 0x168   : > { %v489_v15 = vpop.f32.mrb[0].mxu0 }
 0x169   : > { %v294_v16 = vpop.f32.mrb[1].mxu0  ;;  %v324_v21 = vmul.f32 %v489_v15, %v454_v14 }
 0x16a   : > { %v490_v17 = vpop.f32.mrb[2].mxu0  ;;  %v316_v18 = vmul.f32 %v454_v14, %v294_v16 }
 0x16b   : > { %v297_v19 = vpop.f32.mrb[3].mxu0  ;;  %v328_v22 = vmul.f32 %v490_v17, %v454_v14 }
 0x16c   : > { %v320_v20 = vmul.f32 %v454_v14, %v297_v19  ;;  %317 = vadd.xlane.f32.xlu0 %v316_v18 }
 0x16e   : > { %321 = vadd.xlane.f32.xlu1 %v320_v20 }
 0x170   : > { %325 = vadd.xlane.f32.xlu0 %v324_v21 }
 0x174   : > { %329 = vadd.xlane.f32.xlu0 %v328_v22 }
 0x1f9   : > { %v318_v23 = vpop.xlane.xlu0 %317 }
 0x1fb   : > { %v322_v24 = vpop.xlane.xlu1 %321 }
 0x1fc   : > { %v323_v25 = vadd.f32 %v322_v24, %v318_v23 }
 0x1fd   : > { %v326_v26 = vpop.xlane.xlu0 %325 }
 0x1fe   : > { %v327_v27 = vadd.f32 %v326_v26, %v323_v25 }
 0x201   : > { %v330_v28 = vpop.xlane.xlu0 %329 }
 0x202   : > { %v331_v29 = vadd.f32 %v330_v28, %v327_v27 }
 0x204   : > { %v332_v30 = vmul.f32 0.00390625, %v331_v29 }
 0x206   : > { %v335_v31 = vsub.f32 %v297_v19, %v332_v30  ;;  %v333_v32 = vsub.f32 %v294_v16, %v332_v30  ;;  %v339_v33 = vsub.f32 %v490_v17, %v332_v30  ;;  %v337_v34 = vsub.f32 %v489_v15, %v332_v30 }
 0x208   : > { %v336_v35 = vmul.f32 %v454_v14, %v335_v31  ;;  %v334_v36 = vmul.f32 %v454_v14, %v333_v32  ;;  %v340_v39 = vmul.f32 %v454_v14, %v339_v33  ;;  %v338_v40 = vmul.f32 %v454_v14, %v337_v34 }
 0x20a   : > { %v345_v37 = vmul.f32 %v336_v35, %v336_v35  ;;  %v341_v38 = vmul.f32 %v334_v36, %v334_v36  ;;  %v353_v41 = vmul.f32 %v340_v39, %v340_v39  ;;  %v349_v42 = vmul.f32 %v338_v40, %v338_v40 }
 0x20c   : > { %346 = vadd.xlane.f32.xlu0 %v345_v37  ;;  %342 = vadd.xlane.f32.xlu1 %v341_v38 }
 0x210   : > { %354 = vadd.xlane.f32.xlu0 %v353_v41  ;;  %350 = vadd.xlane.f32.xlu1 %v349_v42 }
 0x299   : > { %v347_v43 = vpop.xlane.xlu0 %346  ;;  %v343_v44 = vpop.xlane.xlu1 %342 }
 0x29a   : > { %v348_v45 = vadd.f32 %v347_v43, %v343_v44 }
 0x29d   : > { %v351_v46 = vpop.xlane.xlu1 %350  ;;  %v355_v48 = vpop.xlane.xlu0 %354 }
 0x29e   : > { %v352_v47 = vadd.f32 %v351_v46, %v348_v45 }
 0x2a0   : > { %v356_v49 = vadd.f32 %v355_v48, %v352_v47 }
 0x2a2   : > { %v357_v50 = vmul.f32 0.00390625, %v356_v49 }
 0x2a4   : > { %v358_v51 = vadd.f32 1e-05, %v357_v50 }
 0x2a6   : > { %508 = vrsqrt.f32 %v358_v51 }
 0x2b0   : > { %v509_v52 = vpop.eup %508 }
 0x2b1   : > { %v360_v53 = vmul.f32 %v509_v52, %v334_v36  ;;  %v364_v54 = vmul.f32 %v509_v52, %v336_v35  ;;  %v369_v55 = vmul.f32 %v509_v52, %v338_v40  ;;  %v374_v56 = vmul.f32 %v509_v52, %v340_v39 }
 0x2b3   : > { %v361_v57 = vmax.f32 %v360_v53, 0.0  ;;  %v365_v58 = vmax.f32 %v364_v54, 0.0  ;;  %v370_v59 = vmax.f32 %v369_v55, 0.0  ;;  %v375_v60 = vmax.f32 %v374_v56, 0.0 }
 0x2b5   : > { %v465_v61 = vpack.c.bf16 %v365_v58, %v361_v57  ;;  %v470_v62 = vpack.c.bf16 %v375_v60, %v370_v59 }
 0x2b7   : > { %466 = vst [vmem:[%s170_s29] sm:$0xff] %v465_v61   ;;  %472 = vst [vmem:[%s170_s29 + $0x8] sm:$0xff] %v470_v62  }
 0x2b8 PF: > { %s13_s12 = sadd.s32 1, %s516_s12  }
 0x2b9   : > { %p10_p4 = scmp.ge.s32.totalorder %s13_s12, 4  }
 0x2bb   :  { %12 = sbr.rel (!%p10_p4) target bundleno = 1 (0x1), region = 65 }

// kernel: cycle_generator_forward.13
= control target key start
LH: loop header
LB: loop body
LE: loop exit
PB: predicated region body
PF: predicated region fallthrough
CT: control target
= control target key end

     0   :  { %s3051_s12 = smov 0   ;;  %s3855_s0 = inlined_call_operand.vmem [shape: bf16[2,16,640], index: 0, kind: input, shape index: {}]   ;;  %s3856_s1 = inlined_call_operand.vmem [shape: bf16[3,784], index: 1, kind: input, shape index: {}]   ;;  %s3857_s2 = inlined_call_operand.vmem [shape: f32[1,384], index: 2, kind: input, shape index: {}]   ;;  %s3858_s3 = inlined_call_operand.vmem [shape: f32[2,3,384], index: 3, kind: output, shape index: {}]  }
   0x1 LB: > { %s2598_s13 = sadd.s32 4294967295, %s2980_s12   ;;  %p2602_p0 = scmp.ge.s32.totalorder %s2980_s12, 1  ;;  %s2980_s12 = sphi %s3051_s12, %s13_s12  }
   0x2   : > { %p137_p1 = scmp.lt.s32.totalorder %s2980_s12, 3 }
   0x4   : > { %p138_p2 = pnand %p2602_p0, %p137_p1 }
   0x5   : > { %p161_p3 = scmp.lt.s32.totalorder (!%p138_p2), %s2598_s13, 1  ;;  %s2982_s17 = smov (!%p138_p2), 127   ;;  %vm223_vm0 = vcmask (!%p138_p2), 1039360   ;;  %vm261_vm1 = vcmask (!%p138_p2), 1031168   ;;  %vm299_vm2 = vcmask (!%p138_p2), 1022976   ;;  %vm337_vm3 = vcmask (!%p138_p2), 1014784  }
   0x6   : > { %141 = sbr.rel (%p138_p2) target bundleno = 750 (0x2ee), region = 32  ;;  %s2983_s18 = smov (!%p138_p2), 126   ;;  %vm3871_vm4 = vcmask (!%p138_p2), 670720   ;;  %vm375_vm5 = vcmask (!%p138_p2), 1006592   ;;  %v3007_v33 = vmov (!%p138_p2), 1983009808   ;;  %v2171_v35 = vlaneseq (!%p138_p2) }
   0x7   : > { %s2984_s19 = smov (!%p138_p2), 125   ;;  %s2985_s20 = smov (!%p138_p2), 124   ;;  %v2169_v34 = vunpack.c.l.s4 (!%p138_p2), %v3007_v33  ;;  %vm3868_vm6 = vcmask (!%p138_p2), 662528   ;;  %v3274_v45 = vld [vmem:[%s3856_s1] sm:$0xff] (!%p138_p2)  ;;  %vm413_vm7 = vcmask (!%p138_p2), 998400   ;;  %vm3867_vm8 = vcmask (!%p138_p2), 654336  }
   0x8   : > { %s2986_s21 = smov (!%p138_p2), 82   ;;  %s2987_s22 = smov (!%p138_p2), 123   ;;  %v2172_v41 = vshrl.u32 (!%p138_p2), %v2171_v35, 7  ;;  %vm3873_vm9 = vcmask (!%p138_p2), 867328   ;;  %vm3865_vm10 = vcmask (!%p138_p2), 646144   ;;  %vm489_vm11 = vcmask (!%p138_p2), 859136  }
   0x9   : > { %s2988_s23 = smov (!%p138_p2), 81   ;;  %s2989_s24 = smov (!%p138_p2), 122   ;;  %v2170_v40 = vunpack.c.0.s8 (!%p138_p2), %v2169_v34  ;;  %vm3863_vm12 = vcmask (!%p138_p2), 637952   ;;  %vm527_vm13 = vcmask (!%p138_p2), 850944   ;;  %vm3862_vm14 = vcmask (!%p138_p2), 506880  }
   0xa   : > { %s2990_s25 = smov (!%p138_p2), 80   ;;  %s2991_s26 = smov (!%p138_p2), 106   ;;  %vm565_vm15 = vcmask (!%p138_p2), 842752  }
   0xb   : > { %s2992_s27 = smov (!%p138_p2), 79   ;;  %s2993_s28 = smov (!%p138_p2), 105   ;;  %v3267_v42 = vsub.s32 (!%p138_p2), %v2170_v40, %v2172_v41 }
   0xc   : > { %s2994_s29 = smov (!%p138_p2), 78   ;;  %s2995_s30 = smov (!%p138_p2), 104  }
   0xd   : > { %s3894_s13 = smov (!%p161_p3, %s2598_s13), 1  ;;  %s3861_s4 = smov 62   ;;  %v3280_v47 = vrot.slane %v3274_v45, %v3267_v42 }
   0xe   : > { %s2888_s2 = smul.u32 40, %s3894_s13  ;;  %s2997_s5 = smov 103  }
   0xf   : > { %s3860_s6 = smov 61   ;;  %s2999_s7 = smov 102   ;;  %v3288_v48 = vcombine.high %v3280_v47, %v3280_v47 }
  0x10   : > { %s3065_s16 = scalar_lea.vmem %s3855_s0, %s2888_s2  ;;  %s3859_s8 = smov 60  }
  0x11   : > { %v195_v0 = vld [vmem:[%s3065_s16] sm:$0xff]  ;;  %v197_v1 = vld [vmem:[%s3065_s16 + $0x14] sm:$0xff]  ;;  %v3070_v2 = vld [vmem:[%s3065_s16 + $0x8] sm:$0xff]  ;;  %s3001_s9 = smov 101   ;;  %s3002_s10 = smov 59   ;;  %2242 = vmatprep.mubr.bf16.mxu1 %v3288_v48 }
  0x12   : > { %v3072_v3 = vcombine.high %v195_v0, %v197_v1  ;;  %v3074_v4 = vcombine.low %v195_v0, %v197_v1  ;;  %v3077_v5 = vld [vmem:[%s3065_s16 + $0x1c] sm:$0xff]  ;;  %s3003_s11 = smov 100   ;;  %s3004_s2 = smov 58  }
  0x13   : > { %v3085_v6 = vcombine.low %v3070_v2, %v3077_v5  ;;  %s3005_s14 = smov 84   ;;  %s3006_s15 = smov 57   ;;  %v3294_v52 = vcombine.high %v3070_v2, %v3077_v5 }
  0x14   : > { %217 = vrot.lane.b32.xlu0 %v3072_v3, %s2982_s17  ;;  %215 = vrot.lane.b32.xlu1 %v3074_v4, %s2982_s17 }
  0x15   : > { %2210 = vmatprep.subr.bf16.mxu1 %v3072_v3 }
  0x16   : > { %2211 = vmatpush1.bf16.msra.mxu1 %v3074_v4 }
  0x18   : > { %219 = vrot.lane.b32.xlu0 %v3085_v6, %s2982_s17  ;;  %255 = vrot.lane.b32.xlu1 %v3072_v3, %s2983_s18 }
  0x1c   : > { %257 = vrot.lane.b32.xlu0 %v3085_v6, %s2983_s18  ;;  %253 = vrot.lane.b32.xlu1 %v3074_v4, %s2983_s18 }
  0x20   : > { %293 = vrot.lane.b32.xlu0 %v3072_v3, %s2984_s19  ;;  %295 = vrot.lane.b32.xlu1 %v3085_v6, %s2984_s19 }
  0x24   : > { %291 = vrot.lane.b32.xlu0 %v3074_v4, %s2984_s19  ;;  %331 = vrot.lane.b32.xlu1 %v3072_v3, %s2985_s20 }
  0x28   : > { %333 = vrot.lane.b32.xlu0 %v3085_v6, %s2985_s20  ;;  %329 = vrot.lane.b32.xlu1 %v3074_v4, %s2985_s20 }
  0x2c   : > { %787 = vrot.lane.b32.xlu0 %v3072_v3, %s2986_s21  ;;  %789 = vrot.lane.b32.xlu1 %v3085_v6, %s2986_s21 }
  0x30   : > { %785 = vrot.lane.b32.xlu0 %v3074_v4, %s2986_s21  ;;  %369 = vrot.lane.b32.xlu1 %v3072_v3, %s2987_s22 }
  0x34   : > { %371 = vrot.lane.b32.xlu0 %v3085_v6, %s2987_s22  ;;  %367 = vrot.lane.b32.xlu1 %v3074_v4, %s2987_s22 }
  0x38   : > { %825 = vrot.lane.b32.xlu0 %v3072_v3, %s2988_s23  ;;  %827 = vrot.lane.b32.xlu1 %v3085_v6, %s2988_s23 }
  0x3c   : > { %823 = vrot.lane.b32.xlu0 %v3074_v4, %s2988_s23  ;;  %407 = vrot.lane.b32.xlu1 %v3072_v3, %s2989_s24 }
  0x40   : > { %409 = vrot.lane.b32.xlu0 %v3085_v6, %s2989_s24  ;;  %405 = vrot.lane.b32.xlu1 %v3074_v4, %s2989_s24 }
  0x44   : > { %863 = vrot.lane.b32.xlu0 %v3072_v3, %s2990_s25  ;;  %865 = vrot.lane.b32.xlu1 %v3085_v6, %s2990_s25 }
  0x48   : > { %861 = vrot.lane.b32.xlu0 %v3074_v4, %s2990_s25  ;;  %445 = vrot.lane.b32.xlu1 %v3072_v3, %s2991_s26 }
  0x4c   : > { %447 = vrot.lane.b32.xlu0 %v3085_v6, %s2991_s26  ;;  %443 = vrot.lane.b32.xlu1 %v3074_v4, %s2991_s26 }
  0x50   : > { %901 = vrot.lane.b32.xlu0 %v3072_v3, %s2992_s27  ;;  %903 = vrot.lane.b32.xlu1 %v3085_v6, %s2992_s27 }
  0x54   : > { %899 = vrot.lane.b32.xlu0 %v3074_v4, %s2992_s27  ;;  %483 = vrot.lane.b32.xlu1 %v3072_v3, %s2993_s28 }
  0x58   : > { %485 = vrot.lane.b32.xlu0 %v3085_v6, %s2993_s28  ;;  %481 = vrot.lane.b32.xlu1 %v3074_v4, %s2993_s28 }
  0x5c   : > { %939 = vrot.lane.b32.xlu0 %v3072_v3, %s2994_s29  ;;  %941 = vrot.lane.b32.xlu1 %v3085_v6, %s2994_s29 }
  0x60   : > { %937 = vrot.lane.b32.xlu0 %v3074_v4, %s2994_s29  ;;  %521 = vrot.lane.b32.xlu1 %v3072_v3, %s2995_s30 }
  0x64   : > { %523 = vrot.lane.b32.xlu0 %v3085_v6, %s2995_s30  ;;  %519 = vrot.lane.b32.xlu1 %v3074_v4, %s2995_s30 }
  0x68   : > { %977 = vrot.lane.b32.xlu0 %v3072_v3, %s3861_s4  ;;  %979 = vrot.lane.b32.xlu1 %v3085_v6, %s3861_s4 }
  0x6c   : > { %975 = vrot.lane.b32.xlu0 %v3074_v4, %s3861_s4  ;;  %559 = vrot.lane.b32.xlu1 %v3072_v3, %s2997_s5  ;;  %s3009_s4 = smov 56  }
  0x70   : > { %561 = vrot.lane.b32.xlu0 %v3085_v6, %s2997_s5  ;;  %557 = vrot.lane.b32.xlu1 %v3074_v4, %s2997_s5 }
  0x74   : > { %1015 = vrot.lane.b32.xlu0 %v3072_v3, %s3860_s6  ;;  %1017 = vrot.lane.b32.xlu1 %v3085_v6, %s3860_s6 }
  0x78   : > { %1013 = vrot.lane.b32.xlu0 %v3074_v4, %s3860_s6  ;;  %597 = vrot.lane.b32.xlu1 %v3072_v3, %s2999_s7  ;;  %s3010_s6 = smov 40  }
  0x7c   : > { %599 = vrot.lane.b32.xlu0 %v3085_v6, %s2999_s7  ;;  %595 = vrot.lane.b32.xlu1 %v3074_v4, %s2999_s7 }
  0x80   : > { %1053 = vrot.lane.b32.xlu0 %v3072_v3, %s3859_s8  ;;  %1055 = vrot.lane.b32.xlu1 %v3085_v6, %s3859_s8 }
  0x84   : > { %1051 = vrot.lane.b32.xlu0 %v3074_v4, %s3859_s8  ;;  %635 = vrot.lane.b32.xlu1 %v3072_v3, %s3001_s9  ;;  %s3008_s8 = smov 83  }
  0x86   : > { %v218_v7 = vpop.permute.xlu0 %217  ;;  %v216_v8 = vpop.permute.xlu1 %215 }
  0x87   : > { %v224_v12 = vsel %vm223_vm0, %v216_v8, %v218_v7 }
  0x88   : > { %637 = vrot.lane.b32.xlu0 %v3085_v6, %s3001_s9  ;;  %633 = vrot.lane.b32.xlu1 %v3074_v4, %s3001_s9 }
  0x8a   : > { %v3205_v9 = vpop.permute.xlu0 %219  ;;  %v256_v10 = vpop.permute.xlu1 %255 }
  0x8b   : > { %v225_v11 = vsel %vm223_vm0, %v218_v7, %v3205_v9 }
  0x8c   : > { %1091 = vrot.lane.b32.xlu0 %v3072_v3, %s3002_s10  ;;  %1093 = vrot.lane.b32.xlu1 %v3085_v6, %s3002_s10 }
  0x8d   : > { %2212 = vmatprep.subr.bf16.mxu1 %v225_v11 }
  0x8e   : > { %2213 = vmatpush1.bf16.msra.mxu1 %v224_v12  ;;  %v3214_v13 = vpop.permute.xlu0 %257  ;;  %v254_v14 = vpop.permute.xlu1 %253 }
  0x8f   : > { %v263_v15 = vsel %vm261_vm1, %v256_v10, %v3214_v13  ;;  %v262_v16 = vsel %vm261_vm1, %v254_v14, %v256_v10 }
  0x90   : > { %1089 = vrot.lane.b32.xlu0 %v3074_v4, %s3002_s10  ;;  %673 = vrot.lane.b32.xlu1 %v3072_v3, %s3003_s11 }
  0x91   : > { %2214 = vmatprep.subr.bf16.mxu1 %v263_v15 }
  0x92   : > { %2215 = vmatpush1.bf16.msra.mxu1 %v262_v16  ;;  %v294_v17 = vpop.permute.xlu0 %293  ;;  %v3223_v18 = vpop.permute.xlu1 %295 }
  0x93   : > { %v301_v19 = vsel %vm299_vm2, %v294_v17, %v3223_v18 }
  0x94   : > { %675 = vrot.lane.b32.xlu0 %v3085_v6, %s3003_s11  ;;  %671 = vrot.lane.b32.xlu1 %v3074_v4, %s3003_s11 }
  0x95   : > { %2216 = vmatprep.subr.bf16.mxu1 %v301_v19 }
  0x96   : > { %v292_v20 = vpop.permute.xlu0 %291  ;;  %v332_v21 = vpop.permute.xlu1 %331 }
  0x97   : > { %v300_v22 = vsel %vm299_vm2, %v292_v20, %v294_v17 }
  0x98   : > { %1129 = vrot.lane.b32.xlu0 %v3072_v3, %s3004_s2  ;;  %1131 = vrot.lane.b32.xlu1 %v3085_v6, %s3004_s2 }
  0x99   : > { %2217 = vmatpush1.bf16.msra.mxu1 %v300_v22 }
  0x9a   : > { %v3236_v23 = vpop.permute.xlu0 %333  ;;  %v330_v24 = vpop.permute.xlu1 %329 }
  0x9b   : > { %v339_v25 = vsel %vm337_vm3, %v332_v21, %v3236_v23  ;;  %v338_v26 = vsel %vm337_vm3, %v330_v24, %v332_v21 }
  0x9c   : > { %1127 = vrot.lane.b32.xlu0 %v3074_v4, %s3004_s2  ;;  %711 = vrot.lane.b32.xlu1 %v3072_v3, %s3005_s14 }
  0x9d   : > { %2218 = vmatprep.subr.bf16.mxu1 %v339_v25  ;;  %v2167_v25 = vcombine.high %v3274_v45, %v3274_v45 }
  0x9e   : > { %2219 = vmatpush1.bf16.msra.mxu1 %v338_v26  ;;  %v788_v27 = vpop.permute.xlu0 %787  ;;  %v3245_v28 = vpop.permute.xlu1 %789 }
  0x9f   : > { %v795_v29 = vsel %vm3871_vm4, %v788_v27, %v3245_v28 }
  0xa0   : > { %713 = vrot.lane.b32.xlu0 %v3085_v6, %s3005_s14  ;;  %709 = vrot.lane.b32.xlu1 %v3074_v4, %s3005_s14 }
  0xa1   : > { %2251 = vmatprep.subr.bf16.mxu0 %v795_v29 }
  0xa2   : > { %v786_v30 = vpop.permute.xlu0 %785  ;;  %v370_v31 = vpop.permute.xlu1 %369 }
  0xa3   : > { %v794_v32 = vsel %vm3871_vm4, %v786_v30, %v788_v27  ;;  %v3369_v27 = vrot.slane %v2167_v25, %v3267_v42  ;;  %vm755_vm4 = vcmask 678912  }
  0xa4   : > { %1167 = vrot.lane.b32.xlu0 %v3072_v3, %s3006_s15  ;;  %1169 = vrot.lane.b32.xlu1 %v3085_v6, %s3006_s15 }
  0xa5   : > { %2252 = vmatpush1.bf16.msra.mxu0 %v794_v32 }
  0xa6   : > { %v3258_v36 = vpop.permute.xlu0 %371  ;;  %v368_v37 = vpop.permute.xlu1 %367 }
  0xa7   : > { %v377_v38 = vsel %vm375_vm5, %v370_v31, %v3258_v36  ;;  %v376_v39 = vsel %vm375_vm5, %v368_v37, %v370_v31  ;;  %v3375_v31 = vcombine.high %v3369_v27, %v3369_v27 }
  0xa8   : > { %1165 = vrot.lane.b32.xlu0 %v3074_v4, %s3006_s15  ;;  %749 = vrot.lane.b32.xlu1 %v3072_v3, %s3008_s8 }
  0xa9   : > { %2220 = vmatprep.subr.bf16.mxu1 %v377_v38  ;;  %2283 = vmatprep.mubr.bf16.mxu0 %v3375_v31 }
  0xaa   : > { %2221 = vmatpush1.bf16.msra.mxu1 %v376_v39  ;;  %v826_v43 = vpop.permute.xlu0 %825  ;;  %v3269_v44 = vpop.permute.xlu1 %827 }
  0xab   : > { %v833_v46 = vsel %vm3868_vm6, %v826_v43, %v3269_v44 }
  0xac   : > { %751 = vrot.lane.b32.xlu0 %v3085_v6, %s3008_s8  ;;  %747 = vrot.lane.b32.xlu1 %v3074_v4, %s3008_s8 }
  0xad   : > { %2253 = vmatprep.subr.bf16.mxu0 %v833_v46 }
  0xae   : > { %v824_v49 = vpop.permute.xlu0 %823  ;;  %v408_v50 = vpop.permute.xlu1 %407 }
  0xaf   : > { %v832_v51 = vsel %vm3868_vm6, %v824_v49, %v826_v43  ;;  %vm3870_vm6 = vcmask 474112  }
  0xb0   : > { %1205 = vrot.lane.b32.xlu0 %v3072_v3, %s3009_s4  ;;  %1207 = vrot.lane.b32.xlu1 %v3085_v6, %s3009_s4 }
  0xb1   : > { %2254 = vmatpush1.bf16.msra.mxu0 %v832_v51  ;;  %v3422_v51 = vld [vmem:[%s3065_s16] ss:$20 sps:$4 sm:$0xff]  }
  0xb2   : > { %v3300_v53 = vpop.permute.xlu0 %409  ;;  %v406_v54 = vpop.permute.xlu1 %405 }
  0xb3   : > { %v415_v55 = vsel %vm413_vm7, %v408_v50, %v3300_v53  ;;  %v414_v56 = vsel %vm413_vm7, %v406_v54, %v408_v50 }
  0xb4   : > { %1203 = vrot.lane.b32.xlu0 %v3074_v4, %s3009_s4  ;;  %487 = vrot.lane.b32.xlu1 %v3294_v52, %s2993_s28  ;;  %s3011_s28 = smov 39  }
  0xb5   : > { %2222 = vmatprep.subr.bf16.mxu1 %v415_v55 }
  0xb6   : > { %2223 = vmatpush1.bf16.msra.mxu1 %v414_v56  ;;  %v864_v57 = vpop.permute.xlu0 %863  ;;  %v3309_v58 = vpop.permute.xlu1 %865 }
  0xb7   : > { %v871_v59 = vsel %vm3867_vm8, %v864_v57, %v3309_v58 }
  0xb8   : > { %1243 = vrot.lane.b32.xlu0 %v3072_v3, %s3010_s6  ;;  %1245 = vrot.lane.b32.xlu1 %v3085_v6, %s3010_s6 }
  0xb9   : > { %2255 = vmatprep.subr.bf16.mxu0 %v871_v59 }
  0xba   : > { %v862_v60 = vpop.permute.xlu0 %861  ;;  %v446_v61 = vpop.permute.xlu1 %445 }
  0xbb   : > { %v870_v62 = vsel %vm3867_vm8, %v862_v60, %v864_v57  ;;  %vm679_vm8 = vcmask 818176  }
  0xbc   : > { %1241 = vrot.lane.b32.xlu0 %v3074_v4, %s3010_s6  ;;  %525 = vrot.lane.b32.xlu1 %v3294_v52, %s2995_s30  ;;  %s3015_s30 = smov 35  }
  0xbd   : > { %2256 = vmatpush1.bf16.msra.mxu0 %v870_v62 }
  0xbe   : > { %v3322_v63 = vpop.permute.xlu0 %447  ;;  %v444_v0 = vpop.permute.xlu1 %443 }
  0xbf   : > { %v453_v1 = vsel %vm3873_vm9, %v446_v61, %v3322_v63  ;;  %v452_v2 = vsel %vm3873_vm9, %v444_v0, %v446_v61  ;;  %vm1249_vm9 = vcmask 326656  }
  0xc0   : > { %221 = vrot.lane.b32.xlu0 %v3294_v52, %s2982_s17  ;;  %1281 = vrot.lane.b32.xlu1 %v3072_v3, %s3011_s28  ;;  %s3012_s17 = smov 38  }
  0xc1   : > { %2224 = vmatprep.subr.bf16.mxu1 %v453_v1 }
  0xc2   : > { %2225 = vmatpush1.bf16.msra.mxu1 %v452_v2  ;;  %v902_v5 = vpop.permute.xlu0 %901  ;;  %v3331_v7 = vpop.permute.xlu1 %903 }
  0xc3   : > { %v909_v8 = vsel %vm3865_vm10, %v902_v5, %v3331_v7 }
  0xc4   : > { %1283 = vrot.lane.b32.xlu0 %v3085_v6, %s3011_s28  ;;  %1279 = vrot.lane.b32.xlu1 %v3074_v4, %s3011_s28 }
  0xc5   : > { %2257 = vmatprep.subr.bf16.mxu0 %v909_v8 }
  0xc6   : > { %v900_v10 = vpop.permute.xlu0 %899  ;;  %v484_v11 = vpop.permute.xlu1 %483 }
  0xc7   : > { %v908_v12 = vsel %vm3865_vm10, %v900_v10, %v902_v5  ;;  %vm641_vm10 = vcmask 826368  }
  0xc8   : > { %563 = vrot.lane.b32.xlu0 %v3294_v52, %s2997_s5  ;;  %259 = vrot.lane.b32.xlu1 %v3294_v52, %s2983_s18  ;;  %s3013_s18 = smov 37   ;;  %s3016_s5 = smov 34  }
  0xc9   : > { %2258 = vmatpush1.bf16.msra.mxu0 %v908_v12 }
  0xca   : > { %v3344_v14 = vpop.permute.xlu0 %485  ;;  %v482_v15 = vpop.permute.xlu1 %481 }
  0xcb   : > { %v491_v16 = vsel %vm489_vm11, %v484_v11, %v3344_v14  ;;  %v490_v17 = vsel %vm489_vm11, %v482_v15, %v484_v11 }
  0xcc   : > { %1319 = vrot.lane.b32.xlu0 %v3072_v3, %s3012_s17  ;;  %1321 = vrot.lane.b32.xlu1 %v3085_v6, %s3012_s17 }
  0xcd   : > { %2226 = vmatprep.subr.bf16.mxu1 %v491_v16 }
  0xce   : > { %2227 = vmatpush1.bf16.msra.mxu1 %v490_v17  ;;  %v940_v19 = vpop.permute.xlu0 %939  ;;  %v3353_v20 = vpop.permute.xlu1 %941 }
  0xcf   : > { %v947_v21 = vsel %vm3863_vm12, %v940_v19, %v3353_v20 }
  0xd0   : > { %1317 = vrot.lane.b32.xlu0 %v3074_v4, %s3012_s17  ;;  %601 = vrot.lane.b32.xlu1 %v3294_v52, %s2999_s7  ;;  %s3017_s7 = smov 18  }
  0xd1   : > { %2259 = vmatprep.subr.bf16.mxu0 %v947_v21 }
  0xd2   : > { %v938_v22 = vpop.permute.xlu0 %937  ;;  %v522_v24 = vpop.permute.xlu1 %521 }
  0xd3   : > { %v946_v26 = vsel %vm3863_vm12, %v938_v22, %v940_v19  ;;  %vm603_vm12 = vcmask 834560  }
  0xd4   : > { %297 = vrot.lane.b32.xlu0 %v3294_v52, %s2984_s19  ;;  %1357 = vrot.lane.b32.xlu1 %v3072_v3, %s3013_s18  ;;  %s3014_s19 = smov 36  }
  0xd5   : > { %2260 = vmatpush1.bf16.msra.mxu0 %v946_v26 }
  0xd6   : > { %v3371_v29 = vpop.permute.xlu0 %523  ;;  %v520_v30 = vpop.permute.xlu1 %519 }
  0xd7   : > { %v529_v32 = vsel %vm527_vm13, %v522_v24, %v3371_v29  ;;  %v528_v33 = vsel %vm527_vm13, %v520_v30, %v522_v24 }
  0xd8   : > { %1359 = vrot.lane.b32.xlu0 %v3085_v6, %s3013_s18  ;;  %1355 = vrot.lane.b32.xlu1 %v3074_v4, %s3013_s18 }
  0xd9   : > { %2228 = vmatprep.subr.bf16.mxu1 %v529_v32 }
  0xda   : > { %2229 = vmatpush1.bf16.msra.mxu1 %v528_v33  ;;  %v978_v34 = vpop.permute.xlu0 %977  ;;  %v3385_v35 = vpop.permute.xlu1 %979 }
  0xdb   : > { %v985_v37 = vsel %vm3862_vm14, %v978_v34, %v3385_v35 }
  0xdc   : > { %639 = vrot.lane.b32.xlu0 %v3294_v52, %s3001_s9  ;;  %335 = vrot.lane.b32.xlu1 %v3294_v52, %s2985_s20  ;;  %s3876_s9 = smov 61  }
  0xdd   : > { %2261 = vmatprep.subr.bf16.mxu0 %v985_v37 }
  0xde   : > { %v976_v38 = vpop.permute.xlu0 %975  ;;  %v560_v39 = vpop.permute.xlu1 %559 }
  0xdf   : > { %v984_v40 = vsel %vm3862_vm14, %v976_v38, %v978_v34  ;;  %vm3864_vm14 = vcmask 498688  }
  0xe0   : > { %1395 = vrot.lane.b32.xlu0 %v3072_v3, %s3014_s19  ;;  %1397 = vrot.lane.b32.xlu1 %v3085_v6, %s3014_s19  ;;  %v3408_v3 = vld [vmem:[%s3065_s16 + $0x4] ss:$20 sps:$4 sm:$0xff]  }
  0xe1   : > { %2262 = vmatpush1.bf16.msra.mxu0 %v984_v40 }
  0xe2   : > { %v3398_v41 = vpop.permute.xlu0 %561  ;;  %v558_v43 = vpop.permute.xlu1 %557 }
  0xe3   : > { %v567_v45 = vsel %vm565_vm15, %v560_v39, %v3398_v41  ;;  %v566_v46 = vsel %vm565_vm15, %v558_v43, %v560_v39 }
  0xe4   : > { %1393 = vrot.lane.b32.xlu0 %v3074_v4, %s3014_s19  ;;  %677 = vrot.lane.b32.xlu1 %v3294_v52, %s3003_s11  ;;  %v3419_v4 = vld [vmem:[%s3065_s16 + $0x8] ss:$20 sps:$4 sm:$0xff]   ;;  %s3024_s11 = smov 121  }
  0xe5   : > { %2230 = vmatprep.subr.bf16.mxu1 %v567_v45 }
  0xe6   : > { %2231 = vmatpush1.bf16.msra.mxu1 %v566_v46  ;;  %v1016_v6 = vpop.permute.xlu0 %1015  ;;  %v3410_v49 = vpop.permute.xlu1 %1017 }
  0xe7   : > { %v1023_v50 = vsel %vm3864_vm14, %v1016_v6, %v3410_v49 }
  0xe8   : > { %373 = vrot.lane.b32.xlu0 %v3294_v52, %s2987_s22  ;;  %1433 = vrot.lane.b32.xlu1 %v3408_v3, %s3015_s30 }
  0xe9   : > { %2263 = vmatprep.subr.bf16.mxu0 %v1023_v50 }
  0xea   : > { %v1014_v54 = vpop.permute.xlu0 %1013  ;;  %v598_v55 = vpop.permute.xlu1 %597 }
  0xeb   : > { %v1022_v56 = vsel %vm3864_vm14, %v1014_v54, %v1016_v6  ;;  %vm3866_vm14 = vcmask 490496  }
  0xec   : > { %1435 = vrot.lane.b32.xlu0 %v3419_v4, %s3015_s30  ;;  %1431 = vrot.lane.b32.xlu1 %v3422_v51, %s3015_s30 }
  0xed   : > { %2264 = vmatpush1.bf16.msra.mxu0 %v1022_v56 }
  0xee   : > { %v3429_v57 = vpop.permute.xlu0 %599  ;;  %v596_v59 = vpop.permute.xlu1 %595 }
  0xef   : > { %v605_v60 = vsel %vm603_vm12, %v598_v55, %v3429_v57  ;;  %v604_v61 = vsel %vm603_vm12, %v596_v59, %v598_v55 }
  0xf0   : > { %715 = vrot.lane.b32.xlu0 %v3294_v52, %s3005_s14  ;;  %411 = vrot.lane.b32.xlu1 %v3294_v52, %s2989_s24  ;;  %s2889_s14 = smul.u32 12, %s3894_s13 }
  0xf1   : > { %2232 = vmatprep.subr.bf16.mxu1 %v605_v60 }
  0xf2   : > { %2233 = vmatpush1.bf16.msra.mxu1 %v604_v61  ;;  %v1054_v62 = vpop.permute.xlu0 %1053  ;;  %v3438_v0 = vpop.permute.xlu1 %1055 }
  0xf3   : > { %v1061_v1 = vsel %vm3866_vm14, %v1054_v62, %v3438_v0 }
  0xf4   : > { %1471 = vrot.lane.b32.xlu0 %v3408_v3, %s3016_s5  ;;  %1473 = vrot.lane.b32.xlu1 %v3419_v4, %s3016_s5 }
  0xf5   : > { %2265 = vmatprep.subr.bf16.mxu0 %v1061_v1 }
  0xf6   : > { %v1052_v2 = vpop.permute.xlu0 %1051  ;;  %v636_v5 = vpop.permute.xlu1 %635 }
  0xf7   : > { %v1060_v8 = vsel %vm3866_vm14, %v1052_v2, %v1054_v62  ;;  %vm3869_vm14 = vcmask 482304  }
  0xf8   : > { %1469 = vrot.lane.b32.xlu0 %v3422_v51, %s3016_s5  ;;  %753 = vrot.lane.b32.xlu1 %v3294_v52, %s3008_s8  ;;  %s3023_s8 = smov 12  }
  0xf9   : > { %2266 = vmatpush1.bf16.msra.mxu0 %v1060_v8 }
  0xfa   : > { %v3451_v10 = vpop.permute.xlu0 %637  ;;  %v634_v11 = vpop.permute.xlu1 %633 }
  0xfb   : > { %v643_v12 = vsel %vm641_vm10, %v636_v5, %v3451_v10  ;;  %v642_v15 = vsel %vm641_vm10, %v634_v11, %v636_v5 }
  0xfc   : > { %449 = vrot.lane.b32.xlu0 %v3294_v52, %s2991_s26  ;;  %1509 = vrot.lane.b32.xlu1 %v3408_v3, %s3017_s7  ;;  %s3018_s26 = smov 17  }
  0xfd   : > { %2234 = vmatprep.subr.bf16.mxu1 %v643_v12 }
  0xfe   : > { %2235 = vmatpush1.bf16.msra.mxu1 %v642_v15  ;;  %v1092_v16 = vpop.permute.xlu0 %1091  ;;  %v3460_v17 = vpop.permute.xlu1 %1093 }
  0xff   : > { %v1099_v19 = vsel %vm3869_vm14, %v1092_v16, %v3460_v17 }
 0x100   : > { %1511 = vrot.lane.b32.xlu0 %v3419_v4, %s3017_s7  ;;  %1507 = vrot.lane.b32.xlu1 %v3422_v51, %s3017_s7 }
 0x101   : > { %2267 = vmatprep.subr.bf16.mxu0 %v1099_v19 }
 0x102   : > { %v1090_v21 = vpop.permute.xlu0 %1089  ;;  %v674_v22 = vpop.permute.xlu1 %673 }
 0x103   : > { %v1098_v24 = vsel %vm3869_vm14, %v1090_v21, %v1092_v16  ;;  %vm717_vm14 = vcmask 687104   ;;  %v2957_v16 = vld [vmem:[%s3065_s16 + $0x8] ss:$20 sps:$4 sm:$0xff]  }
 0x104   : > { %1095 = vrot.lane.b32.xlu0 %v3294_v52, %s3002_s10  ;;  %791 = vrot.lane.b32.xlu1 %v3294_v52, %s2986_s21  ;;  %s3019_s21 = smov 16   ;;  %s3877_s10 = smov 60  }
 0x105   : > { %2268 = vmatpush1.bf16.msra.mxu0 %v1098_v24 }
 0x106   : > { %v3473_v25 = vpop.permute.xlu0 %675  ;;  %v672_v26 = vpop.permute.xlu1 %671 }
 0x107   : > { %v681_v30 = vsel %vm679_vm8, %v674_v22, %v3473_v25  ;;  %v680_v32 = vsel %vm679_vm8, %v672_v26, %v674_v22 }
 0x108   : > { %1547 = vrot.lane.b32.xlu0 %v3408_v3, %s3018_s26  ;;  %1549 = vrot.lane.b32.xlu1 %v3419_v4, %s3018_s26 }
 0x109   : > { %2236 = vmatprep.subr.bf16.mxu1 %v681_v30 }
 0x10a   : > { %2237 = vmatpush1.bf16.msra.mxu1 %v680_v32  ;;  %v1130_v33 = vpop.permute.xlu0 %1129  ;;  %v3482_v34 = vpop.permute.xlu1 %1131 }
 0x10b   : > { %v1137_v37 = vsel %vm3870_vm6, %v1130_v33, %v3482_v34 }
 0x10c   : > { %1545 = vrot.lane.b32.xlu0 %v3422_v51, %s3018_s26  ;;  %1133 = vrot.lane.b32.xlu1 %v3294_v52, %s3004_s2 }
 0x10d   : > { %2269 = vmatprep.subr.bf16.mxu0 %v1137_v37 }
 0x10e   : > { %v1128_v38 = vpop.permute.xlu0 %1127  ;;  %v712_v39 = vpop.permute.xlu1 %711 }
 0x10f   : > { %v1136_v40 = vsel %vm3870_vm6, %v1128_v38, %v1130_v33  ;;  %vm3872_vm6 = vcmask 465920  }
 0x110   : > { %829 = vrot.lane.b32.xlu0 %v3294_v52, %s2988_s23  ;;  %1585 = vrot.lane.b32.xlu1 %v3408_v3, %s3019_s21  ;;  %s3020_s23 = smov 15  }
 0x111   : > { %2270 = vmatpush1.bf16.msra.mxu0 %v1136_v40 }
 0x112   : > { %v3495_v43 = vpop.permute.xlu0 %713  ;;  %v710_v45 = vpop.permute.xlu1 %709 }
 0x113   : > { %v719_v46 = vsel %vm717_vm14, %v712_v39, %v3495_v43  ;;  %v718_v6 = vsel %vm717_vm14, %v710_v45, %v712_v39 }
 0x114   : > { %1587 = vrot.lane.b32.xlu0 %v3419_v4, %s3019_s21  ;;  %1583 = vrot.lane.b32.xlu1 %v3422_v51, %s3019_s21 }
 0x115   : > { %2238 = vmatprep.subr.bf16.mxu1 %v719_v46 }
 0x116   : > { %2239 = vmatpush1.bf16.msra.mxu1 %v718_v6  ;;  %v1168_v50 = vpop.permute.xlu0 %1167  ;;  %v3504_v54 = vpop.permute.xlu1 %1169 }
 0x117   : > { %v1175_v55 = vsel %vm3872_vm6, %v1168_v50, %v3504_v54 }
 0x118   : > { %1171 = vrot.lane.b32.xlu0 %v3294_v52, %s3006_s15  ;;  %867 = vrot.lane.b32.xlu1 %v3294_v52, %s2990_s25  ;;  %s3021_s25 = smov 14  }
 0x119   : > { %2271 = vmatprep.subr.bf16.mxu0 %v1175_v55 }
 0x11a   : > { %v1166_v56 = vpop.permute.xlu0 %1165  ;;  %v750_v59 = vpop.permute.xlu1 %749 }
 0x11b   : > { %v1174_v60 = vsel %vm3872_vm6, %v1166_v56, %v1168_v50  ;;  %vm1211_vm6 = vcmask 457728  }
 0x11c   : > { %1623 = vrot.lane.b32.xlu0 %v3408_v3, %s3020_s23  ;;  %1625 = vrot.lane.b32.xlu1 %v3419_v4, %s3020_s23 }
 0x11d   : > { %2272 = vmatpush1.bf16.msra.mxu0 %v1174_v60 }
 0x11e   : > { %v3517_v61 = vpop.permute.xlu0 %751  ;;  %v748_v62 = vpop.permute.xlu1 %747 }
 0x11f   : > { %v757_v1 = vsel %vm755_vm4, %v750_v59, %v3517_v61  ;;  %v756_v2 = vsel %vm755_vm4, %v748_v62, %v750_v59  ;;  %v3604_v62 = vld [vmem:[%s3065_s16 + $0x4] ss:$20 sps:$4 sm:$0xff]  }
 0x120   : > { %1621 = vrot.lane.b32.xlu0 %v3422_v51, %s3020_s23  ;;  %1209 = vrot.lane.b32.xlu1 %v3294_v52, %s3009_s4 }
 0x121   : > { %2240 = vmatprep.subr.bf16.mxu1 %v757_v1 }
 0x122   : > { %2241 = vmatpush1.bf16.msra.mxu1 %v756_v2  ;;  %v1206_v5 = vpop.permute.xlu0 %1205  ;;  %v3526_v8 = vpop.permute.xlu1 %1207 }
 0x123   : > { %v1213_v11 = vsel %vm1211_vm6, %v1206_v5, %v3526_v8 }
 0x124   : > { %905 = vrot.lane.b32.xlu0 %v3294_v52, %s2992_s27  ;;  %1661 = vrot.lane.b32.xlu1 %v3408_v3, %s3021_s25  ;;  %s3022_s27 = smov 13  }
 0x125   : > { %2273 = vmatprep.subr.bf16.mxu0 %v1213_v11  ;;  %2243 = vmatmul.mubr.bf16.vlgmr.msra.gmra.mrb[0].mxu1 %v3280_v47 }
 0x126   : > { %v1204_v12 = vpop.permute.xlu0 %1203  ;;  %v488_v15 = vpop.permute.xlu1 %487  ;;  %2406 = vmatprep.mubr.bf16.mxu1 %v3288_v48 }
 0x127   : > { %v1212_v19 = vsel %vm1211_vm6, %v1204_v12, %v1206_v5  ;;  %v492_v21 = vsel %vm489_vm11, %v3344_v14, %v488_v15  ;;  %vm1287_vm11 = vcmask 318464  }
 0x128   : > { %1663 = vrot.lane.b32.xlu0 %v3419_v4, %s3021_s25  ;;  %1659 = vrot.lane.b32.xlu1 %v3422_v51, %s3021_s25 }
 0x129   : > { %2274 = vmatpush1.bf16.msra.mxu0 %v1212_v19  ;;  %2804 = vmatprep.subr.bf16.mxu1 %v492_v21 }
 0x12a   : > { %v1244_v22 = vpop.permute.xlu0 %1243  ;;  %v3544_v24 = vpop.permute.xlu1 %1245  ;;  %2805 = vmatpush3.bf16.msra.mxu1 %v2957_v16 }
 0x12b   : > { %v1251_v48 = vsel %vm1249_vm9, %v1244_v22, %v3544_v24 }
 0x12c   : > { %1247 = vrot.lane.b32.xlu0 %v3294_v52, %s3010_s6  ;;  %943 = vrot.lane.b32.xlu1 %v3294_v52, %s2994_s29  ;;  %s3875_s29 = smov 62   ;;  %s170_s6 = scalar_lea.vmem %s3858_s3, %s2889_s14 }
 0x12d   : > { %2275 = vmatprep.subr.bf16.mxu0 %v1251_v48 }
 0x12e   : > { %v1242_v14 = vpop.permute.xlu0 %1241  ;;  %v526_v26 = vpop.permute.xlu1 %525 }
 0x12f   : > { %v1250_v30 = vsel %vm1249_vm9, %v1242_v14, %v1244_v22  ;;  %v530_v32 = vsel %vm527_vm13, %v3371_v29, %v526_v26  ;;  %v3630_v22 = vld [vmem:[%s3065_s16 + $0xc] ss:$20 sps:$4 sm:$0xff]   ;;  %vm3879_vm13 = vcmask 670720  }
 0x130   : > { %1699 = vrot.lane.b32.xlu0 %v3408_v3, %s3022_s27  ;;  %1701 = vrot.lane.b32.xlu1 %v3419_v4, %s3022_s27 }
 0x131   : > { %2276 = vmatpush1.bf16.msra.mxu0 %v1250_v30  ;;  %2806 = vmatprep.subr.bf16.mxu1 %v530_v32 }
 0x132   : > { %v222_v33 = vpop.permute.xlu0 %221  ;;  %v1282_v37 = vpop.permute.xlu1 %1281 }
 0x133   : > { %v226_v38 = vsel %vm223_vm0, %v3205_v9, %v222_v33  ;;  %vm1325_vm0 = vcmask 310272  }
 0x134   : > { %1697 = vrot.lane.b32.xlu0 %v3422_v51, %s3022_s27  ;;  %1285 = vrot.lane.b32.xlu1 %v3294_v52, %s3011_s28 }
 0x135   : > { %2807 = vmatpush3.bf16.msra.mxu1 %v226_v38 }
 0x136   : > { %v3565_v29 = vpop.permute.xlu0 %1283  ;;  %v1280_v39 = vpop.permute.xlu1 %1279 }
 0x137   : > { %v1289_v40 = vsel %vm1287_vm11, %v1282_v37, %v3565_v29  ;;  %v1288_v45 = vsel %vm1287_vm11, %v1280_v39, %v1282_v37 }
 0x138   : > { %981 = vrot.lane.b32.xlu0 %v3294_v52, %s3875_s29  ;;  %1737 = vrot.lane.b32.xlu1 %v3408_v3, %s3023_s8 }
 0x139   : > { %2277 = vmatprep.subr.bf16.mxu0 %v1289_v40 }
 0x13a   : > { %2278 = vmatpush1.bf16.msra.mxu0 %v1288_v45  ;;  %v564_v9 = vpop.permute.xlu0 %563  ;;  %v260_v46 = vpop.permute.xlu1 %259 }
 0x13b   : > { %v264_v6 = vsel %vm261_vm1, %v3214_v13, %v260_v46  ;;  %v568_v50 = vsel %vm565_vm15, %v3398_v41, %v564_v9  ;;  %v3591_v13 = vld [vmem:[%s3065_s16 + $0x8] ss:$20 sps:$4 sm:$0xff]   ;;  %v3594_v41 = vld [vmem:[%s3065_s16 + $0xc] ss:$20 sps:$4 sm:$0xff]   ;;  %vm1363_vm1 = vcmask 302080   ;;  %vm1553_vm15 = vcmask 138240  }
 0x13c   : > { %1739 = vrot.lane.b32.xlu0 %v3419_v4, %s3023_s8  ;;  %1735 = vrot.lane.b32.xlu1 %v3422_v51, %s3023_s8 }
 0x13d   : > { %2808 = vmatprep.subr.bf16.mxu1 %v568_v50 }
 0x13e   : > { %2809 = vmatpush3.bf16.msra.mxu1 %v264_v6  ;;  %v1320_v3 = vpop.permute.xlu0 %1319  ;;  %v3582_v55 = vpop.permute.xlu1 %1321  ;;  %v3672_v6 = vld [vmem:[%s3065_s16 + $0x10] ss:$20 sps:$4 sm:$0xff]   ;;  %s3025_s16 = smov 120  }
 0x13f   : > { %v1327_v56 = vsel %vm1325_vm0, %v1320_v3, %v3582_v55 }
 0x140   : > { %1323 = vrot.lane.b32.xlu0 %v3294_v52, %s3012_s17  ;;  %1019 = vrot.lane.b32.xlu1 %v3294_v52, %s3876_s9 }
 0x141   : > { %2279 = vmatprep.subr.bf16.mxu0 %v1327_v56 }
 0x142   : > { %v1318_v4 = vpop.permute.xlu0 %1317  ;;  %v602_v51 = vpop.permute.xlu1 %601 }
 0x143   : > { %v1326_v59 = vsel %vm1325_vm0, %v1318_v4, %v1320_v3  ;;  %v606_v60 = vsel %vm603_vm12, %v3429_v57, %v602_v51  ;;  %vm3878_vm12 = vcmask 867328  }
 0x144   : > { %1775 = vrot.lane.b32.xlu0 %v3591_v13, %s2985_s20  ;;  %1777 = vrot.lane.b32.xlu1 %v3594_v41, %s2985_s20 }
 0x145   : > { %2280 = vmatpush1.bf16.msra.mxu0 %v1326_v59  ;;  %2810 = vmatprep.subr.bf16.mxu1 %v606_v60 }
 0x146   : > { %v298_v1 = vpop.permute.xlu0 %297  ;;  %v1358_v2 = vpop.permute.xlu1 %1357 }
 0x147   : > { %v302_v5 = vsel %vm299_vm2, %v3223_v18, %v298_v1  ;;  %vm1401_vm2 = vcmask 293888  }
 0x148   : > { %1773 = vrot.lane.b32.xlu0 %v3604_v62, %s2985_s20  ;;  %1361 = vrot.lane.b32.xlu1 %v3294_v52, %s3013_s18 }
 0x149   : > { %2811 = vmatpush3.bf16.msra.mxu1 %v302_v5  ;;  %v3700_v5 = vld [vmem:[%s3856_s1 + $0x8] sm:$0x3f] }
 0x14a   : > { %v3612_v57 = vpop.permute.xlu0 %1359  ;;  %v1356_v11 = vpop.permute.xlu1 %1355 }
 0x14b   : > { %v1365_v12 = vsel %vm1363_vm1, %v1358_v2, %v3612_v57  ;;  %v1364_v15 = vsel %vm1363_vm1, %v1356_v11, %v1358_v2 }
 0x14c   : > { %1057 = vrot.lane.b32.xlu0 %v3294_v52, %s3877_s10  ;;  %1812 = vrot.lane.b32.xlu1 %v3591_v13, %s2987_s22 }
 0x14d   : > { %2281 = vmatprep.subr.bf16.mxu0 %v1365_v12  ;;  %v3707_v12 = vrot.slane %v3700_v5, %v3267_v42 }
 0x14e   : > { %2282 = vmatpush1.bf16.msra.mxu0 %v1364_v15  ;;  %v640_v18 = vpop.permute.xlu0 %639  ;;  %v336_v16 = vpop.permute.xlu1 %335 }
 0x14f   : > { %v340_v19 = vsel %vm337_vm3, %v3236_v23, %v336_v16  ;;  %v644_v21 = vsel %vm641_vm10, %v3451_v10, %v640_v18  ;;  %vm1477_vm10 = vcmask 277504   ;;  %v3716_v15 = vcombine.high %v3707_v12, %v3707_v12 }
 0x150   : > { %1814 = vrot.lane.b32.xlu0 %v3594_v41, %s2987_s22  ;;  %1810 = vrot.lane.b32.xlu1 %v3604_v62, %s2987_s22 }
 0x151   : > { %2812 = vmatprep.subr.bf16.mxu1 %v644_v21  ;;  %2284 = vmatmul.mubr.bf16.vlgmr.msra.gmra.mrb[0].mxu0 %v3369_v27 }
 0x152   : > { %2813 = vmatpush3.bf16.msra.mxu1 %v340_v19  ;;  %v1396_v48 = vpop.permute.xlu0 %1395  ;;  %v3633_v14 = vpop.permute.xlu1 %1397  ;;  %2324 = vmatprep.mubr.bf16.mxu0 %v3716_v15 }
 0x153   : > { %v1403_v23 = vsel %vm1401_vm2, %v1396_v48, %v3633_v14 }
 0x154   : > { %1703 = vrot.lane.b32.xlu0 %v3630_v22, %s3022_s27  ;;  %1399 = vrot.lane.b32.xlu1 %v3294_v52, %s3014_s19 }
 0x155   : > { %2292 = vmatprep.subr.bf16.mxu0 %v1403_v23 }
 0x156   : > { %v1394_v10 = vpop.permute.xlu0 %1393  ;;  %v678_v26 = vpop.permute.xlu1 %677 }
 0x157   : > { %v1402_v30 = vsel %vm1401_vm2, %v1394_v10, %v1396_v48  ;;  %v682_v32 = vsel %vm679_vm8, %v3473_v25, %v678_v26  ;;  %vm1439_vm8 = vcmask 285696  }
 0x158   : > { %1849 = vrot.lane.b32.xlu0 %v3591_v13, %s2989_s24  ;;  %1851 = vrot.lane.b32.xlu1 %v3594_v41, %s2989_s24 }
 0x159   : > { %2293 = vmatpush1.bf16.msra.mxu0 %v1402_v30  ;;  %2814 = vmatprep.subr.bf16.mxu1 %v682_v32 }
 0x15a   : > { %v374_v33 = vpop.permute.xlu0 %373  ;;  %v1434_v37 = vpop.permute.xlu1 %1433 }
 0x15b   : > { %v378_v52 = vsel %vm375_vm5, %v3258_v36, %v374_v33 }
 0x15c   : > { %1847 = vrot.lane.b32.xlu0 %v3604_v62, %s2989_s24  ;;  %1741 = vrot.lane.b32.xlu1 %v3630_v22, %s3023_s8 }
 0x15d   : > { %2815 = vmatpush3.bf16.msra.mxu1 %v378_v52 }
 0x15e   : > { %v3654_v25 = vpop.permute.xlu0 %1435  ;;  %v1432_v38 = vpop.permute.xlu1 %1431 }
 0x15f   : > { %v1440_v39 = vsel %vm1439_vm8, %v1432_v38, %v1434_v37  ;;  %v1441_v40 = vsel %vm1439_vm8, %v1434_v37, %v3654_v25 }
 0x160   : > { %1437 = vrot.lane.b32.xlu0 %v3630_v22, %s3015_s30  ;;  %1886 = vrot.lane.b32.xlu1 %v3591_v13, %s3024_s11 }
 0x161   : > { %2294 = vmatprep.subr.bf16.mxu0 %v1441_v40 }
 0x162   : > { %2295 = vmatpush1.bf16.msra.mxu0 %v1440_v39  ;;  %v716_v36 = vpop.permute.xlu0 %715  ;;  %v412_v45 = vpop.permute.xlu1 %411 }
 0x163   : > { %v416_v9 = vsel %vm413_vm7, %v3300_v53, %v412_v45  ;;  %v720_v46 = vsel %vm717_vm14, %v3495_v43, %v716_v36  ;;  %vm3880_vm14 = vcmask 482304  }
 0x164   : > { %1888 = vrot.lane.b32.xlu0 %v3594_v41, %s3024_s11  ;;  %1884 = vrot.lane.b32.xlu1 %v3604_v62, %s3024_s11 }
 0x165   : > { %2816 = vmatprep.subr.bf16.mxu1 %v720_v46 }
 0x166   : > { %2817 = vmatpush3.bf16.msra.mxu1 %v416_v9  ;;  %v1472_v50 = vpop.permute.xlu0 %1471  ;;  %v3674_v3 = vpop.permute.xlu1 %1473 }
 0x167   : > { %v1479_v53 = vsel %vm1477_vm10, %v1472_v50, %v3674_v3 }
 0x168   : > { %1779 = vrot.lane.b32.xlu0 %v3672_v6, %s2985_s20  ;;  %1475 = vrot.lane.b32.xlu1 %v3630_v22, %s3016_s5 }
 0x169   : > { %2296 = vmatprep.subr.bf16.mxu0 %v1479_v53 }
 0x16a   : > { %v1470_v43 = vpop.permute.xlu0 %1469  ;;  %v754_v56 = vpop.permute.xlu1 %753 }
 0x16b   : > { %v1478_v4 = vsel %vm1477_vm10, %v1470_v43, %v1472_v50  ;;  %v758_v51 = vsel %vm755_vm4, %v3517_v61, %v754_v56  ;;  %vm1515_vm4 = vcmask 146432  }
 0x16c   : > { %1924 = vrot.lane.b32.xlu0 %v3591_v13, %s3025_s16  ;;  %1926 = vrot.lane.b32.xlu1 %v3594_v41, %s3025_s16 }
 0x16d   : > { %2297 = vmatpush1.bf16.msra.mxu0 %v1478_v4  ;;  %2818 = vmatprep.subr.bf16.mxu1 %v758_v51 }
 0x16e   : > { %v450_v59 = vpop.permute.xlu0 %449  ;;  %v1510_v60 = vpop.permute.xlu1 %1509 }
 0x16f   : > { %v454_v1 = vsel %vm3878_vm12, %v3322_v63, %v450_v59  ;;  %vm3881_vm12 = vcmask 474112  }
 0x170   : > { %1922 = vrot.lane.b32.xlu0 %v3604_v62, %s3025_s16  ;;  %1816 = vrot.lane.b32.xlu1 %v3672_v6, %s2987_s22  ;;  %s3026_s22 = smov 119  }
 0x171   : > { %2819 = vmatpush3.bf16.msra.mxu1 %v454_v1 }
 0x172   : > { %v3695_v61 = vpop.permute.xlu0 %1511  ;;  %v1508_v2 = vpop.permute.xlu1 %1507 }
 0x173   : > { %v1516_v11 = vsel %vm1515_vm4, %v1508_v2, %v1510_v60  ;;  %v1517_v63 = vsel %vm1515_vm4, %v1510_v60, %v3695_v61 }
 0x174   : > { %1513 = vrot.lane.b32.xlu0 %v3630_v22, %s3017_s7  ;;  %1962 = vrot.lane.b32.xlu1 %v3591_v13, %s3026_s22 }
 0x175   : > { %2298 = vmatprep.subr.bf16.mxu0 %v1517_v63  ;;  %2407 = vmatmul.mubr.bf16.vlgmr.msra.gmra.mrb[4].mxu1 %v3280_v47 }
 0x176   : > { %2299 = vmatpush1.bf16.msra.mxu0 %v1516_v11  ;;  %v1096_v18 = vpop.permute.xlu0 %1095  ;;  %v792_v16 = vpop.permute.xlu1 %791  ;;  %2446 = vmatprep.mubr.bf16.mxu1 %v3375_v31 }
 0x177   : > { %v796_v19 = vsel %vm3879_vm13, %v3245_v28, %v792_v16  ;;  %v1100_v21 = vsel %vm3880_vm14, %v3460_v17, %v1096_v18  ;;  %vm3882_vm13 = vcmask 662528   ;;  %vm3874_vm14 = vcmask 130048  }
 0x178   : > { %1964 = vrot.lane.b32.xlu0 %v3594_v41, %s3026_s22  ;;  %1960 = vrot.lane.b32.xlu1 %v3604_v62, %s3026_s22 }
 0x179   : > { %2826 = vmatprep.subr.bf16.mxu1 %v1100_v21 }
 0x17a   : > { %2827 = vmatpush3.bf16.msra.mxu1 %v796_v19  ;;  %v1548_v47 = vpop.permute.xlu0 %1547  ;;  %v3728_v48 = vpop.permute.xlu1 %1549 }
 0x17b   : > { %v1555_v28 = vsel %vm1553_vm15, %v1548_v47, %v3728_v48 }
 0x17c   : > { %1853 = vrot.lane.b32.xlu0 %v3672_v6, %s2989_s24  ;;  %1551 = vrot.lane.b32.xlu1 %v3630_v22, %s3018_s26  ;;  %s3027_s24 = smov 118  }
 0x17d   : > { %2300 = vmatprep.subr.bf16.mxu0 %v1555_v28 }
 0x17e   : > { %v1546_v31 = vpop.permute.xlu0 %1545  ;;  %v1134_v17 = vpop.permute.xlu1 %1133 }
 0x17f   : > { %v1554_v23 = vsel %vm1553_vm15, %v1546_v31, %v1548_v47  ;;  %v1138_v10 = vsel %vm3881_vm12, %v3482_v34, %v1134_v17  ;;  %vm3883_vm12 = vcmask 654336  }
 0x180   : > { %1890 = vrot.lane.b32.xlu0 %v3672_v6, %s3024_s11  ;;  %1589 = vrot.lane.b32.xlu1 %v3630_v22, %s3019_s21 }
 0x181   : > { %2301 = vmatpush1.bf16.msra.mxu0 %v1554_v23  ;;  %2828 = vmatprep.subr.bf16.mxu1 %v1138_v10 }
 0x182   : > { %v830_v26 = vpop.permute.xlu0 %829  ;;  %v1586_v30 = vpop.permute.xlu1 %1585 }
 0x183   : > { %v834_v32 = vsel %vm3882_vm13, %v3269_v44, %v830_v26  ;;  %vm3884_vm13 = vcmask 465920  }
 0x184   : > { %1928 = vrot.lane.b32.xlu0 %v3672_v6, %s3025_s16  ;;  %1627 = vrot.lane.b32.xlu1 %v3630_v22, %s3020_s23 }
 0x185   : > { %2829 = vmatpush3.bf16.msra.mxu1 %v834_v32 }
 0x186   : > { %v3749_v34 = vpop.permute.xlu0 %1587  ;;  %v1584_v33 = vpop.permute.xlu1 %1583 }
 0x187   : > { %v1592_v37 = vsel %vm3874_vm14, %v1584_v33, %v1586_v30  ;;  %v1593_v52 = vsel %vm3874_vm14, %v1586_v30, %v3749_v34  ;;  %vm1629_vm14 = vcmask 121856  }
 0x188   : > { %2000 = vrot.lane.b32.xlu0 %v3591_v13, %s3027_s24  ;;  %2002 = vrot.lane.b32.xlu1 %v3594_v41, %s3027_s24 }
 0x189   : > { %2302 = vmatprep.subr.bf16.mxu0 %v1593_v52 }
 0x18a   : > { %2303 = vmatpush1.bf16.msra.mxu0 %v1592_v37  ;;  %v1172_v44 = vpop.permute.xlu0 %1171  ;;  %v868_v38 = vpop.permute.xlu1 %867 }
 0x18b   : > { %v872_v39 = vsel %vm3883_vm12, %v3309_v58, %v868_v38  ;;  %v1176_v40 = vsel %vm3884_vm13, %v3504_v54, %v1172_v44  ;;  %vm3885_vm12 = vcmask 646144   ;;  %vm1667_vm13 = vcmask 113664  }
 0x18c   : > { %1998 = vrot.lane.b32.xlu0 %v3604_v62, %s3027_s24  ;;  %1966 = vrot.lane.b32.xlu1 %v3672_v6, %s3026_s22 }
 0x18d   : > { %2830 = vmatprep.subr.bf16.mxu1 %v1176_v40 }
 0x18e   : > { %2831 = vmatpush3.bf16.msra.mxu1 %v872_v39  ;;  %v1624_v13 = vpop.permute.xlu0 %1623  ;;  %v3763_v41 = vpop.permute.xlu1 %1625 }
 0x18f   : > { %v1631_v36 = vsel %vm1629_vm14, %v1624_v13, %v3763_v41 }
 0x190   : > { %1665 = vrot.lane.b32.xlu0 %v3630_v22, %s3021_s25  ;;  %2004 = vrot.lane.b32.xlu1 %v3672_v6, %s3027_s24 }
 0x191   : > { %2304 = vmatprep.subr.bf16.mxu0 %v1631_v36 }
 0x192   : > { %v1622_v58 = vpop.permute.xlu0 %1621  ;;  %v1210_v54 = vpop.permute.xlu1 %1209 }
 0x193   : > { %v1630_v62 = vsel %vm1629_vm14, %v1622_v58, %v1624_v13  ;;  %v1214_v45 = vsel %vm1211_vm6, %v3526_v8, %v1210_v54  ;;  %vm3886_vm6 = vcmask 637952  }
 0x194   : > { %2305 = vmatpush1.bf16.msra.mxu0 %v1630_v62  ;;  %2832 = vmatprep.subr.bf16.mxu1 %v1214_v45 }
 0x196   : > { %v906_v9 = vpop.permute.xlu0 %905  ;;  %v1662_v46 = vpop.permute.xlu1 %1661 }
 0x197   : > { %v910_v50 = vsel %vm3885_vm12, %v3331_v7, %v906_v9  ;;  %vm1705_vm12 = vcmask 105472  }
 0x198   : > { %2833 = vmatpush3.bf16.msra.mxu1 %v910_v50 }
 0x19a   : > { %v3775_v22 = vpop.permute.xlu0 %1663  ;;  %v1660_v6 = vpop.permute.xlu1 %1659 }
 0x19b   : > { %v1668_v53 = vsel %vm1667_vm13, %v1660_v6, %v1662_v46  ;;  %v1669_v43 = vsel %vm1667_vm13, %v1662_v46, %v3775_v22 }
 0x19c   : > { %2306 = vmatprep.subr.bf16.mxu0 %v1669_v43 }
 0x19d   : > { %2307 = vmatpush1.bf16.msra.mxu0 %v1668_v53 }
 0x19e   : > { %v1248_v8 = vpop.permute.xlu0 %1247  ;;  %v944_v56 = vpop.permute.xlu1 %943 }
 0x19f   : > { %v948_v4 = vsel %vm3886_vm6, %v3353_v20, %v944_v56  ;;  %v1252_v7 = vsel %vm1249_vm9, %v3544_v24, %v1248_v8  ;;  %vm3887_vm9 = vcmask 506880   ;;  %vm1743_vm6 = vcmask 97280  }
 0x1a0   : > { %2834 = vmatprep.subr.bf16.mxu1 %v1252_v7 }
 0x1a1   : > { %2835 = vmatpush3.bf16.msra.mxu1 %v948_v4 }
 0x1a2   : > { %v1700_v51 = vpop.permute.xlu0 %1699  ;;  %v1702_v59 = vpop.permute.xlu1 %1701 }
 0x1a3   : > { %v1707_v60 = vsel %vm1705_vm12, %v1700_v51, %v1702_v59 }
 0x1a4   : > { %2308 = vmatprep.subr.bf16.mxu0 %v1707_v60 }
 0x1a6   : > { %v1698_v1 = vpop.permute.xlu0 %1697  ;;  %v1286_v2 = vpop.permute.xlu1 %1285 }
 0x1a7   : > { %v1706_v11 = vsel %vm1705_vm12, %v1698_v1, %v1700_v51  ;;  %v1290_v63 = vsel %vm1287_vm11, %v3565_v29, %v1286_v2  ;;  %vm3888_vm11 = vcmask 498688  }
 0x1a8   : > { %2309 = vmatpush1.bf16.msra.mxu0 %v1706_v11  ;;  %2836 = vmatprep.subr.bf16.mxu1 %v1290_v63 }
 0x1aa   : > { %v982_v20 = vpop.permute.xlu0 %981  ;;  %v1738_v18 = vpop.permute.xlu1 %1737 }
 0x1ab   : > { %v986_v24 = vsel %vm3887_vm9, %v3385_v35, %v982_v20 }
 0x1ac   : > { %2837 = vmatpush3.bf16.msra.mxu1 %v986_v24 }
 0x1ae   : > { %v1740_v16 = vpop.permute.xlu0 %1739  ;;  %v1736_v19 = vpop.permute.xlu1 %1735 }
 0x1af   : > { %v1744_v21 = vsel %vm1743_vm6, %v1736_v19, %v1738_v18  ;;  %v1745_v47 = vsel %vm1743_vm6, %v1738_v18, %v1740_v16 }
 0x1b0   : > { %2310 = vmatprep.subr.bf16.mxu0 %v1745_v47 }
 0x1b1   : > { %2311 = vmatpush1.bf16.msra.mxu0 %v1744_v21 }
 0x1b2   : > { %v1324_v28 = vpop.permute.xlu0 %1323  ;;  %v1020_v31 = vpop.permute.xlu1 %1019 }
 0x1b3   : > { %v1024_v29 = vsel %vm3888_vm11, %v3410_v49, %v1020_v31  ;;  %v1328_v17 = vsel %vm1325_vm0, %v3582_v55, %v1324_v28  ;;  %vm3889_vm0 = vcmask 490496  }
 0x1b4   : > { %2838 = vmatprep.subr.bf16.mxu1 %v1328_v17 }
 0x1b5   : > { %2839 = vmatpush3.bf16.msra.mxu1 %v1024_v29 }
 0x1b6   : > { %v1776_v35 = vpop.permute.xlu0 %1775  ;;  %v1778_v23 = vpop.permute.xlu1 %1777 }
 0x1b7   : > { %v1782_v10 = vsel %vm337_vm3, %v1776_v35, %v1778_v23 }
 0x1b8   : > { %2312 = vmatprep.subr.bf16.mxu0 %v1782_v10 }
 0x1ba   : > { %v1774_v26 = vpop.permute.xlu0 %1773  ;;  %v1362_v30 = vpop.permute.xlu1 %1361 }
 0x1bb   : > { %v1781_v32 = vsel %vm337_vm3, %v1774_v26, %v1776_v35  ;;  %v1366_v33 = vsel %vm1363_vm1, %v3612_v57, %v1362_v30  ;;  %vm1892_vm1 = vcmask 990208  }
 0x1bc   : > { %2313 = vmatpush1.bf16.msra.mxu0 %v1781_v32  ;;  %2840 = vmatprep.subr.bf16.mxu1 %v1366_v33 }
 0x1be   : > { %v1058_v49 = vpop.permute.xlu0 %1057  ;;  %v1813_v37 = vpop.permute.xlu1 %1812 }
 0x1bf   : > { %v1062_v55 = vsel %vm3889_vm0, %v3438_v0, %v1058_v49 }
 0x1c0   : > { %2841 = vmatpush3.bf16.msra.mxu1 %v1062_v55 }
 0x1c2   : > { %v1815_v52 = vpop.permute.xlu0 %1814  ;;  %v1811_v44 = vpop.permute.xlu1 %1810 }
 0x1c3   : > { %v1818_v38 = vsel %vm375_vm5, %v1811_v44, %v1813_v37  ;;  %v1819_v39 = vsel %vm375_vm5, %v1813_v37, %v1815_v52  ;;  %2447 = vmatmul.mubr.bf16.vlgmr.msra.gmra.mrb[8].mxu1 %v3369_v27 }
 0x1c4   : > { %2314 = vmatprep.subr.bf16.mxu0 %v1819_v39  ;;  %2486 = vmatprep.mubr.bf16.mxu1 %v3716_v15 }
 0x1c5   : > { %2315 = vmatpush1.bf16.msra.mxu0 %v1818_v38 }
 0x1c6   : > { %v1704_v57 = vpop.permute.xlu0 %1703  ;;  %v1400_v40 = vpop.permute.xlu1 %1399 }
 0x1c7   : > { %v1404_v13 = vsel %vm1401_vm2, %v3633_v14, %v1400_v40  ;;  %v1708_v0 = vsel %vm1705_vm12, %v1702_v59, %v1704_v57  ;;  %vm1930_vm2 = vcmask 982016  }
 0x1c8   : > { %2848 = vmatprep.subr.bf16.mxu1 %v1708_v0 }
 0x1c9   : > { %2849 = vmatpush3.bf16.msra.mxu1 %v1404_v13  ;;  %v3029_v13 = vmov 0.0  }
 0x1ca   : > { %v1850_v36 = vpop.permute.xlu0 %1849  ;;  %v1852_v58 = vpop.permute.xlu1 %1851 }
 0x1cb   : > { %v1856_v54 = vsel %vm413_vm7, %v1850_v36, %v1852_v58 }
 0x1cc   : > { %2316 = vmatprep.subr.bf16.mxu0 %v1856_v54 }
 0x1ce   : > { %v1848_v62 = vpop.permute.xlu0 %1847  ;;  %v1742_v27 = vpop.permute.xlu1 %1741 }
 0x1cf   : > { %v1855_v45 = vsel %vm413_vm7, %v1848_v62, %v1850_v36  ;;  %v1746_v15 = vsel %vm1743_vm6, %v1740_v16, %v1742_v27 }
 0x1d0   : > { %2317 = vmatpush1.bf16.msra.mxu0 %v1855_v45  ;;  %2850 = vmatprep.subr.bf16.mxu1 %v1746_v15 }
 0x1d2   : > { %v1438_v9 = vpop.permute.xlu0 %1437  ;;  %v1887_v46 = vpop.permute.xlu1 %1886 }
 0x1d3   : > { %v1442_v14 = vsel %vm1439_vm8, %v3654_v25, %v1438_v9 }
 0x1d4   : > { %2851 = vmatpush3.bf16.msra.mxu1 %v1442_v14 }
 0x1d6   : > { %v1889_v50 = vpop.permute.xlu0 %1888  ;;  %v1885_v6 = vpop.permute.xlu1 %1884 }
 0x1d7   : > { %v1893_v53 = vsel %vm1892_vm1, %v1885_v6, %v1887_v46  ;;  %v1894_v43 = vsel %vm1892_vm1, %v1887_v46, %v1889_v50 }
 0x1d8   : > { %2318 = vmatprep.subr.bf16.mxu0 %v1894_v43 }
 0x1d9   : > { %2319 = vmatpush1.bf16.msra.mxu0 %v1893_v53 }
 0x1da   : > { %v1780_v8 = vpop.permute.xlu0 %1779  ;;  %v1476_v56 = vpop.permute.xlu1 %1475 }
 0x1db   : > { %v1480_v4 = vsel %vm1477_vm10, %v3674_v3, %v1476_v56  ;;  %v1783_v7 = vsel %vm337_vm3, %v1778_v23, %v1780_v8  ;;  %vm1968_vm3 = vcmask 973824   ;;  %vm3030_vm10 = vmmov 0  }
 0x1dc   : > { %2852 = vmatprep.subr.bf16.mxu1 %v1783_v7 }
 0x1dd   : > { %2853 = vmatpush3.bf16.msra.mxu1 %v1480_v4 }
 0x1de   : > { %v1925_v25 = vpop.permute.xlu0 %1924  ;;  %v1927_v51 = vpop.permute.xlu1 %1926 }
 0x1df   : > { %v1932_v59 = vsel %vm1930_vm2, %v1925_v25, %v1927_v51 }
 0x1e0   : > { %2320 = vmatprep.subr.bf16.mxu0 %v1932_v59 }
 0x1e2   : > { %v1923_v60 = vpop.permute.xlu0 %1922  ;;  %v1817_v1 = vpop.permute.xlu1 %1816 }
 0x1e3   : > { %v1931_v2 = vsel %vm1930_vm2, %v1923_v60, %v1925_v25  ;;  %v1820_v11 = vsel %vm375_vm5, %v1815_v52, %v1817_v1  ;;  %vm3890_vm5 = vcmask 130048  }
 0x1e4   : > { %2321 = vmatpush1.bf16.msra.mxu0 %v1931_v2  ;;  %2854 = vmatprep.subr.bf16.mxu1 %v1820_v11  ;;  %vm3891_vm8 = vmmov %vm3890_vm5 }
 0x1e6   : > { %v1514_v63 = vpop.permute.xlu0 %1513  ;;  %v1963_v3 = vpop.permute.xlu1 %1962 }
 0x1e7   : > { %v1518_v20 = vsel %vm1515_vm4, %v3695_v61, %v1514_v63  ;;  %v3028_v61 = vmov 0   ;;  %vm3892_vm4 = vmmov %vm3890_vm5 }
 0x1e8   : > { %2855 = vmatpush3.bf16.msra.mxu1 %v1518_v20 }
 0x1ea   : > { %v1965_v18 = vpop.permute.xlu0 %1964  ;;  %v1961_v24 = vpop.permute.xlu1 %1960 }
 0x1eb   : > { %v1969_v16 = vsel %vm1968_vm3, %v1961_v24, %v1963_v3  ;;  %v1970_v19 = vsel %vm1968_vm3, %v1963_v3, %v1965_v18 }
 0x1ec   : > { %2322 = vmatprep.subr.bf16.mxu0 %v1970_v19 }
 0x1ed   : > { %2323 = vmatpush1.bf16.msra.mxu0 %v1969_v16 }
 0x1ee   : > { %v1854_v21 = vpop.permute.xlu0 %1853  ;;  %v1552_v47 = vpop.permute.xlu1 %1551 }
 0x1ef   : > { %v1556_v28 = vsel %vm1553_vm15, %v3728_v48, %v1552_v47  ;;  %v1857_v31 = vsel %vm413_vm7, %v1852_v58, %v1854_v21  ;;  %vm2006_vm7 = vcmask 965632  }
 0x1f0   : > { %2856 = vmatprep.subr.bf16.mxu1 %v1857_v31  ;;  %2325 = vmatmul.mubr.bf16.vlgmr.msra.gmra.mrb[0].mxu0 %v3707_v12 }
 0x1f1   : > { %2857 = vmatpush3.bf16.msra.mxu1 %v1556_v28  ;;  %2365 = vmatprep.mubr.bf16.mxu0 %v3028_v61 }
 0x1f2   : > { %v1891_v29 = vpop.permute.xlu0 %1890  ;;  %v1590_v17 = vpop.permute.xlu1 %1589 }
 0x1f3   : > { %v1594_v35 = vsel %vm3890_vm5, %v3749_v34, %v1590_v17  ;;  %v1895_v23 = vsel %vm1892_vm1, %v1889_v50, %v1891_v29  ;;  %v2184_v34 = vcombine.high %v3700_v5, %v3700_v5 }
 0x1f4   : > { %2858 = vmatprep.subr.bf16.mxu1 %v1895_v23 }
 0x1f5   : > { %2859 = vmatpush3.bf16.msra.mxu1 %v1594_v35  ;;  %v2198_v40 = vrot.slane %v2184_v34, %v3267_v42 }
 0x1f6   : > { %v1929_v10 = vpop.permute.xlu0 %1928  ;;  %v1628_v26 = vpop.permute.xlu1 %1627 }
 0x1f7   : > { %v1632_v48 = vsel %vm1629_vm14, %v3763_v41, %v1628_v26  ;;  %v1933_v30 = vsel %vm1930_vm2, %v1927_v51, %v1929_v10 }
 0x1f8   : > { %2860 = vmatprep.subr.bf16.mxu1 %v1933_v30  ;;  %v2244_v32 = vpop.f32.mrb[0].mxu1 }
 0x1f9   : > { %2861 = vmatpush3.bf16.msra.mxu1 %v1632_v48  ;;  %v2246_v33 = vpop.f32.mrb[1].mxu1 }
 0x1fa   : > { %v2001_v49 = vpop.permute.xlu0 %2000  ;;  %v2003_v37 = vpop.permute.xlu1 %2002 }
 0x1fb   : > { %v2008_v55 = vsel %vm2006_vm7, %v2001_v49, %v2003_v37  ;;  %v2248_v52 = vpop.f32.mrb[2].mxu1 }
 0x1fc   : > { %2333 = vmatprep.subr.bf16.mxu0 %v2008_v55  ;;  %v2249_v44 = vpop.f32.mrb[3].mxu1 }
 0x1fe   : > { %v1999_v38 = vpop.permute.xlu0 %1998  ;;  %v1967_v39 = vpop.permute.xlu1 %1966 }
 0x1ff   : > { %v2007_v41 = vsel %vm2006_vm7, %v1999_v38, %v2001_v49  ;;  %v1971_v57 = vsel %vm1968_vm3, %v1965_v18, %v1967_v39 }
 0x200   : > { %2334 = vmatpush1.bf16.msra.mxu0 %v2007_v41  ;;  %2862 = vmatprep.subr.bf16.mxu1 %v1971_v57 }
 0x201   : > { %2872 = vmatprep.subr.bf16.mxu0 %v3029_v13 }
 0x202   : > { %v1666_v0 = vpop.permute.xlu0 %1665  ;;  %v2005_v36 = vpop.permute.xlu1 %2004 }
 0x203   : > { %v1670_v5 = vsel %vm1667_vm13, %v3775_v22, %v1666_v0  ;;  %v2009_v58 = vsel %vm2006_vm7, %v2003_v37, %v2005_v36  ;;  %2800 = vmatmul.mubr.msk.bf16.vlgmr.msra.gmra.mrb[0].mxu0 %vm3891_vm8, %v2198_v40 }
 0x204   : > { %2863 = vmatpush3.bf16.msra.mxu1 %v1670_v5  ;;  %2873 = vmatpush3.bf16.msra.mxu0 %v2009_v58 }
 0x205   : > { %2874 = vmatprep.mubr.msk.bf16.mxu0 %vm3030_vm10, %v3029_v13 }
 0x207   : > { %2487 = vmatmul.mubr.bf16.vlgmr.msra.gmra.mrb[12].mxu1 %v3707_v12 }
 0x20b   : > { %2875 = vmatmul.mubr.msk.bf16.vlgmr.msra.gmra.mrb[4].mxu0 %vm3892_vm4, %v2198_v40 }
 0x248   : > { %v2820_v42 = vpop.f32.mrb[4].mxu1 }
 0x249   : > { %v2821_v54 = vpop.f32.mrb[5].mxu1 }
 0x24a   : > { %v2822_v62 = vadd.f32 %v2821_v54, %v2820_v42  ;;  %v2823_v27 = vpop.f32.mrb[6].mxu1 }
 0x24b   : > { %v2824_v45 = vpop.f32.mrb[7].mxu1 }
 0x296   : > { %v2842_v15 = vpop.f32.mrb[8].mxu1 }
 0x297   : > { %v2843_v9 = vpop.f32.mrb[9].mxu1 }
 0x298   : > { %v2844_v22 = vadd.f32 %v2843_v9, %v2842_v15  ;;  %v2845_v46 = vpop.f32.mrb[10].mxu1 }
 0x299   : > { %v2846_v14 = vpop.f32.mrb[11].mxu1 }
 0x29a   : > { %v2449_v50 = vadd.f32 %v2844_v22, %v2822_v62 }
 0x2d6   : > { %v2367_v6 = vpop.f32.mrb[0].mxu0 }
 0x2d7   : > { %v2878_v53 = vadd.f32 %v2367_v6, %v2244_v32  ;;  %v2369_v43 = vpop.f32.mrb[1].mxu0 }
 0x2d8   : > { %v2879_v8 = vadd.f32 %v2369_v43, %v2246_v33  ;;  %v2371_v56 = vpop.f32.mrb[2].mxu0 }
 0x2d9   : > { %2968 = vtanh.f32 %v2878_v53  ;;  %v2372_v12 = vpop.f32.mrb[3].mxu0 }
 0x2da   : > { %2970 = vtanh.f32 %v2879_v8  ;;  %v2864_v4 = vpop.f32.mrb[12].mxu1 }
 0x2db   : > { %v2865_v7 = vpop.f32.mrb[13].mxu1 }
 0x2dc   : > { %v2866_v25 = vadd.f32 %v2865_v7, %v2864_v4  ;;  %v2867_v51 = vpop.f32.mrb[14].mxu1 }
 0x2dd   : > { %v2868_v59 = vpop.f32.mrb[15].mxu1 }
 0x2de   : > { %v2489_v60 = vadd.f32 %v2866_v25, %v2449_v50  ;;  %v2528_v1 = vpop.f32.mrb[4].mxu0 }
 0x2df   : > { %v2876_v2 = vpop.f32.mrb[5].mxu0 }
 0x2e0   : > { %v2529_v11 = vadd.f32 %v2528_v1, %v2489_v60  ;;  %v2531_v63 = vpop.f32.mrb[6].mxu0 }
 0x2e1   : > { %v2877_v3 = vpop.f32.mrb[7].mxu0 }
 0x2e2   : > { %2972 = vtanh.f32 %v2529_v11 }
 0x2e3   : > { %v2969_v20 = vpop.eup %2968 }
 0x2e4   : > { %v2971_v18 = vpop.eup %2970 }
 0x2e5   : > { %v2539_v24 = vcombine.low %v2969_v20, %v2971_v18 }
 0x2e7   : > { %2541 = vst [vmem:[%s170_s6] sm:$0x77] %v2539_v24 }
 0x2ec   : > { %v2973_v16 = vpop.eup %2972 }
 0x2ed   : > { %2542 = vst [vmem:[%s170_s6 + $0x8] sm:$0x7] %v2973_v16 }
 0x2ee PF: > { %s13_s12 = sadd.s32 1, %s2980_s12  }
 0x2ef   : > { %p10_p4 = scmp.ge.s32.totalorder %s13_s12, 4  }
 0x2f1   :  { %12 = sbr.rel (!%p10_p4) target bundleno = 1 (0x1), region = 62 }

</bundles_post_ra>
